<compile_context>
chip_gen: v5e
topology: v5e:2x2
jax: 0.10.0
libtpu: 0.0.40
codegen_flags: <defaults>
</compile_context>

<pallas_src>
import functools

import jax
import jax.numpy as jnp
from jax import lax
from jax.experimental import pallas as pl
from jax.experimental.pallas import tpu as pltpu


def _bigru_kernel(x_ref, h0_ref, wih_ref, whh_ref, bgi_ref, bhn_ref,
                  out_ref, hn_ref,
                  gi_s, outb_s):
    """Fused bidirectional GRU.

    x_ref   : (T, Bp, Hp)   time-major padded input
    h0_ref  : (2, Bp, Hp)   initial hidden (fwd, bwd)
    wih_ref : (Hp, 6Hp)     [W_ih_f (r|z|n) | W_ih_b (r|z|n)], gate blocks Hp wide
    whh_ref : (2Hp, 6Hp)    block-diag: rows 0:Hp -> fwd gates (cols 0:3Hp),
                            rows Hp:2Hp -> bwd gates (cols 3Hp:6Hp)
    bgi_ref : (1, 6Hp)      b_ih + [b_hr, b_hz, 0] per direction (folded)
    bhn_ref : (1, 2Hp)      [b_hn_f | b_hn_b]
    out_ref : (T, Bp, Hp)   summed (fwd + bwd) outputs, time-major
    hn_ref  : (2, Bp, Hp)   final hidden per direction
    gi_s    : (T, Bp, 6Hp)  scratch: hoisted input projections, both directions
    outb_s  : (T, Bp, Hp)   scratch: backward-direction outputs
    """
    T, Bp, Hp = out_ref.shape
    G = 3 * Hp

    # ---- Prologue: ONE large MXU matmul for all input projections, both dirs,
    #      written with a single lane-dense store into scratch.
    x_flat = x_ref[...].reshape(T * Bp, Hp)
    gi = jnp.dot(x_flat, wih_ref[...], preferred_element_type=jnp.float32)
    gi_s[...] = (gi + bgi_ref[...]).reshape(T, Bp, 2 * G)

    # Hoisted constants (JAX does not CSE broadcast_in_dim inside the loop).
    bhn_f = jnp.broadcast_to(bhn_ref[:, 0:Hp], (Bp, Hp))
    bhn_b = jnp.broadcast_to(bhn_ref[:, Hp:2 * Hp], (Bp, Hp))
    whh = whh_ref[...]

    # Hidden state as one lane-concatenated (Bp, 2Hp) tile [h_fwd | h_bwd],
    # carried through the loop (stays in vregs; no per-step VMEM round-trip).
    h_init = jnp.concatenate([h0_ref[0], h0_ref[1]], axis=1)

    def step(i, h_cat):
        tb = T - 1 - i
        # One MXU op covers both directions' recurrent projections.
        gh = jnp.dot(h_cat, whh, preferred_element_type=jnp.float32)    # (Bp, 6Hp)
        gif = gi_s[i, :, 0:G]          # fwd input gates (r|z|n) at t = i
        gib = gi_s[tb, :, G:2 * G]     # bwd input gates (r|z|n) at t = T-1-i

        # Forward direction (gate slices are lane-aligned: multiples of Hp).
        r_f = jax.nn.sigmoid(gif[:, 0:Hp] + gh[:, 0:Hp])
        z_f = jax.nn.sigmoid(gif[:, Hp:2 * Hp] + gh[:, Hp:2 * Hp])
        n_f = jnp.tanh(gif[:, 2 * Hp:G] + r_f * (gh[:, 2 * Hp:G] + bhn_f))
        h_f = (1.0 - z_f) * n_f + z_f * h_cat[:, 0:Hp]

        # Backward direction.
        r_b = jax.nn.sigmoid(gib[:, 0:Hp] + gh[:, G:G + Hp])
        z_b = jax.nn.sigmoid(gib[:, Hp:2 * Hp] + gh[:, G + Hp:G + 2 * Hp])
        n_b = jnp.tanh(gib[:, 2 * Hp:G] + r_b * (gh[:, G + 2 * Hp:2 * G] + bhn_b))
        h_b = (1.0 - z_b) * n_b + z_b * h_cat[:, Hp:2 * Hp]

        out_ref[i] = h_f          # fwd output at time i (unmasked, lane-dense store)
        outb_s[tb] = h_b          # bwd output at time T-1-i into scratch (no RMW)
        return jnp.concatenate([h_f, h_b], axis=1)

    h_fin = lax.fori_loop(0, T, step, h_init,
                          unroll=(True if T <= 32 else 8))

    # Single vectorized, lane-dense add merging the two directions.
    out_ref[...] = out_ref[...] + outb_s[...]
    hn_ref[0] = h_fin[:, 0:Hp]
    hn_ref[1] = h_fin[:, Hp:2 * Hp]


def _round_up(x, m):
    return (x + m - 1) // m * m


@functools.partial(jax.jit, static_argnames=("hidden_size",))
def interactive_rnn_forward(input_x, input_y, params, *, hidden_size):
    """input_x: (B, T, H) batch_first, input_y: (2, B, H) initial hidden."""
    B, T, H = input_x.shape
    assert H == hidden_size
    Hp = max(128, _round_up(H, 128))   # lane-aligned hidden size
    Bp = max(8, _round_up(B, 8))       # sublane-aligned batch

    # Time-major, zero-padded input / initial hidden.
    x_tm = jnp.transpose(input_x, (1, 0, 2)).astype(jnp.float32)          # (T, B, H)
    x_p = jnp.zeros((T, Bp, Hp), jnp.float32).at[:, :B, :H].set(x_tm)
    h0_p = jnp.zeros((2, Bp, Hp), jnp.float32).at[:, :B, :H].set(
        input_y.astype(jnp.float32))

    def pad_w(w):
        # PyTorch layout (3H, H), gate order r|z|n  ->  (Hp, 3Hp), columns per gate
        # padded to Hp so every gate slice lands on a 128-lane boundary.
        wt = w.T.astype(jnp.float32)                                      # (H, 3H)
        out = jnp.zeros((Hp, 3 * Hp), jnp.float32)
        for g in range(3):
            out = out.at[:H, g * Hp:g * Hp + H].set(wt[:, g * H:(g + 1) * H])
        return out

    def pad_b(b):
        out = jnp.zeros((3 * Hp,), jnp.float32)
        for g in range(3):
            out = out.at[g * Hp:g * Hp + H].set(b[g * H:(g + 1) * H].astype(jnp.float32))
        return out.reshape(1, 3 * Hp)

    wih_f = pad_w(params["w_ih_f"]); wih_b = pad_w(params["w_ih_b"])
    whh_f = pad_w(params["w_hh_f"]); whh_b = pad_w(params["w_hh_b"])
    bih_f = pad_b(params["b_ih_f"]); bih_b = pad_b(params["b_ih_b"])
    bhh_f = pad_b(params["b_hh_f"]); bhh_b = pad_b(params["b_hh_b"])

    # Input-projection weights for both directions -> one matmul operand (Hp, 6Hp).
    wih_cat = jnp.concatenate([wih_f, wih_b], axis=1)

    # Block-diagonal recurrent weights (2Hp, 6Hp): one MXU op per step covers both dirs.
    whh_blk = jnp.zeros((2 * Hp, 6 * Hp), jnp.float32)
    whh_blk = whh_blk.at[0:Hp, 0:3 * Hp].set(whh_f)
    whh_blk = whh_blk.at[Hp:2 * Hp, 3 * Hp:6 * Hp].set(whh_b)

    # Fold b_ih + b_hr + b_hz into the hoisted projection bias; keep b_hn separate
    # (it must stay inside the r * (.) term).
    def fold(bih, bhh):
        return bih.at[:, 0:2 * Hp].add(bhh[:, 0:2 * Hp])

    bgi = jnp.concatenate([fold(bih_f, bhh_f), fold(bih_b, bhh_b)], axis=1)   # (1, 6Hp)
    bhn = jnp.concatenate([bhh_f[:, 2 * Hp:3 * Hp],
                           bhh_b[:, 2 * Hp:3 * Hp]], axis=1)                  # (1, 2Hp)

    vmem = pl.BlockSpec(memory_space=pltpu.MemorySpace.VMEM)

    out_tm, hn_p = pl.pallas_call(
        _bigru_kernel,
        out_shape=(
            jax.ShapeDtypeStruct((T, Bp, Hp), jnp.float32),   # summed outputs (time-major)
            jax.ShapeDtypeStruct((2, Bp, Hp), jnp.float32),   # final hidden per direction
        ),
        in_specs=[vmem] * 6,
        out_specs=(vmem, vmem),
        scratch_shapes=[
            pltpu.VMEM((T, Bp, 6 * Hp), jnp.float32),   # hoisted input projections (both dirs)
            pltpu.VMEM((T, Bp, Hp), jnp.float32),       # bwd direction outputs
        ],
        compiler_params=pltpu.CompilerParams(vmem_limit_bytes=32 * 1024 * 1024),
    )(x_p, h0_p, wih_cat, whh_blk, bgi, bhn)

    outputs = jnp.transpose(out_tm[:, :B, :H], (1, 0, 2))   # back to (B, T, H)
    hidden = hn_p[:, :B, :H]                                # (2, B, H)
    return outputs, hidden


def _reference_bigru(input_x, input_y, params, hidden_size):
    """Pure-JAX reference mirroring torch.nn.GRU(batch_first, bidirectional)."""
    H = hidden_size

    def cell(x_t, h, w_ih, w_hh, b_ih, b_hh):
        gi = x_t @ w_ih.T + b_ih
        gh = h @ w_hh.T + b_hh
        r = jax.nn.sigmoid(gi[:, :H] + gh[:, :H])
        z = jax.nn.sigmoid(gi[:, H:2 * H] + gh[:, H:2 * H])
        n = jnp.tanh(gi[:, 2 * H:] + r * gh[:, 2 * H:])
        return (1.0 - z) * n + z * h

    B, T, _ = input_x.shape
    h_f = input_y[0]
    h_b = input_y[1]
    outs_f, outs_b = [], []
    for t in range(T):
        h_f = cell(input_x[:, t], h_f, params["w_ih_f"], params["w_hh_f"],
                   params["b_ih_f"], params["b_hh_f"])
        outs_f.append(h_f)
    for t in range(T - 1, -1, -1):
        h_b = cell(input_x[:, t], h_b, params["w_ih_b"], params["w_hh_b"],
                   params["b_ih_b"], params["b_hh_b"])
        outs_b.append(h_b)
    out_f = jnp.stack(outs_f, axis=1)                    # (B, T, H)
    out_b = jnp.stack(outs_b[::-1], axis=1)              # (B, T, H)
    return out_f + out_b, jnp.stack([h_f, h_b], axis=0)


def make_params(key, hidden_size):
    """Deterministic parameter init matching nn.GRU shapes, U(-1/sqrt(H), 1/sqrt(H))."""
    H = hidden_size
    k = 1.0 / jnp.sqrt(jnp.float32(H))
    names = ["w_ih_f", "w_hh_f", "b_ih_f", "b_hh_f",
             "w_ih_b", "w_hh_b", "b_ih_b", "b_hh_b"]
    shapes = [(3 * H, H), (3 * H, H), (3 * H,), (3 * H,),
              (3 * H, H), (3 * H, H), (3 * H,), (3 * H,)]
    keys = jax.random.split(key, len(names))
    return {n: jax.random.uniform(kk, s, jnp.float32, -k, k)
            for n, s, kk in zip(names, shapes, keys)}


if __name__ == "__main__":
    B, T, H = 2, 8, 32
    root = jax.random.PRNGKey(0)
    k_par, k_x, k_h = jax.random.split(root, 3)

    params = make_params(k_par, H)
    input_x = jax.random.normal(k_x, (B, T, H), jnp.float32)      # (batch, seq, hidden)
    input_y = jax.random.normal(k_h, (2, B, H), jnp.float32)      # initial hidden (2, B, H)

    outputs, hidden = interactive_rnn_forward(input_x, input_y, params, hidden_size=H)
    jax.block_until_ready((outputs, hidden))

    ref_out, ref_hid = _reference_bigru(input_x, input_y, params, H)
    assert jnp.allclose(outputs, ref_out, atol=1e-5, rtol=1e-5)
    assert jnp.allclose(hidden, ref_hid, atol=1e-5, rtol=1e-5)

    print("KERNEL_OK")
</pallas_src>

<mosaic_0001>
module attributes {stable_mosaic.version = 11 : i64} {
  func.func @_bigru_kernel(%arg0: memref<8x8x128xf32, #tpu.memory_space<vmem>>, %arg1: memref<2x8x128xf32, #tpu.memory_space<vmem>>, %arg2: memref<128x768xf32, #tpu.memory_space<vmem>>, %arg3: memref<256x768xf32, #tpu.memory_space<vmem>>, %arg4: memref<1x768xf32, #tpu.memory_space<vmem>>, %arg5: memref<1x256xf32, #tpu.memory_space<vmem>>, %arg6: memref<8x8x128xf32, #tpu.memory_space<vmem>>, %arg7: memref<2x8x128xf32, #tpu.memory_space<vmem>>, %arg8: memref<8x8x768xf32, #tpu.memory_space<vmem>>, %arg9: memref<8x8x128xf32, #tpu.memory_space<vmem>>) attributes {dimension_semantics = [], scalar_prefetch = 0 : i64, scratch_operands = 2 : i64, tpu.core_type = #tpu.core_type<tc>} {
    %c0 = arith.constant 0 : index
    %c0_0 = arith.constant 0 : index
    %c0_1 = arith.constant 0 : index
    %0 = vector.load %arg0[%c0, %c0_0, %c0_1] : memref<8x8x128xf32, #tpu.memory_space<vmem>>, vector<8x8x128xf32>
    %1 = vector.shape_cast %0 : vector<8x8x128xf32> to vector<64x128xf32>
    %c0_2 = arith.constant 0 : index
    %c0_3 = arith.constant 0 : index
    %2 = vector.load %arg2[%c0_2, %c0_3] : memref<128x768xf32, #tpu.memory_space<vmem>>, vector<128x768xf32>
    %cst = arith.constant dense<0.000000e+00> : vector<64x768xf32>
    %3 = tpu.matmul %1, %2, %cst {dimension_numbers = #tpu.dot_dimension_numbers<[1], [0], [0], [1], [0, 0, 1, 1], [], []>} : vector<64x128xf32>, vector<128x768xf32>, vector<64x768xf32> -> vector<64x768xf32>
    %c0_4 = arith.constant 0 : index
    %c0_5 = arith.constant 0 : index
    %4 = vector.load %arg4[%c0_4, %c0_5] : memref<1x768xf32, #tpu.memory_space<vmem>>, vector<1x768xf32>
    %5 = vector.broadcast %4 : vector<1x768xf32> to vector<64x768xf32>
    %6 = arith.addf %3, %5 : vector<64x768xf32>
    %7 = vector.shape_cast %6 : vector<64x768xf32> to vector<8x8x768xf32>
    %c0_6 = arith.constant 0 : index
    %c0_7 = arith.constant 0 : index
    %c0_8 = arith.constant 0 : index
    %8 = vector.load %arg8[%c0_6, %c0_7, %c0_8] : memref<8x8x768xf32, #tpu.memory_space<vmem>>, vector<8x8x768xf32>
    tpu.vector_store %arg8[%c0_6, %c0_7, %c0_8], %7 {strides = array<i32>} : memref<8x8x768xf32, #tpu.memory_space<vmem>>, vector<8x8x768xf32>,
    %c0_9 = arith.constant 0 : index
    %c0_10 = arith.constant 0 : index
    %9 = vector.load %arg5[%c0_9, %c0_10] : memref<1x256xf32, #tpu.memory_space<vmem>>, vector<1x128xf32>
    %10 = vector.shape_cast %9 : vector<1x128xf32> to vector<1x128xf32>
    %11 = vector.broadcast %10 : vector<1x128xf32> to vector<8x128xf32>
    %c0_11 = arith.constant 0 : index
    %c128 = arith.constant 128 : index
    %12 = vector.load %arg5[%c0_11, %c128] : memref<1x256xf32, #tpu.memory_space<vmem>>, vector<1x128xf32>
    %13 = vector.shape_cast %12 : vector<1x128xf32> to vector<1x128xf32>
    %14 = vector.broadcast %13 : vector<1x128xf32> to vector<8x128xf32>
    %c0_12 = arith.constant 0 : index
    %c0_13 = arith.constant 0 : index
    %15 = vector.load %arg3[%c0_12, %c0_13] : memref<256x768xf32, #tpu.memory_space<vmem>>, vector<256x768xf32>
    %c0_14 = arith.constant 0 : index
    %c0_15 = arith.constant 0 : index
    %c0_16 = arith.constant 0 : index
    %16 = vector.load %arg1[%c0_14, %c0_15, %c0_16] : memref<2x8x128xf32, #tpu.memory_space<vmem>>, vector<1x8x128xf32>
    %17 = vector.shape_cast %16 : vector<1x8x128xf32> to vector<8x128xf32>
    %c1 = arith.constant 1 : index
    %c0_17 = arith.constant 0 : index
    %c0_18 = arith.constant 0 : index
    %18 = vector.load %arg1[%c1, %c0_17, %c0_18] : memref<2x8x128xf32, #tpu.memory_space<vmem>>, vector<1x8x128xf32>
    %19 = vector.shape_cast %18 : vector<1x8x128xf32> to vector<8x128xf32>
    %20 = tpu.concatenate %17, %19 in 1 : vector<8x128xf32>, vector<8x128xf32> -> vector<8x256xf32>
    %c0_i32 = arith.constant 0 : i32
    %c7_i32 = arith.constant 7 : i32
    %21 = arith.subi %c7_i32, %c0_i32 : i32
    %cst_19 = arith.constant dense<0.000000e+00> : vector<8x768xf32>
    %22 = tpu.matmul %20, %15, %cst_19 {dimension_numbers = #tpu.dot_dimension_numbers<[1], [0], [0], [1], [0, 0, 1, 1], [], []>} : vector<8x256xf32>, vector<256x768xf32>, vector<8x768xf32> -> vector<8x768xf32>
    %23 = arith.index_cast %c0_i32 : i32 to index
    %c0_20 = arith.constant 0 : index
    %c0_21 = arith.constant 0 : index
    %24 = vector.load %arg8[%23, %c0_20, %c0_21] : memref<8x8x768xf32, #tpu.memory_space<vmem>>, vector<1x8x384xf32>
    %25 = vector.shape_cast %24 : vector<1x8x384xf32> to vector<8x384xf32>
    %26 = arith.index_cast %21 : i32 to index
    %c0_22 = arith.constant 0 : index
    %c384 = arith.constant 384 : index
    %27 = vector.load %arg8[%26, %c0_22, %c384] : memref<8x8x768xf32, #tpu.memory_space<vmem>>, vector<1x8x384xf32>
    %28 = vector.shape_cast %27 : vector<1x8x384xf32> to vector<8x384xf32>
    %29 = vector.extract_strided_slice %25 {offsets = [0, 0], sizes = [8, 128], strides = [1, 1]} : vector<8x384xf32> to vector<8x128xf32>
    %30 = vector.extract_strided_slice %22 {offsets = [0, 0], sizes = [8, 128], strides = [1, 1]} : vector<8x768xf32> to vector<8x128xf32>
    %31 = arith.addf %29, %30 : vector<8x128xf32>
    %32 = arith.negf %31 : vector<8x128xf32>
    %33 = math.exp %32 : vector<8x128xf32>
    %cst_23 = arith.constant 1.000000e+00 : f32
    %34 = vector.broadcast %cst_23 : f32 to vector<8x128xf32>
    %35 = arith.addf %34, %33 : vector<8x128xf32>
    %36 = arith.divf %34, %35 : vector<8x128xf32>
    %37 = vector.extract_strided_slice %25 {offsets = [0, 128], sizes = [8, 128], strides = [1, 1]} : vector<8x384xf32> to vector<8x128xf32>
    %38 = vector.extract_strided_slice %22 {offsets = [0, 128], sizes = [8, 128], strides = [1, 1]} : vector<8x768xf32> to vector<8x128xf32>
    %39 = arith.addf %37, %38 : vector<8x128xf32>
    %40 = arith.negf %39 : vector<8x128xf32>
    %41 = math.exp %40 : vector<8x128xf32>
    %cst_24 = arith.constant 1.000000e+00 : f32
    %42 = vector.broadcast %cst_24 : f32 to vector<8x128xf32>
    %43 = arith.addf %42, %41 : vector<8x128xf32>
    %44 = arith.divf %42, %43 : vector<8x128xf32>
    %45 = vector.extract_strided_slice %25 {offsets = [0, 256], sizes = [8, 128], strides = [1, 1]} : vector<8x384xf32> to vector<8x128xf32>
    %46 = vector.extract_strided_slice %22 {offsets = [0, 256], sizes = [8, 128], strides = [1, 1]} : vector<8x768xf32> to vector<8x128xf32>
    %47 = arith.addf %46, %11 : vector<8x128xf32>
    %48 = arith.mulf %36, %47 : vector<8x128xf32>
    %49 = arith.addf %45, %48 : vector<8x128xf32>
    %50 = math.tanh %49 : vector<8x128xf32>
    %cst_25 = arith.constant 1.000000e+00 : f32
    %51 = vector.broadcast %cst_25 : f32 to vector<8x128xf32>
    %52 = arith.subf %51, %44 : vector<8x128xf32>
    %53 = arith.mulf %52, %50 : vector<8x128xf32>
    %54 = vector.extract_strided_slice %20 {offsets = [0, 0], sizes = [8, 128], strides = [1, 1]} : vector<8x256xf32> to vector<8x128xf32>
    %55 = arith.mulf %44, %54 : vector<8x128xf32>
    %56 = arith.addf %53, %55 : vector<8x128xf32>
    %57 = vector.extract_strided_slice %28 {offsets = [0, 0], sizes = [8, 128], strides = [1, 1]} : vector<8x384xf32> to vector<8x128xf32>
    %58 = vector.extract_strided_slice %22 {offsets = [0, 384], sizes = [8, 128], strides = [1, 1]} : vector<8x768xf32> to vector<8x128xf32>
    %59 = arith.addf %57, %58 : vector<8x128xf32>
    %60 = arith.negf %59 : vector<8x128xf32>
    %61 = math.exp %60 : vector<8x128xf32>
    %cst_26 = arith.constant 1.000000e+00 : f32
    %62 = vector.broadcast %cst_26 : f32 to vector<8x128xf32>
    %63 = arith.addf %62, %61 : vector<8x128xf32>
    %64 = arith.divf %62, %63 : vector<8x128xf32>
    %65 = vector.extract_strided_slice %28 {offsets = [0, 128], sizes = [8, 128], strides = [1, 1]} : vector<8x384xf32> to vector<8x128xf32>
    %66 = vector.extract_strided_slice %22 {offsets = [0, 512], sizes = [8, 128], strides = [1, 1]} : vector<8x768xf32> to vector<8x128xf32>
    %67 = arith.addf %65, %66 : vector<8x128xf32>
    %68 = arith.negf %67 : vector<8x128xf32>
    %69 = math.exp %68 : vector<8x128xf32>
    %cst_27 = arith.constant 1.000000e+00 : f32
    %70 = vector.broadcast %cst_27 : f32 to vector<8x128xf32>
    %71 = arith.addf %70, %69 : vector<8x128xf32>
    %72 = arith.divf %70, %71 : vector<8x128xf32>
    %73 = vector.extract_strided_slice %28 {offsets = [0, 256], sizes = [8, 128], strides = [1, 1]} : vector<8x384xf32> to vector<8x128xf32>
    %74 = vector.extract_strided_slice %22 {offsets = [0, 640], sizes = [8, 128], strides = [1, 1]} : vector<8x768xf32> to vector<8x128xf32>
    %75 = arith.addf %74, %14 : vector<8x128xf32>
    %76 = arith.mulf %64, %75 : vector<8x128xf32>
    %77 = arith.addf %73, %76 : vector<8x128xf32>
    %78 = math.tanh %77 : vector<8x128xf32>
    %cst_28 = arith.constant 1.000000e+00 : f32
    %79 = vector.broadcast %cst_28 : f32 to vector<8x128xf32>
    %80 = arith.subf %79, %72 : vector<8x128xf32>
    %81 = arith.mulf %80, %78 : vector<8x128xf32>
    %82 = vector.extract_strided_slice %20 {offsets = [0, 128], sizes = [8, 128], strides = [1, 1]} : vector<8x256xf32> to vector<8x128xf32>
    %83 = arith.mulf %72, %82 : vector<8x128xf32>
    %84 = arith.addf %81, %83 : vector<8x128xf32>
    %85 = arith.index_cast %c0_i32 : i32 to index
    %c0_29 = arith.constant 0 : index
    %c0_30 = arith.constant 0 : index
    %86 = vector.load %arg6[%85, %c0_29, %c0_30] : memref<8x8x128xf32, #tpu.memory_space<vmem>>, vector<1x8x128xf32>
    %87 = vector.shape_cast %86 : vector<1x8x128xf32> to vector<8x128xf32>
    %88 = vector.shape_cast %56 : vector<8x128xf32> to vector<1x8x128xf32>
    tpu.vector_store %arg6[%85, %c0_29, %c0_30], %88 {strides = array<i32>} : memref<8x8x128xf32, #tpu.memory_space<vmem>>, vector<1x8x128xf32>,
    %89 = arith.index_cast %21 : i32 to index
    %c0_31 = arith.constant 0 : index
    %c0_32 = arith.constant 0 : index
    %90 = vector.load %arg9[%89, %c0_31, %c0_32] : memref<8x8x128xf32, #tpu.memory_space<vmem>>, vector<1x8x128xf32>
    %91 = vector.shape_cast %90 : vector<1x8x128xf32> to vector<8x128xf32>
    %92 = vector.shape_cast %84 : vector<8x128xf32> to vector<1x8x128xf32>
    tpu.vector_store %arg9[%89, %c0_31, %c0_32], %92 {strides = array<i32>} : memref<8x8x128xf32, #tpu.memory_space<vmem>>, vector<1x8x128xf32>,
    %93 = tpu.concatenate %56, %84 in 1 : vector<8x128xf32>, vector<8x128xf32> -> vector<8x256xf32>
    %c1_i32 = arith.constant 1 : i32
    %c7_i32_33 = arith.constant 7 : i32
    %94 = arith.subi %c7_i32_33, %c1_i32 : i32
    %cst_34 = arith.constant dense<0.000000e+00> : vector<8x768xf32>
    %95 = tpu.matmul %93, %15, %cst_34 {dimension_numbers = #tpu.dot_dimension_numbers<[1], [0], [0], [1], [0, 0, 1, 1], [], []>} : vector<8x256xf32>, vector<256x768xf32>, vector<8x768xf32> -> vector<8x768xf32>
    %96 = arith.index_cast %c1_i32 : i32 to index
    %c0_35 = arith.constant 0 : index
    %c0_36 = arith.constant 0 : index
    %97 = vector.load %arg8[%96, %c0_35, %c0_36] : memref<8x8x768xf32, #tpu.memory_space<vmem>>, vector<1x8x384xf32>
    %98 = vector.shape_cast %97 : vector<1x8x384xf32> to vector<8x384xf32>
    %99 = arith.index_cast %94 : i32 to index
    %c0_37 = arith.constant 0 : index
    %c384_38 = arith.constant 384 : index
    %100 = vector.load %arg8[%99, %c0_37, %c384_38] : memref<8x8x768xf32, #tpu.memory_space<vmem>>, vector<1x8x384xf32>
    %101 = vector.shape_cast %100 : vector<1x8x384xf32> to vector<8x384xf32>
    %102 = vector.extract_strided_slice %98 {offsets = [0, 0], sizes = [8, 128], strides = [1, 1]} : vector<8x384xf32> to vector<8x128xf32>
    %103 = vector.extract_strided_slice %95 {offsets = [0, 0], sizes = [8, 128], strides = [1, 1]} : vector<8x768xf32> to vector<8x128xf32>
    %104 = arith.addf %102, %103 : vector<8x128xf32>
    %105 = arith.negf %104 : vector<8x128xf32>
    %106 = math.exp %105 : vector<8x128xf32>
    %cst_39 = arith.constant 1.000000e+00 : f32
    %107 = vector.broadcast %cst_39 : f32 to vector<8x128xf32>
    %108 = arith.addf %107, %106 : vector<8x128xf32>
    %109 = arith.divf %107, %108 : vector<8x128xf32>
    %110 = vector.extract_strided_slice %98 {offsets = [0, 128], sizes = [8, 128], strides = [1, 1]} : vector<8x384xf32> to vector<8x128xf32>
    %111 = vector.extract_strided_slice %95 {offsets = [0, 128], sizes = [8, 128], strides = [1, 1]} : vector<8x768xf32> to vector<8x128xf32>
    %112 = arith.addf %110, %111 : vector<8x128xf32>
    %113 = arith.negf %112 : vector<8x128xf32>
    %114 = math.exp %113 : vector<8x128xf32>
    %cst_40 = arith.constant 1.000000e+00 : f32
    %115 = vector.broadcast %cst_40 : f32 to vector<8x128xf32>
    %116 = arith.addf %115, %114 : vector<8x128xf32>
    %117 = arith.divf %115, %116 : vector<8x128xf32>
    %118 = vector.extract_strided_slice %98 {offsets = [0, 256], sizes = [8, 128], strides = [1, 1]} : vector<8x384xf32> to vector<8x128xf32>
    %119 = vector.extract_strided_slice %95 {offsets = [0, 256], sizes = [8, 128], strides = [1, 1]} : vector<8x768xf32> to vector<8x128xf32>
    %120 = arith.addf %119, %11 : vector<8x128xf32>
    %121 = arith.mulf %109, %120 : vector<8x128xf32>
    %122 = arith.addf %118, %121 : vector<8x128xf32>
    %123 = math.tanh %122 : vector<8x128xf32>
    %cst_41 = arith.constant 1.000000e+00 : f32
    %124 = vector.broadcast %cst_41 : f32 to vector<8x128xf32>
    %125 = arith.subf %124, %117 : vector<8x128xf32>
    %126 = arith.mulf %125, %123 : vector<8x128xf32>
    %127 = vector.extract_strided_slice %93 {offsets = [0, 0], sizes = [8, 128], strides = [1, 1]} : vector<8x256xf32> to vector<8x128xf32>
    %128 = arith.mulf %117, %127 : vector<8x128xf32>
    %129 = arith.addf %126, %128 : vector<8x128xf32>
    %130 = vector.extract_strided_slice %101 {offsets = [0, 0], sizes = [8, 128], strides = [1, 1]} : vector<8x384xf32> to vector<8x128xf32>
    %131 = vector.extract_strided_slice %95 {offsets = [0, 384], sizes = [8, 128], strides = [1, 1]} : vector<8x768xf32> to vector<8x128xf32>
    %132 = arith.addf %130, %131 : vector<8x128xf32>
    %133 = arith.negf %132 : vector<8x128xf32>
    %134 = math.exp %133 : vector<8x128xf32>
    %cst_42 = arith.constant 1.000000e+00 : f32
    %135 = vector.broadcast %cst_42 : f32 to vector<8x128xf32>
    %136 = arith.addf %135, %134 : vector<8x128xf32>
    %137 = arith.divf %135, %136 : vector<8x128xf32>
    %138 = vector.extract_strided_slice %101 {offsets = [0, 128], sizes = [8, 128], strides = [1, 1]} : vector<8x384xf32> to vector<8x128xf32>
    %139 = vector.extract_strided_slice %95 {offsets = [0, 512], sizes = [8, 128], strides = [1, 1]} : vector<8x768xf32> to vector<8x128xf32>
    %140 = arith.addf %138, %139 : vector<8x128xf32>
    %141 = arith.negf %140 : vector<8x128xf32>
    %142 = math.exp %141 : vector<8x128xf32>
    %cst_43 = arith.constant 1.000000e+00 : f32
    %143 = vector.broadcast %cst_43 : f32 to vector<8x128xf32>
    %144 = arith.addf %143, %142 : vector<8x128xf32>
    %145 = arith.divf %143, %144 : vector<8x128xf32>
    %146 = vector.extract_strided_slice %101 {offsets = [0, 256], sizes = [8, 128], strides = [1, 1]} : vector<8x384xf32> to vector<8x128xf32>
    %147 = vector.extract_strided_slice %95 {offsets = [0, 640], sizes = [8, 128], strides = [1, 1]} : vector<8x768xf32> to vector<8x128xf32>
    %148 = arith.addf %147, %14 : vector<8x128xf32>
    %149 = arith.mulf %137, %148 : vector<8x128xf32>
    %150 = arith.addf %146, %149 : vector<8x128xf32>
    %151 = math.tanh %150 : vector<8x128xf32>
    %cst_44 = arith.constant 1.000000e+00 : f32
    %152 = vector.broadcast %cst_44 : f32 to vector<8x128xf32>
    %153 = arith.subf %152, %145 : vector<8x128xf32>
    %154 = arith.mulf %153, %151 : vector<8x128xf32>
    %155 = vector.extract_strided_slice %93 {offsets = [0, 128], sizes = [8, 128], strides = [1, 1]} : vector<8x256xf32> to vector<8x128xf32>
    %156 = arith.mulf %145, %155 : vector<8x128xf32>
    %157 = arith.addf %154, %156 : vector<8x128xf32>
    %158 = arith.index_cast %c1_i32 : i32 to index
    %c0_45 = arith.constant 0 : index
    %c0_46 = arith.constant 0 : index
    %159 = vector.load %arg6[%158, %c0_45, %c0_46] : memref<8x8x128xf32, #tpu.memory_space<vmem>>, vector<1x8x128xf32>
    %160 = vector.shape_cast %159 : vector<1x8x128xf32> to vector<8x128xf32>
    %161 = vector.shape_cast %129 : vector<8x128xf32> to vector<1x8x128xf32>
    tpu.vector_store %arg6[%158, %c0_45, %c0_46], %161 {strides = array<i32>} : memref<8x8x128xf32, #tpu.memory_space<vmem>>, vector<1x8x128xf32>,
    %162 = arith.index_cast %94 : i32 to index
    %c0_47 = arith.constant 0 : index
    %c0_48 = arith.constant 0 : index
    %163 = vector.load %arg9[%162, %c0_47, %c0_48] : memref<8x8x128xf32, #tpu.memory_space<vmem>>, vector<1x8x128xf32>
    %164 = vector.shape_cast %163 : vector<1x8x128xf32> to vector<8x128xf32>
    %165 = vector.shape_cast %157 : vector<8x128xf32> to vector<1x8x128xf32>
    tpu.vector_store %arg9[%162, %c0_47, %c0_48], %165 {strides = array<i32>} : memref<8x8x128xf32, #tpu.memory_space<vmem>>, vector<1x8x128xf32>,
    %166 = tpu.concatenate %129, %157 in 1 : vector<8x128xf32>, vector<8x128xf32> -> vector<8x256xf32>
    %c2_i32 = arith.constant 2 : i32
    %c7_i32_49 = arith.constant 7 : i32
    %167 = arith.subi %c7_i32_49, %c2_i32 : i32
    %cst_50 = arith.constant dense<0.000000e+00> : vector<8x768xf32>
    %168 = tpu.matmul %166, %15, %cst_50 {dimension_numbers = #tpu.dot_dimension_numbers<[1], [0], [0], [1], [0, 0, 1, 1], [], []>} : vector<8x256xf32>, vector<256x768xf32>, vector<8x768xf32> -> vector<8x768xf32>
    %169 = arith.index_cast %c2_i32 : i32 to index
    %c0_51 = arith.constant 0 : index
    %c0_52 = arith.constant 0 : index
    %170 = vector.load %arg8[%169, %c0_51, %c0_52] : memref<8x8x768xf32, #tpu.memory_space<vmem>>, vector<1x8x384xf32>
    %171 = vector.shape_cast %170 : vector<1x8x384xf32> to vector<8x384xf32>
    %172 = arith.index_cast %167 : i32 to index
    %c0_53 = arith.constant 0 : index
    %c384_54 = arith.constant 384 : index
    %173 = vector.load %arg8[%172, %c0_53, %c384_54] : memref<8x8x768xf32, #tpu.memory_space<vmem>>, vector<1x8x384xf32>
    %174 = vector.shape_cast %173 : vector<1x8x384xf32> to vector<8x384xf32>
    %175 = vector.extract_strided_slice %171 {offsets = [0, 0], sizes = [8, 128], strides = [1, 1]} : vector<8x384xf32> to vector<8x128xf32>
    %176 = vector.extract_strided_slice %168 {offsets = [0, 0], sizes = [8, 128], strides = [1, 1]} : vector<8x768xf32> to vector<8x128xf32>
    %177 = arith.addf %175, %176 : vector<8x128xf32>
    %178 = arith.negf %177 : vector<8x128xf32>
    %179 = math.exp %178 : vector<8x128xf32>
    %cst_55 = arith.constant 1.000000e+00 : f32
    %180 = vector.broadcast %cst_55 : f32 to vector<8x128xf32>
    %181 = arith.addf %180, %179 : vector<8x128xf32>
    %182 = arith.divf %180, %181 : vector<8x128xf32>
    %183 = vector.extract_strided_slice %171 {offsets = [0, 128], sizes = [8, 128], strides = [1, 1]} : vector<8x384xf32> to vector<8x128xf32>
    %184 = vector.extract_strided_slice %168 {offsets = [0, 128], sizes = [8, 128], strides = [1, 1]} : vector<8x768xf32> to vector<8x128xf32>
    %185 = arith.addf %183, %184 : vector<8x128xf32>
    %186 = arith.negf %185 : vector<8x128xf32>
    %187 = math.exp %186 : vector<8x128xf32>
    %cst_56 = arith.constant 1.000000e+00 : f32
    %188 = vector.broadcast %cst_56 : f32 to vector<8x128xf32>
    %189 = arith.addf %188, %187 : vector<8x128xf32>
    %190 = arith.divf %188, %189 : vector<8x128xf32>
    %191 = vector.extract_strided_slice %171 {offsets = [0, 256], sizes = [8, 128], strides = [1, 1]} : vector<8x384xf32> to vector<8x128xf32>
    %192 = vector.extract_strided_slice %168 {offsets = [0, 256], sizes = [8, 128], strides = [1, 1]} : vector<8x768xf32> to vector<8x128xf32>
    %193 = arith.addf %192, %11 : vector<8x128xf32>
    %194 = arith.mulf %182, %193 : vector<8x128xf32>
    %195 = arith.addf %191, %194 : vector<8x128xf32>
    %196 = math.tanh %195 : vector<8x128xf32>
    %cst_57 = arith.constant 1.000000e+00 : f32
    %197 = vector.broadcast %cst_57 : f32 to vector<8x128xf32>
    %198 = arith.subf %197, %190 : vector<8x128xf32>
    %199 = arith.mulf %198, %196 : vector<8x128xf32>
    %200 = vector.extract_strided_slice %166 {offsets = [0, 0], sizes = [8, 128], strides = [1, 1]} : vector<8x256xf32> to vector<8x128xf32>
    %201 = arith.mulf %190, %200 : vector<8x128xf32>
    %202 = arith.addf %199, %201 : vector<8x128xf32>
    %203 = vector.extract_strided_slice %174 {offsets = [0, 0], sizes = [8, 128], strides = [1, 1]} : vector<8x384xf32> to vector<8x128xf32>
    %204 = vector.extract_strided_slice %168 {offsets = [0, 384], sizes = [8, 128], strides = [1, 1]} : vector<8x768xf32> to vector<8x128xf32>
    %205 = arith.addf %203, %204 : vector<8x128xf32>
    %206 = arith.negf %205 : vector<8x128xf32>
    %207 = math.exp %206 : vector<8x128xf32>
    %cst_58 = arith.constant 1.000000e+00 : f32
    %208 = vector.broadcast %cst_58 : f32 to vector<8x128xf32>
    %209 = arith.addf %208, %207 : vector<8x128xf32>
    %210 = arith.divf %208, %209 : vector<8x128xf32>
    %211 = vector.extract_strided_slice %174 {offsets = [0, 128], sizes = [8, 128], strides = [1, 1]} : vector<8x384xf32> to vector<8x128xf32>
    %212 = vector.extract_strided_slice %168 {offsets = [0, 512], sizes = [8, 128], strides = [1, 1]} : vector<8x768xf32> to vector<8x128xf32>
    %213 = arith.addf %211, %212 : vector<8x128xf32>
    %214 = arith.negf %213 : vector<8x128xf32>
    %215 = math.exp %214 : vector<8x128xf32>
    %cst_59 = arith.constant 1.000000e+00 : f32
    %216 = vector.broadcast %cst_59 : f32 to vector<8x128xf32>
    %217 = arith.addf %216, %215 : vector<8x128xf32>
    %218 = arith.divf %216, %217 : vector<8x128xf32>
    %219 = vector.extract_strided_slice %174 {offsets = [0, 256], sizes = [8, 128], strides = [1, 1]} : vector<8x384xf32> to vector<8x128xf32>
    %220 = vector.extract_strided_slice %168 {offsets = [0, 640], sizes = [8, 128], strides = [1, 1]} : vector<8x768xf32> to vector<8x128xf32>
    %221 = arith.addf %220, %14 : vector<8x128xf32>
    %222 = arith.mulf %210, %221 : vector<8x128xf32>
    %223 = arith.addf %219, %222 : vector<8x128xf32>
    %224 = math.tanh %223 : vector<8x128xf32>
    %cst_60 = arith.constant 1.000000e+00 : f32
    %225 = vector.broadcast %cst_60 : f32 to vector<8x128xf32>
    %226 = arith.subf %225, %218 : vector<8x128xf32>
    %227 = arith.mulf %226, %224 : vector<8x128xf32>
    %228 = vector.extract_strided_slice %166 {offsets = [0, 128], sizes = [8, 128], strides = [1, 1]} : vector<8x256xf32> to vector<8x128xf32>
    %229 = arith.mulf %218, %228 : vector<8x128xf32>
    %230 = arith.addf %227, %229 : vector<8x128xf32>
    %231 = arith.index_cast %c2_i32 : i32 to index
    %c0_61 = arith.constant 0 : index
    %c0_62 = arith.constant 0 : index
    %232 = vector.load %arg6[%231, %c0_61, %c0_62] : memref<8x8x128xf32, #tpu.memory_space<vmem>>, vector<1x8x128xf32>
    %233 = vector.shape_cast %232 : vector<1x8x128xf32> to vector<8x128xf32>
    %234 = vector.shape_cast %202 : vector<8x128xf32> to vector<1x8x128xf32>
    tpu.vector_store %arg6[%231, %c0_61, %c0_62], %234 {strides = array<i32>} : memref<8x8x128xf32, #tpu.memory_space<vmem>>, vector<1x8x128xf32>,
    %235 = arith.index_cast %167 : i32 to index
    %c0_63 = arith.constant 0 : index
    %c0_64 = arith.constant 0 : index
    %236 = vector.load %arg9[%235, %c0_63, %c0_64] : memref<8x8x128xf32, #tpu.memory_space<vmem>>, vector<1x8x128xf32>
    %237 = vector.shape_cast %236 : vector<1x8x128xf32> to vector<8x128xf32>
    %238 = vector.shape_cast %230 : vector<8x128xf32> to vector<1x8x128xf32>
    tpu.vector_store %arg9[%235, %c0_63, %c0_64], %238 {strides = array<i32>} : memref<8x8x128xf32, #tpu.memory_space<vmem>>, vector<1x8x128xf32>,
    %239 = tpu.concatenate %202, %230 in 1 : vector<8x128xf32>, vector<8x128xf32> -> vector<8x256xf32>
    %c3_i32 = arith.constant 3 : i32
    %c7_i32_65 = arith.constant 7 : i32
    %240 = arith.subi %c7_i32_65, %c3_i32 : i32
    %cst_66 = arith.constant dense<0.000000e+00> : vector<8x768xf32>
    %241 = tpu.matmul %239, %15, %cst_66 {dimension_numbers = #tpu.dot_dimension_numbers<[1], [0], [0], [1], [0, 0, 1, 1], [], []>} : vector<8x256xf32>, vector<256x768xf32>, vector<8x768xf32> -> vector<8x768xf32>
    %242 = arith.index_cast %c3_i32 : i32 to index
    %c0_67 = arith.constant 0 : index
    %c0_68 = arith.constant 0 : index
    %243 = vector.load %arg8[%242, %c0_67, %c0_68] : memref<8x8x768xf32, #tpu.memory_space<vmem>>, vector<1x8x384xf32>
    %244 = vector.shape_cast %243 : vector<1x8x384xf32> to vector<8x384xf32>
    %245 = arith.index_cast %240 : i32 to index
    %c0_69 = arith.constant 0 : index
    %c384_70 = arith.constant 384 : index
    %246 = vector.load %arg8[%245, %c0_69, %c384_70] : memref<8x8x768xf32, #tpu.memory_space<vmem>>, vector<1x8x384xf32>
    %247 = vector.shape_cast %246 : vector<1x8x384xf32> to vector<8x384xf32>
    %248 = vector.extract_strided_slice %244 {offsets = [0, 0], sizes = [8, 128], strides = [1, 1]} : vector<8x384xf32> to vector<8x128xf32>
    %249 = vector.extract_strided_slice %241 {offsets = [0, 0], sizes = [8, 128], strides = [1, 1]} : vector<8x768xf32> to vector<8x128xf32>
    %250 = arith.addf %248, %249 : vector<8x128xf32>
    %251 = arith.negf %250 : vector<8x128xf32>
    %252 = math.exp %251 : vector<8x128xf32>
    %cst_71 = arith.constant 1.000000e+00 : f32
    %253 = vector.broadcast %cst_71 : f32 to vector<8x128xf32>
    %254 = arith.addf %253, %252 : vector<8x128xf32>
    %255 = arith.divf %253, %254 : vector<8x128xf32>
    %256 = vector.extract_strided_slice %244 {offsets = [0, 128], sizes = [8, 128], strides = [1, 1]} : vector<8x384xf32> to vector<8x128xf32>
    %257 = vector.extract_strided_slice %241 {offsets = [0, 128], sizes = [8, 128], strides = [1, 1]} : vector<8x768xf32> to vector<8x128xf32>
    %258 = arith.addf %256, %257 : vector<8x128xf32>
    %259 = arith.negf %258 : vector<8x128xf32>
    %260 = math.exp %259 : vector<8x128xf32>
    %cst_72 = arith.constant 1.000000e+00 : f32
    %261 = vector.broadcast %cst_72 : f32 to vector<8x128xf32>
    %262 = arith.addf %261, %260 : vector<8x128xf32>
    %263 = arith.divf %261, %262 : vector<8x128xf32>
    %264 = vector.extract_strided_slice %244 {offsets = [0, 256], sizes = [8, 128], strides = [1, 1]} : vector<8x384xf32> to vector<8x128xf32>
    %265 = vector.extract_strided_slice %241 {offsets = [0, 256], sizes = [8, 128], strides = [1, 1]} : vector<8x768xf32> to vector<8x128xf32>
    %266 = arith.addf %265, %11 : vector<8x128xf32>
    %267 = arith.mulf %255, %266 : vector<8x128xf32>
    %268 = arith.addf %264, %267 : vector<8x128xf32>
    %269 = math.tanh %268 : vector<8x128xf32>
    %cst_73 = arith.constant 1.000000e+00 : f32
    %270 = vector.broadcast %cst_73 : f32 to vector<8x128xf32>
    %271 = arith.subf %270, %263 : vector<8x128xf32>
    %272 = arith.mulf %271, %269 : vector<8x128xf32>
    %273 = vector.extract_strided_slice %239 {offsets = [0, 0], sizes = [8, 128], strides = [1, 1]} : vector<8x256xf32> to vector<8x128xf32>
    %274 = arith.mulf %263, %273 : vector<8x128xf32>
    %275 = arith.addf %272, %274 : vector<8x128xf32>
    %276 = vector.extract_strided_slice %247 {offsets = [0, 0], sizes = [8, 128], strides = [1, 1]} : vector<8x384xf32> to vector<8x128xf32>
    %277 = vector.extract_strided_slice %241 {offsets = [0, 384], sizes = [8, 128], strides = [1, 1]} : vector<8x768xf32> to vector<8x128xf32>
    %278 = arith.addf %276, %277 : vector<8x128xf32>
    %279 = arith.negf %278 : vector<8x128xf32>
    %280 = math.exp %279 : vector<8x128xf32>
    %cst_74 = arith.constant 1.000000e+00 : f32
    %281 = vector.broadcast %cst_74 : f32 to vector<8x128xf32>
    %282 = arith.addf %281, %280 : vector<8x128xf32>
    %283 = arith.divf %281, %282 : vector<8x128xf32>
    %284 = vector.extract_strided_slice %247 {offsets = [0, 128], sizes = [8, 128], strides = [1, 1]} : vector<8x384xf32> to vector<8x128xf32>
    %285 = vector.extract_strided_slice %241 {offsets = [0, 512], sizes = [8, 128], strides = [1, 1]} : vector<8x768xf32> to vector<8x128xf32>
    %286 = arith.addf %284, %285 : vector<8x128xf32>
    %287 = arith.negf %286 : vector<8x128xf32>
    %288 = math.exp %287 : vector<8x128xf32>
    %cst_75 = arith.constant 1.000000e+00 : f32
    %289 = vector.broadcast %cst_75 : f32 to vector<8x128xf32>
    %290 = arith.addf %289, %288 : vector<8x128xf32>
    %291 = arith.divf %289, %290 : vector<8x128xf32>
    %292 = vector.extract_strided_slice %247 {offsets = [0, 256], sizes = [8, 128], strides = [1, 1]} : vector<8x384xf32> to vector<8x128xf32>
    %293 = vector.extract_strided_slice %241 {offsets = [0, 640], sizes = [8, 128], strides = [1, 1]} : vector<8x768xf32> to vector<8x128xf32>
    %294 = arith.addf %293, %14 : vector<8x128xf32>
    %295 = arith.mulf %283, %294 : vector<8x128xf32>
    %296 = arith.addf %292, %295 : vector<8x128xf32>
    %297 = math.tanh %296 : vector<8x128xf32>
    %cst_76 = arith.constant 1.000000e+00 : f32
    %298 = vector.broadcast %cst_76 : f32 to vector<8x128xf32>
    %299 = arith.subf %298, %291 : vector<8x128xf32>
    %300 = arith.mulf %299, %297 : vector<8x128xf32>
    %301 = vector.extract_strided_slice %239 {offsets = [0, 128], sizes = [8, 128], strides = [1, 1]} : vector<8x256xf32> to vector<8x128xf32>
    %302 = arith.mulf %291, %301 : vector<8x128xf32>
    %303 = arith.addf %300, %302 : vector<8x128xf32>
    %304 = arith.index_cast %c3_i32 : i32 to index
    %c0_77 = arith.constant 0 : index
    %c0_78 = arith.constant 0 : index
    %305 = vector.load %arg6[%304, %c0_77, %c0_78] : memref<8x8x128xf32, #tpu.memory_space<vmem>>, vector<1x8x128xf32>
    %306 = vector.shape_cast %305 : vector<1x8x128xf32> to vector<8x128xf32>
    %307 = vector.shape_cast %275 : vector<8x128xf32> to vector<1x8x128xf32>
    tpu.vector_store %arg6[%304, %c0_77, %c0_78], %307 {strides = array<i32>} : memref<8x8x128xf32, #tpu.memory_space<vmem>>, vector<1x8x128xf32>,
    %308 = arith.index_cast %240 : i32 to index
    %c0_79 = arith.constant 0 : index
    %c0_80 = arith.constant 0 : index
    %309 = vector.load %arg9[%308, %c0_79, %c0_80] : memref<8x8x128xf32, #tpu.memory_space<vmem>>, vector<1x8x128xf32>
    %310 = vector.shape_cast %309 : vector<1x8x128xf32> to vector<8x128xf32>
    %311 = vector.shape_cast %303 : vector<8x128xf32> to vector<1x8x128xf32>
    tpu.vector_store %arg9[%308, %c0_79, %c0_80], %311 {strides = array<i32>} : memref<8x8x128xf32, #tpu.memory_space<vmem>>, vector<1x8x128xf32>,
    %312 = tpu.concatenate %275, %303 in 1 : vector<8x128xf32>, vector<8x128xf32> -> vector<8x256xf32>
    %c4_i32 = arith.constant 4 : i32
    %c7_i32_81 = arith.constant 7 : i32
    %313 = arith.subi %c7_i32_81, %c4_i32 : i32
    %cst_82 = arith.constant dense<0.000000e+00> : vector<8x768xf32>
    %314 = tpu.matmul %312, %15, %cst_82 {dimension_numbers = #tpu.dot_dimension_numbers<[1], [0], [0], [1], [0, 0, 1, 1], [], []>} : vector<8x256xf32>, vector<256x768xf32>, vector<8x768xf32> -> vector<8x768xf32>
    %315 = arith.index_cast %c4_i32 : i32 to index
    %c0_83 = arith.constant 0 : index
    %c0_84 = arith.constant 0 : index
    %316 = vector.load %arg8[%315, %c0_83, %c0_84] : memref<8x8x768xf32, #tpu.memory_space<vmem>>, vector<1x8x384xf32>
    %317 = vector.shape_cast %316 : vector<1x8x384xf32> to vector<8x384xf32>
    %318 = arith.index_cast %313 : i32 to index
    %c0_85 = arith.constant 0 : index
    %c384_86 = arith.constant 384 : index
    %319 = vector.load %arg8[%318, %c0_85, %c384_86] : memref<8x8x768xf32, #tpu.memory_space<vmem>>, vector<1x8x384xf32>
    %320 = vector.shape_cast %319 : vector<1x8x384xf32> to vector<8x384xf32>
    %321 = vector.extract_strided_slice %317 {offsets = [0, 0], sizes = [8, 128], strides = [1, 1]} : vector<8x384xf32> to vector<8x128xf32>
    %322 = vector.extract_strided_slice %314 {offsets = [0, 0], sizes = [8, 128], strides = [1, 1]} : vector<8x768xf32> to vector<8x128xf32>
    %323 = arith.addf %321, %322 : vector<8x128xf32>
    %324 = arith.negf %323 : vector<8x128xf32>
    %325 = math.exp %324 : vector<8x128xf32>
    %cst_87 = arith.constant 1.000000e+00 : f32
    %326 = vector.broadcast %cst_87 : f32 to vector<8x128xf32>
    %327 = arith.addf %326, %325 : vector<8x128xf32>
    %328 = arith.divf %326, %327 : vector<8x128xf32>
    %329 = vector.extract_strided_slice %317 {offsets = [0, 128], sizes = [8, 128], strides = [1, 1]} : vector<8x384xf32> to vector<8x128xf32>
    %330 = vector.extract_strided_slice %314 {offsets = [0, 128], sizes = [8, 128], strides = [1, 1]} : vector<8x768xf32> to vector<8x128xf32>
    %331 = arith.addf %329, %330 : vector<8x128xf32>
    %332 = arith.negf %331 : vector<8x128xf32>
    %333 = math.exp %332 : vector<8x128xf32>
    %cst_88 = arith.constant 1.000000e+00 : f32
    %334 = vector.broadcast %cst_88 : f32 to vector<8x128xf32>
    %335 = arith.addf %334, %333 : vector<8x128xf32>
    %336 = arith.divf %334, %335 : vector<8x128xf32>
    %337 = vector.extract_strided_slice %317 {offsets = [0, 256], sizes = [8, 128], strides = [1, 1]} : vector<8x384xf32> to vector<8x128xf32>
    %338 = vector.extract_strided_slice %314 {offsets = [0, 256], sizes = [8, 128], strides = [1, 1]} : vector<8x768xf32> to vector<8x128xf32>
    %339 = arith.addf %338, %11 : vector<8x128xf32>
    %340 = arith.mulf %328, %339 : vector<8x128xf32>
    %341 = arith.addf %337, %340 : vector<8x128xf32>
    %342 = math.tanh %341 : vector<8x128xf32>
    %cst_89 = arith.constant 1.000000e+00 : f32
    %343 = vector.broadcast %cst_89 : f32 to vector<8x128xf32>
    %344 = arith.subf %343, %336 : vector<8x128xf32>
    %345 = arith.mulf %344, %342 : vector<8x128xf32>
    %346 = vector.extract_strided_slice %312 {offsets = [0, 0], sizes = [8, 128], strides = [1, 1]} : vector<8x256xf32> to vector<8x128xf32>
    %347 = arith.mulf %336, %346 : vector<8x128xf32>
    %348 = arith.addf %345, %347 : vector<8x128xf32>
    %349 = vector.extract_strided_slice %320 {offsets = [0, 0], sizes = [8, 128], strides = [1, 1]} : vector<8x384xf32> to vector<8x128xf32>
    %350 = vector.extract_strided_slice %314 {offsets = [0, 384], sizes = [8, 128], strides = [1, 1]} : vector<8x768xf32> to vector<8x128xf32>
    %351 = arith.addf %349, %350 : vector<8x128xf32>
    %352 = arith.negf %351 : vector<8x128xf32>
    %353 = math.exp %352 : vector<8x128xf32>
    %cst_90 = arith.constant 1.000000e+00 : f32
    %354 = vector.broadcast %cst_90 : f32 to vector<8x128xf32>
    %355 = arith.addf %354, %353 : vector<8x128xf32>
    %356 = arith.divf %354, %355 : vector<8x128xf32>
    %357 = vector.extract_strided_slice %320 {offsets = [0, 128], sizes = [8, 128], strides = [1, 1]} : vector<8x384xf32> to vector<8x128xf32>
    %358 = vector.extract_strided_slice %314 {offsets = [0, 512], sizes = [8, 128], strides = [1, 1]} : vector<8x768xf32> to vector<8x128xf32>
    %359 = arith.addf %357, %358 : vector<8x128xf32>
    %360 = arith.negf %359 : vector<8x128xf32>
    %361 = math.exp %360 : vector<8x128xf32>
    %cst_91 = arith.constant 1.000000e+00 : f32
    %362 = vector.broadcast %cst_91 : f32 to vector<8x128xf32>
    %363 = arith.addf %362, %361 : vector<8x128xf32>
    %364 = arith.divf %362, %363 : vector<8x128xf32>
    %365 = vector.extract_strided_slice %320 {offsets = [0, 256], sizes = [8, 128], strides = [1, 1]} : vector<8x384xf32> to vector<8x128xf32>
    %366 = vector.extract_strided_slice %314 {offsets = [0, 640], sizes = [8, 128], strides = [1, 1]} : vector<8x768xf32> to vector<8x128xf32>
    %367 = arith.addf %366, %14 : vector<8x128xf32>
    %368 = arith.mulf %356, %367 : vector<8x128xf32>
    %369 = arith.addf %365, %368 : vector<8x128xf32>
    %370 = math.tanh %369 : vector<8x128xf32>
    %cst_92 = arith.constant 1.000000e+00 : f32
    %371 = vector.broadcast %cst_92 : f32 to vector<8x128xf32>
    %372 = arith.subf %371, %364 : vector<8x128xf32>
    %373 = arith.mulf %372, %370 : vector<8x128xf32>
    %374 = vector.extract_strided_slice %312 {offsets = [0, 128], sizes = [8, 128], strides = [1, 1]} : vector<8x256xf32> to vector<8x128xf32>
    %375 = arith.mulf %364, %374 : vector<8x128xf32>
    %376 = arith.addf %373, %375 : vector<8x128xf32>
    %377 = arith.index_cast %c4_i32 : i32 to index
    %c0_93 = arith.constant 0 : index
    %c0_94 = arith.constant 0 : index
    %378 = vector.load %arg6[%377, %c0_93, %c0_94] : memref<8x8x128xf32, #tpu.memory_space<vmem>>, vector<1x8x128xf32>
    %379 = vector.shape_cast %378 : vector<1x8x128xf32> to vector<8x128xf32>
    %380 = vector.shape_cast %348 : vector<8x128xf32> to vector<1x8x128xf32>
    tpu.vector_store %arg6[%377, %c0_93, %c0_94], %380 {strides = array<i32>} : memref<8x8x128xf32, #tpu.memory_space<vmem>>, vector<1x8x128xf32>,
    %381 = arith.index_cast %313 : i32 to index
    %c0_95 = arith.constant 0 : index
    %c0_96 = arith.constant 0 : index
    %382 = vector.load %arg9[%381, %c0_95, %c0_96] : memref<8x8x128xf32, #tpu.memory_space<vmem>>, vector<1x8x128xf32>
    %383 = vector.shape_cast %382 : vector<1x8x128xf32> to vector<8x128xf32>
    %384 = vector.shape_cast %376 : vector<8x128xf32> to vector<1x8x128xf32>
    tpu.vector_store %arg9[%381, %c0_95, %c0_96], %384 {strides = array<i32>} : memref<8x8x128xf32, #tpu.memory_space<vmem>>, vector<1x8x128xf32>,
    %385 = tpu.concatenate %348, %376 in 1 : vector<8x128xf32>, vector<8x128xf32> -> vector<8x256xf32>
    %c5_i32 = arith.constant 5 : i32
    %c7_i32_97 = arith.constant 7 : i32
    %386 = arith.subi %c7_i32_97, %c5_i32 : i32
    %cst_98 = arith.constant dense<0.000000e+00> : vector<8x768xf32>
    %387 = tpu.matmul %385, %15, %cst_98 {dimension_numbers = #tpu.dot_dimension_numbers<[1], [0], [0], [1], [0, 0, 1, 1], [], []>} : vector<8x256xf32>, vector<256x768xf32>, vector<8x768xf32> -> vector<8x768xf32>
    %388 = arith.index_cast %c5_i32 : i32 to index
    %c0_99 = arith.constant 0 : index
    %c0_100 = arith.constant 0 : index
    %389 = vector.load %arg8[%388, %c0_99, %c0_100] : memref<8x8x768xf32, #tpu.memory_space<vmem>>, vector<1x8x384xf32>
    %390 = vector.shape_cast %389 : vector<1x8x384xf32> to vector<8x384xf32>
    %391 = arith.index_cast %386 : i32 to index
    %c0_101 = arith.constant 0 : index
    %c384_102 = arith.constant 384 : index
    %392 = vector.load %arg8[%391, %c0_101, %c384_102] : memref<8x8x768xf32, #tpu.memory_space<vmem>>, vector<1x8x384xf32>
    %393 = vector.shape_cast %392 : vector<1x8x384xf32> to vector<8x384xf32>
    %394 = vector.extract_strided_slice %390 {offsets = [0, 0], sizes = [8, 128], strides = [1, 1]} : vector<8x384xf32> to vector<8x128xf32>
    %395 = vector.extract_strided_slice %387 {offsets = [0, 0], sizes = [8, 128], strides = [1, 1]} : vector<8x768xf32> to vector<8x128xf32>
    %396 = arith.addf %394, %395 : vector<8x128xf32>
    %397 = arith.negf %396 : vector<8x128xf32>
    %398 = math.exp %397 : vector<8x128xf32>
    %cst_103 = arith.constant 1.000000e+00 : f32
    %399 = vector.broadcast %cst_103 : f32 to vector<8x128xf32>
    %400 = arith.addf %399, %398 : vector<8x128xf32>
    %401 = arith.divf %399, %400 : vector<8x128xf32>
    %402 = vector.extract_strided_slice %390 {offsets = [0, 128], sizes = [8, 128], strides = [1, 1]} : vector<8x384xf32> to vector<8x128xf32>
    %403 = vector.extract_strided_slice %387 {offsets = [0, 128], sizes = [8, 128], strides = [1, 1]} : vector<8x768xf32> to vector<8x128xf32>
    %404 = arith.addf %402, %403 : vector<8x128xf32>
    %405 = arith.negf %404 : vector<8x128xf32>
    %406 = math.exp %405 : vector<8x128xf32>
    %cst_104 = arith.constant 1.000000e+00 : f32
    %407 = vector.broadcast %cst_104 : f32 to vector<8x128xf32>
    %408 = arith.addf %407, %406 : vector<8x128xf32>
    %409 = arith.divf %407, %408 : vector<8x128xf32>
    %410 = vector.extract_strided_slice %390 {offsets = [0, 256], sizes = [8, 128], strides = [1, 1]} : vector<8x384xf32> to vector<8x128xf32>
    %411 = vector.extract_strided_slice %387 {offsets = [0, 256], sizes = [8, 128], strides = [1, 1]} : vector<8x768xf32> to vector<8x128xf32>
    %412 = arith.addf %411, %11 : vector<8x128xf32>
    %413 = arith.mulf %401, %412 : vector<8x128xf32>
    %414 = arith.addf %410, %413 : vector<8x128xf32>
    %415 = math.tanh %414 : vector<8x128xf32>
    %cst_105 = arith.constant 1.000000e+00 : f32
    %416 = vector.broadcast %cst_105 : f32 to vector<8x128xf32>
    %417 = arith.subf %416, %409 : vector<8x128xf32>
    %418 = arith.mulf %417, %415 : vector<8x128xf32>
    %419 = vector.extract_strided_slice %385 {offsets = [0, 0], sizes = [8, 128], strides = [1, 1]} : vector<8x256xf32> to vector<8x128xf32>
    %420 = arith.mulf %409, %419 : vector<8x128xf32>
    %421 = arith.addf %418, %420 : vector<8x128xf32>
    %422 = vector.extract_strided_slice %393 {offsets = [0, 0], sizes = [8, 128], strides = [1, 1]} : vector<8x384xf32> to vector<8x128xf32>
    %423 = vector.extract_strided_slice %387 {offsets = [0, 384], sizes = [8, 128], strides = [1, 1]} : vector<8x768xf32> to vector<8x128xf32>
    %424 = arith.addf %422, %423 : vector<8x128xf32>
    %425 = arith.negf %424 : vector<8x128xf32>
    %426 = math.exp %425 : vector<8x128xf32>
    %cst_106 = arith.constant 1.000000e+00 : f32
    %427 = vector.broadcast %cst_106 : f32 to vector<8x128xf32>
    %428 = arith.addf %427, %426 : vector<8x128xf32>
    %429 = arith.divf %427, %428 : vector<8x128xf32>
    %430 = vector.extract_strided_slice %393 {offsets = [0, 128], sizes = [8, 128], strides = [1, 1]} : vector<8x384xf32> to vector<8x128xf32>
    %431 = vector.extract_strided_slice %387 {offsets = [0, 512], sizes = [8, 128], strides = [1, 1]} : vector<8x768xf32> to vector<8x128xf32>
    %432 = arith.addf %430, %431 : vector<8x128xf32>
    %433 = arith.negf %432 : vector<8x128xf32>
    %434 = math.exp %433 : vector<8x128xf32>
    %cst_107 = arith.constant 1.000000e+00 : f32
    %435 = vector.broadcast %cst_107 : f32 to vector<8x128xf32>
    %436 = arith.addf %435, %434 : vector<8x128xf32>
    %437 = arith.divf %435, %436 : vector<8x128xf32>
    %438 = vector.extract_strided_slice %393 {offsets = [0, 256], sizes = [8, 128], strides = [1, 1]} : vector<8x384xf32> to vector<8x128xf32>
    %439 = vector.extract_strided_slice %387 {offsets = [0, 640], sizes = [8, 128], strides = [1, 1]} : vector<8x768xf32> to vector<8x128xf32>
    %440 = arith.addf %439, %14 : vector<8x128xf32>
    %441 = arith.mulf %429, %440 : vector<8x128xf32>
    %442 = arith.addf %438, %441 : vector<8x128xf32>
    %443 = math.tanh %442 : vector<8x128xf32>
    %cst_108 = arith.constant 1.000000e+00 : f32
    %444 = vector.broadcast %cst_108 : f32 to vector<8x128xf32>
    %445 = arith.subf %444, %437 : vector<8x128xf32>
    %446 = arith.mulf %445, %443 : vector<8x128xf32>
    %447 = vector.extract_strided_slice %385 {offsets = [0, 128], sizes = [8, 128], strides = [1, 1]} : vector<8x256xf32> to vector<8x128xf32>
    %448 = arith.mulf %437, %447 : vector<8x128xf32>
    %449 = arith.addf %446, %448 : vector<8x128xf32>
    %450 = arith.index_cast %c5_i32 : i32 to index
    %c0_109 = arith.constant 0 : index
    %c0_110 = arith.constant 0 : index
    %451 = vector.load %arg6[%450, %c0_109, %c0_110] : memref<8x8x128xf32, #tpu.memory_space<vmem>>, vector<1x8x128xf32>
    %452 = vector.shape_cast %451 : vector<1x8x128xf32> to vector<8x128xf32>
    %453 = vector.shape_cast %421 : vector<8x128xf32> to vector<1x8x128xf32>
    tpu.vector_store %arg6[%450, %c0_109, %c0_110], %453 {strides = array<i32>} : memref<8x8x128xf32, #tpu.memory_space<vmem>>, vector<1x8x128xf32>,
    %454 = arith.index_cast %386 : i32 to index
    %c0_111 = arith.constant 0 : index
    %c0_112 = arith.constant 0 : index
    %455 = vector.load %arg9[%454, %c0_111, %c0_112] : memref<8x8x128xf32, #tpu.memory_space<vmem>>, vector<1x8x128xf32>
    %456 = vector.shape_cast %455 : vector<1x8x128xf32> to vector<8x128xf32>
    %457 = vector.shape_cast %449 : vector<8x128xf32> to vector<1x8x128xf32>
    tpu.vector_store %arg9[%454, %c0_111, %c0_112], %457 {strides = array<i32>} : memref<8x8x128xf32, #tpu.memory_space<vmem>>, vector<1x8x128xf32>,
    %458 = tpu.concatenate %421, %449 in 1 : vector<8x128xf32>, vector<8x128xf32> -> vector<8x256xf32>
    %c6_i32 = arith.constant 6 : i32
    %c7_i32_113 = arith.constant 7 : i32
    %459 = arith.subi %c7_i32_113, %c6_i32 : i32
    %cst_114 = arith.constant dense<0.000000e+00> : vector<8x768xf32>
    %460 = tpu.matmul %458, %15, %cst_114 {dimension_numbers = #tpu.dot_dimension_numbers<[1], [0], [0], [1], [0, 0, 1, 1], [], []>} : vector<8x256xf32>, vector<256x768xf32>, vector<8x768xf32> -> vector<8x768xf32>
    %461 = arith.index_cast %c6_i32 : i32 to index
    %c0_115 = arith.constant 0 : index
    %c0_116 = arith.constant 0 : index
    %462 = vector.load %arg8[%461, %c0_115, %c0_116] : memref<8x8x768xf32, #tpu.memory_space<vmem>>, vector<1x8x384xf32>
    %463 = vector.shape_cast %462 : vector<1x8x384xf32> to vector<8x384xf32>
    %464 = arith.index_cast %459 : i32 to index
    %c0_117 = arith.constant 0 : index
    %c384_118 = arith.constant 384 : index
    %465 = vector.load %arg8[%464, %c0_117, %c384_118] : memref<8x8x768xf32, #tpu.memory_space<vmem>>, vector<1x8x384xf32>
    %466 = vector.shape_cast %465 : vector<1x8x384xf32> to vector<8x384xf32>
    %467 = vector.extract_strided_slice %463 {offsets = [0, 0], sizes = [8, 128], strides = [1, 1]} : vector<8x384xf32> to vector<8x128xf32>
    %468 = vector.extract_strided_slice %460 {offsets = [0, 0], sizes = [8, 128], strides = [1, 1]} : vector<8x768xf32> to vector<8x128xf32>
    %469 = arith.addf %467, %468 : vector<8x128xf32>
    %470 = arith.negf %469 : vector<8x128xf32>
    %471 = math.exp %470 : vector<8x128xf32>
    %cst_119 = arith.constant 1.000000e+00 : f32
    %472 = vector.broadcast %cst_119 : f32 to vector<8x128xf32>
    %473 = arith.addf %472, %471 : vector<8x128xf32>
    %474 = arith.divf %472, %473 : vector<8x128xf32>
    %475 = vector.extract_strided_slice %463 {offsets = [0, 128], sizes = [8, 128], strides = [1, 1]} : vector<8x384xf32> to vector<8x128xf32>
    %476 = vector.extract_strided_slice %460 {offsets = [0, 128], sizes = [8, 128], strides = [1, 1]} : vector<8x768xf32> to vector<8x128xf32>
    %477 = arith.addf %475, %476 : vector<8x128xf32>
    %478 = arith.negf %477 : vector<8x128xf32>
    %479 = math.exp %478 : vector<8x128xf32>
    %cst_120 = arith.constant 1.000000e+00 : f32
    %480 = vector.broadcast %cst_120 : f32 to vector<8x128xf32>
    %481 = arith.addf %480, %479 : vector<8x128xf32>
    %482 = arith.divf %480, %481 : vector<8x128xf32>
    %483 = vector.extract_strided_slice %463 {offsets = [0, 256], sizes = [8, 128], strides = [1, 1]} : vector<8x384xf32> to vector<8x128xf32>
    %484 = vector.extract_strided_slice %460 {offsets = [0, 256], sizes = [8, 128], strides = [1, 1]} : vector<8x768xf32> to vector<8x128xf32>
    %485 = arith.addf %484, %11 : vector<8x128xf32>
    %486 = arith.mulf %474, %485 : vector<8x128xf32>
    %487 = arith.addf %483, %486 : vector<8x128xf32>
    %488 = math.tanh %487 : vector<8x128xf32>
    %cst_121 = arith.constant 1.000000e+00 : f32
    %489 = vector.broadcast %cst_121 : f32 to vector<8x128xf32>
    %490 = arith.subf %489, %482 : vector<8x128xf32>
    %491 = arith.mulf %490, %488 : vector<8x128xf32>
    %492 = vector.extract_strided_slice %458 {offsets = [0, 0], sizes = [8, 128], strides = [1, 1]} : vector<8x256xf32> to vector<8x128xf32>
    %493 = arith.mulf %482, %492 : vector<8x128xf32>
    %494 = arith.addf %491, %493 : vector<8x128xf32>
    %495 = vector.extract_strided_slice %466 {offsets = [0, 0], sizes = [8, 128], strides = [1, 1]} : vector<8x384xf32> to vector<8x128xf32>
    %496 = vector.extract_strided_slice %460 {offsets = [0, 384], sizes = [8, 128], strides = [1, 1]} : vector<8x768xf32> to vector<8x128xf32>
    %497 = arith.addf %495, %496 : vector<8x128xf32>
    %498 = arith.negf %497 : vector<8x128xf32>
    %499 = math.exp %498 : vector<8x128xf32>
    %cst_122 = arith.constant 1.000000e+00 : f32
    %500 = vector.broadcast %cst_122 : f32 to vector<8x128xf32>
    %501 = arith.addf %500, %499 : vector<8x128xf32>
    %502 = arith.divf %500, %501 : vector<8x128xf32>
    %503 = vector.extract_strided_slice %466 {offsets = [0, 128], sizes = [8, 128], strides = [1, 1]} : vector<8x384xf32> to vector<8x128xf32>
    %504 = vector.extract_strided_slice %460 {offsets = [0, 512], sizes = [8, 128], strides = [1, 1]} : vector<8x768xf32> to vector<8x128xf32>
    %505 = arith.addf %503, %504 : vector<8x128xf32>
    %506 = arith.negf %505 : vector<8x128xf32>
    %507 = math.exp %506 : vector<8x128xf32>
    %cst_123 = arith.constant 1.000000e+00 : f32
    %508 = vector.broadcast %cst_123 : f32 to vector<8x128xf32>
    %509 = arith.addf %508, %507 : vector<8x128xf32>
    %510 = arith.divf %508, %509 : vector<8x128xf32>
    %511 = vector.extract_strided_slice %466 {offsets = [0, 256], sizes = [8, 128], strides = [1, 1]} : vector<8x384xf32> to vector<8x128xf32>
    %512 = vector.extract_strided_slice %460 {offsets = [0, 640], sizes = [8, 128], strides = [1, 1]} : vector<8x768xf32> to vector<8x128xf32>
    %513 = arith.addf %512, %14 : vector<8x128xf32>
    %514 = arith.mulf %502, %513 : vector<8x128xf32>
    %515 = arith.addf %511, %514 : vector<8x128xf32>
    %516 = math.tanh %515 : vector<8x128xf32>
    %cst_124 = arith.constant 1.000000e+00 : f32
    %517 = vector.broadcast %cst_124 : f32 to vector<8x128xf32>
    %518 = arith.subf %517, %510 : vector<8x128xf32>
    %519 = arith.mulf %518, %516 : vector<8x128xf32>
    %520 = vector.extract_strided_slice %458 {offsets = [0, 128], sizes = [8, 128], strides = [1, 1]} : vector<8x256xf32> to vector<8x128xf32>
    %521 = arith.mulf %510, %520 : vector<8x128xf32>
    %522 = arith.addf %519, %521 : vector<8x128xf32>
    %523 = arith.index_cast %c6_i32 : i32 to index
    %c0_125 = arith.constant 0 : index
    %c0_126 = arith.constant 0 : index
    %524 = vector.load %arg6[%523, %c0_125, %c0_126] : memref<8x8x128xf32, #tpu.memory_space<vmem>>, vector<1x8x128xf32>
    %525 = vector.shape_cast %524 : vector<1x8x128xf32> to vector<8x128xf32>
    %526 = vector.shape_cast %494 : vector<8x128xf32> to vector<1x8x128xf32>
    tpu.vector_store %arg6[%523, %c0_125, %c0_126], %526 {strides = array<i32>} : memref<8x8x128xf32, #tpu.memory_space<vmem>>, vector<1x8x128xf32>,
    %527 = arith.index_cast %459 : i32 to index
    %c0_127 = arith.constant 0 : index
    %c0_128 = arith.constant 0 : index
    %528 = vector.load %arg9[%527, %c0_127, %c0_128] : memref<8x8x128xf32, #tpu.memory_space<vmem>>, vector<1x8x128xf32>
    %529 = vector.shape_cast %528 : vector<1x8x128xf32> to vector<8x128xf32>
    %530 = vector.shape_cast %522 : vector<8x128xf32> to vector<1x8x128xf32>
    tpu.vector_store %arg9[%527, %c0_127, %c0_128], %530 {strides = array<i32>} : memref<8x8x128xf32, #tpu.memory_space<vmem>>, vector<1x8x128xf32>,
    %531 = tpu.concatenate %494, %522 in 1 : vector<8x128xf32>, vector<8x128xf32> -> vector<8x256xf32>
    %c7_i32_129 = arith.constant 7 : i32
    %c7_i32_130 = arith.constant 7 : i32
    %532 = arith.subi %c7_i32_130, %c7_i32_129 : i32
    %cst_131 = arith.constant dense<0.000000e+00> : vector<8x768xf32>
    %533 = tpu.matmul %531, %15, %cst_131 {dimension_numbers = #tpu.dot_dimension_numbers<[1], [0], [0], [1], [0, 0, 1, 1], [], []>} : vector<8x256xf32>, vector<256x768xf32>, vector<8x768xf32> -> vector<8x768xf32>
    %534 = arith.index_cast %c7_i32_129 : i32 to index
    %c0_132 = arith.constant 0 : index
    %c0_133 = arith.constant 0 : index
    %535 = vector.load %arg8[%534, %c0_132, %c0_133] : memref<8x8x768xf32, #tpu.memory_space<vmem>>, vector<1x8x384xf32>
    %536 = vector.shape_cast %535 : vector<1x8x384xf32> to vector<8x384xf32>
    %537 = arith.index_cast %532 : i32 to index
    %c0_134 = arith.constant 0 : index
    %c384_135 = arith.constant 384 : index
    %538 = vector.load %arg8[%537, %c0_134, %c384_135] : memref<8x8x768xf32, #tpu.memory_space<vmem>>, vector<1x8x384xf32>
    %539 = vector.shape_cast %538 : vector<1x8x384xf32> to vector<8x384xf32>
    %540 = vector.extract_strided_slice %536 {offsets = [0, 0], sizes = [8, 128], strides = [1, 1]} : vector<8x384xf32> to vector<8x128xf32>
    %541 = vector.extract_strided_slice %533 {offsets = [0, 0], sizes = [8, 128], strides = [1, 1]} : vector<8x768xf32> to vector<8x128xf32>
    %542 = arith.addf %540, %541 : vector<8x128xf32>
    %543 = arith.negf %542 : vector<8x128xf32>
    %544 = math.exp %543 : vector<8x128xf32>
    %cst_136 = arith.constant 1.000000e+00 : f32
    %545 = vector.broadcast %cst_136 : f32 to vector<8x128xf32>
    %546 = arith.addf %545, %544 : vector<8x128xf32>
    %547 = arith.divf %545, %546 : vector<8x128xf32>
    %548 = vector.extract_strided_slice %536 {offsets = [0, 128], sizes = [8, 128], strides = [1, 1]} : vector<8x384xf32> to vector<8x128xf32>
    %549 = vector.extract_strided_slice %533 {offsets = [0, 128], sizes = [8, 128], strides = [1, 1]} : vector<8x768xf32> to vector<8x128xf32>
    %550 = arith.addf %548, %549 : vector<8x128xf32>
    %551 = arith.negf %550 : vector<8x128xf32>
    %552 = math.exp %551 : vector<8x128xf32>
    %cst_137 = arith.constant 1.000000e+00 : f32
    %553 = vector.broadcast %cst_137 : f32 to vector<8x128xf32>
    %554 = arith.addf %553, %552 : vector<8x128xf32>
    %555 = arith.divf %553, %554 : vector<8x128xf32>
    %556 = vector.extract_strided_slice %536 {offsets = [0, 256], sizes = [8, 128], strides = [1, 1]} : vector<8x384xf32> to vector<8x128xf32>
    %557 = vector.extract_strided_slice %533 {offsets = [0, 256], sizes = [8, 128], strides = [1, 1]} : vector<8x768xf32> to vector<8x128xf32>
    %558 = arith.addf %557, %11 : vector<8x128xf32>
    %559 = arith.mulf %547, %558 : vector<8x128xf32>
    %560 = arith.addf %556, %559 : vector<8x128xf32>
    %561 = math.tanh %560 : vector<8x128xf32>
    %cst_138 = arith.constant 1.000000e+00 : f32
    %562 = vector.broadcast %cst_138 : f32 to vector<8x128xf32>
    %563 = arith.subf %562, %555 : vector<8x128xf32>
    %564 = arith.mulf %563, %561 : vector<8x128xf32>
    %565 = vector.extract_strided_slice %531 {offsets = [0, 0], sizes = [8, 128], strides = [1, 1]} : vector<8x256xf32> to vector<8x128xf32>
    %566 = arith.mulf %555, %565 : vector<8x128xf32>
    %567 = arith.addf %564, %566 : vector<8x128xf32>
    %568 = vector.extract_strided_slice %539 {offsets = [0, 0], sizes = [8, 128], strides = [1, 1]} : vector<8x384xf32> to vector<8x128xf32>
    %569 = vector.extract_strided_slice %533 {offsets = [0, 384], sizes = [8, 128], strides = [1, 1]} : vector<8x768xf32> to vector<8x128xf32>
    %570 = arith.addf %568, %569 : vector<8x128xf32>
    %571 = arith.negf %570 : vector<8x128xf32>
    %572 = math.exp %571 : vector<8x128xf32>
    %cst_139 = arith.constant 1.000000e+00 : f32
    %573 = vector.broadcast %cst_139 : f32 to vector<8x128xf32>
    %574 = arith.addf %573, %572 : vector<8x128xf32>
    %575 = arith.divf %573, %574 : vector<8x128xf32>
    %576 = vector.extract_strided_slice %539 {offsets = [0, 128], sizes = [8, 128], strides = [1, 1]} : vector<8x384xf32> to vector<8x128xf32>
    %577 = vector.extract_strided_slice %533 {offsets = [0, 512], sizes = [8, 128], strides = [1, 1]} : vector<8x768xf32> to vector<8x128xf32>
    %578 = arith.addf %576, %577 : vector<8x128xf32>
    %579 = arith.negf %578 : vector<8x128xf32>
    %580 = math.exp %579 : vector<8x128xf32>
    %cst_140 = arith.constant 1.000000e+00 : f32
    %581 = vector.broadcast %cst_140 : f32 to vector<8x128xf32>
    %582 = arith.addf %581, %580 : vector<8x128xf32>
    %583 = arith.divf %581, %582 : vector<8x128xf32>
    %584 = vector.extract_strided_slice %539 {offsets = [0, 256], sizes = [8, 128], strides = [1, 1]} : vector<8x384xf32> to vector<8x128xf32>
    %585 = vector.extract_strided_slice %533 {offsets = [0, 640], sizes = [8, 128], strides = [1, 1]} : vector<8x768xf32> to vector<8x128xf32>
    %586 = arith.addf %585, %14 : vector<8x128xf32>
    %587 = arith.mulf %575, %586 : vector<8x128xf32>
    %588 = arith.addf %584, %587 : vector<8x128xf32>
    %589 = math.tanh %588 : vector<8x128xf32>
    %cst_141 = arith.constant 1.000000e+00 : f32
    %590 = vector.broadcast %cst_141 : f32 to vector<8x128xf32>
    %591 = arith.subf %590, %583 : vector<8x128xf32>
    %592 = arith.mulf %591, %589 : vector<8x128xf32>
    %593 = vector.extract_strided_slice %531 {offsets = [0, 128], sizes = [8, 128], strides = [1, 1]} : vector<8x256xf32> to vector<8x128xf32>
    %594 = arith.mulf %583, %593 : vector<8x128xf32>
    %595 = arith.addf %592, %594 : vector<8x128xf32>
    %596 = arith.index_cast %c7_i32_129 : i32 to index
    %c0_142 = arith.constant 0 : index
    %c0_143 = arith.constant 0 : index
    %597 = vector.load %arg6[%596, %c0_142, %c0_143] : memref<8x8x128xf32, #tpu.memory_space<vmem>>, vector<1x8x128xf32>
    %598 = vector.shape_cast %597 : vector<1x8x128xf32> to vector<8x128xf32>
    %599 = vector.shape_cast %567 : vector<8x128xf32> to vector<1x8x128xf32>
    tpu.vector_store %arg6[%596, %c0_142, %c0_143], %599 {strides = array<i32>} : memref<8x8x128xf32, #tpu.memory_space<vmem>>, vector<1x8x128xf32>,
    %600 = arith.index_cast %532 : i32 to index
    %c0_144 = arith.constant 0 : index
    %c0_145 = arith.constant 0 : index
    %601 = vector.load %arg9[%600, %c0_144, %c0_145] : memref<8x8x128xf32, #tpu.memory_space<vmem>>, vector<1x8x128xf32>
    %602 = vector.shape_cast %601 : vector<1x8x128xf32> to vector<8x128xf32>
    %603 = vector.shape_cast %595 : vector<8x128xf32> to vector<1x8x128xf32>
    tpu.vector_store %arg9[%600, %c0_144, %c0_145], %603 {strides = array<i32>} : memref<8x8x128xf32, #tpu.memory_space<vmem>>, vector<1x8x128xf32>,
    %604 = tpu.concatenate %567, %595 in 1 : vector<8x128xf32>, vector<8x128xf32> -> vector<8x256xf32>
    %c8_i32 = arith.constant 8 : i32
    %c0_146 = arith.constant 0 : index
    %c0_147 = arith.constant 0 : index
    %c0_148 = arith.constant 0 : index
    %605 = vector.load %arg6[%c0_146, %c0_147, %c0_148] : memref<8x8x128xf32, #tpu.memory_space<vmem>>, vector<8x8x128xf32>
    %c0_149 = arith.constant 0 : index
    %c0_150 = arith.constant 0 : index
    %c0_151 = arith.constant 0 : index
    %606 = vector.load %arg9[%c0_149, %c0_150, %c0_151] : memref<8x8x128xf32, #tpu.memory_space<vmem>>, vector<8x8x128xf32>
    %607 = arith.addf %605, %606 : vector<8x8x128xf32>
    %c0_152 = arith.constant 0 : index
    %c0_153 = arith.constant 0 : index
    %c0_154 = arith.constant 0 : index
    %608 = vector.load %arg6[%c0_152, %c0_153, %c0_154] : memref<8x8x128xf32, #tpu.memory_space<vmem>>, vector<8x8x128xf32>
    tpu.vector_store %arg6[%c0_152, %c0_153, %c0_154], %607 {strides = array<i32>} : memref<8x8x128xf32, #tpu.memory_space<vmem>>, vector<8x8x128xf32>,
    %609 = vector.extract_strided_slice %604 {offsets = [0, 0], sizes = [8, 128], strides = [1, 1]} : vector<8x256xf32> to vector<8x128xf32>
    %c0_155 = arith.constant 0 : index
    %c0_156 = arith.constant 0 : index
    %c0_157 = arith.constant 0 : index
    %610 = vector.load %arg7[%c0_155, %c0_156, %c0_157] : memref<2x8x128xf32, #tpu.memory_space<vmem>>, vector<1x8x128xf32>
    %611 = vector.shape_cast %610 : vector<1x8x128xf32> to vector<8x128xf32>
    %612 = vector.shape_cast %609 : vector<8x128xf32> to vector<1x8x128xf32>
    tpu.vector_store %arg7[%c0_155, %c0_156, %c0_157], %612 {strides = array<i32>} : memref<2x8x128xf32, #tpu.memory_space<vmem>>, vector<1x8x128xf32>,
    %613 = vector.extract_strided_slice %604 {offsets = [0, 128], sizes = [8, 128], strides = [1, 1]} : vector<8x256xf32> to vector<8x128xf32>
    %c1_158 = arith.constant 1 : index
    %c0_159 = arith.constant 0 : index
    %c0_160 = arith.constant 0 : index
    %614 = vector.load %arg7[%c1_158, %c0_159, %c0_160] : memref<2x8x128xf32, #tpu.memory_space<vmem>>, vector<1x8x128xf32>
    %615 = vector.shape_cast %614 : vector<1x8x128xf32> to vector<8x128xf32>
    %616 = vector.shape_cast %613 : vector<8x128xf32> to vector<1x8x128xf32>
    tpu.vector_store %arg7[%c1_158, %c0_159, %c0_160], %616 {strides = array<i32>} : memref<2x8x128xf32, #tpu.memory_space<vmem>>, vector<1x8x128xf32>,
    return
  }
}

</mosaic_0001>

<bundles_post_ra>
// kernel: interactive_rnn_forward.1
= control target key start
LH: loop header
LB: loop body
LE: loop exit
PB: predicated region body
PF: predicated region fallthrough
CT: control target
= control target key end

     0   :  { %s10523_s2 = inlined_call_operand.vmem [shape: f32[128,768], index: 2, kind: input, shape index: {}]   ;;  %s10524_s0 = inlined_call_operand.vmem [shape: f32[8,8,128], index: 0, kind: input, shape index: {}]   ;;  %s10525_s3 = inlined_call_operand.vmem [shape: f32[256,768], index: 3, kind: input, shape index: {}]   ;;  %s10526_s1 = inlined_call_operand.vmem [shape: f32[2,8,128], index: 1, kind: input, shape index: {}]   ;;  %s10527_s5 = inlined_call_operand.vmem [shape: f32[1,256], index: 5, kind: input, shape index: {}]   ;;  %s10528_s4 = inlined_call_operand.vmem [shape: f32[1,768], index: 4, kind: input, shape index: {}]   ;;  %s10529_s6 = inlined_call_operand.vmem [shape: f32[8,8,128], index: 6, kind: output, shape index: {0}]   ;;  %s10530_s7 = inlined_call_operand.vmem [shape: f32[2,8,128], index: 7, kind: output, shape index: {1}]  }
   0x1   :  { %v123_v0 = vld [vmem:[%s10523_s2 + $0x2d0] sm:$0xff]  ;;  %v124_v1 = vld [vmem:[%s10523_s2 + $0x2d8] sm:$0xff]  ;;  %v125_v2 = vld [vmem:[%s10523_s2 + $0x2e0] sm:$0xff] }
   0x2   :  { %143 = vmatpush.msra.mxu0 %v123_v0  ;;  %184 = vmatpush.msra.mxu1 %v124_v1  ;;  %v126_v3 = vld [vmem:[%s10523_s2 + $0x2e8] sm:$0xff]  ;;  %v117_v4 = vld [vmem:[%s10523_s2 + $0x2a0] sm:$0xff]  ;;  %v119_v6 = vld [vmem:[%s10523_s2 + $0x2b0] sm:$0xff] }
   0x3   :  { %v118_v5 = vld [vmem:[%s10523_s2 + $0x2a8] sm:$0xff]  ;;  %225 = vmatpush.msra.mxu2 %v125_v2  ;;  %266 = vmatpush.msra.mxu3 %v126_v3  ;;  %v120_v7 = vld [vmem:[%s10523_s2 + $0x2b8] sm:$0xff]  ;;  %v111_v8 = vld [vmem:[%s10523_s2 + $0x270] sm:$0xff] }
   0x4   :  { %144 = vmatpush.msra.mxu0 %v117_v4  ;;  %185 = vmatpush.msra.mxu1 %v118_v5  ;;  %v112_v9 = vld [vmem:[%s10523_s2 + $0x278] sm:$0xff]  ;;  %v113_v10 = vld [vmem:[%s10523_s2 + $0x280] sm:$0xff]  ;;  %v114_v11 = vld [vmem:[%s10523_s2 + $0x288] sm:$0xff] }
   0x5   :  { %226 = vmatpush.msra.mxu2 %v119_v6  ;;  %267 = vmatpush.msra.mxu3 %v120_v7  ;;  %v105_v12 = vld [vmem:[%s10523_s2 + $0x240] sm:$0xff]  ;;  %v106_v13 = vld [vmem:[%s10523_s2 + $0x248] sm:$0xff]  ;;  %v107_v14 = vld [vmem:[%s10523_s2 + $0x250] sm:$0xff] }
   0x6   :  { %145 = vmatpush.msra.mxu0 %v111_v8  ;;  %186 = vmatpush.msra.mxu1 %v112_v9  ;;  %v108_v15 = vld [vmem:[%s10523_s2 + $0x258] sm:$0xff]  ;;  %v99_v16 = vld [vmem:[%s10523_s2 + $0x210] sm:$0xff]  ;;  %v101_v18 = vld [vmem:[%s10523_s2 + $0x220] sm:$0xff] }
   0x7   :  { %227 = vmatpush.msra.mxu2 %v113_v10  ;;  %268 = vmatpush.msra.mxu3 %v114_v11  ;;  %v100_v17 = vld [vmem:[%s10523_s2 + $0x218] sm:$0xff]  ;;  %v102_v19 = vld [vmem:[%s10523_s2 + $0x228] sm:$0xff]  ;;  %v93_v20 = vld [vmem:[%s10523_s2 + $0x1e0] sm:$0xff] }
   0x8   :  { %146 = vmatpush.msra.mxu0 %v105_v12  ;;  %187 = vmatpush.msra.mxu1 %v106_v13  ;;  %v94_v21 = vld [vmem:[%s10523_s2 + $0x1e8] sm:$0xff]  ;;  %v95_v22 = vld [vmem:[%s10523_s2 + $0x1f0] sm:$0xff]  ;;  %v96_v23 = vld [vmem:[%s10523_s2 + $0x1f8] sm:$0xff] }
   0x9   :  { %228 = vmatpush.msra.mxu2 %v107_v14  ;;  %269 = vmatpush.msra.mxu3 %v108_v15  ;;  %v87_v24 = vld [vmem:[%s10523_s2 + $0x1b0] sm:$0xff]  ;;  %v88_v25 = vld [vmem:[%s10523_s2 + $0x1b8] sm:$0xff]  ;;  %v89_v26 = vld [vmem:[%s10523_s2 + $0x1c0] sm:$0xff] }
   0xa   :  { %147 = vmatpush.msra.mxu0 %v99_v16  ;;  %188 = vmatpush.msra.mxu1 %v100_v17  ;;  %v90_v27 = vld [vmem:[%s10523_s2 + $0x1c8] sm:$0xff]  ;;  %v81_v28 = vld [vmem:[%s10523_s2 + $0x180] sm:$0xff]  ;;  %v83_v30 = vld [vmem:[%s10523_s2 + $0x190] sm:$0xff] }
   0xb   :  { %229 = vmatpush.msra.mxu2 %v101_v18  ;;  %270 = vmatpush.msra.mxu3 %v102_v19  ;;  %v82_v29 = vld [vmem:[%s10523_s2 + $0x188] sm:$0xff]  ;;  %v84_v31 = vld [vmem:[%s10523_s2 + $0x198] sm:$0xff]  ;;  %v75_v32 = vld [vmem:[%s10523_s2 + $0x150] sm:$0xff] }
   0xc   :  { %148 = vmatpush.msra.mxu0 %v93_v20  ;;  %189 = vmatpush.msra.mxu1 %v94_v21  ;;  %v76_v33 = vld [vmem:[%s10523_s2 + $0x158] sm:$0xff]  ;;  %v77_v34 = vld [vmem:[%s10523_s2 + $0x160] sm:$0xff]  ;;  %v78_v35 = vld [vmem:[%s10523_s2 + $0x168] sm:$0xff] }
   0xd   :  { %230 = vmatpush.msra.mxu2 %v95_v22  ;;  %271 = vmatpush.msra.mxu3 %v96_v23  ;;  %v69_v36 = vld [vmem:[%s10523_s2 + $0x120] sm:$0xff]  ;;  %v70_v37 = vld [vmem:[%s10523_s2 + $0x128] sm:$0xff]  ;;  %v71_v38 = vld [vmem:[%s10523_s2 + $0x130] sm:$0xff] }
   0xe   :  { %149 = vmatpush.msra.mxu0 %v87_v24  ;;  %190 = vmatpush.msra.mxu1 %v88_v25  ;;  %v72_v39 = vld [vmem:[%s10523_s2 + $0x138] sm:$0xff]  ;;  %v63_v40 = vld [vmem:[%s10523_s2 + $0xf0] sm:$0xff]  ;;  %v65_v42 = vld [vmem:[%s10523_s2 + $0x100] sm:$0xff] }
   0xf   :  { %231 = vmatpush.msra.mxu2 %v89_v26  ;;  %272 = vmatpush.msra.mxu3 %v90_v27  ;;  %v64_v41 = vld [vmem:[%s10523_s2 + $0xf8] sm:$0xff]  ;;  %v66_v43 = vld [vmem:[%s10523_s2 + $0x108] sm:$0xff]  ;;  %v57_v44 = vld [vmem:[%s10523_s2 + $0xc0] sm:$0xff] }
  0x10   :  { %150 = vmatpush.msra.mxu0 %v81_v28  ;;  %191 = vmatpush.msra.mxu1 %v82_v29  ;;  %v58_v45 = vld [vmem:[%s10523_s2 + $0xc8] sm:$0xff]  ;;  %v59_v46 = vld [vmem:[%s10523_s2 + $0xd0] sm:$0xff]  ;;  %v60_v47 = vld [vmem:[%s10523_s2 + $0xd8] sm:$0xff] }
  0x11   :  { %232 = vmatpush.msra.mxu2 %v83_v30  ;;  %273 = vmatpush.msra.mxu3 %v84_v31  ;;  %v51_v48 = vld [vmem:[%s10523_s2 + $0x90] sm:$0xff]  ;;  %v52_v49 = vld [vmem:[%s10523_s2 + $0x98] sm:$0xff]  ;;  %v53_v50 = vld [vmem:[%s10523_s2 + $0xa0] sm:$0xff] }
  0x12   :  { %151 = vmatpush.msra.mxu0 %v75_v32  ;;  %192 = vmatpush.msra.mxu1 %v76_v33  ;;  %v54_v51 = vld [vmem:[%s10523_s2 + $0xa8] sm:$0xff]  ;;  %v45_v52 = vld [vmem:[%s10523_s2 + $0x60] sm:$0xff]  ;;  %v47_v54 = vld [vmem:[%s10523_s2 + $0x70] sm:$0xff] }
  0x13   :  { %233 = vmatpush.msra.mxu2 %v77_v34  ;;  %274 = vmatpush.msra.mxu3 %v78_v35  ;;  %v46_v53 = vld [vmem:[%s10523_s2 + $0x68] sm:$0xff]  ;;  %v48_v55 = vld [vmem:[%s10523_s2 + $0x78] sm:$0xff]  ;;  %v39_v56 = vld [vmem:[%s10523_s2 + $0x30] sm:$0xff] }
  0x14   :  { %152 = vmatpush.msra.mxu0 %v69_v36  ;;  %193 = vmatpush.msra.mxu1 %v70_v37  ;;  %v40_v57 = vld [vmem:[%s10523_s2 + $0x38] sm:$0xff]  ;;  %v41_v58 = vld [vmem:[%s10523_s2 + $0x40] sm:$0xff]  ;;  %v42_v59 = vld [vmem:[%s10523_s2 + $0x48] sm:$0xff] }
  0x15   :  { %234 = vmatpush.msra.mxu2 %v71_v38  ;;  %275 = vmatpush.msra.mxu3 %v72_v39  ;;  %v33_v60 = vld [vmem:[%s10523_s2] sm:$0xff]  ;;  %v34_v61 = vld [vmem:[%s10523_s2 + $0x8] sm:$0xff]  ;;  %v35_v62 = vld [vmem:[%s10523_s2 + $0x10] sm:$0xff] }
  0x16   :  { %153 = vmatpush.msra.mxu0 %v63_v40  ;;  %194 = vmatpush.msra.mxu1 %v64_v41  ;;  %v36_v63 = vld [vmem:[%s10523_s2 + $0x18] sm:$0xff]  ;;  %v4493_v0 = vld [vmem:[%s10524_s0] sm:$0xff]  ;;  %v127_v1 = vld [vmem:[%s10523_s2 + $0x2f0] sm:$0xff] }
  0x17   :  { %235 = vmatpush.msra.mxu2 %v65_v42  ;;  %276 = vmatpush.msra.mxu3 %v66_v43  ;;  %v128_v2 = vld [vmem:[%s10523_s2 + $0x2f8] sm:$0xff]  ;;  %v535_v3 = vld [vmem:[%s10525_s3 + $0x2d0] sm:$0xff]  ;;  %v121_v5 = vld [vmem:[%s10523_s2 + $0x2c0] sm:$0xff] }
  0x18   :  { %154 = vmatpush.msra.mxu0 %v57_v44  ;;  %195 = vmatpush.msra.mxu1 %v58_v45  ;;  %v631_v4 = vld [vmem:[%s10525_s3 + $0x5d0] sm:$0xff]  ;;  %v122_v6 = vld [vmem:[%s10523_s2 + $0x2c8] sm:$0xff]  ;;  %v529_v7 = vld [vmem:[%s10525_s3 + $0x2a0] sm:$0xff] }
  0x19   :  { %236 = vmatpush.msra.mxu2 %v59_v46  ;;  %277 = vmatpush.msra.mxu3 %v60_v47  ;;  %v625_v8 = vld [vmem:[%s10525_s3 + $0x5a0] sm:$0xff]  ;;  %v115_v9 = vld [vmem:[%s10523_s2 + $0x290] sm:$0xff]  ;;  %v116_v10 = vld [vmem:[%s10523_s2 + $0x298] sm:$0xff] }
  0x1a   :  { %155 = vmatpush.msra.mxu0 %v51_v48  ;;  %196 = vmatpush.msra.mxu1 %v52_v49  ;;  %v523_v11 = vld [vmem:[%s10525_s3 + $0x270] sm:$0xff]  ;;  %v4538_v13 = vld [vmem:[%s10524_s0 + $0x8] sm:$0xff]  ;;  %v517_v14 = vld [vmem:[%s10525_s3 + $0x240] sm:$0xff] }
  0x1b   :  { %237 = vmatpush.msra.mxu2 %v53_v50  ;;  %278 = vmatpush.msra.mxu3 %v54_v51  ;;  %v619_v12 = vld [vmem:[%s10525_s3 + $0x570] sm:$0xff]  ;;  %v613_v15 = vld [vmem:[%s10525_s3 + $0x540] sm:$0xff]  ;;  %v110_v17 = vld [vmem:[%s10523_s2 + $0x268] sm:$0xff] }
  0x1c   :  { %156 = vmatpush.msra.mxu0 %v45_v52  ;;  %197 = vmatpush.msra.mxu1 %v46_v53  ;;  %v109_v16 = vld [vmem:[%s10523_s2 + $0x260] sm:$0xff]  ;;  %v511_v18 = vld [vmem:[%s10525_s3 + $0x210] sm:$0xff]  ;;  %v104_v21 = vld [vmem:[%s10523_s2 + $0x238] sm:$0xff] }
  0x1d   :  { %238 = vmatpush.msra.mxu2 %v47_v54  ;;  %279 = vmatpush.msra.mxu3 %v48_v55  ;;  %v607_v19 = vld [vmem:[%s10525_s3 + $0x510] sm:$0xff]  ;;  %v505_v22 = vld [vmem:[%s10525_s3 + $0x1e0] sm:$0xff]  ;;  %v98_v25 = vld [vmem:[%s10523_s2 + $0x208] sm:$0xff] }
  0x1e   :  { %157 = vmatpush.msra.mxu0 %v39_v56  ;;  %198 = vmatpush.msra.mxu1 %v40_v57  ;;  %v103_v20 = vld [vmem:[%s10523_s2 + $0x230] sm:$0xff]  ;;  %v601_v23 = vld [vmem:[%s10525_s3 + $0x4e0] sm:$0xff]  ;;  %v92_v32 = vld [vmem:[%s10523_s2 + $0x1d8] sm:$0xff] }
  0x1f   :  { %239 = vmatpush.msra.mxu2 %v41_v58  ;;  %280 = vmatpush.msra.mxu3 %v42_v59  ;;  %v97_v24 = vld [vmem:[%s10523_s2 + $0x200] sm:$0xff]  ;;  %v499_v26 = vld [vmem:[%s10525_s3 + $0x1b0] sm:$0xff]  ;;  %v86_v36 = vld [vmem:[%s10523_s2 + $0x1a8] sm:$0xff] }
  0x20   :  { %158 = vmatpush.msra.mxu0 %v33_v60  ;;  %199 = vmatpush.msra.mxu1 %v34_v61  ;;  %v595_v27 = vld [vmem:[%s10525_s3 + $0x4b0] sm:$0xff]  ;;  %v4594_v29 = vld [vmem:[%s10525_s3 + $0x180] sm:$0xff]  ;;  %v80_v40 = vld [vmem:[%s10523_s2 + $0x178] sm:$0xff] }
  0x21   :  { %240 = vmatpush.msra.mxu2 %v35_v62  ;;  %281 = vmatpush.msra.mxu3 %v36_v63  ;;  %v4589_v28 = vld [vmem:[%s10524_s0 + $0x10] sm:$0xff]  ;;  %v589_v30 = vld [vmem:[%s10525_s3 + $0x480] sm:$0xff]  ;;  %v4659_v43 = vld [vmem:[%s10524_s0 + $0x18] sm:$0xff] }
  0x22   :  { %159 = vmatmul.f32.vlgmr.msra.gmra.mxu0 %v4493_v0  ;;  %200 = vmatmul.f32.vlgmr.msra.gmra.mxu1 %v4493_v0  ;;  %v91_v31 = vld [vmem:[%s10523_s2 + $0x1d0] sm:$0xff]  ;;  %v85_v35 = vld [vmem:[%s10523_s2 + $0x1a0] sm:$0xff]  ;;  %v74_v47 = vld [vmem:[%s10523_s2 + $0x148] sm:$0xff] }
  0x23   :  { %241 = vmatmul.f32.vlgmr.msra.gmra.mxu2 %v4493_v0  ;;  %282 = vmatmul.f32.vlgmr.msra.gmra.mxu3 %v4493_v0  ;;  %v4612_v33 = vld [vmem:[%s10525_s3 + $0x150] sm:$0xff]  ;;  %v4629_v37 = vld [vmem:[%s10525_s3 + $0x120] sm:$0xff]  ;;  %v68_v51 = vld [vmem:[%s10523_s2 + $0x118] sm:$0xff] }
  0x24   :  { %307 = vmatpush.msrb.mxu0 %v127_v1  ;;  %348 = vmatpush.msrb.mxu1 %v128_v2  ;;  %v4617_v34 = vld [vmem:[%s10525_s3 + $0x450] sm:$0xff]  ;;  %v4634_v38 = vld [vmem:[%s10525_s3 + $0x420] sm:$0xff]  ;;  %v62_v55 = vld [vmem:[%s10523_s2 + $0xe8] sm:$0xff] }
  0x25   :  { %640 = vmatpush.msrb.mxu2 %v535_v3  ;;  %660 = vmatpush.msrb.mxu3 %v631_v4  ;;  %v79_v39 = vld [vmem:[%s10523_s2 + $0x170] sm:$0xff]  ;;  %v4666_v44 = vld [vmem:[%s10525_s3 + $0xc0] sm:$0xff]  ;;  %v4753_v61 = vld [vmem:[%s10525_s3 + $0x2d8] sm:$0xff] }
  0x26   :  { %308 = vmatpush.msrb.mxu0 %v121_v5  ;;  %349 = vmatpush.msrb.mxu1 %v122_v6  ;;  %v4647_v41 = vld [vmem:[%s10525_s3 + $0xf0] sm:$0xff]  ;;  %v4671_v45 = vld [vmem:[%s10525_s3 + $0x3c0] sm:$0xff]  ;;  %v4758_v62 = vld [vmem:[%s10525_s3 + $0x5d8] sm:$0xff] }
  0x27   :  { %641 = vmatpush.msrb.mxu2 %v529_v7  ;;  %661 = vmatpush.msrb.mxu3 %v625_v8  ;;  %v4652_v42 = vld [vmem:[%s10525_s3 + $0x3f0] sm:$0xff]  ;;  %v73_v46 = vld [vmem:[%s10523_s2 + $0x140] sm:$0xff]  ;;  %v56_v1 = vld [vmem:[%s10523_s2 + $0xb8] sm:$0xff] }
  0x28   :  { %309 = vmatpush.msrb.mxu0 %v115_v9  ;;  %350 = vmatpush.msrb.mxu1 %v116_v10  ;;  %v4686_v48 = vld [vmem:[%s10525_s3 + $0x90] sm:$0xff]  ;;  %v4704_v52 = vld [vmem:[%s10525_s3 + $0x60] sm:$0xff]  ;;  %v4773_v2 = vld [vmem:[%s10525_s3 + $0x2a8] sm:$0xff] }
  0x29   :  { %642 = vmatpush.msrb.mxu2 %v523_v11  ;;  %662 = vmatpush.msrb.mxu3 %v619_v12  ;;  %v4691_v49 = vld [vmem:[%s10525_s3 + $0x390] sm:$0xff]  ;;  %v4709_v53 = vld [vmem:[%s10525_s3 + $0x360] sm:$0xff]  ;;  %v4778_v3 = vld [vmem:[%s10525_s3 + $0x5a8] sm:$0xff] }
  0x2a   :  { %162 = vmatmul.f32.gmra.mxu0 %v4538_v13  ;;  %203 = vmatmul.f32.gmra.mxu1 %v4538_v13  ;;  %v67_v50 = vld [vmem:[%s10523_s2 + $0x110] sm:$0xff]  ;;  %11026 = vst [vmem:[#allocation4_spill] sm:$0xff] %v4709_v53  ;;  %v61_v54 = vld [vmem:[%s10523_s2 + $0xe0] sm:$0xff]  ;;  %v50_v5 = vld [vmem:[%s10523_s2 + $0x88] sm:$0xff] }
  0x2b   :  { %244 = vmatmul.f32.gmra.mxu2 %v4538_v13  ;;  %285 = vmatmul.f32.gmra.mxu3 %v4538_v13  ;;  %v4722_v56 = vld [vmem:[%s10525_s3 + $0x30] sm:$0xff]  ;;  %v4734_v58 = vld [vmem:[%s10524_s0 + $0x20] sm:$0xff]  ;;  %v4791_v6 = vld [vmem:[%s10525_s3 + $0x278] sm:$0xff] }
  0x2c   :  { %643 = vmatpush.msrb.mxu2 %v517_v14  ;;  %663 = vmatpush.msrb.mxu3 %v613_v15  ;;  %11027 = vst [vmem:[#allocation5_spill] sm:$0xff] %v4722_v56  ;;  %v4727_v57 = vld [vmem:[%s10525_s3 + $0x330] sm:$0xff]  ;;  %v4741_v59 = vld [vmem:[%s10525_s3] sm:$0xff]  ;;  %v4796_v7 = vld [vmem:[%s10525_s3 + $0x578] sm:$0xff] }
  0x2d   :  { %310 = vmatpush.msrb.mxu0 %v109_v16  ;;  %351 = vmatpush.msrb.mxu1 %v110_v17  ;;  %11028 = vst [vmem:[#allocation6_spill] sm:$0xff] %v4727_v57  ;;  %v4746_v60 = vld [vmem:[%s10525_s3 + $0x300] sm:$0xff]  ;;  %v55_v63 = vld [vmem:[%s10523_s2 + $0xb0] sm:$0xff]  ;;  %v4803_v8 = vld [vmem:[%s10524_s0 + $0x28] sm:$0xff] }
  0x2e   :  { %644 = vmatpush.msrb.mxu2 %v511_v18  ;;  %664 = vmatpush.msrb.mxu3 %v607_v19  ;;  %11029 = vst [vmem:[#allocation7_spill] sm:$0xff] %v4741_v59  ;;  %v49_v4 = vld [vmem:[%s10523_s2 + $0x80] sm:$0xff]  ;;  %v4808_v9 = vld [vmem:[%s10525_s3 + $0x248] sm:$0xff]  ;;  %v4822_v11 = vld [vmem:[%s10525_s3 + $0x218] sm:$0xff] }
  0x2f   :  { %311 = vmatpush.msrb.mxu0 %v103_v20  ;;  %352 = vmatpush.msrb.mxu1 %v104_v21  ;;  %11030 = vst [vmem:[#allocation8_spill] sm:$0xff] %v4746_v60  ;;  %v4813_v10 = vld [vmem:[%s10525_s3 + $0x548] sm:$0xff]  ;;  %v4827_v12 = vld [vmem:[%s10525_s3 + $0x518] sm:$0xff]  ;;  %v43_v14 = vld [vmem:[%s10523_s2 + $0x50] sm:$0xff] }
  0x30   :  { %645 = vmatpush.msrb.mxu2 %v505_v22  ;;  %665 = vmatpush.msrb.mxu3 %v601_v23  ;;  %v44_v15 = vld [vmem:[%s10523_s2 + $0x58] sm:$0xff]  ;;  %v4842_v16 = vld [vmem:[%s10525_s3 + $0x1e8] sm:$0xff]  ;;  %v37_v18 = vld [vmem:[%s10523_s2 + $0x20] sm:$0xff] }
  0x31   :  { %312 = vmatpush.msrb.mxu0 %v97_v24  ;;  %353 = vmatpush.msrb.mxu1 %v98_v25  ;;  %v4847_v17 = vld [vmem:[%s10525_s3 + $0x4e8] sm:$0xff]  ;;  %v4860_v20 = vld [vmem:[%s10525_s3 + $0x1b8] sm:$0xff]  ;;  %v4872_v22 = vld [vmem:[%s10524_s0 + $0x30] sm:$0xff] }
  0x32   :  { %646 = vmatpush.msrb.mxu2 %v499_v26  ;;  %666 = vmatpush.msrb.mxu3 %v595_v27  ;;  %v38_v19 = vld [vmem:[%s10523_s2 + $0x28] sm:$0xff]  ;;  %v4865_v21 = vld [vmem:[%s10525_s3 + $0x4b8] sm:$0xff]  ;;  %v4903_v27 = vld [vmem:[%s10525_s3 + $0x2e0] sm:$0xff] }
  0x33   :  { %165 = vmatmul.f32.gmra.mxu0 %v4589_v28  ;;  %206 = vmatmul.f32.gmra.mxu1 %v4589_v28  ;;  %v4877_v23 = vld [vmem:[%s10525_s3 + $0x188] sm:$0xff]  ;;  %v4891_v25 = vld [vmem:[%s10525_s3 + $0x158] sm:$0xff]  ;;  %11031 = vst [vmem:[#allocation9_spill] sm:$0xff] %v4903_v27 }
  0x34   :  { %247 = vmatmul.f32.gmra.mxu2 %v4589_v28  ;;  %288 = vmatmul.f32.gmra.mxu3 %v4589_v28  ;;  %v4882_v24 = vld [vmem:[%s10525_s3 + $0x488] sm:$0xff]  ;;  %v4896_v26 = vld [vmem:[%s10525_s3 + $0x458] sm:$0xff] }
  0x35   :  { %647 = vmatpush.msrb.mxu2 %v4594_v29  ;;  %667 = vmatpush.msrb.mxu3 %v589_v30  ;;  %v4908_v30 = vld [vmem:[%s10525_s3 + $0x5e0] sm:$0xff] }
  0x36   :  { %313 = vmatpush.msrb.mxu0 %v91_v31  ;;  %354 = vmatpush.msrb.mxu1 %v92_v32  ;;  %11032 = vst [vmem:[#allocation10_spill] sm:$0xff] %v4908_v30  ;;  %v4915_v31 = vld [vmem:[%s10525_s3 + $0x128] sm:$0xff] }
  0x37   :  { %648 = vmatpush.msrb.mxu2 %v4612_v33  ;;  %668 = vmatpush.msrb.mxu3 %v4617_v34  ;;  %v4920_v32 = vld [vmem:[%s10525_s3 + $0x428] sm:$0xff] }
  0x38   :  { %314 = vmatpush.msrb.mxu0 %v85_v35  ;;  %355 = vmatpush.msrb.mxu1 %v86_v36  ;;  %v4927_v35 = vld [vmem:[%s10525_s3 + $0x2b0] sm:$0xff] }
  0x39   :  { %649 = vmatpush.msrb.mxu2 %v4629_v37  ;;  %669 = vmatpush.msrb.mxu3 %v4634_v38  ;;  %11033 = vst [vmem:[#allocation11_spill] sm:$0xff] %v4927_v35  ;;  %v4932_v36 = vld [vmem:[%s10525_s3 + $0x5b0] sm:$0xff] }
  0x3a   :  { %315 = vmatpush.msrb.mxu0 %v79_v39  ;;  %356 = vmatpush.msrb.mxu1 %v80_v40  ;;  %11034 = vst [vmem:[#allocation12_spill] sm:$0xff] %v4932_v36  ;;  %v4937_v39 = vld [vmem:[%s10525_s3 + $0xf8] sm:$0xff] }
  0x3b   :  { %650 = vmatpush.msrb.mxu2 %v4647_v41  ;;  %670 = vmatpush.msrb.mxu3 %v4652_v42  ;;  %v4942_v40 = vld [vmem:[%s10525_s3 + $0x3f8] sm:$0xff] }
  0x3c   :  { %168 = vmatmul.f32.gmra.mxu0 %v4659_v43  ;;  %209 = vmatmul.f32.gmra.mxu1 %v4659_v43 }
  0x3d   :  { %250 = vmatmul.f32.gmra.mxu2 %v4659_v43  ;;  %291 = vmatmul.f32.gmra.mxu3 %v4659_v43 }
  0x3e   :  { %651 = vmatpush.msrb.mxu2 %v4666_v44  ;;  %671 = vmatpush.msrb.mxu3 %v4671_v45 }
  0x3f   :  { %316 = vmatpush.msrb.mxu0 %v73_v46  ;;  %357 = vmatpush.msrb.mxu1 %v74_v47  ;;  %v4951_v46 = vld [vmem:[%s10524_s0 + $0x38] sm:$0xff]  ;;  %v4956_v47 = vld [vmem:[%s10525_s3 + $0xc8] sm:$0xff] }
  0x40   :  { %652 = vmatpush.msrb.mxu2 %v4686_v48  ;;  %672 = vmatpush.msrb.mxu3 %v4691_v49 }
  0x41   :  { %317 = vmatpush.msrb.mxu0 %v67_v50  ;;  %358 = vmatpush.msrb.mxu1 %v68_v51  ;;  %v4961_v50 = vld [vmem:[%s10525_s3 + $0x3c8] sm:$0xff]  ;;  %v4972_v51 = vld [vmem:[%s10525_s3 + $0x98] sm:$0xff] }
  0x42   :  { %653 = vmatpush.msrb.mxu2 %v4704_v52  ;;  %673 = vmatpush.msrb.mxu3 %v4709_v53  ;;  %v5123_v53 = vld [vmem:[%s10525_s3 + $0x558] sm:$0xff] }
  0x43   :  { %318 = vmatpush.msrb.mxu0 %v61_v54  ;;  %359 = vmatpush.msrb.mxu1 %v62_v55  ;;  %v4977_v54 = vld [vmem:[%s10525_s3 + $0x398] sm:$0xff]  ;;  %v4984_v55 = vld [vmem:[%s10525_s3 + $0x280] sm:$0xff]  ;;  %11048 = vst [vmem:[#allocation26_spill] sm:$0xff] %v5123_v53 }
  0x44   :  { %654 = vmatpush.msrb.mxu2 %v4722_v56  ;;  %674 = vmatpush.msrb.mxu3 %v4727_v57  ;;  %11035 = vst [vmem:[#allocation13_spill] sm:$0xff] %v4984_v55  ;;  %v5104_v57 = vld [vmem:[%s10525_s3 + $0x288] sm:$0xff] }
  0x45   :  { %171 = vmatmul.f32.gmra.mxu0 %v4734_v58  ;;  %212 = vmatmul.f32.gmra.mxu1 %v4734_v58  ;;  %11045 = vst [vmem:[#allocation23_spill] sm:$0xff] %v5104_v57  ;;  %v5109_v56 = vld [vmem:[%s10525_s3 + $0x588] sm:$0xff] }
  0x46   :  { %253 = vmatmul.f32.gmra.mxu2 %v4734_v58  ;;  %294 = vmatmul.f32.gmra.mxu3 %v4734_v58  ;;  %11046 = vst [vmem:[#allocation24_spill] sm:$0xff] %v5109_v56 }
  0x47   :  { %655 = vmatpush.msrb.mxu2 %v4741_v59  ;;  %675 = vmatpush.msrb.mxu3 %v4746_v60  ;;  %v5087_v60 = vld [vmem:[%s10525_s3 + $0x5b8] sm:$0xff]  ;;  %v5099_v59 = vld [vmem:[%s10525_s3 + $0x4f0] sm:$0xff] }
  0x48   :  { %319 = vmatpush.msrb.mxu0 %v55_v63  ;;  %360 = vmatpush.msrb.mxu1 %v56_v1  ;;  %v4989_v63 = vld [vmem:[%s10525_s3 + $0x580] sm:$0xff]  ;;  %v4996_v1 = vld [vmem:[%s10525_s3 + $0x68] sm:$0xff]  ;;  %11042 = vst [vmem:[#allocation20_spill] sm:$0xff] %v5087_v60 }
  0x49   :  { %680 = vmatpush.msra.mxu2 %v4753_v61  ;;  %700 = vmatpush.msra.mxu3 %v4758_v62  ;;  %11036 = vst [vmem:[#allocation14_spill] sm:$0xff] %v4989_v63 }
  0x4a   :  { %320 = vmatpush.msrb.mxu0 %v49_v4  ;;  %361 = vmatpush.msrb.mxu1 %v50_v5  ;;  %v5001_v4 = vld [vmem:[%s10525_s3 + $0x368] sm:$0xff]  ;;  %v5008_v5 = vld [vmem:[%s10525_s3 + $0x250] sm:$0xff]  ;;  %11044 = vst [vmem:[#allocation22_spill] sm:$0xff] %v5099_v59 }
  0x4b   :  { %681 = vmatpush.msra.mxu2 %v4773_v2  ;;  %701 = vmatpush.msra.mxu3 %v4778_v3  ;;  %11037 = vst [vmem:[#allocation15_spill] sm:$0xff] %v5008_v5 }
  0x4c   :  { %321 = vmatpush.msrb.mxu0 %v43_v14  ;;  %362 = vmatpush.msrb.mxu1 %v44_v15  ;;  %v5013_v14 = vld [vmem:[%s10525_s3 + $0x550] sm:$0xff]  ;;  %v5018_v15 = vld [vmem:[%s10525_s3 + $0x38] sm:$0xff] }
  0x4d   :  { %682 = vmatpush.msra.mxu2 %v4791_v6  ;;  %702 = vmatpush.msra.mxu3 %v4796_v7  ;;  %11038 = vst [vmem:[#allocation16_spill] sm:$0xff] %v5013_v14 }
  0x4e   :  { %174 = vmatmul.f32.gmra.mxu0 %v4803_v8  ;;  %215 = vmatmul.f32.gmra.mxu1 %v4803_v8 }
  0x4f   :  { %683 = vmatpush.msra.mxu2 %v4808_v9  ;;  %703 = vmatpush.msra.mxu3 %v4813_v10 }
  0x50   :  { %256 = vmatmul.f32.gmra.mxu2 %v4803_v8  ;;  %297 = vmatmul.f32.gmra.mxu3 %v4803_v8 }
  0x51   :  { %684 = vmatpush.msra.mxu2 %v4822_v11  ;;  %704 = vmatpush.msra.mxu3 %v4827_v12 }
  0x52   :  { %322 = vmatpush.msrb.mxu0 %v37_v18  ;;  %363 = vmatpush.msrb.mxu1 %v38_v19  ;;  %v5023_v18 = vld [vmem:[%s10525_s3 + $0x338] sm:$0xff]  ;;  %v5032_v19 = vld [vmem:[%s10525_s3 + $0x8] sm:$0xff] }
  0x53   :  { %685 = vmatpush.msra.mxu2 %v4842_v16  ;;  %705 = vmatpush.msra.mxu3 %v4847_v17 }
  0x54   :  { %720 = vmatpush.msra.mxu0 %v4903_v27  ;;  %740 = vmatpush.msra.mxu1 %v4908_v30  ;;  %v5070_v30 = vld [vmem:[%s10525_s3 + $0x220] sm:$0xff]  ;;  %v5094_v27 = vld [vmem:[%s10525_s3 + $0x1f0] sm:$0xff] }
  0x55   :  { %686 = vmatpush.msra.mxu2 %v4860_v20  ;;  %706 = vmatpush.msra.mxu3 %v4865_v21  ;;  %11040 = vst [vmem:[#allocation18_spill] sm:$0xff] %v5070_v30 }
  0x56   :  { %177 = vmatmul.f32.gmra.mxu0 %v4872_v22  ;;  %218 = vmatmul.f32.gmra.mxu1 %v4872_v22  ;;  %11043 = vst [vmem:[#allocation21_spill] sm:$0xff] %v5094_v27 }
  0x57   :  { %687 = vmatpush.msra.mxu2 %v4877_v23  ;;  %707 = vmatpush.msra.mxu3 %v4882_v24 }
  0x58   :  { %259 = vmatmul.f32.gmra.mxu2 %v4872_v22  ;;  %300 = vmatmul.f32.gmra.mxu3 %v4872_v22 }
  0x59   :  { %688 = vmatpush.msra.mxu2 %v4891_v25  ;;  %708 = vmatpush.msra.mxu3 %v4896_v26 }
  0x5a   :  { %721 = vmatpush.msra.mxu0 %v4927_v35  ;;  %741 = vmatpush.msra.mxu1 %v4932_v36  ;;  %v5037_v36 = vld [vmem:[%s10525_s3 + $0x308] sm:$0xff]  ;;  %v5082_v35 = vld [vmem:[%s10525_s3 + $0x2b8] sm:$0xff] }
  0x5b   :  { %689 = vmatpush.msra.mxu2 %v4915_v31  ;;  %709 = vmatpush.msra.mxu3 %v4920_v32 }
  0x5c   :  { %722 = vmatpush.msra.mxu0 %v4984_v55  ;;  %742 = vmatpush.msra.mxu1 %v4989_v63  ;;  %v5046_v63 = vld [vmem:[%s10526_s1] sm:$0xff]  ;;  %v5051_v55 = vld [vmem:[%s10526_s1 + $0x8] sm:$0xff] }
  0x5d   :  { %690 = vmatpush.msra.mxu2 %v4937_v39  ;;  %710 = vmatpush.msra.mxu3 %v4942_v40 }
  0x5e   :  { %180 = vmatmul.f32.gmra.mxu0 %v4951_v46  ;;  %221 = vmatmul.f32.gmra.mxu1 %v4951_v46 }
  0x5f   :  { %691 = vmatpush.msra.mxu2 %v4956_v47  ;;  %711 = vmatpush.msra.mxu3 %v4961_v50 }
  0x60   :  { %262 = vmatmul.f32.gmra.mxu2 %v4951_v46  ;;  %303 = vmatmul.f32.gmra.mxu3 %v4951_v46 }
  0x61   :  { %692 = vmatpush.msra.mxu2 %v4972_v51  ;;  %712 = vmatpush.msra.mxu3 %v4977_v54 }
  0x62   :  { %723 = vmatpush.msra.mxu0 %v5008_v5  ;;  %743 = vmatpush.msra.mxu1 %v5013_v14  ;;  %v5058_v14 = vld [vmem:[%s10525_s3 + $0x2e8] sm:$0xff] }
  0x63   :  { %693 = vmatpush.msra.mxu2 %v4996_v1  ;;  %713 = vmatpush.msra.mxu3 %v5001_v4  ;;  %v5063_v5 = vld [vmem:[%s10525_s3 + $0x5e8] sm:$0xff] }
  0x64   :  { %11039 = vst [vmem:[#allocation17_spill] sm:$0xff] %v5063_v5  ;;  %724 = vmatpush.msra.mxu0 %v5070_v30  ;;  %v5139_v30 = vld [vmem:[%s10525_s3 + $0x528] sm:$0xff] }
  0x65   :  { %694 = vmatpush.msra.mxu2 %v5018_v15  ;;  %714 = vmatpush.msra.mxu3 %v5023_v18  ;;  %11050 = vst [vmem:[#allocation28_spill] sm:$0xff] %v5139_v30 }
  0x66   :  { %323 = vmatmul.f32.vlgmr.msrb.gmra.mxu0 %v4493_v0  ;;  %364 = vmatmul.f32.vlgmr.msrb.gmra.mxu1 %v4493_v0  ;;  %v5075_v0 = vld [vmem:[%s10525_s3 + $0x520] sm:$0xff] }
  0x67   :  { %695 = vmatpush.msra.mxu2 %v5032_v19  ;;  %715 = vmatpush.msra.mxu3 %v5037_v36  ;;  %11041 = vst [vmem:[#allocation19_spill] sm:$0xff] %v5075_v0 }
  0x68   :  { %656 = vmatmul.f32.vlgmr.msrb.gmra.mxu2 %v5046_v63  ;;  %676 = vmatmul.f32.vlgmr.msrb.gmra.mxu3 %v5051_v55 }
  0x69   :  { %760 = vmatpush.msrb.mxu2 %v5058_v14  ;;  %780 = vmatpush.msrb.mxu3 %v5063_v5  ;;  %v5118_v5 = vld [vmem:[%s10525_s3 + $0x258] sm:$0xff] }
  0x6a   :  { %744 = vmatpush.msra.mxu1 %v5075_v0  ;;  %11047 = vst [vmem:[#allocation25_spill] sm:$0xff] %v5118_v5  ;;  %725 = vmatpush.msra.mxu0 %v5094_v27  ;;  %v5134_v0 = vld [vmem:[%s10525_s3 + $0x228] sm:$0xff]  ;;  %v5158_v27 = vld [vmem:[%s10525_s3 + $0x1f8] sm:$0xff] }
  0x6b   :  { %761 = vmatpush.msrb.mxu2 %v5082_v35  ;;  %781 = vmatpush.msrb.mxu3 %v5087_v60  ;;  %11049 = vst [vmem:[#allocation27_spill] sm:$0xff] %v5134_v0  ;;  %v5180_v60 = vld [vmem:[%s10525_s3 + $0x1c8] sm:$0xff] }
  0x6c   :  { %745 = vmatpush.msra.mxu1 %v5099_v59  ;;  %v5146_v59 = vld [vmem:[%s10525_s3 + $0x1c0] sm:$0xff]  ;;  %11056 = vst [vmem:[#allocation34_spill] sm:$0xff] %v5180_v60 }
  0x6d   :  { %762 = vmatpush.msrb.mxu2 %v5104_v57  ;;  %782 = vmatpush.msrb.mxu3 %v5109_v56  ;;  %11051 = vst [vmem:[#allocation29_spill] sm:$0xff] %v5146_v59  ;;  %v5170_v56 = vld [vmem:[%s10525_s3 + $0x190] sm:$0xff]  ;;  %v5199_v57 = vld [vmem:[%s10525_s3 + $0x498] sm:$0xff] }
  0x6e   :  { %326 = vmatmul.f32.gmra.mxu0 %v4538_v13  ;;  %367 = vmatmul.f32.gmra.mxu1 %v4538_v13  ;;  %v5151_v13 = vld [vmem:[%s10525_s3 + $0x4c0] sm:$0xff]  ;;  %11054 = vst [vmem:[#allocation32_spill] sm:$0xff] %v5170_v56 }
  0x6f   :  { %763 = vmatpush.msrb.mxu2 %v5118_v5  ;;  %783 = vmatpush.msrb.mxu3 %v5123_v53  ;;  %11052 = vst [vmem:[#allocation30_spill] sm:$0xff] %v5151_v13  ;;  %v5163_v53 = vld [vmem:[%s10525_s3 + $0x4f8] sm:$0xff]  ;;  %v5175_v5 = vld [vmem:[%s10525_s3 + $0x490] sm:$0xff] }
  0x70   :  { %696 = vmatmul.f32.vlgmr.msra.gmra.mxu2 %v5046_v63  ;;  %716 = vmatmul.f32.vlgmr.msra.gmra.mxu3 %v5051_v55  ;;  %11053 = vst [vmem:[#allocation31_spill] sm:$0xff] %v5163_v53 }
  0x71   :  { %764 = vmatpush.msrb.mxu2 %v5134_v0  ;;  %784 = vmatpush.msrb.mxu3 %v5139_v30  ;;  %11055 = vst [vmem:[#allocation33_spill] sm:$0xff] %v5175_v5  ;;  %v5185_v0 = vld [vmem:[%s10525_s3 + $0x4c8] sm:$0xff]  ;;  %v5194_v30 = vld [vmem:[%s10525_s3 + $0x198] sm:$0xff] }
  0x72   :  { %11057 = vst [vmem:[#allocation35_spill] sm:$0xff] %v5185_v0  ;;  %726 = vmatpush.msra.mxu0 %v5146_v59  ;;  %746 = vmatpush.msra.mxu1 %v5151_v13  ;;  %v5208_v13 = vld [vmem:[%s10525_s3 + $0x160] sm:$0xff] }
  0x73   :  { %765 = vmatpush.msrb.mxu2 %v5158_v27  ;;  %785 = vmatpush.msrb.mxu3 %v5163_v53  ;;  %11058 = vst [vmem:[#allocation36_spill] sm:$0xff] %v5194_v30  ;;  %v5213_v59 = vld [vmem:[%s10525_s3 + $0x460] sm:$0xff]  ;;  %v5242_v53 = vld [vmem:[%s10525_s3 + $0x138] sm:$0xff] }
  0x74   :  { %11059 = vst [vmem:[#allocation37_spill] sm:$0xff] %v5199_v57  ;;  %727 = vmatpush.msra.mxu0 %v5170_v56  ;;  %747 = vmatpush.msra.mxu1 %v5175_v5  ;;  %v5220_v5 = vld [vmem:[%s10525_s3 + $0x168] sm:$0xff] }
  0x75   :  { %766 = vmatpush.msrb.mxu2 %v5180_v60  ;;  %786 = vmatpush.msrb.mxu3 %v5185_v0  ;;  %11060 = vst [vmem:[#allocation38_spill] sm:$0xff] %v5208_v13  ;;  %v5225_v56 = vld [vmem:[%s10525_s3 + $0x468] sm:$0xff]  ;;  %v5232_v0 = vld [vmem:[%s10525_s3 + $0x130] sm:$0xff]  ;;  %v5261_v60 = vld [vmem:[%s10525_s3 + $0x400] sm:$0xff] }
  0x76   :  { %11061 = vst [vmem:[#allocation39_spill] sm:$0xff] %v5213_v59  ;;  %329 = vmatmul.f32.gmra.mxu0 %v4589_v28  ;;  %370 = vmatmul.f32.gmra.mxu1 %v4589_v28  ;;  %v5237_v28 = vld [vmem:[%s10525_s3 + $0x430] sm:$0xff] }
  0x77   :  { %11062 = vst [vmem:[#allocation40_spill] sm:$0xff] %v5220_v5  ;;  %767 = vmatpush.msrb.mxu2 %v5194_v30  ;;  %787 = vmatpush.msrb.mxu3 %v5199_v57  ;;  %v5247_v30 = vld [vmem:[%s10525_s3 + $0x438] sm:$0xff]  ;;  %v5256_v57 = vld [vmem:[%s10525_s3 + $0x100] sm:$0xff] }
  0x78   :  { %11063 = vst [vmem:[#allocation41_spill] sm:$0xff] %v5225_v56  ;;  %728 = vmatpush.msra.mxu0 %v5208_v13  ;;  %748 = vmatpush.msra.mxu1 %v5213_v59  ;;  %v5266_v13 = vld [vmem:[%s10525_s3 + $0x108] sm:$0xff] }
  0x79   :  { %11064 = vst [vmem:[#allocation42_spill] sm:$0xff] %v5232_v0  ;;  %768 = vmatpush.msrb.mxu2 %v5220_v5  ;;  %788 = vmatpush.msrb.mxu3 %v5225_v56  ;;  %v5271_v59 = vld [vmem:[%s10525_s3 + $0x408] sm:$0xff]  ;;  %v5280_v56 = vld [vmem:[%s10525_s3 + $0xd8] sm:$0xff] }
  0x7a   :  { %11065 = vst [vmem:[#allocation43_spill] sm:$0xff] %v5237_v28  ;;  %729 = vmatpush.msra.mxu0 %v5232_v0  ;;  %749 = vmatpush.msra.mxu1 %v5237_v28  ;;  %v5285_v5 = vld [vmem:[%s10525_s3 + $0x3d8] sm:$0xff]  ;;  %v5294_v28 = vld [vmem:[%s10525_s3 + $0xd0] sm:$0xff] }
  0x7b   :  { %11066 = vst [vmem:[#allocation44_spill] sm:$0xff] %v5247_v30  ;;  %769 = vmatpush.msrb.mxu2 %v5242_v53  ;;  %789 = vmatpush.msrb.mxu3 %v5247_v30  ;;  %v5299_v0 = vld [vmem:[%s10525_s3 + $0x3d0] sm:$0xff]  ;;  %v5328_v30 = vld [vmem:[%s10525_s3 + $0x78] sm:$0xff] }
  0x7c   :  { %11067 = vst [vmem:[#allocation45_spill] sm:$0xff] %v5256_v57  ;;  %730 = vmatpush.msra.mxu0 %v5256_v57  ;;  %750 = vmatpush.msra.mxu1 %v5261_v60  ;;  %v5311_v57 = vld [vmem:[%s10525_s3 + $0x3a8] sm:$0xff] }
  0x7d   :  { %11068 = vst [vmem:[#allocation46_spill] sm:$0xff] %v5261_v60  ;;  %770 = vmatpush.msrb.mxu2 %v5266_v13  ;;  %790 = vmatpush.msrb.mxu3 %v5271_v59  ;;  %v5306_v60 = vld [vmem:[%s10525_s3 + $0xa8] sm:$0xff] }
  0x7e   :  { %11069 = vst [vmem:[#allocation47_spill] sm:$0xff] %v5266_v13  ;;  %332 = vmatmul.f32.gmra.mxu0 %v4659_v43  ;;  %373 = vmatmul.f32.gmra.mxu1 %v4659_v43  ;;  %v5323_v43 = vld [vmem:[%s10525_s3 + $0x3a0] sm:$0xff]  ;;  %v5347_v13 = vld [vmem:[%s10525_s3 + $0x370] sm:$0xff] }
  0x7f   :  { %11070 = vst [vmem:[#allocation48_spill] sm:$0xff] %v5271_v59  ;;  %771 = vmatpush.msrb.mxu2 %v5280_v56  ;;  %791 = vmatpush.msrb.mxu3 %v5285_v5  ;;  %v5318_v59 = vld [vmem:[%s10525_s3 + $0xa0] sm:$0xff] }
  0x80   :  { %11071 = vst [vmem:[#allocation49_spill] sm:$0xff] %v5280_v56  ;;  %v5333_v56 = vld [vmem:[%s10525_s3 + $0x378] sm:$0xff]  ;;  %731 = vmatpush.msra.mxu0 %v5294_v28  ;;  %751 = vmatpush.msra.mxu1 %v5299_v0 }
  0x81   :  { %11072 = vst [vmem:[#allocation50_spill] sm:$0xff] %v5285_v5  ;;  %772 = vmatpush.msrb.mxu2 %v5306_v60  ;;  %792 = vmatpush.msrb.mxu3 %v5311_v57  ;;  %v5342_v5 = vld [vmem:[%s10525_s3 + $0x70] sm:$0xff] }
  0x82   :  { %11073 = vst [vmem:[#allocation51_spill] sm:$0xff] %v5294_v28  ;;  %v5352_v28 = vld [vmem:[%s10525_s3 + $0x48] sm:$0xff]  ;;  %732 = vmatpush.msra.mxu0 %v5318_v59  ;;  %752 = vmatpush.msra.mxu1 %v5323_v43 }
  0x83   :  { %11074 = vst [vmem:[#allocation52_spill] sm:$0xff] %v5299_v0  ;;  %v5357_v0 = vld [vmem:[%s10525_s3 + $0x348] sm:$0xff]  ;;  %773 = vmatpush.msrb.mxu2 %v5328_v30  ;;  %793 = vmatpush.msrb.mxu3 %v5333_v56 }
  0x84   :  { %11075 = vst [vmem:[#allocation53_spill] sm:$0xff] %v5306_v60  ;;  %v5371_v60 = vld [vmem:[%s10525_s3 + $0x318] sm:$0xff]  ;;  %733 = vmatpush.msra.mxu0 %v5342_v5  ;;  %753 = vmatpush.msra.mxu1 %v5347_v13 }
  0x85   :  { %11076 = vst [vmem:[#allocation54_spill] sm:$0xff] %v5311_v57  ;;  %v5366_v57 = vld [vmem:[%s10525_s3 + $0x18] sm:$0xff]  ;;  %774 = vmatpush.msrb.mxu2 %v5352_v28  ;;  %794 = vmatpush.msrb.mxu3 %v5357_v0 }
  0x86   :  { %11077 = vst [vmem:[#allocation55_spill] sm:$0xff] %v5318_v59  ;;  %v5385_v59 = vld [vmem:[%s10525_s3 + $0x5f8] sm:$0xff]  ;;  %335 = vmatmul.f32.gmra.mxu0 %v4734_v58  ;;  %376 = vmatmul.f32.gmra.mxu1 %v4734_v58  ;;  %v5406_v58 = vld [vmem:[%s10525_s3 + $0x2c8] sm:$0xff] }
  0x87   :  { %11078 = vst [vmem:[#allocation56_spill] sm:$0xff] %v5323_v43  ;;  %v5380_v43 = vld [vmem:[%s10525_s3 + $0x2f8] sm:$0xff]  ;;  %775 = vmatpush.msrb.mxu2 %v5366_v57  ;;  %795 = vmatpush.msrb.mxu3 %v5371_v60 }
  0x88   :  { %11079 = vst [vmem:[#allocation57_spill] sm:$0xff] %v5333_v56  ;;  %776 = vmatmul.f32.vlgmr.msrb.gmra.mxu2 %v5046_v63  ;;  %796 = vmatmul.f32.vlgmr.msrb.gmra.mxu3 %v5051_v55  ;;  %v5428_v56 = vld [vmem:[%s10525_s3 + $0x298] sm:$0xff] }
  0x89   :  { %11080 = vst [vmem:[#allocation58_spill] sm:$0xff] %v5342_v5  ;;  %v5399_v5 = vld [vmem:[%s10525_s3 + $0x340] sm:$0xff]  ;;  %840 = vmatpush.msra.mxu2 %v5380_v43  ;;  %860 = vmatpush.msra.mxu3 %v5385_v59 }
  0x8a   :  { %11081 = vst [vmem:[#allocation59_spill] sm:$0xff] %v5347_v13  ;;  %v5394_v13 = vld [vmem:[%s10525_s3 + $0x40] sm:$0xff]  ;;  %754 = vmatpush.msra.mxu1 %v5399_v5 }
  0x8b   :  { %11082 = vst [vmem:[#allocation60_spill] sm:$0xff] %v5352_v28  ;;  %734 = vmatpush.msra.mxu0 %v5394_v13  ;;  %841 = vmatpush.msra.mxu2 %v5406_v58  ;;  %v5447_v28 = vld [vmem:[%s10525_s3 + $0x568] sm:$0xff] }
  0x8c   :  { %11083 = vst [vmem:[#allocation61_spill] sm:$0xff] %v5357_v0  ;;  %v5418_v0 = vld [vmem:[%s10525_s3 + $0x10] sm:$0xff] }
  0x8d   :  { %11084 = vst [vmem:[#allocation62_spill] sm:$0xff] %v5366_v57  ;;  %v5423_v57 = vld [vmem:[%s10525_s3 + $0x310] sm:$0xff]  ;;  %735 = vmatpush.msra.mxu0 %v5418_v0  ;;  %842 = vmatpush.msra.mxu2 %v5428_v56 }
  0x8e   :  { %11085 = vst [vmem:[#allocation63_spill] sm:$0xff] %v5371_v60  ;;  %v5411_v60 = vld [vmem:[%s10525_s3 + $0x5c8] sm:$0xff]  ;;  %755 = vmatpush.msra.mxu1 %v5423_v57  ;;  %338 = vmatmul.f32.gmra.mxu0 %v4803_v8 }
  0x8f   :  { %11086 = vst [vmem:[#allocation64_spill] sm:$0xff] %v5380_v43  ;;  %v5433_v43 = vld [vmem:[%s10525_s3 + $0x598] sm:$0xff]  ;;  %861 = vmatpush.msra.mxu3 %v5411_v60  ;;  %379 = vmatmul.f32.gmra.mxu1 %v4803_v8  ;;  %v5492_v8 = vld [vmem:[%s10525_s3 + $0x208] sm:$0xff] }
  0x90   :  { %11087 = vst [vmem:[#allocation65_spill] sm:$0xff] %v5385_v59  ;;  %v5442_v59 = vld [vmem:[%s10525_s3 + $0x268] sm:$0xff] }
  0x91   :  { %11088 = vst [vmem:[#allocation66_spill] sm:$0xff] %v5399_v5  ;;  %862 = vmatpush.msra.mxu3 %v5433_v43  ;;  %v5466_v5 = vld [vmem:[%s10525_s3 + $0x238] sm:$0xff]  ;;  %843 = vmatpush.msra.mxu2 %v5442_v59 }
  0x92   :  { %11089 = vst [vmem:[#allocation67_spill] sm:$0xff] %v5406_v58  ;;  %v5461_v58 = vld [vmem:[%s10525_s3 + $0x5f0] sm:$0xff] }
  0x93   :  { %11090 = vst [vmem:[#allocation68_spill] sm:$0xff] %v5411_v60  ;;  %v5456_v60 = vld [vmem:[%s10525_s3 + $0x2f0] sm:$0xff]  ;;  %863 = vmatpush.msra.mxu3 %v5447_v28  ;;  %820 = vmatpush.msrb.mxu1 %v5461_v58 }
  0x94   :  { %11091 = vst [vmem:[#allocation69_spill] sm:$0xff] %v5423_v57  ;;  %v5485_v57 = vld [vmem:[%s10525_s3 + $0x5c0] sm:$0xff]  ;;  %800 = vmatpush.msrb.mxu0 %v5456_v60  ;;  %844 = vmatpush.msra.mxu2 %v5466_v5 }
  0x95   :  { %11092 = vst [vmem:[#allocation70_spill] sm:$0xff] %v5428_v56  ;;  %v5471_v56 = vld [vmem:[%s10525_s3 + $0x538] sm:$0xff]  ;;  %821 = vmatpush.msrb.mxu1 %v5485_v57 }
  0x96   :  { %11093 = vst [vmem:[#allocation71_spill] sm:$0xff] %v5433_v43  ;;  %v5480_v43 = vld [vmem:[%s10525_s3 + $0x2c0] sm:$0xff]  ;;  %864 = vmatpush.msra.mxu3 %v5471_v56  ;;  %845 = vmatpush.msra.mxu2 %v5492_v8 }
  0x97   :  { %11094 = vst [vmem:[#allocation72_spill] sm:$0xff] %v5442_v59  ;;  %v5504_v59 = vld [vmem:[%s10525_s3 + $0x290] sm:$0xff]  ;;  %801 = vmatpush.msrb.mxu0 %v5480_v43  ;;  %382 = vmatmul.f32.gmra.mxu1 %v4872_v22 }
  0x98   :  { %11095 = vst [vmem:[#allocation73_spill] sm:$0xff] %v5447_v28  ;;  %v5497_v28 = vld [vmem:[%s10525_s3 + $0x508] sm:$0xff]  ;;  %341 = vmatmul.f32.gmra.mxu0 %v4872_v22  ;;  %v5595_v22 = vld [vmem:[%s10525_s3 + $0x500] sm:$0xff] }
  0x99   :  { %11096 = vst [vmem:[#allocation74_spill] sm:$0xff] %v5456_v60  ;;  %865 = vmatpush.msra.mxu3 %v5497_v28  ;;  %802 = vmatpush.msrb.mxu0 %v5504_v59 }
  0x9a   :  { %11097 = vst [vmem:[#allocation75_spill] sm:$0xff] %v5461_v58  ;;  %v5509_v58 = vld [vmem:[%s10525_s3 + $0x590] sm:$0xff] }
  0x9b   :  { %11098 = vst [vmem:[#allocation76_spill] sm:$0xff] %v5466_v5  ;;  %v5516_v5 = vld [vmem:[%s10525_s3 + $0x1d8] sm:$0xff]  ;;  %822 = vmatpush.msrb.mxu1 %v5509_v58 }
  0x9c   :  { %11099 = vst [vmem:[#allocation77_spill] sm:$0xff] %v5471_v56  ;;  %v5521_v56 = vld [vmem:[%s10525_s3 + $0x4d8] sm:$0xff]  ;;  %846 = vmatpush.msra.mxu2 %v5516_v5 }
  0x9d   :  { %11100 = vst [vmem:[#allocation78_spill] sm:$0xff] %v5480_v43  ;;  %v5528_v43 = vld [vmem:[%s10525_s3 + $0x260] sm:$0xff]  ;;  %866 = vmatpush.msra.mxu3 %v5521_v56 }
  0x9e   :  { %11101 = vst [vmem:[#allocation79_spill] sm:$0xff] %v5485_v57  ;;  %v5533_v57 = vld [vmem:[%s10525_s3 + $0x560] sm:$0xff]  ;;  %803 = vmatpush.msrb.mxu0 %v5528_v43 }
  0x9f   :  { %11102 = vst [vmem:[#allocation80_spill] sm:$0xff] %v5492_v8  ;;  %v5540_v8 = vld [vmem:[%s10525_s3 + $0x1a8] sm:$0xff]  ;;  %823 = vmatpush.msrb.mxu1 %v5533_v57  ;;  %v5673_v60 = vpop.f32.mrf.mxu1 }
  0xa0   :  { %11103 = vst [vmem:[#allocation81_spill] sm:$0xff] %v5497_v28  ;;  %v5545_v28 = vld [vmem:[%s10525_s3 + $0x4a8] sm:$0xff]  ;;  %847 = vmatpush.msra.mxu2 %v5540_v8  ;;  %344 = vmatmul.f32.gmra.mxu0 %v4951_v46 }
  0xa1   :  { %11104 = vst [vmem:[#allocation82_spill] sm:$0xff] %v5504_v59  ;;  %v5559_v59 = vld [vmem:[%s10525_s3 + $0x478] sm:$0xff]  ;;  %867 = vmatpush.msra.mxu3 %v5545_v28  ;;  %385 = vmatmul.f32.gmra.mxu1 %v4951_v46 }
  0xa2   :  { %11105 = vst [vmem:[#allocation83_spill] sm:$0xff] %v5509_v58  ;;  %v5554_v58 = vld [vmem:[%s10525_s3 + $0x178] sm:$0xff] }
  0xa3   :  { %11106 = vst [vmem:[#allocation84_spill] sm:$0xff] %v5516_v5  ;;  %848 = vmatpush.msra.mxu2 %v5554_v58  ;;  %868 = vmatpush.msra.mxu3 %v5559_v59  ;;  %v5590_v5 = vld [vmem:[%s10525_s3 + $0x200] sm:$0xff]  ;;  %v5709_v46 = vld [vmem:[%s10525_s3 + $0x358] sm:$0xff] }
  0xa4   :  { %11107 = vst [vmem:[#allocation85_spill] sm:$0xff] %v5521_v56  ;;  %v5566_v56 = vld [vmem:[%s10525_s3 + $0x230] sm:$0xff] }
  0xa5   :  { %11108 = vst [vmem:[#allocation86_spill] sm:$0xff] %v5528_v43  ;;  %804 = vmatpush.msrb.mxu0 %v5566_v56  ;;  %v5671_v43 = vpop.f32.mrf.mxu0 }
  0xa6   :  { %11109 = vst [vmem:[#allocation87_spill] sm:$0xff] %v5533_v57  ;;  %v5571_v57 = vld [vmem:[%s10525_s3 + $0x530] sm:$0xff] }
  0xa7   :  { %11110 = vst [vmem:[#allocation88_spill] sm:$0xff] %v5540_v8  ;;  %v5578_v8 = vld [vmem:[%s10525_s3 + $0x148] sm:$0xff]  ;;  %824 = vmatpush.msrb.mxu1 %v5571_v57  ;;  %805 = vmatpush.msrb.mxu0 %v5590_v5 }
  0xa8   :  { %11111 = vst [vmem:[#allocation89_spill] sm:$0xff] %v5545_v28  ;;  %v5583_v28 = vld [vmem:[%s10525_s3 + $0x448] sm:$0xff]  ;;  %849 = vmatpush.msra.mxu2 %v5578_v8  ;;  %736 = vmatmul.f32.vlgmr.msra.gmra.mxu0 %v5046_v63 }
  0xa9   :  { %11112 = vst [vmem:[#allocation90_spill] sm:$0xff] %v5554_v58  ;;  %v5602_v58 = vld [vmem:[%s10525_s3 + $0x118] sm:$0xff]  ;;  %869 = vmatpush.msra.mxu3 %v5583_v28  ;;  %825 = vmatpush.msrb.mxu1 %v5595_v22 }
  0xaa   :  { %11113 = vst [vmem:[#allocation91_spill] sm:$0xff] %v5559_v59  ;;  %v5607_v59 = vld [vmem:[%s10525_s3 + $0x418] sm:$0xff]  ;;  %850 = vmatpush.msra.mxu2 %v5602_v58  ;;  %756 = vmatmul.f32.vlgmr.msra.gmra.mxu1 %v5051_v55 }
  0xab   :  { %11114 = vst [vmem:[#allocation92_spill] sm:$0xff] %v5566_v56  ;;  %v5614_v56 = vld [vmem:[%s10525_s3 + $0x1d0] sm:$0xff]  ;;  %870 = vmatpush.msra.mxu3 %v5607_v59 }
  0xac   :  { %11115 = vst [vmem:[#allocation93_spill] sm:$0xff] %v5571_v57  ;;  %v5619_v57 = vld [vmem:[%s10525_s3 + $0x4d0] sm:$0xff]  ;;  %806 = vmatpush.msrb.mxu0 %v5614_v56 }
  0xad   :  { %11116 = vst [vmem:[#allocation94_spill] sm:$0xff] %v5578_v8  ;;  %v5626_v8 = vld [vmem:[%s10525_s3 + $0xe8] sm:$0xff]  ;;  %826 = vmatpush.msrb.mxu1 %v5619_v57 }
  0xae   :  { %11117 = vst [vmem:[#allocation95_spill] sm:$0xff] %v5583_v28  ;;  %v5631_v28 = vld [vmem:[%s10525_s3 + $0x3e8] sm:$0xff]  ;;  %851 = vmatpush.msra.mxu2 %v5626_v8 }
  0xaf   :  { %11118 = vst [vmem:[#allocation96_spill] sm:$0xff] %v5590_v5  ;;  %v5638_v5 = vld [vmem:[%s10525_s3 + $0x1a0] sm:$0xff]  ;;  %871 = vmatpush.msra.mxu3 %v5631_v28 }
  0xb0   :  { %11119 = vst [vmem:[#allocation97_spill] sm:$0xff] %v5595_v22  ;;  %v5643_v22 = vld [vmem:[%s10525_s3 + $0x4a0] sm:$0xff]  ;;  %807 = vmatpush.msrb.mxu0 %v5638_v5 }
  0xb1   :  { %11120 = vst [vmem:[#allocation98_spill] sm:$0xff] %v5602_v58  ;;  %v5650_v58 = vld [vmem:[%s10525_s3 + $0xb8] sm:$0xff]  ;;  %827 = vmatpush.msrb.mxu1 %v5643_v22 }
  0xb2   :  { %11121 = vst [vmem:[#allocation99_spill] sm:$0xff] %v5607_v59  ;;  %v5655_v59 = vld [vmem:[%s10525_s3 + $0x3b8] sm:$0xff]  ;;  %852 = vmatpush.msra.mxu2 %v5650_v58 }
  0xb3   :  { %11122 = vst [vmem:[#allocation100_spill] sm:$0xff] %v5614_v56  ;;  %v5669_v56 = vld [vmem:[%s10525_s3 + $0x470] sm:$0xff]  ;;  %872 = vmatpush.msra.mxu3 %v5655_v59 }
  0xb4   :  { %11123 = vst [vmem:[#allocation101_spill] sm:$0xff] %v5619_v57  ;;  %v5664_v57 = vld [vmem:[%s10525_s3 + $0x170] sm:$0xff]  ;;  %828 = vmatpush.msrb.mxu1 %v5669_v56 }
  0xb5   :  { %11124 = vst [vmem:[#allocation102_spill] sm:$0xff] %v5626_v8  ;;  %808 = vmatpush.msrb.mxu0 %v5664_v57  ;;  %v5704_v8 = vld [vmem:[%s10525_s3 + $0x58] sm:$0xff] }
  0xb6   :  { %11125 = vst [vmem:[#allocation103_spill] sm:$0xff] %v5631_v28  ;;  %v5680_v28 = vld [vmem:[%s10525_s3 + $0x88] sm:$0xff] }
  0xb7   :  { %11126 = vst [vmem:[#allocation104_spill] sm:$0xff] %v5638_v5  ;;  %853 = vmatpush.msra.mxu2 %v5680_v28  ;;  %v5749_v5 = vpop.f32.mrf.mxu2 }
  0xb8   :  { %11127 = vst [vmem:[#allocation105_spill] sm:$0xff] %v5643_v22  ;;  %v5685_v22 = vld [vmem:[%s10525_s3 + $0x388] sm:$0xff] }
  0xb9   :  { %11128 = vst [vmem:[#allocation106_spill] sm:$0xff] %v5650_v58  ;;  %v5692_v58 = vld [vmem:[%s10525_s3 + $0x140] sm:$0xff]  ;;  %873 = vmatpush.msra.mxu3 %v5685_v22  ;;  %854 = vmatpush.msra.mxu2 %v5704_v8 }
  0xba   :  { %11129 = vst [vmem:[#allocation107_spill] sm:$0xff] %v5655_v59  ;;  %v5697_v59 = vld [vmem:[%s10525_s3 + $0x440] sm:$0xff]  ;;  %809 = vmatpush.msrb.mxu0 %v5692_v58 }
  0xbb   :  { %11130 = vst [vmem:[#allocation108_spill] sm:$0xff] %v5664_v57  ;;  %v5716_v57 = vld [vmem:[%s10525_s3 + $0x110] sm:$0xff]  ;;  %829 = vmatpush.msrb.mxu1 %v5697_v59  ;;  %874 = vmatpush.msra.mxu3 %v5709_v46 }
  0xbc   :  { %11131 = vst [vmem:[#allocation109_spill] sm:$0xff] %v5669_v56  ;;  %v5721_v56 = vld [vmem:[%s10525_s3 + $0x410] sm:$0xff]  ;;  %810 = vmatpush.msrb.mxu0 %v5716_v57 }
  0xbd   :  { %11132 = vst [vmem:[#allocation110_spill] sm:$0xff] %v5673_v60  ;;  %830 = vmatpush.msrb.mxu1 %v5721_v56  ;;  %v5751_v60 = vpop.f32.mrf.mxu3 }
  0xbe   :  { %11133 = vst [vmem:[#allocation111_spill] sm:$0xff] %v5680_v28  ;;  %v5728_v28 = vld [vmem:[%s10525_s3 + $0x28] sm:$0xff] }
  0xbf   :  { %11134 = vst [vmem:[#allocation112_spill] sm:$0xff] %v5685_v22  ;;  %v5733_v22 = vld [vmem:[%s10525_s3 + $0x328] sm:$0xff]  ;;  %855 = vmatpush.msra.mxu2 %v5728_v28 }
  0xc0   :  { %11135 = vst [vmem:[#allocation113_spill] sm:$0xff] %v5692_v58  ;;  %v5747_v58 = vld [vmem:[%s10525_s3 + $0x3e0] sm:$0xff]  ;;  %875 = vmatpush.msra.mxu3 %v5733_v22  ;;  %856 = vmatmul.f32.vlgmr.msra.gmra.mxu2 %v5046_v63 }
  0xc1   :  { %11136 = vst [vmem:[#allocation114_spill] sm:$0xff] %v5697_v59  ;;  %v5742_v59 = vld [vmem:[%s10525_s3 + $0xe0] sm:$0xff]  ;;  %876 = vmatmul.f32.vlgmr.msra.gmra.mxu3 %v5051_v55  ;;  %831 = vmatpush.msrb.mxu1 %v5747_v58 }
  0xc2   :  { %11137 = vst [vmem:[#allocation115_spill] sm:$0xff] %v5704_v8  ;;  %v5762_v8 = vpop.f32.mrf.mxu1  ;;  %811 = vmatpush.msrb.mxu0 %v5742_v59  ;;  %1026 = vmatpush.msrb.mxu2 %v4753_v61 }
  0xc3   :  { %11138 = vst [vmem:[#allocation116_spill] sm:$0xff] %v5709_v46  ;;  %v5758_v46 = vld [vmem:[%s10525_s3 + $0xb0] sm:$0xff]  ;;  %1046 = vmatpush.msrb.mxu3 %v4758_v62 }
  0xc4   :  { %11139 = vst [vmem:[#allocation117_spill] sm:$0xff] %v5721_v56  ;;  %v5760_v56 = vpop.f32.mrf.mxu0  ;;  %812 = vmatpush.msrb.mxu0 %v5758_v46  ;;  %1027 = vmatpush.msrb.mxu2 %v4773_v2  ;;  %v5832_v2 = vld [vmem:[%s10525_s3 + $0x2d0] sm:$0xff] }
  0xc5   :  { %11140 = vst [vmem:[#allocation118_spill] sm:$0xff] %v5728_v28  ;;  %v5809_v28 = vld [vmem:[%s10525_s3 + $0x320] sm:$0xff]  ;;  %1047 = vmatpush.msrb.mxu3 %v4778_v3  ;;  %v5839_v3 = vld [vmem:[%s10525_s3 + $0x5d0] sm:$0xff] }
  0xc6   :  { %11141 = vst [vmem:[#allocation119_spill] sm:$0xff] %v5733_v22  ;;  %v5790_v22 = vld [vmem:[%s10525_s3 + $0x50] sm:$0xff]  ;;  %1028 = vmatpush.msrb.mxu2 %v4791_v6  ;;  %v5846_v6 = vld [vmem:[%s10525_s3 + $0x2a0] sm:$0xff] }
  0xc7   :  { %11142 = vst [vmem:[#allocation120_spill] sm:$0xff] %v5742_v59  ;;  %v5813_v59 = vpop.f32.mrf.mxu3  ;;  %1048 = vmatpush.msrb.mxu3 %v4796_v7  ;;  %v5853_v7 = vld [vmem:[%s10525_s3 + $0x5a0] sm:$0xff] }
  0xc8   :  { %11143 = vst [vmem:[#allocation121_spill] sm:$0xff] %v5747_v58  ;;  %v5795_v58 = vld [vmem:[%s10525_s3 + $0x350] sm:$0xff]  ;;  %1029 = vmatpush.msrb.mxu2 %v4808_v9 }
  0xc9   :  { %11144 = vst [vmem:[#allocation122_spill] sm:$0xff] %v5751_v60  ;;  %v5769_v60 = vld [vmem:[%s10525_s3 + $0x3b0] sm:$0xff]  ;;  %1049 = vmatpush.msrb.mxu3 %v4813_v10 }
  0xca   :  { %11145 = vst [vmem:[#allocation123_spill] sm:$0xff] %v5758_v46  ;;  %832 = vmatpush.msrb.mxu1 %v5769_v60  ;;  %v5811_v46 = vpop.f32.mrf.mxu2  ;;  %v5821_v62 = vpop.f32.mrf.mxu1  ;;  %1030 = vmatpush.msrb.mxu2 %v4822_v11  ;;  %v5871_v11 = vld [vmem:[%s10525_s3 + $0x570] sm:$0xff] }
  0xcb   :  { %11146 = vst [vmem:[#allocation124_spill] sm:$0xff] %v5760_v56  ;;  %v5783_v56 = vld [vmem:[%s10525_s3 + $0x380] sm:$0xff]  ;;  %1050 = vmatpush.msrb.mxu3 %v4827_v12 }
  0xcc   :  { %11147 = vst [vmem:[#allocation125_spill] sm:$0xff] %v5762_v8  ;;  %v5778_v8 = vld [vmem:[%s10525_s3 + $0x80] sm:$0xff]  ;;  %833 = vmatpush.msrb.mxu1 %v5783_v56  ;;  %v5819_v61 = vpop.f32.mrf.mxu0  ;;  %1031 = vmatpush.msrb.mxu2 %v4842_v16 }
  0xcd   :  { %11148 = vst [vmem:[#allocation126_spill] sm:$0xff] %v5769_v60  ;;  %813 = vmatpush.msrb.mxu0 %v5778_v8  ;;  %v5804_v60 = vld [vmem:[%s10525_s3 + $0x20] sm:$0xff]  ;;  %1051 = vmatpush.msrb.mxu3 %v4847_v17  ;;  %v5896_v17 = vld [vmem:[%s10525_s3 + $0x210] sm:$0xff] }
  0xce   :  { %11149 = vst [vmem:[#allocation127_spill] sm:$0xff] %v5813_v59  ;;  %834 = vmatpush.msrb.mxu1 %v5795_v58  ;;  %v5882_v59 = vld [vmem:[%s10525_s3 + $0x240] sm:$0xff]  ;;  %1032 = vmatpush.msrb.mxu2 %v4860_v20  ;;  %v5903_v20 = vld [vmem:[%s10525_s3 + $0x510] sm:$0xff] }
  0xcf   :  { %814 = vmatpush.msrb.mxu0 %v5790_v22  ;;  %11150 = vst [vmem:[#allocation128_spill] sm:$0xff] %v5819_v61  ;;  %v5859_v10 = vpop.f32.mrf.mxu3  ;;  %v5889_v16 = vld [vmem:[%s10525_s3 + $0x540] sm:$0xff]  ;;  %1052 = vmatpush.msrb.mxu3 %v4865_v21  ;;  %v6552_v61 = vld [vmem:[%s10525_s3 + $0x3f0] sm:$0xff] }
  0xd0   :  { %11151 = vst [vmem:[#allocation129_spill] sm:$0xff] %v5821_v62  ;;  %835 = vmatpush.msrb.mxu1 %v5809_v28  ;;  %1033 = vmatpush.msrb.mxu2 %v4877_v23  ;;  %v5910_v21 = vld [vmem:[%s10525_s3 + $0x1e0] sm:$0xff]  ;;  %v6546_v62 = vld [vmem:[%s10525_s3 + $0x1f8] sm:$0xff] }
  0xd1   :  { %815 = vmatpush.msrb.mxu0 %v5804_v60  ;;  %836 = vmatmul.f32.vlgmr.msrb.gmra.mxu1 %v5051_v55  ;;  %11153 = vst [vmem:[#allocation131_spill] sm:$0xff] %v5859_v10  ;;  %v5864_v55 = vld [vmem:[%s10525_s3 + $0x270] sm:$0xff]  ;;  %v5917_v23 = vld [vmem:[%s10525_s3 + $0x4e0] sm:$0xff] }
  0xd2   :  { %816 = vmatmul.f32.vlgmr.msrb.gmra.mxu0 %v5046_v63  ;;  %1006 = vmatpush.msra.mxu1 %v5839_v3  ;;  %v5857_v9 = vpop.f32.mrf.mxu2  ;;  %v5877_v63 = vpop.f32.mrf.mxu1 }
  0xd3   :  { %986 = vmatpush.msra.mxu0 %v5832_v2  ;;  %11152 = vst [vmem:[#allocation130_spill] sm:$0xff] %v5857_v9  ;;  %1053 = vmatpush.msrb.mxu3 %v4882_v24  ;;  %v5924_v24 = vld [vmem:[%s10525_s3 + $0x1b0] sm:$0xff]  ;;  %v6534_v9 = vld [vmem:[%s10525_s3 + $0x428] sm:$0xff] }
  0xd4   :  { %1007 = vmatpush.msra.mxu1 %v5853_v7  ;;  %v5875_v12 = vpop.f32.mrf.mxu0  ;;  %11155 = vst [vmem:[#allocation133_spill] sm:$0xff] %v5877_v63  ;;  %1034 = vmatpush.msrb.mxu2 %v4891_v25  ;;  %v5935_v63 = vld [vmem:[%s10525_s3 + $0x4b0] sm:$0xff] }
  0xd5   :  { %987 = vmatpush.msra.mxu0 %v5846_v6  ;;  %11154 = vst [vmem:[#allocation132_spill] sm:$0xff] %v5875_v12  ;;  %1054 = vmatpush.msrb.mxu3 %v4896_v26 }
  0xd6   :  { %1008 = vmatpush.msra.mxu1 %v5871_v11  ;;  %1035 = vmatpush.msrb.mxu2 %v4915_v31 }
  0xd7   :  { %988 = vmatpush.msra.mxu0 %v5864_v55  ;;  %v5930_v25 = vpop.f32.mrf.mxu3  ;;  %1055 = vmatpush.msrb.mxu3 %v4920_v32  ;;  %v11170_v32 = vld [vmem:[#allocation20_spill] sm:$0xff] }
  0xd8   :  { %1009 = vmatpush.msra.mxu1 %v5889_v16  ;;  %11157 = vst [vmem:[#allocation135_spill] sm:$0xff] %v5930_v25  ;;  %1036 = vmatpush.msrb.mxu2 %v4937_v39  ;;  %v5948_v25 = vld [vmem:[%s10525_s3 + $0x480] sm:$0xff] }
  0xd9   :  { %989 = vmatpush.msra.mxu0 %v5882_v59  ;;  %1056 = vmatpush.msrb.mxu3 %v4942_v40 }
  0xda   :  { %1010 = vmatpush.msra.mxu1 %v5903_v20  ;;  %v5928_v10 = vpop.f32.mrf.mxu2  ;;  %v5943_v31 = vpop.f32.mrf.mxu1  ;;  %1037 = vmatpush.msrb.mxu2 %v4956_v47  ;;  %v11177_v47 = vld [vmem:[#allocation8_spill] sm:$0xff] }
  0xdb   :  { %990 = vmatpush.msra.mxu0 %v5896_v17  ;;  %11156 = vst [vmem:[#allocation134_spill] sm:$0xff] %v5928_v10  ;;  %1057 = vmatpush.msrb.mxu3 %v4961_v50  ;;  %v11178_v50 = vld [vmem:[#allocation24_spill] sm:$0xff] }
  0xdc   :  { %1011 = vmatpush.msra.mxu1 %v5917_v23  ;;  %v5941_v26 = vpop.f32.mrf.mxu0  ;;  %11159 = vst [vmem:[#allocation137_spill] sm:$0xff] %v5943_v31  ;;  %1038 = vmatpush.msrb.mxu2 %v4972_v51  ;;  %v11179_v51 = vld [vmem:[#allocation11_spill] sm:$0xff] }
  0xdd   :  { %991 = vmatpush.msra.mxu0 %v5910_v21  ;;  %11158 = vst [vmem:[#allocation136_spill] sm:$0xff] %v5941_v26  ;;  %1058 = vmatpush.msrb.mxu3 %v4977_v54  ;;  %v11180_v54 = vld [vmem:[#allocation27_spill] sm:$0xff] }
  0xde   :  { %1012 = vmatpush.msra.mxu1 %v5935_v63  ;;  %1039 = vmatpush.msrb.mxu2 %v4996_v1  ;;  %v11181_v1 = vld [vmem:[#allocation10_spill] sm:$0xff] }
  0xdf   :  { %992 = vmatpush.msra.mxu0 %v5924_v24  ;;  %1059 = vmatpush.msrb.mxu3 %v5001_v4  ;;  %v11182_v4 = vld [vmem:[#allocation26_spill] sm:$0xff] }
  0xe0   :  { %1013 = vmatpush.msra.mxu1 %v5948_v25  ;;  %1040 = vmatpush.msrb.mxu2 %v5018_v15  ;;  %v11184_v15 = vld [vmem:[#allocation12_spill] sm:$0xff] }
  0xe1   :  { %993 = vmatpush.msra.mxu0 %v4594_v29  ;;  %1060 = vmatpush.msrb.mxu3 %v5023_v18  ;;  %v11185_v18 = vld [vmem:[#allocation28_spill] sm:$0xff] }
  0xe2   :  { %1014 = vmatpush.msra.mxu1 %v4617_v34  ;;  %v5964_v29 = vpop.f32.mrf.mxu2  ;;  %1041 = vmatpush.msrb.mxu2 %v5032_v19  ;;  %v11186_v19 = vld [vmem:[#allocation15_spill] sm:$0xff] }
  0xe3   :  { %994 = vmatpush.msra.mxu0 %v4612_v33  ;;  %11160 = vst [vmem:[#allocation138_spill] sm:$0xff] %v5964_v29  ;;  %v5966_v33 = vpop.f32.mrf.mxu3  ;;  %1061 = vmatpush.msrb.mxu3 %v5037_v36  ;;  %v11173_v36 = vld [vmem:[#allocation9_spill] sm:$0xff] }
  0xe4   :  { %1015 = vmatpush.msra.mxu1 %v4634_v38  ;;  %11161 = vst [vmem:[#allocation139_spill] sm:$0xff] %v5966_v33  ;;  %v5970_v34 = vpop.f32.mrf.mxu0  ;;  %1106 = vmatpush.msra.mxu2 %v5058_v14  ;;  %v11164_v38 = vld [vmem:[#allocation4_spill] sm:$0xff]  ;;  %v11183_v14 = vld [vmem:[#allocation13_spill] sm:$0xff] }
  0xe5   :  { %995 = vmatpush.msra.mxu0 %v4629_v37  ;;  %11162 = vst [vmem:[#allocation140_spill] sm:$0xff] %v5970_v34  ;;  %v5972_v37 = vpop.f32.mrf.mxu1 }
  0xe6   :  { %1016 = vmatpush.msra.mxu1 %v4652_v42  ;;  %11163 = vst [vmem:[#allocation141_spill] sm:$0xff] %v5972_v37  ;;  %1107 = vmatpush.msra.mxu2 %v5082_v35  ;;  %v11166_v42 = vld [vmem:[#allocation17_spill] sm:$0xff] }
  0xe7   :  { %996 = vmatpush.msra.mxu0 %v4647_v41  ;;  %v11165_v41 = vld [vmem:[#allocation5_spill] sm:$0xff]  ;;  %1126 = vmatpush.msra.mxu3 %v11166_v42  ;;  %v11189_v42 = vld [vmem:[#allocation31_spill] sm:$0xff] }
  0xe8   :  { %1017 = vmatpush.msra.mxu1 %v4671_v45  ;;  %v11168_v45 = vld [vmem:[#allocation6_spill] sm:$0xff]  ;;  %v11174_v35 = vld [vmem:[#allocation25_spill] sm:$0xff] }
  0xe9   :  { %997 = vmatpush.msra.mxu0 %v4666_v44  ;;  %v11167_v44 = vld [vmem:[#allocation23_spill] sm:$0xff]  ;;  %1127 = vmatpush.msra.mxu3 %v11170_v32 }
  0xea   :  { %1018 = vmatpush.msra.mxu1 %v4691_v49  ;;  %1108 = vmatpush.msra.mxu2 %v11167_v44  ;;  %v5990_v49 = vpop.f32.mrf.mxu2  ;;  %v11190_v44 = vld [vmem:[#allocation18_spill] sm:$0xff] }
  0xeb   :  { %998 = vmatpush.msra.mxu0 %v4686_v48  ;;  %v11169_v48 = vld [vmem:[#allocation7_spill] sm:$0xff]  ;;  %11171 = vst [vmem:[#allocation4_spill] sm:$0xff] %v5990_v49  ;;  %1128 = vmatpush.msra.mxu3 %v11178_v50  ;;  %v11197_v50 = vld [vmem:[#allocation21_spill] sm:$0xff] }
  0xec   :  { %1019 = vmatpush.msra.mxu1 %v11164_v38  ;;  %1109 = vmatpush.msra.mxu2 %v11174_v35  ;;  %v5996_v39 = vpop.f32.mrf.mxu0  ;;  %v11187_v38 = vld [vmem:[#allocation34_spill] sm:$0xff] }
  0xed   :  { %999 = vmatpush.msra.mxu0 %v4704_v52  ;;  %v5992_v52 = vpop.f32.mrf.mxu3  ;;  %11175 = vst [vmem:[#allocation17_spill] sm:$0xff] %v5996_v39  ;;  %v5998_v40 = vpop.f32.mrf.mxu1  ;;  %1129 = vmatpush.msra.mxu3 %v11182_v4  ;;  %v11201_v4 = vld [vmem:[#allocation29_spill] sm:$0xff] }
  0xee   :  { %1020 = vmatpush.msra.mxu1 %v11168_v45  ;;  %11172 = vst [vmem:[#allocation5_spill] sm:$0xff] %v5992_v52  ;;  %1110 = vmatpush.msra.mxu2 %v11180_v54  ;;  %v11191_v45 = vld [vmem:[#allocation36_spill] sm:$0xff]  ;;  %v11199_v54 = vld [vmem:[#allocation19_spill] sm:$0xff]  ;;  %v6540_v52 = vld [vmem:[%s10525_s3 + $0x1f0] sm:$0xff] }
  0xef   :  { %1000 = vmatpush.msra.mxu0 %v11165_v41  ;;  %11176 = vst [vmem:[#allocation23_spill] sm:$0xff] %v5998_v40  ;;  %1130 = vmatpush.msra.mxu3 %v11185_v18  ;;  %v11188_v41 = vld [vmem:[#allocation14_spill] sm:$0xff]  ;;  %v11204_v18 = vld [vmem:[#allocation32_spill] sm:$0xff] }
  0xf0   :  { %1021 = vmatpush.msra.mxu1 %v11177_v47  ;;  %1111 = vmatpush.msra.mxu2 %v5158_v27  ;;  %v11194_v27 = vld [vmem:[#allocation16_spill] sm:$0xff] }
  0xf1   :  { %1001 = vmatpush.msra.mxu0 %v11169_v48  ;;  %1131 = vmatpush.msra.mxu3 %v11189_v42  ;;  %v11208_v42 = vld [vmem:[#allocation38_spill] sm:$0xff] }
  0xf2   :  { %1086 = vmatpush.msrb.mxu1 %v11181_v1  ;;  %1112 = vmatpush.msra.mxu2 %v11187_v38  ;;  %v6022_v35 = vpop.f32.mrf.mxu2  ;;  %v11200_v1 = vld [vmem:[#allocation37_spill] sm:$0xff]  ;;  %v11206_v38 = vld [vmem:[#allocation30_spill] sm:$0xff] }
  0xf3   :  { %1066 = vmatpush.msrb.mxu0 %v11173_v36  ;;  %v11195_v36 = vld [vmem:[#allocation35_spill] sm:$0xff]  ;;  %11196 = vst [vmem:[#allocation20_spill] sm:$0xff] %v6022_v35 }
  0xf4   :  { %1087 = vmatpush.msrb.mxu1 %v11184_v15  ;;  %1113 = vmatpush.msra.mxu2 %v11191_v45  ;;  %v6016_v48 = vpop.f32.mrf.mxu0  ;;  %v11203_v15 = vld [vmem:[#allocation41_spill] sm:$0xff] }
  0xf5   :  { %1067 = vmatpush.msrb.mxu0 %v11179_v51  ;;  %11192 = vst [vmem:[#allocation6_spill] sm:$0xff] %v6016_v48  ;;  %v6018_v32 = vpop.f32.mrf.mxu1  ;;  %1132 = vmatpush.msra.mxu3 %v11195_v36  ;;  %v6024_v47 = vpop.f32.mrf.mxu3  ;;  %v11198_v51 = vld [vmem:[#allocation40_spill] sm:$0xff] }
  0xf6   :  { %1088 = vmatpush.msrb.mxu1 %v11188_v41  ;;  %11193 = vst [vmem:[#allocation7_spill] sm:$0xff] %v6018_v32  ;;  %1114 = vmatpush.msra.mxu2 %v11198_v51  ;;  %v11207_v41 = vld [vmem:[#allocation44_spill] sm:$0xff]  ;;  %v11215_v51 = vld [vmem:[#allocation53_spill] sm:$0xff] }
  0xf7   :  { %1068 = vmatpush.msrb.mxu0 %v11183_v14  ;;  %1133 = vmatpush.msra.mxu3 %v11200_v1  ;;  %v11202_v14 = vld [vmem:[#allocation22_spill] sm:$0xff]  ;;  %v11213_v36 = vld [vmem:[#allocation48_spill] sm:$0xff]  ;;  %11326 = vst [vmem:[#allocation53_spill] sm:$0xff] %v6546_v62 }
  0xf8   :  { %1089 = vmatpush.msrb.mxu1 %v11194_v27  ;;  %1115 = vmatpush.msra.mxu2 %v5242_v53  ;;  %v11212_v53 = vld [vmem:[#allocation33_spill] sm:$0xff]  ;;  %v11217_v1 = vld [vmem:[#allocation50_spill] sm:$0xff]  ;;  %11324 = vst [vmem:[#allocation48_spill] sm:$0xff] %v6534_v9 }
  0xf9   :  { %1069 = vmatpush.msrb.mxu0 %v11186_v19  ;;  %1134 = vmatpush.msra.mxu3 %v11203_v15  ;;  %v11205_v19 = vld [vmem:[#allocation47_spill] sm:$0xff]  ;;  %v11219_v15 = vld [vmem:[#allocation45_spill] sm:$0xff] }
  0xfa   :  { %1090 = vmatpush.msrb.mxu1 %v11199_v54  ;;  %1116 = vmatpush.msra.mxu2 %v11205_v19  ;;  %v11216_v54 = vld [vmem:[#allocation39_spill] sm:$0xff]  ;;  %v11221_v19 = vld [vmem:[#allocation54_spill] sm:$0xff] }
  0xfb   :  { %1070 = vmatpush.msrb.mxu0 %v11190_v44  ;;  %1135 = vmatpush.msra.mxu3 %v11207_v41  ;;  %v11209_v44 = vld [vmem:[#allocation49_spill] sm:$0xff]  ;;  %v11223_v41 = vld [vmem:[#allocation60_spill] sm:$0xff]  ;;  %11327 = vst [vmem:[#allocation39_spill] sm:$0xff] %v6552_v61 }
  0xfc   :  { %1091 = vmatpush.msrb.mxu1 %v11202_v14  ;;  %1117 = vmatpush.msra.mxu2 %v11209_v44  ;;  %v6040_v45 = vpop.f32.mrf.mxu0  ;;  %v11225_v44 = vld [vmem:[#allocation57_spill] sm:$0xff] }
  0xfd   :  { %1071 = vmatpush.msrb.mxu0 %v11197_v50  ;;  %11210 = vst [vmem:[#allocation9_spill] sm:$0xff] %v6040_v45  ;;  %v6042_v27 = vpop.f32.mrf.mxu1  ;;  %1136 = vmatpush.msra.mxu3 %v11213_v36  ;;  %v11214_v50 = vld [vmem:[#allocation42_spill] sm:$0xff]  ;;  %v304_v14 = vpop.f32.mrf.mxu3 }
  0xfe   :  { %1092 = vmatpush.msrb.mxu1 %v11206_v38  ;;  %11211 = vst [vmem:[#allocation25_spill] sm:$0xff] %v6042_v27  ;;  %1118 = vmatpush.msra.mxu2 %v11215_v51  ;;  %v11222_v38 = vld [vmem:[#allocation51_spill] sm:$0xff]  ;;  %v11227_v36 = vld [vmem:[#allocation62_spill] sm:$0xff] }
  0xff   :  { %1072 = vmatpush.msrb.mxu0 %v11201_v4  ;;  %1137 = vmatpush.msra.mxu3 %v11217_v1  ;;  %v6050_v4 = vpop.f32.mrf.mxu2  ;;  %v11232_v1 = vld [vmem:[#allocation58_spill] sm:$0xff]  ;;  %11325 = vst [vmem:[#allocation42_spill] sm:$0xff] %v6540_v52 }
 0x100   :  { %1093 = vmatpush.msrb.mxu1 %v11212_v53  ;;  %11218 = vst [vmem:[#allocation8_spill] sm:$0xff] %v6050_v4  ;;  %1119 = vmatpush.msra.mxu2 %v5328_v30  ;;  %v11226_v53 = vld [vmem:[#allocation55_spill] sm:$0xff]  ;;  %v11230_v30 = vld [vmem:[#allocation52_spill] sm:$0xff] }
 0x101   :  { %1073 = vmatpush.msrb.mxu0 %v11204_v18  ;;  %v11220_v18 = vld [vmem:[#allocation43_spill] sm:$0xff]  ;;  %1138 = vmatpush.msra.mxu3 %v11221_v19 }
 0x102   :  { %1094 = vmatpush.msrb.mxu1 %v11216_v54  ;;  %1120 = vmatpush.msra.mxu2 %v11223_v41  ;;  %v11231_v54 = vld [vmem:[#allocation61_spill] sm:$0xff]  ;;  %v11235_v19 = vld [vmem:[#allocation59_spill] sm:$0xff] }
 0x103   :  { %1074 = vmatpush.msrb.mxu0 %v11208_v42  ;;  %v11224_v42 = vld [vmem:[#allocation46_spill] sm:$0xff]  ;;  %1139 = vmatpush.msra.mxu3 %v11225_v44 }
 0x104   :  { %1095 = vmatpush.msrb.mxu1 %v11220_v18  ;;  %1121 = vmatpush.msra.mxu2 %v11227_v36  ;;  %v11234_v18 = vld [vmem:[#allocation63_spill] sm:$0xff]  ;;  %v11236_v44 = vld [vmem:[#allocation66_spill] sm:$0xff] }
 0x105   :  { %1075 = vmatpush.msrb.mxu0 %v11214_v50  ;;  %v6062_v50 = vpop.f32.mrf.mxu0  ;;  %v6064_v51 = vpop.f32.mrf.mxu1  ;;  %1140 = vmatpush.msra.mxu3 %v11231_v54 }
 0x106   :  { %1096 = vmatpush.msrb.mxu1 %v11224_v42  ;;  %11228 = vst [vmem:[#allocation24_spill] sm:$0xff] %v6062_v50  ;;  %v677_v41 = vpop.f32.mrf.mxu3  ;;  %v6077_v42 = vld [vmem:[%s10528_s4] sm:$0x3f] }
 0x107   :  { %1076 = vmatpush.msrb.mxu0 %v11219_v15  ;;  %11229 = vst [vmem:[#allocation11_spill] sm:$0xff] %v6064_v51  ;;  %v11233_v15 = vld [vmem:[#allocation56_spill] sm:$0xff]  ;;  %1141 = vmatpush.msra.mxu3 %v11234_v18  ;;  %v6132_v33 = vperm.slane %v6077_v42, 4 }
 0x108   :  { %1097 = vmatpush.msrb.mxu1 %v11230_v30  ;;  %v11239_v30 = vld [vmem:[#allocation69_spill] sm:$0xff] }
 0x109   :  { %1077 = vmatpush.msrb.mxu0 %v11222_v38  ;;  %v657_v38 = vpop.f32.mrf.mxu2  ;;  %11251 = vst [vmem:[#allocation16_spill] sm:$0xff] %v6132_v33 }
 0x10a   :  { %1098 = vmatpush.msrb.mxu1 %v11233_v15  ;;  %v678_v54 = vadd.f32 %v677_v41, %v657_v38 }
 0x10b   :  { %1078 = vmatpush.msrb.mxu0 %v11226_v53 }
 0x10c   :  { %1099 = vmatpush.msrb.mxu1 %v11235_v19  ;;  %v6091_v19 = vperm.slane %v6077_v42, 1 }
 0x10d   :  { %1079 = vmatpush.msrb.mxu0 %v11232_v1  ;;  %v6080_v53 = vpop.f32.mrf.mxu0  ;;  %v6082_v36 = vpop.f32.mrf.mxu1 }
 0x10e   :  { %1100 = vmatpush.msrb.mxu1 %v11236_v44  ;;  %11237 = vst [vmem:[#allocation27_spill] sm:$0xff] %v6080_v53  ;;  %v717_v18 = vpop.f32.mrf.mxu3 }
 0x10f   :  { %1080 = vmatpush.msrb.mxu0 %v5394_v13  ;;  %11238 = vst [vmem:[#allocation10_spill] sm:$0xff] %v6082_v36  ;;  %v6086_v13 = vperm.slane %v6077_v42, 0 }
 0x110   :  { %1101 = vmatpush.msrb.mxu1 %v11239_v30  ;;  %11241 = vst [vmem:[#allocation13_spill] sm:$0xff] %v6091_v19  ;;  %v11244_v30 = vld [vmem:[#allocation110_spill] sm:$0xff] }
 0x111   :  { %1081 = vmatpush.msrb.mxu0 %v5418_v0  ;;  %11240 = vst [vmem:[#allocation26_spill] sm:$0xff] %v6086_v13  ;;  %v161_v0 = vadd.f32 %v5671_v43, %v6086_v13  ;;  %v697_v15 = vpop.f32.mrf.mxu2  ;;  %v202_v32 = vadd.f32 %v11244_v30, %v6091_v19 }
 0x112   :  { %v718_v45 = vadd.f32 %v717_v18, %v697_v15 }
 0x113   :  { %v887_v1 = vadd.f32 %v678_v54, %v161_v0 }
 0x114   :  { %v907_v48 = vadd.f32 %v718_v45, %v202_v32 }
 0x115   :  { %v6093_v44 = vpop.f32.mrf.mxu0  ;;  %v6095_v27 = vpop.f32.mrf.mxu1  ;;  %v3457_v4 = vmul.f32 -1.442695, %v887_v1  ;;  %v6108_v1 = vperm.slane %v6077_v42, 3 }
 0x116   :  { %11242 = vst [vmem:[#allocation12_spill] sm:$0xff] %v6093_v44  ;;  %v3458_v41 = vmul.f32 -1.442695, %v907_v48  ;;  %v797_v51 = vpop.f32.mrf.mxu3 }
 0x117   :  { %11243 = vst [vmem:[#allocation28_spill] sm:$0xff] %v6095_v27  ;;  %3499 = vpow2.f32 %v3457_v4  ;;  %v305_v45 = vadd.f32 %v304_v14, %v6108_v1 }
 0x118   :  { %3501 = vpow2.f32 %v3458_v41  ;;  %11249 = vst [vmem:[#allocation18_spill] sm:$0xff] %v6108_v1 }
 0x119   :  { %v777_v0 = vpop.f32.mrf.mxu2 }
 0x11a   :  { %v798_v15 = vadd.f32 %v797_v51, %v777_v0 }
 0x11c   :  { %v935_v4 = vadd.f32 %v798_v15, %v305_v45 }
 0x11d   :  { %v6099_v38 = vpop.f32.mrf.mxu0  ;;  %v6101_v43 = vpop.f32.mrf.mxu1 }
 0x11e   :  { %11245 = vst [vmem:[#allocation15_spill] sm:$0xff] %v6099_v38  ;;  %v3500_v54 = vpop.eup %3499 }
 0x11f   :  { %11246 = vst [vmem:[#allocation34_spill] sm:$0xff] %v6101_v43  ;;  %v891_v50 = vadd.f32 1.0, %v3500_v54  ;;  %v3502_v32 = vpop.eup %3501  ;;  %v3459_v54 = vmul.f32 -1.442695, %v935_v4  ;;  %v6123_v4 = vld [vmem:[%s10527_s5] ss:$0 sm:$0xff] }
 0x120   :  { %v911_v18 = vadd.f32 1.0, %v3502_v32 }
 0x121   :  { %3503 = vrcp.f32 %v891_v50  ;;  %v903_v45 = vand.u32 2147483648, %v891_v50  ;;  %vm897_vm1 = vweird.f32 %v891_v50 }
 0x122   :  { %3505 = vrcp.f32 %v911_v18  ;;  %vm917_vm5 = vweird.f32 %v911_v18  ;;  %v921_v10 = vand.u32 2147483647, %v911_v18 }
 0x123   :  { %3507 = vpow2.f32 %v3459_v54 }
 0x124   :  { %vm922_vm7 = vcmp.eq.f32.partialorder %v921_v10, 8.507059e+37  ;;  %v6144_v10 = vld [vmem:[%s10527_s5 + $0x1] ss:$0 sm:$0xff] }
 0x125   :  { %v6103_v35 = vpop.f32.mrf.mxu0  ;;  %v6105_v40 = vpop.f32.mrf.mxu1 }
 0x126   :  { %11247 = vst [vmem:[#allocation14_spill] sm:$0xff] %v6103_v35  ;;  %v6528_v35 = vld [vmem:[%s10525_s3 + $0x420] sm:$0xff] }
 0x127   :  { %11248 = vst [vmem:[#allocation31_spill] sm:$0xff] %v6105_v40  ;;  %v3504_v41 = vpop.eup %3503  ;;  %v6522_v40 = vld [vmem:[%s10525_s3 + $0x228] sm:$0xff] }
 0x128   :  { %v893_v39 = vmul.f32 %v3504_v41, %v891_v50  ;;  %v3506_v36 = vpop.eup %3505  ;;  %vm898_vm0 = vweird.f32 %v3504_v41  ;;  %11322 = vst [vmem:[#allocation49_spill] sm:$0xff] %v6522_v40 }
 0x129   :  { %v3508_v51 = vpop.eup %3507  ;;  %v913_v0 = vmul.f32 %v3506_v36, %v911_v18  ;;  %vm899_vm2 = vmor %vm897_vm1, %vm898_vm0  ;;  %vm918_vm4 = vweird.f32 %v3506_v36  ;;  %11323 = vst [vmem:[#allocation33_spill] sm:$0xff] %v6528_v35 }
 0x12a   :  { %v894_v53 = vsub.f32 1.0, %v893_v39  ;;  %v6117_v34 = vadd.f32 1.0, %v3508_v51  ;;  %v901_v39 = vand.u32 2147483647, %v891_v50  ;;  %vm919_vm6 = vmor %vm917_vm5, %vm918_vm4 }
 0x12b   :  { %v914_v15 = vsub.f32 1.0, %v913_v0 }
 0x12c   :  { %v895_v14 = vmul.f32 %v3504_v41, %v894_v53  ;;  %3509 = vrcp.f32 %v6117_v34  ;;  %v6126_v53 = vperm.slane %v6077_v42, 2  ;;  %vm902_vm3 = vcmp.eq.f32.partialorder %v901_v39, 8.507059e+37 }
 0x12d   :  { %v6111_v48 = vpop.f32.mrf.mxu0  ;;  %v6113_v30 = vpop.f32.mrf.mxu1  ;;  %v915_v54 = vmul.f32 %v3506_v36, %v914_v15  ;;  %v923_v15 = vand.u32 2147483648, %v911_v18  ;;  %vm945_vm9 = vweird.f32 %v6117_v34 }
 0x12e   :  { %v896_v32 = vadd.f32 %v3504_v41, %v895_v14  ;;  %11250 = vst [vmem:[#allocation36_spill] sm:$0xff] %v6126_v53  ;;  %v904_v14 = vor.u32 1.1754944e-38, %v903_v45  ;;  %v243_v50 = vadd.f32 %v5749_v5, %v6126_v53 }
 0x12f   :  { %v916_v31 = vadd.f32 %v3506_v36, %v915_v54  ;;  %v924_v39 = vor.u32 1.1754944e-38, %v923_v15 }
 0x130   :  { %v900_v0 = vsel %vm899_vm2, %v3504_v41, %v896_v32 }
 0x131   :  { %v905_v26 = vsel %vm902_vm3, %v904_v14, %v900_v0 }
 0x132   :  { %v3510_v43 = vpop.eup %3509 }
 0x133   :  { %v941_v41 = vmul.f32 %v3510_v43, %v6117_v34  ;;  %vm946_vm8 = vweird.f32 %v3510_v43 }
 0x134   :  { %vm947_vm10 = vmor %vm945_vm9, %vm946_vm8 }
 0x135   :  { %v345_v49 = vpop.f32.mrf.mxu0  ;;  %v6115_v37 = vpop.f32.mrf.mxu1 }
 0x136   :  { %v346_v54 = vadd.f32 %v345_v49, %v6132_v33 }
 0x13d   :  { %v737_v27 = vpop.f32.mrf.mxu0  ;;  %v757_v44 = vpop.f32.mrf.mxu1 }
 0x13e   :  { %v758_v51 = vadd.f32 %v757_v44, %v737_v27  ;;  %v920_v44 = vsel %vm919_vm6, %v3506_v36, %v916_v31  ;;  %v3674_v31 = vld [vmem:[%s10526_s1] sm:$0xff] }
 0x13f   :  { %v925_v5 = vsel %vm922_vm7, %v924_v39, %v920_v44  ;;  %v949_v39 = vand.u32 2147483647, %v6117_v34 }
 0x140   :  { %v927_v29 = vadd.f32 %v6123_v4, %v758_v51  ;;  %v931_v0 = vsub.f32 1.0, %v925_v5  ;;  %v933_v36 = vmul.f32 %v3674_v31, %v925_v5  ;;  %v11255_v5 = vld [vmem:[#allocation67_spill] sm:$0xff] }
 0x141   :  { %vm950_vm11 = vcmp.eq.f32.partialorder %v949_v39, 8.507059e+37  ;;  %v11264_v39 = vld [vmem:[#allocation100_spill] sm:$0xff] }
 0x142   :  { %v928_v38 = vmul.f32 %v927_v29, %v905_v26  ;;  %v942_v29 = vsub.f32 1.0, %v941_v41 }
 0x144   :  { %v929_v27 = vadd.f32 %v928_v38, %v243_v50  ;;  %v943_v38 = vmul.f32 %v3510_v43, %v942_v29  ;;  %v857_v50 = vpop.f32.mrf.mxu2  ;;  %v877_v15 = vpop.f32.mrf.mxu3 }
 0x146   :  { %3511 = vtanh.f32 %v929_v27  ;;  %v878_v27 = vadd.f32 %v877_v15, %v857_v50  ;;  %v944_v44 = vadd.f32 %v3510_v43, %v943_v38  ;;  %v6165_v38 = vperm.slane %v6077_v42, 5  ;;  %v11261_v15 = vld [vmem:[#allocation76_spill] sm:$0xff] }
 0x148   :  { %v975_v29 = vadd.f32 %v6144_v10, %v878_v27 }
 0x14c   :  { %v3512_v14 = vpop.eup %3511 }
 0x14d   :  { %v932_v12 = vmul.f32 %v3512_v14, %v931_v0  ;;  %v11256_v0 = vld [vmem:[#allocation82_spill] sm:$0xff] }
 0x14e   :  { %v837_v45 = vpop.f32.mrf.mxu1  ;;  %v11257_v14 = vld [vmem:[#allocation70_spill] sm:$0xff] }
 0x14f   :  { %v817_v32 = vpop.f32.mrf.mxu0  ;;  %v6139_v49 = vadd.f32 %v933_v36, %v932_v12  ;;  %v951_v12 = vand.u32 2147483648, %v6117_v34  ;;  %v11258_v36 = vld [vmem:[#allocation86_spill] sm:$0xff]  ;;  %v11259_v34 = vld [vmem:[#allocation72_spill] sm:$0xff] }
 0x150   :  { %v838_v51 = vadd.f32 %v837_v45, %v817_v32  ;;  %v11252_v32 = vld [vmem:[#allocation74_spill] sm:$0xff]  ;;  %v11253_v45 = vld [vmem:[#allocation64_spill] sm:$0xff] }
 0x151   :  { %1002 = vmatmul.f32.vlgmr.msra.gmra.mxu0 %v6139_v49  ;;  %1042 = vmatmul.f32.vlgmr.msrb.gmra.mxu2 %v6139_v49  ;;  %983 = vst [vmem:[%s10529_s6] sm:$0xff] %v6139_v49 }
 0x152   :  { %v955_v26 = vadd.f32 %v838_v51, %v346_v54  ;;  %1146 = vmatpush.msra.mxu0 %v11252_v32  ;;  %1186 = vmatpush.msrb.mxu2 %v11253_v45  ;;  %v11254_v51 = vld [vmem:[#allocation78_spill] sm:$0xff]  ;;  %v11263_v32 = vld [vmem:[#allocation80_spill] sm:$0xff] }
 0x154   :  { %v3460_v18 = vmul.f32 -1.442695, %v955_v26  ;;  %1147 = vmatpush.msra.mxu0 %v11254_v51  ;;  %1187 = vmatpush.msrb.mxu2 %v11255_v5  ;;  %v948_v26 = vsel %vm947_vm10, %v3510_v43, %v944_v44  ;;  %v11260_v43 = vld [vmem:[#allocation92_spill] sm:$0xff]  ;;  %v387_v44 = vadd.f32 %v6115_v37, %v6165_v38 }
 0x155   :  { %v11265_v51 = vld [vmem:[#allocation84_spill] sm:$0xff] }
 0x156   :  { %3513 = vpow2.f32 %v3460_v18  ;;  %v952_v18 = vor.u32 1.1754944e-38, %v951_v12  ;;  %1148 = vmatpush.msra.mxu0 %v11256_v0  ;;  %1188 = vmatpush.msrb.mxu2 %v11257_v14  ;;  %v11262_v12 = vld [vmem:[#allocation96_spill] sm:$0xff] }
 0x157   :  { %v11267_v0 = vld [vmem:[#allocation88_spill] sm:$0xff] }
 0x158   :  { %v953_v31 = vsel %vm950_vm11, %v952_v18, %v948_v26  ;;  %1149 = vmatpush.msra.mxu0 %v11258_v36  ;;  %1189 = vmatpush.msrb.mxu2 %v11259_v34  ;;  %v11266_v18 = vld [vmem:[#allocation104_spill] sm:$0xff] }
 0x159   :  { %v976_v50 = vmul.f32 %v975_v29, %v953_v31  ;;  %1082 = vmatmul.f32.vlgmr.msrb.gmra.mxu0 %v6139_v49  ;;  %1122 = vmatmul.f32.vlgmr.msra.gmra.mxu2 %v6139_v49  ;;  %v11268_v14 = vld [vmem:[#allocation108_spill] sm:$0xff]  ;;  %v11269_v31 = vld [vmem:[#allocation90_spill] sm:$0xff] }
 0x15a   :  { %1150 = vmatpush.msra.mxu0 %v11260_v43  ;;  %1190 = vmatpush.msrb.mxu2 %v11261_v15  ;;  %v11271_v43 = vld [vmem:[#allocation94_spill] sm:$0xff] }
 0x15b   :  { %v977_v42 = vadd.f32 %v976_v50, %v387_v44  ;;  %v11270_v50 = vld [vmem:[#allocation113_spill] sm:$0xff] }
 0x15c   :  { %v3514_v41 = vpop.eup %3513  ;;  %1151 = vmatpush.msra.mxu0 %v11262_v12  ;;  %1191 = vmatpush.msrb.mxu2 %v11263_v32  ;;  %v3675_v32 = vld [vmem:[%s10526_s1 + $0x8] sm:$0xff] }
 0x15d   :  { %v959_v54 = vadd.f32 1.0, %v3514_v41 }
 0x15e   :  { %1152 = vmatpush.msra.mxu0 %v11264_v39  ;;  %1192 = vmatpush.msrb.mxu2 %v11265_v51  ;;  %v11276_v51 = vld [vmem:[#allocation123_spill] sm:$0xff] }
 0x15f   :  { %3515 = vrcp.f32 %v959_v54  ;;  %v971_v5 = vand.u32 2147483648, %v959_v54  ;;  %v969_v29 = vand.u32 2147483647, %v959_v54  ;;  %vm965_vm13 = vweird.f32 %v959_v54 }
 0x160   :  { %1153 = vmatpush.msra.mxu0 %v11266_v18  ;;  %1193 = vmatpush.msrb.mxu2 %v11267_v0  ;;  %3517 = vtanh.f32 %v977_v42  ;;  %v11281_v18 = vld [vmem:[#allocation115_spill] sm:$0xff] }
 0x161   :  { %v972_v36 = vor.u32 1.1754944e-38, %v971_v5  ;;  %vm970_vm15 = vcmp.eq.f32.partialorder %v969_v29, 8.507059e+37  ;;  %v11277_v5 = vld [vmem:[#allocation106_spill] sm:$0xff]  ;;  %v11280_v29 = vld [vmem:[#allocation65_spill] sm:$0xff]  ;;  %v11282_v0 = vld [vmem:[#allocation79_spill] sm:$0xff] }
 0x162   :  { %1154 = vmatpush.msra.mxu0 %v11268_v14  ;;  %1194 = vmatpush.msrb.mxu2 %v11269_v31  ;;  %v11285_v14 = vld [vmem:[#allocation83_spill] sm:$0xff] }
 0x163   :  { %v11286_v31 = vld [vmem:[#allocation71_spill] sm:$0xff] }
 0x164   :  { %1155 = vmatpush.msra.mxu0 %v11270_v50  ;;  %1195 = vmatpush.msrb.mxu2 %v11271_v43  ;;  %v6220_v50 = vld [vmem:[%s10525_s3 + $0x2d8] sm:$0xff]  ;;  %v11291_v43 = vld [vmem:[#allocation97_spill] sm:$0xff] }
 0x165   :  { %v3516_v27 = vpop.eup %3515 }
 0x166   :  { %v961_v41 = vmul.f32 %v3516_v27, %v959_v54  ;;  %vm966_vm12 = vweird.f32 %v3516_v27  ;;  %1156 = vmatpush.msra.mxu0 %v5716_v57  ;;  %v3518_v12 = vpop.eup %3517  ;;  %v11278_v57 = vld [vmem:[#allocation111_spill] sm:$0xff] }
 0x167   :  { %vm967_vm14 = vmor %vm965_vm13, %vm966_vm12 }
 0x168   :  { %v962_v45 = vsub.f32 1.0, %v961_v41  ;;  %v11272_v41 = vld [vmem:[#allocation98_spill] sm:$0xff] }
 0x169   :  { %1196 = vmatpush.msrb.mxu2 %v11272_v41  ;;  %v11294_v41 = vld [vmem:[#allocation85_spill] sm:$0xff] }
 0x16a   :  { %v963_v26 = vmul.f32 %v3516_v27, %v962_v45  ;;  %v11273_v45 = vld [vmem:[#allocation120_spill] sm:$0xff] }
 0x16b   :  { %1157 = vmatpush.msra.mxu0 %v11273_v45  ;;  %v6256_v45 = vld [vmem:[%s10525_s3 + $0x218] sm:$0xff] }
 0x16c   :  { %v964_v37 = vadd.f32 %v3516_v27, %v963_v26  ;;  %v11279_v26 = vld [vmem:[#allocation75_spill] sm:$0xff] }
 0x16d   :  { %1158 = vmatpush.msra.mxu0 %v11276_v51  ;;  %v6265_v51 = vld [vmem:[%s10525_s3 + $0x1e8] sm:$0xff] }
 0x16e   :  { %v968_v34 = vsel %vm967_vm14, %v3516_v27, %v964_v37  ;;  %v11274_v27 = vld [vmem:[#allocation102_spill] sm:$0xff]  ;;  %v11283_v37 = vld [vmem:[#allocation68_spill] sm:$0xff] }
 0x16f   :  { %v973_v15 = vsel %vm970_vm15, %v972_v36, %v968_v34  ;;  %1197 = vmatpush.msrb.mxu2 %v11274_v27  ;;  %1159 = vmatpush.msra.mxu0 %v5778_v8  ;;  %v11284_v8 = vld [vmem:[#allocation118_spill] sm:$0xff]  ;;  %v11287_v36 = vld [vmem:[#allocation87_spill] sm:$0xff]  ;;  %v11290_v34 = vld [vmem:[#allocation77_spill] sm:$0xff] }
 0x170   :  { %v979_v44 = vsub.f32 1.0, %v973_v15  ;;  %v981_v42 = vmul.f32 %v3675_v32, %v973_v15  ;;  %v6229_v15 = vld [vmem:[%s10525_s3 + $0x2a8] sm:$0xff]  ;;  %v11300_v27 = vld [vmem:[#allocation95_spill] sm:$0xff] }
 0x171   :  { %1198 = vmatpush.msrb.mxu2 %v11277_v5  ;;  %1160 = vmatpush.msra.mxu0 %v5790_v22  ;;  %v11288_v22 = vld [vmem:[#allocation73_spill] sm:$0xff]  ;;  %v11302_v5 = vld [vmem:[#allocation99_spill] sm:$0xff] }
 0x172   :  { %v980_v54 = vmul.f32 %v3518_v12, %v979_v44  ;;  %v11293_v44 = vld [vmem:[#allocation101_spill] sm:$0xff]  ;;  %v6238_v12 = vld [vmem:[%s10525_s3 + $0x278] sm:$0xff] }
 0x173   :  { %1199 = vmatpush.msrb.mxu2 %v11278_v57  ;;  %1161 = vmatpush.msra.mxu0 %v5804_v60  ;;  %v11289_v60 = vld [vmem:[#allocation93_spill] sm:$0xff]  ;;  %v6274_v57 = vld [vmem:[%s10525_s3 + $0x1b8] sm:$0xff] }
 0x174   :  { %v6190_v39 = vadd.f32 %v981_v42, %v980_v54  ;;  %1162 = vmatmul.f32.vlgmr.msra.gmra.mxu0 %v6139_v49  ;;  %v11296_v54 = vld [vmem:[#allocation89_spill] sm:$0xff]  ;;  %v11298_v42 = vld [vmem:[#allocation91_spill] sm:$0xff] }
 0x175   :  { %1200 = vmatpush.msrb.mxu2 %v11281_v18  ;;  %1334 = vmatpush.msrb.mxu0 %v5832_v2  ;;  %v11292_v2 = vld [vmem:[#allocation81_spill] sm:$0xff]  ;;  %v11305_v18 = vld [vmem:[#allocation126_spill] sm:$0xff] }
 0x176   :  { %11275 = vst [vmem:[#allocation35_spill] sm:$0xff] %v6190_v39  ;;  %1022 = vmatmul.f32.vlgmr.msra.gmra.mxu1 %v6190_v39  ;;  %1062 = vmatmul.f32.vlgmr.msrb.gmra.mxu3 %v6190_v39  ;;  %v6247_v32 = vld [vmem:[%s10525_s3 + $0x248] sm:$0xff] }
 0x177   :  { %1166 = vmatpush.msra.mxu1 %v11279_v26  ;;  %1206 = vmatpush.msrb.mxu3 %v11280_v29  ;;  %v6281_v26 = vld [vmem:[%s10525_s3 + $0x180] sm:$0xff]  ;;  %v11304_v29 = vld [vmem:[#allocation103_spill] sm:$0xff] }
 0x178   :  { %1201 = vmatpush.msrb.mxu2 %v11284_v8  ;;  %1335 = vmatpush.msrb.mxu0 %v5846_v6  ;;  %v11295_v6 = vld [vmem:[#allocation105_spill] sm:$0xff]  ;;  %v6302_v8 = vld [vmem:[%s10525_s3 + $0x158] sm:$0xff] }
 0x179   :  { %1167 = vmatpush.msra.mxu1 %v11282_v0  ;;  %1207 = vmatpush.msrb.mxu3 %v11283_v37  ;;  %v6295_v0 = vld [vmem:[%s10525_s3 + $0x150] sm:$0xff]  ;;  %v11306_v37 = vld [vmem:[#allocation107_spill] sm:$0xff] }
 0x17a   :  { %1202 = vmatmul.f32.vlgmr.msrb.gmra.mxu2 %v6139_v49  ;;  %1336 = vmatpush.msrb.mxu0 %v5864_v55  ;;  %v11297_v55 = vld [vmem:[#allocation109_spill] sm:$0xff] }
 0x17b   :  { %1168 = vmatpush.msra.mxu1 %v11285_v14  ;;  %1208 = vmatpush.msrb.mxu3 %v11286_v31  ;;  %v6309_v14 = vld [vmem:[%s10525_s3 + $0x120] sm:$0xff] }
 0x17c   :  { %1374 = vmatpush.msra.mxu2 %v6220_v50  ;;  %1337 = vmatpush.msrb.mxu0 %v5882_v59  ;;  %v11299_v59 = vld [vmem:[#allocation114_spill] sm:$0xff]  ;;  %v11307_v31 = vld [vmem:[#allocation112_spill] sm:$0xff] }
 0x17d   :  { %1169 = vmatpush.msra.mxu1 %v11287_v36  ;;  %1209 = vmatpush.msrb.mxu3 %v11288_v22  ;;  %v6316_v36 = vld [vmem:[%s10525_s3 + $0x128] sm:$0xff]  ;;  %v11308_v22 = vld [vmem:[#allocation116_spill] sm:$0xff] }
 0x17e   :  { %1102 = vmatmul.f32.vlgmr.msrb.gmra.mxu1 %v6190_v39  ;;  %1142 = vmatmul.f32.vlgmr.msra.gmra.mxu3 %v6190_v39 }
 0x17f   :  { %1170 = vmatpush.msra.mxu1 %v11289_v60  ;;  %1210 = vmatpush.msrb.mxu3 %v11290_v34  ;;  %v6330_v60 = vld [vmem:[%s10525_s3 + $0xf8] sm:$0xff] }
 0x180   :  { %1375 = vmatpush.msra.mxu2 %v6229_v15  ;;  %1338 = vmatpush.msrb.mxu0 %v5896_v17  ;;  %v11301_v17 = vld [vmem:[#allocation117_spill] sm:$0xff]  ;;  %v11309_v34 = vld [vmem:[#allocation119_spill] sm:$0xff] }
 0x181   :  { %1171 = vmatpush.msra.mxu1 %v11291_v43  ;;  %1211 = vmatpush.msrb.mxu3 %v11292_v2  ;;  %v6347_v43 = vld [vmem:[%s10525_s3 + $0xc8] sm:$0xff]  ;;  %v6359_v2 = vld [vmem:[%s10525_s3 + $0x90] sm:$0xff] }
 0x182   :  { %1376 = vmatpush.msra.mxu2 %v6238_v12  ;;  %1339 = vmatpush.msrb.mxu0 %v5910_v21  ;;  %v11303_v21 = vld [vmem:[#allocation121_spill] sm:$0xff] }
 0x183   :  { %1172 = vmatpush.msra.mxu1 %v11293_v44  ;;  %1212 = vmatpush.msrb.mxu3 %v11294_v41  ;;  %v6372_v44 = vld [vmem:[%s10525_s3 + $0x5a8] sm:$0xff]  ;;  %v6378_v41 = vld [vmem:[%s10525_s3 + $0x60] sm:$0xff] }
 0x184   :  { %1377 = vmatpush.msra.mxu2 %v6247_v32  ;;  %1340 = vmatpush.msrb.mxu0 %v5924_v24  ;;  %v6288_v24 = vld [vmem:[%s10525_s3 + $0x188] sm:$0xff] }
 0x185   :  { %1173 = vmatpush.msra.mxu1 %v11295_v6  ;;  %1213 = vmatpush.msrb.mxu3 %v11296_v54  ;;  %v6391_v6 = vld [vmem:[%s10525_s3 + $0x578] sm:$0xff]  ;;  %v6397_v54 = vld [vmem:[%s10525_s3 + $0x30] sm:$0xff] }
 0x186   :  { %1378 = vmatpush.msra.mxu2 %v6256_v45  ;;  %1341 = vmatpush.msrb.mxu0 %v6281_v26 }
 0x187   :  { %1174 = vmatpush.msra.mxu1 %v11297_v55  ;;  %1214 = vmatpush.msrb.mxu3 %v11298_v42  ;;  %v6410_v55 = vld [vmem:[%s10525_s3 + $0x548] sm:$0xff]  ;;  %v6416_v42 = vld [vmem:[%s10525_s3] sm:$0xff] }
 0x188   :  { %1379 = vmatpush.msra.mxu2 %v6265_v51  ;;  %1342 = vmatpush.msrb.mxu0 %v6295_v0 }
 0x189   :  { %1175 = vmatpush.msra.mxu1 %v11299_v59  ;;  %1215 = vmatpush.msrb.mxu3 %v11300_v27  ;;  %v6429_v59 = vld [vmem:[%s10525_s3 + $0x518] sm:$0xff]  ;;  %v6435_v27 = vld [vmem:[%s10525_s3 + $0x2e0] sm:$0xff] }
 0x18a   :  { %1380 = vmatpush.msra.mxu2 %v6274_v57  ;;  %1343 = vmatpush.msrb.mxu0 %v6309_v14 }
 0x18b   :  { %1176 = vmatpush.msra.mxu1 %v11301_v17  ;;  %1216 = vmatpush.msrb.mxu3 %v11302_v5  ;;  %v6448_v17 = vld [vmem:[%s10525_s3 + $0x4e8] sm:$0xff]  ;;  %v6454_v5 = vld [vmem:[%s10525_s3 + $0x2b0] sm:$0xff] }
 0x18c   :  { %1381 = vmatpush.msra.mxu2 %v6288_v24  ;;  %11310 = vst [vmem:[#allocation21_spill] sm:$0xff] %v6448_v17 }
 0x18d   :  { %1177 = vmatpush.msra.mxu1 %v11303_v21  ;;  %1217 = vmatpush.msrb.mxu3 %v11304_v29  ;;  %11311 = vst [vmem:[#allocation40_spill] sm:$0xff] %v6454_v5  ;;  %v6460_v21 = vld [vmem:[%s10525_s3 + $0x2b8] sm:$0xff]  ;;  %v6473_v29 = vld [vmem:[%s10525_s3 + $0x280] sm:$0xff] }
 0x18e   :  { %1382 = vmatpush.msra.mxu2 %v6302_v8  ;;  %11312 = vst [vmem:[#allocation19_spill] sm:$0xff] %v6460_v21 }
 0x18f   :  { %1178 = vmatpush.msra.mxu1 %v11305_v18  ;;  %1218 = vmatpush.msrb.mxu3 %v11306_v37  ;;  %11314 = vst [vmem:[#allocation29_spill] sm:$0xff] %v6473_v29  ;;  %v6479_v18 = vld [vmem:[%s10525_s3 + $0x288] sm:$0xff]  ;;  %v6492_v37 = vld [vmem:[%s10525_s3 + $0x250] sm:$0xff] }
 0x190   :  { %1383 = vmatpush.msra.mxu2 %v6316_v36  ;;  %11315 = vst [vmem:[#allocation22_spill] sm:$0xff] %v6479_v18 }
 0x191   :  { %1179 = vmatpush.msra.mxu1 %v5783_v56  ;;  %1219 = vmatpush.msrb.mxu3 %v11307_v31  ;;  %v6323_v56 = vld [vmem:[%s10525_s3 + $0xf0] sm:$0xff]  ;;  %11317 = vst [vmem:[#allocation32_spill] sm:$0xff] %v6492_v37  ;;  %v6498_v31 = vld [vmem:[%s10525_s3 + $0x258] sm:$0xff] }
 0x192   :  { %1344 = vmatpush.msrb.mxu0 %v6323_v56  ;;  %1384 = vmatpush.msra.mxu2 %v6330_v60  ;;  %11318 = vst [vmem:[#allocation47_spill] sm:$0xff] %v6498_v31 }
 0x193   :  { %1180 = vmatpush.msra.mxu1 %v5795_v58  ;;  %1220 = vmatpush.msrb.mxu3 %v11308_v22  ;;  %v6337_v58 = vld [vmem:[%s10525_s3 + $0xc0] sm:$0xff]  ;;  %v6510_v22 = vld [vmem:[%s10525_s3 + $0x458] sm:$0xff] }
 0x194   :  { %1345 = vmatpush.msrb.mxu0 %v6337_v58  ;;  %1385 = vmatpush.msra.mxu2 %v6347_v43  ;;  %11320 = vst [vmem:[#allocation44_spill] sm:$0xff] %v6510_v22 }
 0x195   :  { %1181 = vmatpush.msra.mxu1 %v5809_v28  ;;  %1221 = vmatpush.msrb.mxu3 %v11309_v34  ;;  %v6353_v28 = vld [vmem:[%s10525_s3 + $0x5d8] sm:$0xff]  ;;  %v6516_v34 = vld [vmem:[%s10525_s3 + $0x220] sm:$0xff] }
 0x196   :  { %1182 = vmatmul.f32.vlgmr.msra.gmra.mxu1 %v6190_v39  ;;  %1222 = vmatmul.f32.vlgmr.msrb.gmra.mxu3 %v6190_v39  ;;  %11321 = vst [vmem:[#allocation38_spill] sm:$0xff] %v6516_v34 }
 0x197   :  { %1354 = vmatpush.msrb.mxu1 %v5839_v3  ;;  %1394 = vmatpush.msra.mxu3 %v6353_v28  ;;  %v6366_v3 = vld [vmem:[%s10525_s3 + $0x98] sm:$0xff] }
 0x198   :  { %1346 = vmatpush.msrb.mxu0 %v6359_v2  ;;  %1386 = vmatpush.msra.mxu2 %v6366_v3 }
 0x199   :  { %1355 = vmatpush.msrb.mxu1 %v5853_v7  ;;  %1395 = vmatpush.msra.mxu3 %v6372_v44  ;;  %v6385_v7 = vld [vmem:[%s10525_s3 + $0x68] sm:$0xff] }
 0x19a   :  { %1347 = vmatpush.msrb.mxu0 %v6378_v41  ;;  %1387 = vmatpush.msra.mxu2 %v6385_v7 }
 0x19b   :  { %1356 = vmatpush.msrb.mxu1 %v5871_v11  ;;  %1396 = vmatpush.msra.mxu3 %v6391_v6  ;;  %v6404_v11 = vld [vmem:[%s10525_s3 + $0x38] sm:$0xff] }
 0x19c   :  { %1348 = vmatpush.msrb.mxu0 %v6397_v54  ;;  %1388 = vmatpush.msra.mxu2 %v6404_v11 }
 0x19d   :  { %1357 = vmatpush.msrb.mxu1 %v5889_v16  ;;  %1397 = vmatpush.msra.mxu3 %v6410_v55  ;;  %v6423_v16 = vld [vmem:[%s10525_s3 + $0x8] sm:$0xff] }
 0x19e   :  { %1349 = vmatpush.msrb.mxu0 %v6416_v42  ;;  %1389 = vmatpush.msra.mxu2 %v6423_v16 }
 0x19f   :  { %1358 = vmatpush.msrb.mxu1 %v5903_v20  ;;  %1398 = vmatpush.msra.mxu3 %v6429_v59  ;;  %v6441_v20 = vld [vmem:[%s10525_s3 + $0x2e8] sm:$0xff] }
 0x1a0   :  { %1414 = vmatpush.msra.mxu0 %v6435_v27  ;;  %1454 = vmatpush.msrb.mxu2 %v6441_v20 }
 0x1a1   :  { %1359 = vmatpush.msrb.mxu1 %v5917_v23  ;;  %1399 = vmatpush.msra.mxu3 %v6448_v17  ;;  %v6467_v23 = vld [vmem:[%s10525_s3 + $0x4b8] sm:$0xff] }
 0x1a2   :  { %1415 = vmatpush.msra.mxu0 %v6454_v5  ;;  %1455 = vmatpush.msrb.mxu2 %v6460_v21  ;;  %11313 = vst [vmem:[#allocation37_spill] sm:$0xff] %v6467_v23 }
 0x1a3   :  { %1360 = vmatpush.msrb.mxu1 %v5935_v63  ;;  %1400 = vmatpush.msra.mxu3 %v6467_v23  ;;  %v6486_v63 = vld [vmem:[%s10525_s3 + $0x488] sm:$0xff] }
 0x1a4   :  { %1416 = vmatpush.msra.mxu0 %v6473_v29  ;;  %1456 = vmatpush.msrb.mxu2 %v6479_v18  ;;  %11316 = vst [vmem:[#allocation41_spill] sm:$0xff] %v6486_v63 }
 0x1a5   :  { %1361 = vmatpush.msrb.mxu1 %v5948_v25  ;;  %1401 = vmatpush.msra.mxu3 %v6486_v63  ;;  %v6504_v25 = vld [vmem:[%s10525_s3 + $0x450] sm:$0xff]  ;;  %v11392_v63 = vld [vmem:[#allocation125_spill] sm:$0xff] }
 0x1a6   :  { %1417 = vmatpush.msra.mxu0 %v6492_v37  ;;  %1457 = vmatpush.msrb.mxu2 %v6498_v31  ;;  %11319 = vst [vmem:[#allocation30_spill] sm:$0xff] %v6504_v25 }
 0x1a7   :  { %1362 = vmatpush.msrb.mxu1 %v6504_v25  ;;  %1402 = vmatpush.msra.mxu3 %v6510_v22 }
 0x1a8   :  { %1418 = vmatpush.msra.mxu0 %v6516_v34  ;;  %1458 = vmatpush.msrb.mxu2 %v6522_v40  ;;  %v11391_v40 = vld [vmem:[#allocation124_spill] sm:$0xff] }
 0x1a9   :  { %1363 = vmatpush.msrb.mxu1 %v6528_v35  ;;  %1403 = vmatpush.msra.mxu3 %v6534_v9  ;;  %v6558_v9 = vld [vmem:[%s10525_s3 + $0x3f8] sm:$0xff]  ;;  %v164_v34 = vadd.f32 %v11391_v40, %v6086_v13 }
 0x1aa   :  { %1419 = vmatpush.msra.mxu0 %v6540_v52  ;;  %1459 = vmatpush.msrb.mxu2 %v6546_v62  ;;  %11328 = vst [vmem:[#allocation50_spill] sm:$0xff] %v6558_v9  ;;  %v6564_v52 = vld [vmem:[%s10525_s3 + $0x1c0] sm:$0xff]  ;;  %v6570_v62 = vld [vmem:[%s10525_s3 + $0x1c8] sm:$0xff] }
 0x1ab   :  { %1364 = vmatpush.msrb.mxu1 %v6552_v61  ;;  %1404 = vmatpush.msra.mxu3 %v6558_v9  ;;  %11329 = vst [vmem:[#allocation45_spill] sm:$0xff] %v6564_v52  ;;  %v6576_v61 = vld [vmem:[%s10525_s3 + $0x3c0] sm:$0xff]  ;;  %v6582_v9 = vld [vmem:[%s10525_s3 + $0x3c8] sm:$0xff] }
 0x1ac   :  { %1420 = vmatpush.msra.mxu0 %v6564_v52  ;;  %11330 = vst [vmem:[#allocation43_spill] sm:$0xff] %v6570_v62  ;;  %1460 = vmatpush.msrb.mxu2 %v6570_v62  ;;  %v6588_v52 = vld [vmem:[%s10525_s3 + $0x190] sm:$0xff]  ;;  %v6594_v62 = vld [vmem:[%s10525_s3 + $0x198] sm:$0xff] }
 0x1ad   :  { %11331 = vst [vmem:[#allocation54_spill] sm:$0xff] %v6576_v61  ;;  %1365 = vmatpush.msrb.mxu1 %v6576_v61  ;;  %1405 = vmatpush.msra.mxu3 %v6582_v9  ;;  %v6600_v61 = vld [vmem:[%s10525_s3 + $0x390] sm:$0xff] }
 0x1ae   :  { %11332 = vst [vmem:[#allocation51_spill] sm:$0xff] %v6582_v9  ;;  %1421 = vmatpush.msra.mxu0 %v6588_v52  ;;  %1461 = vmatpush.msrb.mxu2 %v6594_v62  ;;  %v6606_v9 = vld [vmem:[%s10525_s3 + $0x398] sm:$0xff] }
 0x1af   :  { %11333 = vst [vmem:[#allocation60_spill] sm:$0xff] %v6588_v52  ;;  %1366 = vmatpush.msrb.mxu1 %v6600_v61  ;;  %1406 = vmatpush.msra.mxu3 %v6606_v9  ;;  %v6612_v52 = vld [vmem:[%s10525_s3 + $0x160] sm:$0xff] }
 0x1b0   :  { %11334 = vst [vmem:[#allocation46_spill] sm:$0xff] %v6594_v62  ;;  %1422 = vmatpush.msra.mxu0 %v6612_v52  ;;  %v6618_v62 = vld [vmem:[%s10525_s3 + $0x168] sm:$0xff] }
 0x1b1   :  { %11335 = vst [vmem:[#allocation57_spill] sm:$0xff] %v6600_v61  ;;  %1462 = vmatpush.msrb.mxu2 %v6618_v62  ;;  %v6624_v61 = vld [vmem:[%s10525_s3 + $0x360] sm:$0xff] }
 0x1b2   :  { %11336 = vst [vmem:[#allocation55_spill] sm:$0xff] %v6606_v9  ;;  %1367 = vmatpush.msrb.mxu1 %v6624_v61  ;;  %v6630_v9 = vld [vmem:[%s10525_s3 + $0x368] sm:$0xff] }
 0x1b3   :  { %11337 = vst [vmem:[#allocation62_spill] sm:$0xff] %v6612_v52  ;;  %1407 = vmatpush.msra.mxu3 %v6630_v9  ;;  %v6636_v52 = vld [vmem:[%s10525_s3 + $0x130] sm:$0xff] }
 0x1b4   :  { %11338 = vst [vmem:[#allocation52_spill] sm:$0xff] %v6618_v62  ;;  %1423 = vmatpush.msra.mxu0 %v6636_v52  ;;  %v6642_v62 = vld [vmem:[%s10525_s3 + $0x138] sm:$0xff] }
 0x1b5   :  { %11339 = vst [vmem:[#allocation61_spill] sm:$0xff] %v6624_v61  ;;  %1463 = vmatpush.msrb.mxu2 %v6642_v62  ;;  %v6648_v61 = vld [vmem:[%s10525_s3 + $0x330] sm:$0xff] }
 0x1b6   :  { %11340 = vst [vmem:[#allocation58_spill] sm:$0xff] %v6630_v9  ;;  %1368 = vmatpush.msrb.mxu1 %v6648_v61  ;;  %v6654_v9 = vld [vmem:[%s10525_s3 + $0x338] sm:$0xff] }
 0x1b7   :  { %11341 = vst [vmem:[#allocation56_spill] sm:$0xff] %v6636_v52  ;;  %1408 = vmatpush.msra.mxu3 %v6654_v9  ;;  %v6660_v52 = vld [vmem:[%s10525_s3 + $0x100] sm:$0xff] }
 0x1b8   :  { %11342 = vst [vmem:[#allocation63_spill] sm:$0xff] %v6642_v62  ;;  %1424 = vmatpush.msra.mxu0 %v6660_v52  ;;  %v6666_v62 = vld [vmem:[%s10525_s3 + $0x108] sm:$0xff] }
 0x1b9   :  { %11343 = vst [vmem:[#allocation59_spill] sm:$0xff] %v6648_v61  ;;  %1464 = vmatpush.msrb.mxu2 %v6666_v62  ;;  %v6672_v61 = vld [vmem:[%s10525_s3 + $0x300] sm:$0xff] }
 0x1ba   :  { %11344 = vst [vmem:[#allocation66_spill] sm:$0xff] %v6654_v9  ;;  %1369 = vmatpush.msrb.mxu1 %v6672_v61  ;;  %v6678_v9 = vld [vmem:[%s10525_s3 + $0x308] sm:$0xff] }
 0x1bb   :  { %11345 = vst [vmem:[#allocation69_spill] sm:$0xff] %v6660_v52  ;;  %1409 = vmatpush.msra.mxu3 %v6678_v9  ;;  %v6684_v52 = vld [vmem:[%s10525_s3 + $0xd0] sm:$0xff] }
 0x1bc   :  { %11346 = vst [vmem:[#allocation110_spill] sm:$0xff] %v6666_v62  ;;  %1425 = vmatpush.msra.mxu0 %v6684_v52  ;;  %v6690_v62 = vld [vmem:[%s10525_s3 + $0x5e0] sm:$0xff] }
 0x1bd   :  { %11347 = vst [vmem:[#allocation74_spill] sm:$0xff] %v6672_v61  ;;  %1434 = vmatpush.msra.mxu1 %v6690_v62  ;;  %v6696_v61 = vld [vmem:[%s10525_s3 + $0xd8] sm:$0xff] }
 0x1be   :  { %11348 = vst [vmem:[#allocation64_spill] sm:$0xff] %v6678_v9  ;;  %1465 = vmatpush.msrb.mxu2 %v6696_v61  ;;  %v6702_v9 = vld [vmem:[%s10525_s3 + $0x5e8] sm:$0xff] }
 0x1bf   :  { %11349 = vst [vmem:[#allocation78_spill] sm:$0xff] %v6684_v52  ;;  %1474 = vmatpush.msrb.mxu3 %v6702_v9  ;;  %v6708_v52 = vld [vmem:[%s10525_s3 + $0xa0] sm:$0xff] }
 0x1c0   :  { %11350 = vst [vmem:[#allocation67_spill] sm:$0xff] %v6690_v62  ;;  %1426 = vmatpush.msra.mxu0 %v6708_v52  ;;  %v6714_v62 = vld [vmem:[%s10525_s3 + $0x5b0] sm:$0xff] }
 0x1c1   :  { %11351 = vst [vmem:[#allocation82_spill] sm:$0xff] %v6696_v61  ;;  %1435 = vmatpush.msra.mxu1 %v6714_v62  ;;  %v6720_v61 = vld [vmem:[%s10525_s3 + $0xa8] sm:$0xff] }
 0x1c2   :  { %11352 = vst [vmem:[#allocation70_spill] sm:$0xff] %v6702_v9  ;;  %1466 = vmatpush.msrb.mxu2 %v6720_v61  ;;  %v6726_v9 = vld [vmem:[%s10525_s3 + $0x5b8] sm:$0xff] }
 0x1c3   :  { %11353 = vst [vmem:[#allocation86_spill] sm:$0xff] %v6708_v52  ;;  %1475 = vmatpush.msrb.mxu3 %v6726_v9  ;;  %v6732_v52 = vld [vmem:[%s10525_s3 + $0x70] sm:$0xff] }
 0x1c4   :  { %11354 = vst [vmem:[#allocation72_spill] sm:$0xff] %v6714_v62  ;;  %1427 = vmatpush.msra.mxu0 %v6732_v52  ;;  %v6738_v62 = vld [vmem:[%s10525_s3 + $0x580] sm:$0xff] }
 0x1c5   :  { %11355 = vst [vmem:[#allocation92_spill] sm:$0xff] %v6720_v61  ;;  %1436 = vmatpush.msra.mxu1 %v6738_v62  ;;  %v6744_v61 = vld [vmem:[%s10525_s3 + $0x78] sm:$0xff] }
 0x1c6   :  { %11356 = vst [vmem:[#allocation76_spill] sm:$0xff] %v6726_v9  ;;  %1467 = vmatpush.msrb.mxu2 %v6744_v61  ;;  %v6750_v9 = vld [vmem:[%s10525_s3 + $0x588] sm:$0xff] }
 0x1c7   :  { %11357 = vst [vmem:[#allocation96_spill] sm:$0xff] %v6732_v52  ;;  %1476 = vmatpush.msrb.mxu3 %v6750_v9  ;;  %v6756_v52 = vld [vmem:[%s10525_s3 + $0x40] sm:$0xff] }
 0x1c8   :  { %11358 = vst [vmem:[#allocation80_spill] sm:$0xff] %v6738_v62  ;;  %1428 = vmatpush.msra.mxu0 %v6756_v52  ;;  %v6762_v62 = vld [vmem:[%s10525_s3 + $0x550] sm:$0xff] }
 0x1c9   :  { %11359 = vst [vmem:[#allocation100_spill] sm:$0xff] %v6744_v61  ;;  %1437 = vmatpush.msra.mxu1 %v6762_v62  ;;  %v6768_v61 = vld [vmem:[%s10525_s3 + $0x48] sm:$0xff] }
 0x1ca   :  { %11360 = vst [vmem:[#allocation84_spill] sm:$0xff] %v6750_v9  ;;  %1468 = vmatpush.msrb.mxu2 %v6768_v61  ;;  %v6774_v9 = vld [vmem:[%s10525_s3 + $0x558] sm:$0xff] }
 0x1cb   :  { %11361 = vst [vmem:[#allocation104_spill] sm:$0xff] %v6756_v52  ;;  %1477 = vmatpush.msrb.mxu3 %v6774_v9  ;;  %v6780_v52 = vld [vmem:[%s10525_s3 + $0x10] sm:$0xff] }
 0x1cc   :  { %11362 = vst [vmem:[#allocation88_spill] sm:$0xff] %v6762_v62  ;;  %1429 = vmatpush.msra.mxu0 %v6780_v52  ;;  %v6786_v62 = vld [vmem:[%s10525_s3 + $0x520] sm:$0xff] }
 0x1cd   :  { %11363 = vst [vmem:[#allocation108_spill] sm:$0xff] %v6768_v61  ;;  %1438 = vmatpush.msra.mxu1 %v6786_v62  ;;  %v6792_v61 = vld [vmem:[%s10525_s3 + $0x18] sm:$0xff] }
 0x1ce   :  { %11364 = vst [vmem:[#allocation90_spill] sm:$0xff] %v6774_v9  ;;  %1469 = vmatpush.msrb.mxu2 %v6792_v61  ;;  %v6798_v9 = vld [vmem:[%s10525_s3 + $0x528] sm:$0xff] }
 0x1cf   :  { %11365 = vst [vmem:[#allocation113_spill] sm:$0xff] %v6780_v52  ;;  %1478 = vmatpush.msrb.mxu3 %v6798_v9  ;;  %v6804_v52 = vld [vmem:[%s10525_s3 + $0x4f0] sm:$0xff] }
 0x1d0   :  { %11366 = vst [vmem:[#allocation94_spill] sm:$0xff] %v6786_v62  ;;  %1439 = vmatpush.msra.mxu1 %v6804_v52  ;;  %v6810_v62 = vld [vmem:[%s10525_s3 + $0x4f8] sm:$0xff] }
 0x1d1   :  { %11367 = vst [vmem:[#allocation98_spill] sm:$0xff] %v6792_v61  ;;  %1479 = vmatpush.msrb.mxu3 %v6810_v62  ;;  %v6816_v61 = vld [vmem:[%s10525_s3 + $0x4c0] sm:$0xff] }
 0x1d2   :  { %11368 = vst [vmem:[#allocation120_spill] sm:$0xff] %v6798_v9  ;;  %1440 = vmatpush.msra.mxu1 %v6816_v61  ;;  %v6822_v9 = vld [vmem:[%s10525_s3 + $0x4c8] sm:$0xff] }
 0x1d3   :  { %11369 = vst [vmem:[#allocation102_spill] sm:$0xff] %v6804_v52  ;;  %1480 = vmatpush.msrb.mxu3 %v6822_v9  ;;  %v6828_v52 = vld [vmem:[%s10525_s3 + $0x490] sm:$0xff] }
 0x1d4   :  { %11370 = vst [vmem:[#allocation123_spill] sm:$0xff] %v6810_v62  ;;  %1441 = vmatpush.msra.mxu1 %v6828_v52  ;;  %v6834_v62 = vld [vmem:[%s10525_s3 + $0x498] sm:$0xff]  ;;  %v1043_v31 = vpop.f32.mrf.mxu2 }
 0x1d5   :  { %11371 = vst [vmem:[#allocation106_spill] sm:$0xff] %v6816_v61  ;;  %1481 = vmatpush.msrb.mxu3 %v6834_v62  ;;  %v6840_v61 = vld [vmem:[%s10525_s3 + $0x460] sm:$0xff] }
 0x1d6   :  { %11372 = vst [vmem:[#allocation111_spill] sm:$0xff] %v6822_v9  ;;  %1442 = vmatpush.msra.mxu1 %v6840_v61  ;;  %v6846_v9 = vld [vmem:[%s10525_s3 + $0x468] sm:$0xff] }
 0x1d7   :  { %11373 = vst [vmem:[#allocation75_spill] sm:$0xff] %v6828_v52  ;;  %1482 = vmatpush.msrb.mxu3 %v6846_v9  ;;  %v6852_v52 = vld [vmem:[%s10525_s3 + $0x430] sm:$0xff] }
 0x1d8   :  { %11374 = vst [vmem:[#allocation65_spill] sm:$0xff] %v6834_v62  ;;  %1443 = vmatpush.msra.mxu1 %v6852_v52  ;;  %v6858_v62 = vld [vmem:[%s10525_s3 + $0x438] sm:$0xff] }
 0x1d9   :  { %11375 = vst [vmem:[#allocation115_spill] sm:$0xff] %v6840_v61  ;;  %1483 = vmatpush.msrb.mxu3 %v6858_v62  ;;  %v6864_v61 = vld [vmem:[%s10525_s3 + $0x400] sm:$0xff] }
 0x1da   :  { %11376 = vst [vmem:[#allocation79_spill] sm:$0xff] %v6846_v9  ;;  %1444 = vmatpush.msra.mxu1 %v6864_v61  ;;  %v6870_v9 = vld [vmem:[%s10525_s3 + $0x408] sm:$0xff] }
 0x1db   :  { %11377 = vst [vmem:[#allocation68_spill] sm:$0xff] %v6852_v52  ;;  %1484 = vmatpush.msrb.mxu3 %v6870_v9  ;;  %v6876_v52 = vld [vmem:[%s10525_s3 + $0x3d0] sm:$0xff] }
 0x1dc   :  { %11378 = vst [vmem:[#allocation118_spill] sm:$0xff] %v6858_v62  ;;  %1445 = vmatpush.msra.mxu1 %v6876_v52  ;;  %v6882_v62 = vld [vmem:[%s10525_s3 + $0x3d8] sm:$0xff]  ;;  %v1123_v17 = vpop.f32.mrf.mxu2 }
 0x1dd   :  { %11379 = vst [vmem:[#allocation83_spill] sm:$0xff] %v6864_v61  ;;  %1485 = vmatpush.msrb.mxu3 %v6882_v62  ;;  %v6888_v61 = vld [vmem:[%s10525_s3 + $0x3a0] sm:$0xff] }
 0x1de   :  { %11380 = vst [vmem:[#allocation71_spill] sm:$0xff] %v6870_v9  ;;  %1446 = vmatpush.msra.mxu1 %v6888_v61  ;;  %v6894_v9 = vld [vmem:[%s10525_s3 + $0x3a8] sm:$0xff] }
 0x1df   :  { %11381 = vst [vmem:[#allocation87_spill] sm:$0xff] %v6876_v52  ;;  %1486 = vmatpush.msrb.mxu3 %v6894_v9  ;;  %v6900_v52 = vld [vmem:[%s10525_s3 + $0x370] sm:$0xff] }
 0x1e0   :  { %11382 = vst [vmem:[#allocation73_spill] sm:$0xff] %v6882_v62  ;;  %1447 = vmatpush.msra.mxu1 %v6900_v52  ;;  %v6906_v62 = vld [vmem:[%s10525_s3 + $0x378] sm:$0xff] }
 0x1e1   :  { %11383 = vst [vmem:[#allocation93_spill] sm:$0xff] %v6888_v61  ;;  %1487 = vmatpush.msrb.mxu3 %v6906_v62  ;;  %v6912_v61 = vld [vmem:[%s10525_s3 + $0x340] sm:$0xff] }
 0x1e2   :  { %11384 = vst [vmem:[#allocation77_spill] sm:$0xff] %v6894_v9  ;;  %1448 = vmatpush.msra.mxu1 %v6912_v61  ;;  %v6918_v9 = vld [vmem:[%s10525_s3 + $0x348] sm:$0xff] }
 0x1e3   :  { %11385 = vst [vmem:[#allocation97_spill] sm:$0xff] %v6900_v52  ;;  %1488 = vmatpush.msrb.mxu3 %v6918_v9  ;;  %v6924_v52 = vld [vmem:[%s10525_s3 + $0x310] sm:$0xff] }
 0x1e4   :  { %11386 = vst [vmem:[#allocation81_spill] sm:$0xff] %v6906_v62  ;;  %1449 = vmatpush.msra.mxu1 %v6924_v52  ;;  %v6930_v62 = vld [vmem:[%s10525_s3 + $0x318] sm:$0xff] }
 0x1e5   :  { %11387 = vst [vmem:[#allocation101_spill] sm:$0xff] %v6912_v61  ;;  %1489 = vmatpush.msrb.mxu3 %v6930_v62  ;;  %v1003_v61 = vpop.f32.mrf.mxu0 }
 0x1e6   :  { %11388 = vst [vmem:[#allocation85_spill] sm:$0xff] %v6918_v9 }
 0x1e7   :  { %11389 = vst [vmem:[#allocation105_spill] sm:$0xff] %v6924_v52  ;;  %v205_v52 = vadd.f32 %v11392_v63, %v6091_v19 }
 0x1e8   :  { %11390 = vst [vmem:[#allocation89_spill] sm:$0xff] %v6930_v62 }
 0x1f3   :  { %v1023_v35 = vpop.f32.mrf.mxu1 }
 0x1f4   :  { %v1024_v9 = vadd.f32 %v1023_v35, %v1003_v61  ;;  %v302_v61 = vadd.f32 %v6024_v47, %v6108_v1 }
 0x1f6   :  { %v1234_v22 = vadd.f32 %v1024_v9, %v164_v34 }
 0x1f8   :  { %v3461_v25 = vmul.f32 -1.442695, %v1234_v22 }
 0x1f9   :  { %v1063_v37 = vpop.f32.mrf.mxu3 }
 0x1fa   :  { %3519 = vpow2.f32 %v3461_v25  ;;  %v1064_v18 = vadd.f32 %v1063_v37, %v1043_v31 }
 0x1fc   :  { %v1254_v29 = vadd.f32 %v1064_v18, %v205_v52  ;;  %v1083_v52 = vpop.f32.mrf.mxu0 }
 0x1fe   :  { %v3462_v23 = vmul.f32 -1.442695, %v1254_v29  ;;  %v1103_v29 = vpop.f32.mrf.mxu1 }
 0x200   :  { %v3520_v21 = vpop.eup %3519  ;;  %3521 = vpow2.f32 %v3462_v23 }
 0x201   :  { %v1238_v62 = vadd.f32 1.0, %v3520_v21  ;;  %v1143_v5 = vpop.f32.mrf.mxu3  ;;  %v1104_v21 = vadd.f32 %v1103_v29, %v1083_v52 }
 0x202   :  { %v1144_v9 = vadd.f32 %v1143_v5, %v1123_v17  ;;  %v246_v5 = vadd.f32 %v5811_v46, %v6126_v53 }
 0x203   :  { %3523 = vrcp.f32 %v1238_v62  ;;  %v1250_v23 = vand.u32 2147483648, %v1238_v62  ;;  %v1248_v31 = vand.u32 2147483647, %v1238_v62  ;;  %vm1244_vm1 = vweird.f32 %v1238_v62 }
 0x204   :  { %v1282_v35 = vadd.f32 %v1144_v9, %v302_v61  ;;  %v1163_v52 = vpop.f32.mrf.mxu0 }
 0x205   :  { %v1251_v61 = vor.u32 1.1754944e-38, %v1250_v23  ;;  %vm1249_vm3 = vcmp.eq.f32.partialorder %v1248_v31, 8.507059e+37 }
 0x206   :  { %v3522_v40 = vpop.eup %3521  ;;  %v3463_v34 = vmul.f32 -1.442695, %v1282_v35 }
 0x207   :  { %v1258_v22 = vadd.f32 1.0, %v3522_v40 }
 0x209   :  { %v3524_v13 = vpop.eup %3523  ;;  %3525 = vrcp.f32 %v1258_v22  ;;  %v1270_v29 = vand.u32 2147483648, %v1258_v22  ;;  %v1268_v53 = vand.u32 2147483647, %v1258_v22  ;;  %vm1264_vm5 = vweird.f32 %v1258_v22 }
 0x20a   :  { %v1240_v63 = vmul.f32 %v3524_v13, %v1238_v62  ;;  %3527 = vpow2.f32 %v3463_v34  ;;  %vm1245_vm0 = vweird.f32 %v3524_v13  ;;  %v1274_v34 = vadd.f32 %v6123_v4, %v1104_v21 }
 0x20b   :  { %vm1246_vm2 = vmor %vm1244_vm1, %vm1245_vm0  ;;  %v1271_v31 = vor.u32 1.1754944e-38, %v1270_v29  ;;  %vm1269_vm7 = vcmp.eq.f32.partialorder %v1268_v53, 8.507059e+37 }
 0x20c   :  { %v1241_v18 = vsub.f32 1.0, %v1240_v63  ;;  %v343_v63 = vadd.f32 %v6111_v48, %v6132_v33 }
 0x20e   :  { %v1242_v37 = vmul.f32 %v3524_v13, %v1241_v18 }
 0x20f   :  { %v3526_v25 = vpop.eup %3525 }
 0x210   :  { %v3528_v19 = vpop.eup %3527  ;;  %v1260_v47 = vmul.f32 %v3526_v25, %v1258_v22  ;;  %v1243_v17 = vadd.f32 %v3524_v13, %v1242_v37  ;;  %vm1265_vm4 = vweird.f32 %v3526_v25 }
 0x211   :  { %v1286_v9 = vadd.f32 1.0, %v3528_v19  ;;  %vm1266_vm6 = vmor %vm1264_vm5, %vm1265_vm4 }
 0x212   :  { %v1261_v40 = vsub.f32 1.0, %v1260_v47  ;;  %v1247_v35 = vsel %vm1246_vm2, %v3524_v13, %v1243_v17 }
 0x213   :  { %v1252_v18 = vsel %vm1249_vm3, %v1251_v61, %v1247_v35  ;;  %3529 = vrcp.f32 %v1286_v9  ;;  %v1183_v37 = vpop.f32.mrf.mxu1  ;;  %v1298_v22 = vand.u32 2147483648, %v1286_v9  ;;  %vm1292_vm9 = vweird.f32 %v1286_v9 }
 0x214   :  { %v1262_v62 = vmul.f32 %v3526_v25, %v1261_v40  ;;  %v1275_v1 = vmul.f32 %v1274_v34, %v1252_v18  ;;  %v1184_v46 = vadd.f32 %v1183_v37, %v1163_v52  ;;  %v1203_v52 = vpop.f32.mrf.mxu2 }
 0x216   :  { %v1263_v23 = vadd.f32 %v3526_v25, %v1262_v62  ;;  %v1276_v19 = vadd.f32 %v1275_v1, %v246_v5  ;;  %v1302_v13 = vadd.f32 %v1184_v46, %v343_v63 }
 0x218   :  { %v1267_v4 = vsel %vm1266_vm6, %v3526_v25, %v1263_v23  ;;  %3531 = vtanh.f32 %v1276_v19  ;;  %v3464_v21 = vmul.f32 -1.442695, %v1302_v13  ;;  %v1296_v25 = vand.u32 2147483647, %v1286_v9  ;;  %v6957_v19 = vld [vmem:[%s10525_s3 + $0x2f0] sm:$0xff]  ;;  %v6963_v13 = vld [vmem:[%s10525_s3 + $0x2f8] sm:$0xff] }
 0x219   :  { %v3530_v48 = vpop.eup %3529  ;;  %v1272_v47 = vsel %vm1269_vm7, %v1271_v31, %v1267_v4  ;;  %v1223_v61 = vpop.f32.mrf.mxu3  ;;  %v1299_v23 = vor.u32 1.1754944e-38, %v1298_v22  ;;  %v6971_v4 = vld [vmem:[%s10525_s3 + $0x2c0] sm:$0xff] }
 0x21a   :  { %3533 = vpow2.f32 %v3464_v21  ;;  %v1288_v17 = vmul.f32 %v3530_v48, %v1286_v9  ;;  %v1278_v35 = vsub.f32 1.0, %v1272_v47  ;;  %vm1293_vm8 = vweird.f32 %v3530_v48  ;;  %v6977_v21 = vld [vmem:[%s10525_s3 + $0x2c8] sm:$0xff] }
 0x21b   :  { %v1280_v5 = vmul.f32 %v1272_v47, %v6139_v49  ;;  %v1224_v63 = vadd.f32 %v1223_v61, %v1203_v52  ;;  %vm1294_vm10 = vmor %vm1292_vm9, %vm1293_vm8  ;;  %vm1297_vm11 = vcmp.eq.f32.partialorder %v1296_v25, 8.507059e+37  ;;  %v6989_v47 = vld [vmem:[%s10525_s3 + $0x298] sm:$0xff]  ;;  %v7009_v52 = vld [vmem:[%s10525_s3 + $0x230] sm:$0xff] }
 0x21c   :  { %v1289_v40 = vsub.f32 1.0, %v1288_v17  ;;  %v7027_v25 = vld [vmem:[%s10525_s3 + $0x208] sm:$0xff] }
 0x21d   :  { %v1322_v49 = vadd.f32 %v6144_v10, %v1224_v63  ;;  %v384_v10 = vadd.f32 %v6113_v30, %v6165_v38  ;;  %v6983_v30 = vld [vmem:[%s10525_s3 + $0x290] sm:$0xff]  ;;  %v7021_v63 = vld [vmem:[%s10525_s3 + $0x200] sm:$0xff] }
 0x21e   :  { %v3532_v34 = vpop.eup %3531  ;;  %v1290_v18 = vmul.f32 %v3530_v48, %v1289_v40  ;;  %v6995_v40 = vld [vmem:[%s10525_s3 + $0x260] sm:$0xff] }
 0x21f   :  { %v1279_v1 = vmul.f32 %v3532_v34, %v1278_v35  ;;  %v7001_v35 = vld [vmem:[%s10525_s3 + $0x268] sm:$0xff] }
 0x220   :  { %v3534_v29 = vpop.eup %3533  ;;  %v1291_v37 = vadd.f32 %v3530_v48, %v1290_v18  ;;  %v7015_v18 = vld [vmem:[%s10525_s3 + $0x238] sm:$0xff] }
 0x221   :  { %v6945_v53 = vadd.f32 %v1280_v5, %v1279_v1  ;;  %v1306_v62 = vadd.f32 1.0, %v3534_v29 }
 0x222   :  { %v1295_v46 = vsel %vm1294_vm10, %v3530_v48, %v1291_v37  ;;  %v7033_v37 = vld [vmem:[%s10525_s3 + $0x1d0] sm:$0xff] }
 0x223   :  { %3465 = vst [vmem:[%s10529_s6 + $0x8] sm:$0xff] %v6945_v53  ;;  %3535 = vrcp.f32 %v1306_v62  ;;  %1350 = vmatmul.f32.vlgmr.msrb.gmra.mxu0 %v6945_v53  ;;  %1390 = vmatmul.f32.vlgmr.msra.gmra.mxu2 %v6945_v53  ;;  %v1300_v9 = vsel %vm1297_vm11, %v1299_v23, %v1295_v46  ;;  %v1318_v22 = vand.u32 2147483648, %v1306_v62  ;;  %v1316_v5 = vand.u32 2147483647, %v1306_v62  ;;  %v7039_v46 = vld [vmem:[%s10525_s3 + $0x1d8] sm:$0xff] }
 0x224   :  { %1494 = vmatpush.msrb.mxu0 %v6957_v19  ;;  %1534 = vmatpush.msra.mxu2 %v6963_v13  ;;  %v1323_v31 = vmul.f32 %v1322_v49, %v1300_v9  ;;  %vm1312_vm13 = vweird.f32 %v1306_v62  ;;  %v7051_v9 = vld [vmem:[%s10525_s3 + $0x1a8] sm:$0xff] }
 0x225   :  { %v1319_v23 = vor.u32 1.1754944e-38, %v1318_v22  ;;  %vm1317_vm15 = vcmp.eq.f32.partialorder %v1316_v5, 8.507059e+37  ;;  %v7076_v5 = vld [vmem:[%s10525_s3 + $0x148] sm:$0xff] }
 0x226   :  { %1495 = vmatpush.msrb.mxu0 %v6971_v4  ;;  %1535 = vmatpush.msra.mxu2 %v6977_v21  ;;  %v1324_v48 = vadd.f32 %v1323_v31, %v384_v10 }
 0x228   :  { %1496 = vmatpush.msrb.mxu0 %v6983_v30  ;;  %1536 = vmatpush.msra.mxu2 %v6989_v47  ;;  %3537 = vtanh.f32 %v1324_v48  ;;  %v7057_v48 = vld [vmem:[%s10525_s3 + $0x170] sm:$0xff] }
 0x229   :  { %v3536_v17 = vpop.eup %3535 }
 0x22a   :  { %v1308_v61 = vmul.f32 %v3536_v17, %v1306_v62  ;;  %1497 = vmatpush.msrb.mxu0 %v6995_v40  ;;  %1537 = vmatpush.msra.mxu2 %v7001_v35  ;;  %vm1313_vm12 = vweird.f32 %v3536_v17  ;;  %v7045_v62 = vld [vmem:[%s10525_s3 + $0x1a0] sm:$0xff] }
 0x22b   :  { %1430 = vmatmul.f32.vlgmr.msra.gmra.mxu0 %v6945_v53  ;;  %1470 = vmatmul.f32.vlgmr.msrb.gmra.mxu2 %v6945_v53  ;;  %vm1314_vm14 = vmor %vm1312_vm13, %vm1313_vm12 }
 0x22c   :  { %v1309_v34 = vsub.f32 1.0, %v1308_v61  ;;  %1498 = vmatpush.msrb.mxu0 %v7009_v52  ;;  %1538 = vmatpush.msra.mxu2 %v7015_v18 }
 0x22e   :  { %v1310_v1 = vmul.f32 %v3536_v17, %v1309_v34  ;;  %1499 = vmatpush.msrb.mxu0 %v7021_v63  ;;  %1539 = vmatpush.msra.mxu2 %v7027_v25  ;;  %v3538_v61 = vpop.eup %3537 }
 0x230   :  { %v1311_v29 = vadd.f32 %v3536_v17, %v1310_v1  ;;  %1500 = vmatpush.msrb.mxu0 %v7033_v37  ;;  %1540 = vmatpush.msra.mxu2 %v7039_v46  ;;  %v7070_v1 = vld [vmem:[%s10525_s3 + $0x140] sm:$0xff] }
 0x232   :  { %v1315_v49 = vsel %vm1314_vm14, %v3536_v17, %v1311_v29  ;;  %1501 = vmatpush.msrb.mxu0 %v7045_v62  ;;  %1541 = vmatpush.msra.mxu2 %v7051_v9  ;;  %v7063_v17 = vld [vmem:[%s10525_s3 + $0x178] sm:$0xff] }
 0x233   :  { %v1320_v10 = vsel %vm1317_vm15, %v1319_v23, %v1315_v49  ;;  %v7084_v23 = vld [vmem:[%s10525_s3 + $0x110] sm:$0xff]  ;;  %v7090_v49 = vld [vmem:[%s10525_s3 + $0x118] sm:$0xff] }
 0x234   :  { %v1326_v31 = vsub.f32 1.0, %v1320_v10  ;;  %1502 = vmatpush.msrb.mxu0 %v7057_v48  ;;  %1542 = vmatpush.msra.mxu2 %v7063_v17  ;;  %v1328_v22 = vmul.f32 %v1320_v10, %v6190_v39  ;;  %v7098_v10 = vld [vmem:[%s10525_s3 + $0xe0] sm:$0xff] }
 0x235   :  { %v7128_v39 = vld [vmem:[%s10525_s3 + $0x5c0] sm:$0xff] }
 0x236   :  { %v1327_v34 = vmul.f32 %v3538_v61, %v1326_v31  ;;  %1503 = vmatpush.msrb.mxu0 %v7070_v1  ;;  %1543 = vmatpush.msra.mxu2 %v7076_v5  ;;  %v7104_v31 = vld [vmem:[%s10525_s3 + $0x5f0] sm:$0xff]  ;;  %v7110_v61 = vld [vmem:[%s10525_s3 + $0xe8] sm:$0xff]  ;;  %11397 = vst [vmem:[#allocation117_spill] sm:$0xff] %v7128_v39 }
 0x237   :  { %11394 = vst [vmem:[#allocation91_spill] sm:$0xff] %v7104_v31 }
 0x238   :  { %v7079_v29 = vadd.f32 %v1328_v22, %v1327_v34  ;;  %1504 = vmatpush.msrb.mxu0 %v7084_v23  ;;  %1544 = vmatpush.msra.mxu2 %v7090_v49  ;;  %v7116_v34 = vld [vmem:[%s10525_s3 + $0x5f8] sm:$0xff]  ;;  %v7122_v22 = vld [vmem:[%s10525_s3 + $0xb0] sm:$0xff] }
 0x239   :  { %11395 = vst [vmem:[#allocation114_spill] sm:$0xff] %v7116_v34 }
 0x23a   :  { %11393 = vst [vmem:[#allocation109_spill] sm:$0xff] %v7079_v29  ;;  %1370 = vmatmul.f32.vlgmr.msrb.gmra.mxu1 %v7079_v29  ;;  %1410 = vmatmul.f32.vlgmr.msra.gmra.mxu3 %v7079_v29 }
 0x23b   :  { %1505 = vmatpush.msrb.mxu0 %v7098_v10  ;;  %1514 = vmatpush.msrb.mxu1 %v7104_v31  ;;  %11396 = vst [vmem:[#allocation95_spill] sm:$0xff] %v7122_v22  ;;  %v7134_v31 = vld [vmem:[%s10525_s3 + $0xb8] sm:$0xff] }
 0x23c   :  { %1545 = vmatpush.msra.mxu2 %v7110_v61  ;;  %1554 = vmatpush.msra.mxu3 %v7116_v34  ;;  %11398 = vst [vmem:[#allocation99_spill] sm:$0xff] %v7134_v31  ;;  %v7140_v34 = vld [vmem:[%s10525_s3 + $0x5c8] sm:$0xff] }
 0x23d   :  { %1506 = vmatpush.msrb.mxu0 %v7122_v22  ;;  %1515 = vmatpush.msrb.mxu1 %v7128_v39  ;;  %11399 = vst [vmem:[#allocation121_spill] sm:$0xff] %v7140_v34  ;;  %v7146_v22 = vld [vmem:[%s10525_s3 + $0x80] sm:$0xff]  ;;  %v7152_v39 = vld [vmem:[%s10525_s3 + $0x590] sm:$0xff] }
 0x23e   :  { %1546 = vmatpush.msra.mxu2 %v7134_v31  ;;  %1555 = vmatpush.msra.mxu3 %v7140_v34  ;;  %11400 = vst [vmem:[#allocation103_spill] sm:$0xff] %v7146_v22  ;;  %v7158_v31 = vld [vmem:[%s10525_s3 + $0x88] sm:$0xff]  ;;  %v7164_v34 = vld [vmem:[%s10525_s3 + $0x598] sm:$0xff] }
 0x23f   :  { %1507 = vmatpush.msrb.mxu0 %v7146_v22  ;;  %11401 = vst [vmem:[#allocation126_spill] sm:$0xff] %v7152_v39  ;;  %1516 = vmatpush.msrb.mxu1 %v7152_v39  ;;  %v7170_v22 = vld [vmem:[%s10525_s3 + $0x50] sm:$0xff]  ;;  %v7176_v39 = vld [vmem:[%s10525_s3 + $0x560] sm:$0xff] }
 0x240   :  { %11402 = vst [vmem:[#allocation107_spill] sm:$0xff] %v7158_v31  ;;  %1547 = vmatpush.msra.mxu2 %v7158_v31  ;;  %1556 = vmatpush.msra.mxu3 %v7164_v34  ;;  %v7182_v31 = vld [vmem:[%s10525_s3 + $0x58] sm:$0xff] }
 0x241   :  { %11403 = vst [vmem:[#allocation112_spill] sm:$0xff] %v7164_v34  ;;  %1508 = vmatpush.msrb.mxu0 %v7170_v22  ;;  %1517 = vmatpush.msrb.mxu1 %v7176_v39  ;;  %v7188_v34 = vld [vmem:[%s10525_s3 + $0x568] sm:$0xff] }
 0x242   :  { %11404 = vst [vmem:[#allocation116_spill] sm:$0xff] %v7170_v22  ;;  %1548 = vmatpush.msra.mxu2 %v7182_v31  ;;  %1557 = vmatpush.msra.mxu3 %v7188_v34  ;;  %v7214_v22 = vld [vmem:[%s10525_s3 + $0x538] sm:$0xff] }
 0x243   :  { %11405 = vst [vmem:[#allocation119_spill] sm:$0xff] %v7176_v39  ;;  %1450 = vmatmul.f32.vlgmr.msra.gmra.mxu1 %v7079_v29  ;;  %1490 = vmatmul.f32.vlgmr.msrb.gmra.mxu3 %v7079_v29  ;;  %v7196_v39 = vld [vmem:[%s10525_s3 + $0x20] sm:$0xff] }
 0x244   :  { %11406 = vst [vmem:[#allocation124_spill] sm:$0xff] %v7182_v31  ;;  %1509 = vmatpush.msrb.mxu0 %v7196_v39  ;;  %v7202_v31 = vld [vmem:[%s10525_s3 + $0x530] sm:$0xff]  ;;  %1558 = vmatpush.msra.mxu3 %v7214_v22 }
 0x245   :  { %11407 = vst [vmem:[#allocation125_spill] sm:$0xff] %v7188_v34  ;;  %1518 = vmatpush.msrb.mxu1 %v7202_v31  ;;  %v7208_v34 = vld [vmem:[%s10525_s3 + $0x28] sm:$0xff]  ;;  %1510 = vmatmul.f32.vlgmr.msrb.gmra.mxu0 %v6945_v53 }
 0x246   :  { %11408 = vst [vmem:[#allocation142_spill] sm:$0xff] %v7202_v31  ;;  %1549 = vmatpush.msra.mxu2 %v7208_v34  ;;  %v7222_v31 = vld [vmem:[%s10525_s3 + $0x500] sm:$0xff] }
 0x247   :  { %11409 = vst [vmem:[#allocation143_spill] sm:$0xff] %v7208_v34  ;;  %1550 = vmatmul.f32.vlgmr.msra.gmra.mxu2 %v6945_v53  ;;  %1519 = vmatpush.msrb.mxu1 %v7222_v31  ;;  %v7228_v34 = vld [vmem:[%s10525_s3 + $0x508] sm:$0xff] }
 0x248   :  { %11410 = vst [vmem:[#allocation144_spill] sm:$0xff] %v7214_v22  ;;  %1559 = vmatpush.msra.mxu3 %v7228_v34  ;;  %v7234_v22 = vld [vmem:[%s10525_s3 + $0x2d0] sm:$0xff]  ;;  %1722 = vmatpush.msrb.mxu2 %v6220_v50  ;;  %v7260_v50 = vld [vmem:[%s10525_s3 + $0x4a0] sm:$0xff] }
 0x249   :  { %11411 = vst [vmem:[#allocation145_spill] sm:$0xff] %v7222_v31  ;;  %1682 = vmatpush.msra.mxu0 %v7234_v22  ;;  %v7241_v31 = vld [vmem:[%s10525_s3 + $0x4d0] sm:$0xff] }
 0x24a   :  { %11412 = vst [vmem:[#allocation146_spill] sm:$0xff] %v7228_v34  ;;  %1520 = vmatpush.msrb.mxu1 %v7241_v31  ;;  %v7247_v34 = vld [vmem:[%s10525_s3 + $0x4d8] sm:$0xff]  ;;  %1723 = vmatpush.msrb.mxu2 %v6229_v15  ;;  %v7279_v15 = vld [vmem:[%s10525_s3 + $0x470] sm:$0xff] }
 0x24b   :  { %11413 = vst [vmem:[#allocation147_spill] sm:$0xff] %v7234_v22  ;;  %1560 = vmatpush.msra.mxu3 %v7247_v34  ;;  %v7253_v22 = vld [vmem:[%s10525_s3 + $0x2a0] sm:$0xff] }
 0x24c   :  { %11414 = vst [vmem:[#allocation148_spill] sm:$0xff] %v7247_v34  ;;  %1683 = vmatpush.msra.mxu0 %v7253_v22  ;;  %1521 = vmatpush.msrb.mxu1 %v7260_v50  ;;  %v7266_v34 = vld [vmem:[%s10525_s3 + $0x4a8] sm:$0xff] }
 0x24d   :  { %11415 = vst [vmem:[#allocation149_spill] sm:$0xff] %v7253_v22  ;;  %1561 = vmatpush.msra.mxu3 %v7266_v34  ;;  %v7272_v22 = vld [vmem:[%s10525_s3 + $0x270] sm:$0xff]  ;;  %1724 = vmatpush.msrb.mxu2 %v6238_v12  ;;  %v7298_v12 = vld [vmem:[%s10525_s3 + $0x440] sm:$0xff] }
 0x24e   :  { %11416 = vst [vmem:[#allocation150_spill] sm:$0xff] %v7266_v34  ;;  %1684 = vmatpush.msra.mxu0 %v7272_v22  ;;  %1522 = vmatpush.msrb.mxu1 %v7279_v15  ;;  %v7285_v34 = vld [vmem:[%s10525_s3 + $0x478] sm:$0xff] }
 0x24f   :  { %11417 = vst [vmem:[#allocation151_spill] sm:$0xff] %v7272_v22  ;;  %1562 = vmatpush.msra.mxu3 %v7285_v34  ;;  %v7291_v22 = vld [vmem:[%s10525_s3 + $0x240] sm:$0xff]  ;;  %1725 = vmatpush.msrb.mxu2 %v6247_v32  ;;  %v7317_v32 = vld [vmem:[%s10525_s3 + $0x410] sm:$0xff] }
 0x250   :  { %11418 = vst [vmem:[#allocation152_spill] sm:$0xff] %v7285_v34  ;;  %1685 = vmatpush.msra.mxu0 %v7291_v22  ;;  %1523 = vmatpush.msrb.mxu1 %v7298_v12  ;;  %v7304_v34 = vld [vmem:[%s10525_s3 + $0x448] sm:$0xff] }
 0x251   :  { %11419 = vst [vmem:[#allocation153_spill] sm:$0xff] %v7291_v22  ;;  %1563 = vmatpush.msra.mxu3 %v7304_v34  ;;  %v7310_v22 = vld [vmem:[%s10525_s3 + $0x210] sm:$0xff]  ;;  %1726 = vmatpush.msrb.mxu2 %v6256_v45  ;;  %v7336_v45 = vld [vmem:[%s10525_s3 + $0x3e0] sm:$0xff] }
 0x252   :  { %11420 = vst [vmem:[#allocation154_spill] sm:$0xff] %v7304_v34  ;;  %1686 = vmatpush.msra.mxu0 %v7310_v22  ;;  %1524 = vmatpush.msrb.mxu1 %v7317_v32  ;;  %v7323_v34 = vld [vmem:[%s10525_s3 + $0x418] sm:$0xff] }
 0x253   :  { %11421 = vst [vmem:[#allocation155_spill] sm:$0xff] %v7310_v22  ;;  %1564 = vmatpush.msra.mxu3 %v7323_v34  ;;  %v7329_v22 = vld [vmem:[%s10525_s3 + $0x1e0] sm:$0xff]  ;;  %1727 = vmatpush.msrb.mxu2 %v6265_v51  ;;  %v7355_v51 = vld [vmem:[%s10525_s3 + $0x3b0] sm:$0xff] }
 0x254   :  { %11422 = vst [vmem:[#allocation156_spill] sm:$0xff] %v7323_v34  ;;  %1687 = vmatpush.msra.mxu0 %v7329_v22  ;;  %1525 = vmatpush.msrb.mxu1 %v7336_v45  ;;  %v7342_v34 = vld [vmem:[%s10525_s3 + $0x3e8] sm:$0xff] }
 0x255   :  { %11423 = vst [vmem:[#allocation157_spill] sm:$0xff] %v7329_v22  ;;  %1565 = vmatpush.msra.mxu3 %v7342_v34  ;;  %v7348_v22 = vld [vmem:[%s10525_s3 + $0x1b0] sm:$0xff]  ;;  %1728 = vmatpush.msrb.mxu2 %v6274_v57  ;;  %v7369_v57 = vld [vmem:[%s10525_s3 + $0x380] sm:$0xff] }
 0x256   :  { %11424 = vst [vmem:[#allocation158_spill] sm:$0xff] %v7342_v34  ;;  %1688 = vmatpush.msra.mxu0 %v7348_v22  ;;  %1526 = vmatpush.msrb.mxu1 %v7355_v51  ;;  %v7361_v34 = vld [vmem:[%s10525_s3 + $0x3b8] sm:$0xff] }
 0x257   :  { %11425 = vst [vmem:[#allocation159_spill] sm:$0xff] %v7355_v51  ;;  %1566 = vmatpush.msra.mxu3 %v7361_v34  ;;  %1729 = vmatpush.msrb.mxu2 %v6288_v24  ;;  %v7375_v51 = vld [vmem:[%s10525_s3 + $0x388] sm:$0xff]  ;;  %v7389_v24 = vld [vmem:[%s10525_s3 + $0x358] sm:$0xff] }
 0x258   :  { %1689 = vmatpush.msra.mxu0 %v6281_v26  ;;  %1527 = vmatpush.msrb.mxu1 %v7369_v57  ;;  %v7383_v26 = vld [vmem:[%s10525_s3 + $0x350] sm:$0xff]  ;;  %11427 = vst [vmem:[#allocation161_spill] sm:$0xff] %v7389_v24 }
 0x259   :  { %1567 = vmatpush.msra.mxu3 %v7375_v51  ;;  %1730 = vmatpush.msrb.mxu2 %v6302_v8  ;;  %11426 = vst [vmem:[#allocation160_spill] sm:$0xff] %v7383_v26  ;;  %v7403_v8 = vld [vmem:[%s10525_s3 + $0x328] sm:$0xff] }
 0x25a   :  { %1690 = vmatpush.msra.mxu0 %v6295_v0  ;;  %1528 = vmatpush.msrb.mxu1 %v7383_v26  ;;  %v7397_v0 = vld [vmem:[%s10525_s3 + $0x320] sm:$0xff]  ;;  %11429 = vst [vmem:[#allocation163_spill] sm:$0xff] %v7403_v8 }
 0x25b   :  { %1568 = vmatpush.msra.mxu3 %v7389_v24  ;;  %1731 = vmatpush.msrb.mxu2 %v6316_v36  ;;  %11428 = vst [vmem:[#allocation162_spill] sm:$0xff] %v7397_v0  ;;  %v7422_v36 = vld [vmem:[%s10525_s3 + $0x5a0] sm:$0xff] }
 0x25c   :  { %1691 = vmatpush.msra.mxu0 %v6309_v14  ;;  %1529 = vmatpush.msrb.mxu1 %v7397_v0  ;;  %v7413_v14 = vld [vmem:[%s10525_s3 + $0x5d0] sm:$0xff]  ;;  %11431 = vst [vmem:[#allocation165_spill] sm:$0xff] %v7422_v36 }
 0x25d   :  { %1569 = vmatpush.msra.mxu3 %v7403_v8  ;;  %1530 = vmatmul.f32.vlgmr.msrb.gmra.mxu1 %v7079_v29  ;;  %11430 = vst [vmem:[#allocation164_spill] sm:$0xff] %v7413_v14 }
 0x25e   :  { %1570 = vmatmul.f32.vlgmr.msra.gmra.mxu3 %v7079_v29  ;;  %1692 = vmatpush.msra.mxu0 %v6323_v56  ;;  %v7431_v56 = vld [vmem:[%s10525_s3 + $0x570] sm:$0xff] }
 0x25f   :  { %1732 = vmatpush.msrb.mxu2 %v6330_v60  ;;  %1702 = vmatpush.msra.mxu1 %v7413_v14  ;;  %11432 = vst [vmem:[#allocation166_spill] sm:$0xff] %v7431_v56  ;;  %v7440_v60 = vld [vmem:[%s10525_s3 + $0x540] sm:$0xff]  ;;  %v11523_v14 = vld [vmem:[#allocation18_spill] sm:$0xff] }
 0x260   :  { %1742 = vmatpush.msrb.mxu3 %v6353_v28  ;;  %1693 = vmatpush.msra.mxu0 %v6337_v58  ;;  %11433 = vst [vmem:[#allocation167_spill] sm:$0xff] %v7440_v60  ;;  %v7449_v58 = vld [vmem:[%s10525_s3 + $0x510] sm:$0xff]  ;;  %v11436_v28 = vld [vmem:[#allocation21_spill] sm:$0xff] }
 0x261   :  { %1733 = vmatpush.msrb.mxu2 %v6347_v43  ;;  %1703 = vmatpush.msra.mxu1 %v7422_v36  ;;  %11434 = vst [vmem:[#allocation168_spill] sm:$0xff] %v7449_v58  ;;  %v7460_v43 = vld [vmem:[%s10525_s3 + $0x4e0] sm:$0xff] }
 0x262   :  { %1743 = vmatpush.msrb.mxu3 %v6372_v44  ;;  %1694 = vmatpush.msra.mxu0 %v6359_v2  ;;  %11435 = vst [vmem:[#allocation169_spill] sm:$0xff] %v7460_v43  ;;  %v11437_v2 = vld [vmem:[#allocation40_spill] sm:$0xff]  ;;  %v7469_v44 = vld [vmem:[%s10525_s3 + $0x4b0] sm:$0xff] }
 0x263   :  { %1734 = vmatpush.msrb.mxu2 %v6366_v3  ;;  %1704 = vmatpush.msra.mxu1 %v7431_v56  ;;  %v11438_v3 = vld [vmem:[#allocation19_spill] sm:$0xff]  ;;  %11439 = vst [vmem:[#allocation21_spill] sm:$0xff] %v7469_v44 }
 0x264   :  { %1744 = vmatpush.msrb.mxu3 %v6391_v6  ;;  %1695 = vmatpush.msra.mxu0 %v6378_v41  ;;  %v11440_v41 = vld [vmem:[#allocation37_spill] sm:$0xff]  ;;  %v11442_v6 = vld [vmem:[#allocation22_spill] sm:$0xff] }
 0x265   :  { %1735 = vmatpush.msrb.mxu2 %v6385_v7  ;;  %1705 = vmatpush.msra.mxu1 %v7440_v60  ;;  %v11441_v7 = vld [vmem:[#allocation29_spill] sm:$0xff] }
 0x266   :  { %1745 = vmatpush.msrb.mxu3 %v6410_v55  ;;  %1696 = vmatpush.msra.mxu0 %v6397_v54  ;;  %v7478_v54 = vld [vmem:[%s10525_s3 + $0x480] sm:$0xff] }
 0x267   :  { %1736 = vmatpush.msrb.mxu2 %v6404_v11  ;;  %1706 = vmatpush.msra.mxu1 %v7449_v58  ;;  %11443 = vst [vmem:[#allocation40_spill] sm:$0xff] %v7478_v54  ;;  %v11444_v11 = vld [vmem:[#allocation41_spill] sm:$0xff]  ;;  %v11445_v55 = vld [vmem:[#allocation32_spill] sm:$0xff] }
 0x268   :  { %1746 = vmatpush.msrb.mxu3 %v6429_v59  ;;  %1697 = vmatpush.msra.mxu0 %v6416_v42  ;;  %v11446_v42 = vld [vmem:[#allocation47_spill] sm:$0xff]  ;;  %v11448_v59 = vld [vmem:[#allocation44_spill] sm:$0xff] }
 0x269   :  { %1737 = vmatpush.msrb.mxu2 %v6423_v16  ;;  %1707 = vmatpush.msra.mxu1 %v7460_v43  ;;  %v11447_v16 = vld [vmem:[#allocation30_spill] sm:$0xff]  ;;  %v11521_v43 = vld [vmem:[#allocation13_spill] sm:$0xff] }
 0x26a   :  { %1762 = vmatpush.msrb.mxu0 %v6435_v27  ;;  %1747 = vmatpush.msrb.mxu3 %v11436_v28  ;;  %v11449_v27 = vld [vmem:[#allocation38_spill] sm:$0xff]  ;;  %v11451_v28 = vld [vmem:[#allocation33_spill] sm:$0xff] }
 0x26b   :  { %1802 = vmatpush.msra.mxu2 %v6441_v20  ;;  %1708 = vmatpush.msra.mxu1 %v7469_v44  ;;  %v11450_v20 = vld [vmem:[#allocation49_spill] sm:$0xff] }
 0x26c   :  { %1763 = vmatpush.msrb.mxu0 %v11437_v2  ;;  %1748 = vmatpush.msrb.mxu3 %v11440_v41  ;;  %v11452_v2 = vld [vmem:[#allocation48_spill] sm:$0xff]  ;;  %v11454_v41 = vld [vmem:[#allocation53_spill] sm:$0xff] }
 0x26d   :  { %1803 = vmatpush.msra.mxu2 %v11438_v3  ;;  %1709 = vmatpush.msra.mxu1 %v7478_v54  ;;  %v11453_v3 = vld [vmem:[#allocation42_spill] sm:$0xff] }
 0x26e   :  { %1764 = vmatpush.msrb.mxu0 %v11441_v7  ;;  %1749 = vmatpush.msrb.mxu3 %v11444_v11  ;;  %v11455_v7 = vld [vmem:[#allocation39_spill] sm:$0xff]  ;;  %v11457_v11 = vld [vmem:[#allocation45_spill] sm:$0xff] }
 0x26f   :  { %1804 = vmatpush.msra.mxu2 %v11442_v6  ;;  %1710 = vmatpush.msra.mxu1 %v11447_v16  ;;  %v11456_v6 = vld [vmem:[#allocation50_spill] sm:$0xff]  ;;  %v11460_v16 = vld [vmem:[#allocation51_spill] sm:$0xff] }
 0x270   :  { %1765 = vmatpush.msrb.mxu0 %v11445_v55  ;;  %1750 = vmatpush.msrb.mxu3 %v11448_v59  ;;  %v11458_v55 = vld [vmem:[#allocation43_spill] sm:$0xff]  ;;  %v11461_v59 = vld [vmem:[#allocation60_spill] sm:$0xff] }
 0x271   :  { %1805 = vmatpush.msra.mxu2 %v11446_v42  ;;  %1711 = vmatpush.msra.mxu1 %v11451_v28  ;;  %v11459_v42 = vld [vmem:[#allocation54_spill] sm:$0xff]  ;;  %v11464_v28 = vld [vmem:[#allocation55_spill] sm:$0xff] }
 0x272   :  { %1766 = vmatpush.msrb.mxu0 %v11449_v27  ;;  %1751 = vmatpush.msrb.mxu3 %v11452_v2  ;;  %v11462_v27 = vld [vmem:[#allocation46_spill] sm:$0xff] }
 0x273   :  { %1806 = vmatpush.msra.mxu2 %v11450_v20  ;;  %1712 = vmatpush.msra.mxu1 %v11455_v7  ;;  %v11463_v20 = vld [vmem:[#allocation57_spill] sm:$0xff]  ;;  %v11465_v2 = vld [vmem:[#allocation62_spill] sm:$0xff] }
 0x274   :  { %1767 = vmatpush.msrb.mxu0 %v11453_v3  ;;  %1752 = vmatpush.msrb.mxu3 %v11456_v6  ;;  %v11466_v3 = vld [vmem:[#allocation52_spill] sm:$0xff]  ;;  %v11468_v7 = vld [vmem:[#allocation58_spill] sm:$0xff] }
 0x275   :  { %1807 = vmatpush.msra.mxu2 %v11454_v41  ;;  %1713 = vmatpush.msra.mxu1 %v11459_v42  ;;  %v11467_v41 = vld [vmem:[#allocation61_spill] sm:$0xff]  ;;  %v11469_v6 = vld [vmem:[#allocation56_spill] sm:$0xff]  ;;  %v11472_v42 = vld [vmem:[#allocation66_spill] sm:$0xff] }
 0x276   :  { %1768 = vmatpush.msrb.mxu0 %v11457_v11  ;;  %1753 = vmatpush.msrb.mxu3 %v11460_v16  ;;  %v11470_v11 = vld [vmem:[#allocation63_spill] sm:$0xff]  ;;  %v11473_v16 = vld [vmem:[#allocation69_spill] sm:$0xff] }
 0x277   :  { %1808 = vmatpush.msra.mxu2 %v11458_v55  ;;  %1714 = vmatpush.msra.mxu1 %v11463_v20  ;;  %v11471_v55 = vld [vmem:[#allocation59_spill] sm:$0xff]  ;;  %v11476_v20 = vld [vmem:[#allocation64_spill] sm:$0xff] }
 0x278   :  { %1769 = vmatpush.msrb.mxu0 %v11461_v59  ;;  %1754 = vmatpush.msrb.mxu3 %v11464_v28  ;;  %v11474_v59 = vld [vmem:[#allocation110_spill] sm:$0xff] }
 0x279   :  { %1809 = vmatpush.msra.mxu2 %v11462_v27  ;;  %1715 = vmatpush.msra.mxu1 %v11467_v41  ;;  %v11475_v27 = vld [vmem:[#allocation74_spill] sm:$0xff] }
 0x27a   :  { %1770 = vmatpush.msrb.mxu0 %v11465_v2  ;;  %1755 = vmatpush.msrb.mxu3 %v11468_v7  ;;  %v11477_v28 = vld [vmem:[#allocation78_spill] sm:$0xff]  ;;  %v11478_v2 = vld [vmem:[#allocation67_spill] sm:$0xff] }
 0x27b   :  { %1810 = vmatpush.msra.mxu2 %v11466_v3  ;;  %1716 = vmatpush.msra.mxu1 %v11471_v55  ;;  %v11479_v3 = vld [vmem:[#allocation82_spill] sm:$0xff]  ;;  %v11484_v55 = vld [vmem:[#allocation76_spill] sm:$0xff] }
 0x27c   :  { %1771 = vmatpush.msrb.mxu0 %v11469_v6  ;;  %1756 = vmatpush.msrb.mxu3 %v11472_v42  ;;  %v11480_v41 = vld [vmem:[#allocation70_spill] sm:$0xff]  ;;  %v11482_v6 = vld [vmem:[#allocation72_spill] sm:$0xff] }
 0x27d   :  { %1811 = vmatpush.msra.mxu2 %v11470_v11  ;;  %1717 = vmatpush.msra.mxu1 %v11475_v27  ;;  %v11481_v7 = vld [vmem:[#allocation86_spill] sm:$0xff]  ;;  %v11483_v11 = vld [vmem:[#allocation92_spill] sm:$0xff] }
 0x27e   :  { %1772 = vmatpush.msrb.mxu0 %v11473_v16  ;;  %1757 = vmatpush.msrb.mxu3 %v11476_v20  ;;  %v11485_v42 = vld [vmem:[#allocation96_spill] sm:$0xff] }
 0x27f   :  { %1812 = vmatpush.msra.mxu2 %v11474_v59  ;;  %1782 = vmatpush.msrb.mxu1 %v11478_v2  ;;  %v11486_v16 = vld [vmem:[#allocation80_spill] sm:$0xff] }
 0x280   :  { %1773 = vmatpush.msrb.mxu0 %v11477_v28  ;;  %1822 = vmatpush.msra.mxu3 %v11480_v41  ;;  %v11487_v59 = vld [vmem:[#allocation100_spill] sm:$0xff]  ;;  %v11493_v41 = vld [vmem:[#allocation113_spill] sm:$0xff] }
 0x281   :  { %1813 = vmatpush.msra.mxu2 %v11479_v3  ;;  %1783 = vmatpush.msrb.mxu1 %v11482_v6  ;;  %v11488_v27 = vld [vmem:[#allocation84_spill] sm:$0xff]  ;;  %v11492_v3 = vld [vmem:[#allocation90_spill] sm:$0xff] }
 0x282   :  { %1774 = vmatpush.msrb.mxu0 %v11481_v7  ;;  %1823 = vmatpush.msra.mxu3 %v11484_v55  ;;  %v11489_v20 = vld [vmem:[#allocation104_spill] sm:$0xff]  ;;  %v11494_v7 = vld [vmem:[#allocation94_spill] sm:$0xff] }
 0x283   :  { %1814 = vmatpush.msra.mxu2 %v11483_v11  ;;  %1784 = vmatpush.msrb.mxu1 %v11486_v16  ;;  %v11490_v28 = vld [vmem:[#allocation88_spill] sm:$0xff]  ;;  %v11495_v6 = vld [vmem:[#allocation98_spill] sm:$0xff] }
 0x284   :  { %1775 = vmatpush.msrb.mxu0 %v11485_v42  ;;  %1824 = vmatpush.msra.mxu3 %v11488_v27  ;;  %v11491_v2 = vld [vmem:[#allocation108_spill] sm:$0xff]  ;;  %v11497_v55 = vld [vmem:[#allocation102_spill] sm:$0xff]  ;;  %v11498_v42 = vld [vmem:[#allocation123_spill] sm:$0xff] }
 0x285   :  { %1815 = vmatpush.msra.mxu2 %v11487_v59  ;;  %1785 = vmatpush.msrb.mxu1 %v11490_v28  ;;  %v11496_v11 = vld [vmem:[#allocation120_spill] sm:$0xff]  ;;  %v11499_v16 = vld [vmem:[#allocation106_spill] sm:$0xff]  ;;  %v11500_v59 = vld [vmem:[#allocation111_spill] sm:$0xff] }
 0x286   :  { %1776 = vmatpush.msrb.mxu0 %v11489_v20  ;;  %1825 = vmatpush.msra.mxu3 %v11492_v3  ;;  %v11501_v27 = vld [vmem:[#allocation75_spill] sm:$0xff]  ;;  %v11502_v20 = vld [vmem:[#allocation65_spill] sm:$0xff]  ;;  %v11505_v3 = vld [vmem:[#allocation68_spill] sm:$0xff] }
 0x287   :  { %1816 = vmatpush.msra.mxu2 %v11491_v2  ;;  %1786 = vmatpush.msrb.mxu1 %v11494_v7  ;;  %v11503_v28 = vld [vmem:[#allocation115_spill] sm:$0xff] }
 0x288   :  { %1777 = vmatpush.msrb.mxu0 %v11493_v41  ;;  %1826 = vmatpush.msra.mxu3 %v11496_v11  ;;  %v11504_v2 = vld [vmem:[#allocation79_spill] sm:$0xff]  ;;  %v11506_v41 = vld [vmem:[#allocation118_spill] sm:$0xff] }
 0x289   :  { %1817 = vmatpush.msra.mxu2 %v11495_v6  ;;  %1787 = vmatpush.msrb.mxu1 %v11497_v55  ;;  %v11507_v7 = vld [vmem:[#allocation83_spill] sm:$0xff]  ;;  %v11510_v55 = vld [vmem:[#allocation73_spill] sm:$0xff] }
 0x28a   :  { %1827 = vmatpush.msra.mxu3 %v11498_v42  ;;  %v11508_v6 = vld [vmem:[#allocation71_spill] sm:$0xff]  ;;  %v11511_v42 = vld [vmem:[#allocation93_spill] sm:$0xff] }
 0x28b   :  { %1788 = vmatpush.msrb.mxu1 %v11499_v16  ;;  %v11509_v11 = vld [vmem:[#allocation87_spill] sm:$0xff]  ;;  %v11512_v16 = vld [vmem:[#allocation77_spill] sm:$0xff] }
 0x28c   :  { %1828 = vmatpush.msra.mxu3 %v11500_v59  ;;  %v11513_v59 = vld [vmem:[#allocation97_spill] sm:$0xff] }
 0x28d   :  { %1789 = vmatpush.msrb.mxu1 %v11501_v27  ;;  %v11514_v27 = vld [vmem:[#allocation81_spill] sm:$0xff] }
 0x28e   :  { %1829 = vmatpush.msra.mxu3 %v11502_v20  ;;  %v11515_v20 = vld [vmem:[#allocation101_spill] sm:$0xff] }
 0x28f   :  { %1790 = vmatpush.msrb.mxu1 %v11503_v28  ;;  %v11516_v28 = vld [vmem:[#allocation85_spill] sm:$0xff] }
 0x290   :  { %1830 = vmatpush.msra.mxu3 %v11504_v2  ;;  %v11517_v2 = vld [vmem:[#allocation105_spill] sm:$0xff] }
 0x291   :  { %1791 = vmatpush.msrb.mxu1 %v11505_v3  ;;  %v11518_v3 = vld [vmem:[#allocation89_spill] sm:$0xff] }
 0x292   :  { %1831 = vmatpush.msra.mxu3 %v11506_v41 }
 0x293   :  { %1792 = vmatpush.msrb.mxu1 %v11507_v7 }
 0x294   :  { %1832 = vmatpush.msra.mxu3 %v11508_v6  ;;  %v11519_v6 = vld [vmem:[#allocation26_spill] sm:$0xff] }
 0x295   :  { %1793 = vmatpush.msrb.mxu1 %v11509_v11  ;;  %v11520_v11 = vld [vmem:[#allocation128_spill] sm:$0xff] }
 0x296   :  { %1833 = vmatpush.msra.mxu3 %v11510_v55  ;;  %v167_v55 = vadd.f32 %v11520_v11, %v11519_v6  ;;  %v11524_v11 = vld [vmem:[#allocation5_spill] sm:$0xff] }
 0x297   :  { %1794 = vmatpush.msrb.mxu1 %v11511_v42 }
 0x298   :  { %1834 = vmatpush.msra.mxu3 %v11512_v16 }
 0x299   :  { %1795 = vmatpush.msrb.mxu1 %v11513_v59 }
 0x29a   :  { %1835 = vmatpush.msra.mxu3 %v11514_v27  ;;  %v11522_v27 = vld [vmem:[#allocation129_spill] sm:$0xff] }
 0x29b   :  { %1796 = vmatpush.msrb.mxu1 %v11515_v20  ;;  %v208_v58 = vadd.f32 %v11522_v27, %v11521_v43 }
 0x29c   :  { %1836 = vmatpush.msra.mxu3 %v11516_v28 }
 0x29d   :  { %1797 = vmatpush.msrb.mxu1 %v11517_v2 }
 0x29e   :  { %1837 = vmatpush.msra.mxu3 %v11518_v3 }
 0x2a0   :  { %v1351_v41 = vpop.f32.mrf.mxu0 }
 0x2a6   :  { %v1391_v44 = vpop.f32.mrf.mxu2 }
 0x2ae   :  { %v1471_v36 = vpop.f32.mrf.mxu2 }
 0x2b7   :  { %v1371_v7 = vpop.f32.mrf.mxu1 }
 0x2b8   :  { %v1372_v42 = vadd.f32 %v1371_v7, %v1351_v41  ;;  %v299_v41 = vadd.f32 %v11524_v11, %v11523_v14 }
 0x2ba   :  { %v1582_v54 = vadd.f32 %v1372_v42, %v167_v55 }
 0x2bc   :  { %v3466_v16 = vmul.f32 -1.442695, %v1582_v54 }
 0x2bd   :  { %v1411_v59 = vpop.f32.mrf.mxu3 }
 0x2be   :  { %3539 = vpow2.f32 %v3466_v16  ;;  %v1412_v20 = vadd.f32 %v1411_v59, %v1391_v44  ;;  %v1431_v59 = vpop.f32.mrf.mxu0 }
 0x2c0   :  { %v1602_v28 = vadd.f32 %v1412_v20, %v208_v58  ;;  %v1451_v58 = vpop.f32.mrf.mxu1 }
 0x2c1   :  { %v1452_v27 = vadd.f32 %v1451_v58, %v1431_v59  ;;  %v11527_v58 = vld [vmem:[#allocation130_spill] sm:$0xff] }
 0x2c2   :  { %v3467_v60 = vmul.f32 -1.442695, %v1602_v28 }
 0x2c4   :  { %v3540_v2 = vpop.eup %3539  ;;  %3541 = vpow2.f32 %v3467_v60 }
 0x2c5   :  { %v1586_v3 = vadd.f32 1.0, %v3540_v2 }
 0x2c6   :  { %v1491_v56 = vpop.f32.mrf.mxu3 }
 0x2c7   :  { %3543 = vrcp.f32 %v1586_v3  ;;  %v1492_v7 = vadd.f32 %v1491_v56, %v1471_v36  ;;  %v1598_v60 = vand.u32 2147483648, %v1586_v3  ;;  %v1596_v28 = vand.u32 2147483647, %v1586_v3 }
 0x2c8   :  { %vm1592_vm1 = vweird.f32 %v1586_v3 }
 0x2c9   :  { %v1630_v55 = vadd.f32 %v1492_v7, %v299_v41  ;;  %v1599_v56 = vor.u32 1.1754944e-38, %v1598_v60  ;;  %vm1597_vm3 = vcmp.eq.f32.partialorder %v1596_v28, 8.507059e+37 }
 0x2ca   :  { %v3542_v54 = vpop.eup %3541 }
 0x2cb   :  { %v1606_v42 = vadd.f32 1.0, %v3542_v54  ;;  %v3468_v6 = vmul.f32 -1.442695, %v1630_v55 }
 0x2cd   :  { %v3544_v8 = vpop.eup %3543  ;;  %3545 = vrcp.f32 %v1606_v42  ;;  %v1616_v28 = vand.u32 2147483647, %v1606_v42  ;;  %vm1612_vm5 = vweird.f32 %v1606_v42 }
 0x2ce   :  { %v1588_v16 = vmul.f32 %v3544_v8, %v1586_v3  ;;  %3547 = vpow2.f32 %v3468_v6  ;;  %vm1593_vm0 = vweird.f32 %v3544_v8  ;;  %v7565_v6 = vld [vmem:[%s10527_s5] ss:$0 sm:$0xff]  ;;  %v1618_v3 = vand.u32 2147483648, %v1606_v42 }
 0x2cf   :  { %vm1594_vm2 = vmor %vm1592_vm1, %vm1593_vm0  ;;  %11525 = vst [vmem:[#allocation19_spill] sm:$0xff] %v7565_v6  ;;  %v1622_v55 = vadd.f32 %v7565_v6, %v1452_v27  ;;  %vm1617_vm7 = vcmp.eq.f32.partialorder %v1616_v28, 8.507059e+37  ;;  %v7578_v28 = vld [vmem:[%s10527_s5 + $0x1] ss:$0 sm:$0xff] }
 0x2d0   :  { %v1589_v44 = vsub.f32 1.0, %v1588_v16  ;;  %v11526_v16 = vld [vmem:[#allocation36_spill] sm:$0xff]  ;;  %v1619_v27 = vor.u32 1.1754944e-38, %v1618_v3 }
 0x2d2   :  { %v1590_v20 = vmul.f32 %v3544_v8, %v1589_v44  ;;  %v249_v44 = vadd.f32 %v11527_v58, %v11526_v16  ;;  %v1551_v16 = vpop.f32.mrf.mxu2 }
 0x2d3   :  { %v3546_v2 = vpop.eup %3545 }
 0x2d4   :  { %v3548_v43 = vpop.eup %3547  ;;  %v1608_v11 = vmul.f32 %v3546_v2, %v1606_v42  ;;  %v1591_v36 = vadd.f32 %v3544_v8, %v1590_v20  ;;  %vm1613_vm4 = vweird.f32 %v3546_v2 }
 0x2d5   :  { %v1634_v41 = vadd.f32 1.0, %v3548_v43  ;;  %v11528_v43 = vld [vmem:[#allocation14_spill] sm:$0xff]  ;;  %vm1614_vm6 = vmor %vm1612_vm5, %vm1613_vm4 }
 0x2d6   :  { %v1609_v7 = vsub.f32 1.0, %v1608_v11  ;;  %v1595_v54 = vsel %vm1594_vm2, %v3544_v8, %v1591_v36  ;;  %v340_v8 = vadd.f32 %v11528_v43, %v6132_v33  ;;  %v1511_v11 = vpop.f32.mrf.mxu0 }
 0x2d7   :  { %v1600_v59 = vsel %vm1597_vm3, %v1599_v56, %v1595_v54  ;;  %3549 = vrcp.f32 %v1634_v41  ;;  %v1646_v26 = vand.u32 2147483648, %v1634_v41  ;;  %vm1640_vm9 = vweird.f32 %v1634_v41 }
 0x2d8   :  { %v1610_v20 = vmul.f32 %v3546_v2, %v1609_v7  ;;  %v1623_v60 = vmul.f32 %v1622_v55, %v1600_v59 }
 0x2da   :  { %v1531_v36 = vpop.f32.mrf.mxu1  ;;  %v1611_v14 = vadd.f32 %v3546_v2, %v1610_v20  ;;  %v1624_v0 = vadd.f32 %v1623_v60, %v249_v44  ;;  %v1644_v60 = vand.u32 2147483647, %v1634_v41 }
 0x2db   :  { %v1532_v24 = vadd.f32 %v1531_v36, %v1511_v11 }
 0x2dc   :  { %v1615_v6 = vsel %vm1614_vm6, %v3546_v2, %v1611_v14  ;;  %3551 = vtanh.f32 %v1624_v0  ;;  %v1647_v2 = vor.u32 1.1754944e-38, %v1646_v26  ;;  %vm1645_vm11 = vcmp.eq.f32.partialorder %v1644_v60, 8.507059e+37  ;;  %v11529_v26 = vld [vmem:[#allocation31_spill] sm:$0xff]  ;;  %v11551_v60 = vld [vmem:[#allocation148_spill] sm:$0xff] }
 0x2dd   :  { %v1650_v56 = vadd.f32 %v1532_v24, %v340_v8  ;;  %v3550_v54 = vpop.eup %3549  ;;  %v1620_v7 = vsel %vm1617_vm7, %v1619_v27, %v1615_v6 }
 0x2de   :  { %v1636_v55 = vmul.f32 %v3550_v54, %v1634_v41  ;;  %v1626_v33 = vsub.f32 1.0, %v1620_v7  ;;  %vm1641_vm8 = vweird.f32 %v3550_v54  ;;  %v1628_v0 = vmul.f32 %v1620_v7, %v6945_v53  ;;  %v11543_v7 = vld [vmem:[#allocation119_spill] sm:$0xff] }
 0x2df   :  { %v3469_v58 = vmul.f32 -1.442695, %v1650_v56  ;;  %vm1642_vm10 = vmor %vm1640_vm9, %vm1641_vm8  ;;  %v381_v41 = vadd.f32 %v11529_v26, %v6165_v38  ;;  %v11541_v56 = vld [vmem:[#allocation116_spill] sm:$0xff]  ;;  %v11560_v26 = vld [vmem:[#allocation157_spill] sm:$0xff] }
 0x2e0   :  { %v1637_v43 = vsub.f32 1.0, %v1636_v55  ;;  %v11545_v55 = vld [vmem:[#allocation142_spill] sm:$0xff] }
 0x2e1   :  { %v1571_v59 = vpop.f32.mrf.mxu3  ;;  %3553 = vpow2.f32 %v3469_v58  ;;  %v11544_v58 = vld [vmem:[#allocation125_spill] sm:$0xff] }
 0x2e2   :  { %v3552_v20 = vpop.eup %3551  ;;  %v1572_v42 = vadd.f32 %v1571_v59, %v1551_v16  ;;  %v1638_v44 = vmul.f32 %v3550_v54, %v1637_v43  ;;  %v11546_v59 = vld [vmem:[#allocation143_spill] sm:$0xff]  ;;  %v11547_v43 = vld [vmem:[#allocation144_spill] sm:$0xff] }
 0x2e3   :  { %v1627_v3 = vmul.f32 %v3552_v20, %v1626_v33  ;;  %v11548_v20 = vld [vmem:[#allocation145_spill] sm:$0xff] }
 0x2e4   :  { %v1639_v24 = vadd.f32 %v3550_v54, %v1638_v44  ;;  %v1670_v16 = vadd.f32 %v7578_v28, %v1572_v42  ;;  %v11549_v42 = vld [vmem:[#allocation146_spill] sm:$0xff]  ;;  %v11550_v44 = vld [vmem:[#allocation147_spill] sm:$0xff] }
 0x2e5   :  { %v7573_v14 = vadd.f32 %v1628_v0, %v1627_v3  ;;  %v11552_v3 = vld [vmem:[#allocation149_spill] sm:$0xff] }
 0x2e6   :  { %v1643_v8 = vsel %vm1642_vm10, %v3550_v54, %v1639_v24  ;;  %v11542_v54 = vld [vmem:[#allocation124_spill] sm:$0xff]  ;;  %v7657_v0 = vld [vmem:[%s10525_s3 + $0x2a8] sm:$0xff]  ;;  %v11553_v24 = vld [vmem:[#allocation150_spill] sm:$0xff] }
 0x2e7   :  { %v3554_v6 = vpop.eup %3553  ;;  %3470 = vst [vmem:[%s10529_s6 + $0x10] sm:$0xff] %v7573_v14  ;;  %v1648_v53 = vsel %vm1645_vm11, %v1647_v2, %v1643_v8  ;;  %1698 = vmatmul.f32.vlgmr.msra.gmra.mxu0 %v7573_v14  ;;  %1738 = vmatmul.f32.vlgmr.msrb.gmra.mxu2 %v7573_v14  ;;  %v11554_v2 = vld [vmem:[#allocation151_spill] sm:$0xff]  ;;  %v11556_v8 = vld [vmem:[#allocation153_spill] sm:$0xff] }
 0x2e8   :  { %v1654_v33 = vadd.f32 1.0, %v3554_v6  ;;  %v1671_v11 = vmul.f32 %v1670_v16, %v1648_v53  ;;  %1842 = vmatpush.msra.mxu0 %v6957_v19  ;;  %1882 = vmatpush.msrb.mxu2 %v6963_v13  ;;  %v11555_v6 = vld [vmem:[#allocation152_spill] sm:$0xff]  ;;  %v11557_v16 = vld [vmem:[#allocation154_spill] sm:$0xff] }
 0x2e9   :  { %v11559_v53 = vld [vmem:[#allocation156_spill] sm:$0xff] }
 0x2ea   :  { %3555 = vrcp.f32 %v1654_v33  ;;  %v1672_v36 = vadd.f32 %v1671_v11, %v381_v41  ;;  %1843 = vmatpush.msra.mxu0 %v6971_v4  ;;  %1883 = vmatpush.msrb.mxu2 %v6977_v21  ;;  %v1666_v4 = vand.u32 2147483648, %v1654_v33  ;;  %vm1660_vm13 = vweird.f32 %v1654_v33  ;;  %v11561_v41 = vld [vmem:[#allocation158_spill] sm:$0xff]  ;;  %v11562_v11 = vld [vmem:[#allocation159_spill] sm:$0xff] }
 0x2ec   :  { %1844 = vmatpush.msra.mxu0 %v6983_v30  ;;  %1884 = vmatpush.msrb.mxu2 %v6989_v47  ;;  %v1664_v30 = vand.u32 2147483647, %v1654_v33  ;;  %3557 = vtanh.f32 %v1672_v36  ;;  %v7710_v36 = vld [vmem:[%s10525_s3 + $0x180] sm:$0xff] }
 0x2ee   :  { %1845 = vmatpush.msra.mxu0 %v6995_v40  ;;  %1885 = vmatpush.msrb.mxu2 %v7001_v35  ;;  %v1667_v40 = vor.u32 1.1754944e-38, %v1666_v4  ;;  %vm1665_vm15 = vcmp.eq.f32.partialorder %v1664_v30, 8.507059e+37  ;;  %v11566_v4 = vld [vmem:[#allocation163_spill] sm:$0xff] }
 0x2ef   :  { %1778 = vmatmul.f32.vlgmr.msrb.gmra.mxu0 %v7573_v14  ;;  %1818 = vmatmul.f32.vlgmr.msra.gmra.mxu2 %v7573_v14  ;;  %v7760_v30 = vld [vmem:[%s10525_s3 + $0xf8] sm:$0xff] }
 0x2f0   :  { %v3556_v27 = vpop.eup %3555  ;;  %1846 = vmatpush.msra.mxu0 %v7009_v52  ;;  %1886 = vmatpush.msrb.mxu2 %v7015_v18 }
 0x2f1   :  { %v1656_v19 = vmul.f32 %v3556_v27, %v1654_v33  ;;  %vm1661_vm12 = vweird.f32 %v3556_v27  ;;  %v11558_v33 = vld [vmem:[#allocation155_spill] sm:$0xff] }
 0x2f2   :  { %1847 = vmatpush.msra.mxu0 %v7021_v63  ;;  %1887 = vmatpush.msrb.mxu2 %v7027_v25  ;;  %vm1662_vm14 = vmor %vm1660_vm13, %vm1661_vm12  ;;  %v3558_v63 = vpop.eup %3557 }
 0x2f3   :  { %v1657_v13 = vsub.f32 1.0, %v1656_v19  ;;  %v11564_v19 = vld [vmem:[#allocation161_spill] sm:$0xff] }
 0x2f4   :  { %1848 = vmatpush.msra.mxu0 %v7033_v37  ;;  %1888 = vmatpush.msrb.mxu2 %v7039_v46 }
 0x2f5   :  { %v1658_v21 = vmul.f32 %v3556_v27, %v1657_v13  ;;  %v11565_v13 = vld [vmem:[#allocation162_spill] sm:$0xff] }
 0x2f6   :  { %1849 = vmatpush.msra.mxu0 %v7045_v62  ;;  %1889 = vmatpush.msrb.mxu2 %v7051_v9  ;;  %v11531_v62 = vld [vmem:[#allocation91_spill] sm:$0xff]  ;;  %v11532_v9 = vld [vmem:[#allocation114_spill] sm:$0xff] }
 0x2f7   :  { %v1659_v47 = vadd.f32 %v3556_v27, %v1658_v21  ;;  %v7754_v21 = vld [vmem:[%s10525_s3 + $0xf0] sm:$0xff] }
 0x2f8   :  { %1850 = vmatpush.msra.mxu0 %v7057_v48  ;;  %1890 = vmatpush.msrb.mxu2 %v7063_v17  ;;  %v11533_v48 = vld [vmem:[#allocation95_spill] sm:$0xff] }
 0x2f9   :  { %v1663_v35 = vsel %vm1662_vm14, %v3556_v27, %v1659_v47  ;;  %v11534_v17 = vld [vmem:[#allocation99_spill] sm:$0xff]  ;;  %v11563_v27 = vld [vmem:[#allocation160_spill] sm:$0xff] }
 0x2fa   :  { %v1668_v52 = vsel %vm1665_vm15, %v1667_v40, %v1663_v35  ;;  %1851 = vmatpush.msra.mxu0 %v7070_v1  ;;  %1891 = vmatpush.msrb.mxu2 %v7076_v5  ;;  %v11535_v1 = vld [vmem:[#allocation117_spill] sm:$0xff]  ;;  %v11567_v47 = vld [vmem:[#allocation164_spill] sm:$0xff]  ;;  %v7767_v40 = vld [vmem:[%s10525_s3 + $0x5d8] sm:$0xff] }
 0x2fb   :  { %v1674_v18 = vsub.f32 1.0, %v1668_v52  ;;  %v1676_v37 = vmul.f32 %v1668_v52, %v7079_v29  ;;  %v11536_v5 = vld [vmem:[#allocation121_spill] sm:$0xff]  ;;  %v7773_v35 = vld [vmem:[%s10525_s3 + $0xc0] sm:$0xff] }
 0x2fc   :  { %1852 = vmatpush.msra.mxu0 %v7084_v23  ;;  %1892 = vmatpush.msrb.mxu2 %v7090_v49  ;;  %v11537_v23 = vld [vmem:[#allocation103_spill] sm:$0xff]  ;;  %v7779_v52 = vld [vmem:[%s10525_s3 + $0xc8] sm:$0xff]  ;;  %v8038_v29 = vld [vmem:[%s10525_s3 + $0x160] sm:$0xff] }
 0x2fd   :  { %v1675_v25 = vmul.f32 %v3558_v63, %v1674_v18  ;;  %v11538_v49 = vld [vmem:[#allocation107_spill] sm:$0xff]  ;;  %v11568_v18 = vld [vmem:[#allocation165_spill] sm:$0xff]  ;;  %11601 = vst [vmem:[#allocation58_spill] sm:$0xff] %v8038_v29 }
 0x2fe   :  { %1853 = vmatpush.msra.mxu0 %v7098_v10  ;;  %1893 = vmatpush.msrb.mxu2 %v7110_v61  ;;  %v11539_v10 = vld [vmem:[#allocation126_spill] sm:$0xff]  ;;  %v11540_v61 = vld [vmem:[#allocation112_spill] sm:$0xff]  ;;  %v7786_v63 = vld [vmem:[%s10525_s3 + $0x5a8] sm:$0xff] }
 0x2ff   :  { %v7614_v46 = vadd.f32 %v1676_v37, %v1675_v25  ;;  %v7792_v25 = vld [vmem:[%s10525_s3 + $0x90] sm:$0xff]  ;;  %v7798_v37 = vld [vmem:[%s10525_s3 + $0x98] sm:$0xff] }
 0x300   :  { %1854 = vmatpush.msra.mxu0 %v11533_v48  ;;  %1894 = vmatpush.msrb.mxu2 %v11534_v17  ;;  %v7811_v48 = vld [vmem:[%s10525_s3 + $0x60] sm:$0xff]  ;;  %v7817_v17 = vld [vmem:[%s10525_s3 + $0x68] sm:$0xff] }
 0x301   :  { %11530 = vst [vmem:[#allocation37_spill] sm:$0xff] %v7614_v46  ;;  %1718 = vmatmul.f32.vlgmr.msra.gmra.mxu1 %v7614_v46  ;;  %1758 = vmatmul.f32.vlgmr.msrb.gmra.mxu3 %v7614_v46 }
 0x302   :  { %1862 = vmatpush.msra.mxu1 %v11531_v62  ;;  %1902 = vmatpush.msrb.mxu3 %v11532_v9  ;;  %v11569_v62 = vld [vmem:[#allocation166_spill] sm:$0xff]  ;;  %v7805_v9 = vld [vmem:[%s10525_s3 + $0x578] sm:$0xff] }
 0x303   :  { %1855 = vmatpush.msra.mxu0 %v11537_v23  ;;  %1895 = vmatpush.msrb.mxu2 %v11538_v49  ;;  %v7830_v23 = vld [vmem:[%s10525_s3 + $0x30] sm:$0xff]  ;;  %v7836_v49 = vld [vmem:[%s10525_s3 + $0x38] sm:$0xff] }
 0x304   :  { %1863 = vmatpush.msra.mxu1 %v11535_v1  ;;  %1903 = vmatpush.msrb.mxu3 %v11536_v5  ;;  %v11570_v1 = vld [vmem:[#allocation167_spill] sm:$0xff]  ;;  %v7824_v5 = vld [vmem:[%s10525_s3 + $0x548] sm:$0xff] }
 0x305   :  { %1856 = vmatpush.msra.mxu0 %v11541_v56  ;;  %1896 = vmatpush.msrb.mxu2 %v11542_v54  ;;  %v7849_v56 = vld [vmem:[%s10525_s3] sm:$0xff]  ;;  %v7855_v54 = vld [vmem:[%s10525_s3 + $0x8] sm:$0xff] }
 0x306   :  { %1864 = vmatpush.msra.mxu1 %v11539_v10  ;;  %1904 = vmatpush.msrb.mxu3 %v11540_v61  ;;  %v11571_v10 = vld [vmem:[#allocation168_spill] sm:$0xff]  ;;  %v7843_v61 = vld [vmem:[%s10525_s3 + $0x518] sm:$0xff] }
 0x307   :  { %1857 = vmatpush.msra.mxu0 %v7196_v39  ;;  %1897 = vmatpush.msrb.mxu2 %v11546_v59  ;;  %v7648_v39 = vld [vmem:[%s10525_s3 + $0x2d8] sm:$0xff]  ;;  %v7874_v59 = vld [vmem:[%s10525_s3 + $0x4e8] sm:$0xff] }
 0x308   :  { %1865 = vmatpush.msra.mxu1 %v11543_v7  ;;  %1905 = vmatpush.msrb.mxu3 %v11544_v58  ;;  %v7861_v7 = vld [vmem:[%s10525_s3 + $0x2e0] sm:$0xff]  ;;  %v7867_v58 = vld [vmem:[%s10525_s3 + $0x2e8] sm:$0xff] }
 0x309   :  { %1798 = vmatmul.f32.vlgmr.msrb.gmra.mxu1 %v7614_v46  ;;  %1838 = vmatmul.f32.vlgmr.msra.gmra.mxu3 %v7614_v46 }
 0x30a   :  { %1866 = vmatpush.msra.mxu1 %v11545_v55  ;;  %1906 = vmatpush.msrb.mxu3 %v11547_v43  ;;  %v11572_v55 = vld [vmem:[#allocation169_spill] sm:$0xff]  ;;  %v7880_v43 = vld [vmem:[%s10525_s3 + $0x2b0] sm:$0xff] }
 0x30b   :  { %1858 = vmatmul.f32.vlgmr.msra.gmra.mxu0 %v7573_v14  ;;  %1898 = vmatmul.f32.vlgmr.msrb.gmra.mxu2 %v7573_v14  ;;  %11573 = vst [vmem:[#allocation29_spill] sm:$0xff] %v7880_v43 }
 0x30c   :  { %1867 = vmatpush.msra.mxu1 %v11548_v20  ;;  %1907 = vmatpush.msrb.mxu3 %v11549_v42  ;;  %v7886_v20 = vld [vmem:[%s10525_s3 + $0x2b8] sm:$0xff]  ;;  %v11575_v42 = vld [vmem:[#allocation21_spill] sm:$0xff] }
 0x30d   :  { %2030 = vmatpush.msrb.mxu0 %v11550_v44  ;;  %2070 = vmatpush.msra.mxu2 %v7648_v39  ;;  %11574 = vst [vmem:[#allocation22_spill] sm:$0xff] %v7886_v20  ;;  %v7893_v44 = vld [vmem:[%s10525_s3 + $0x4b8] sm:$0xff] }
 0x30e   :  { %1868 = vmatpush.msra.mxu1 %v7241_v31  ;;  %1908 = vmatpush.msrb.mxu3 %v11551_v60  ;;  %v7666_v31 = vld [vmem:[%s10525_s3 + $0x278] sm:$0xff]  ;;  %11576 = vst [vmem:[#allocation41_spill] sm:$0xff] %v7893_v44  ;;  %v7899_v60 = vld [vmem:[%s10525_s3 + $0x280] sm:$0xff] }
 0x30f   :  { %2031 = vmatpush.msrb.mxu0 %v11552_v3  ;;  %2071 = vmatpush.msra.mxu2 %v7657_v0  ;;  %11577 = vst [vmem:[#allocation32_spill] sm:$0xff] %v7899_v60  ;;  %v7905_v3 = vld [vmem:[%s10525_s3 + $0x288] sm:$0xff] }
 0x310   :  { %1869 = vmatpush.msra.mxu1 %v7260_v50  ;;  %1909 = vmatpush.msrb.mxu3 %v11553_v24  ;;  %v7675_v50 = vld [vmem:[%s10525_s3 + $0x248] sm:$0xff]  ;;  %11578 = vst [vmem:[#allocation47_spill] sm:$0xff] %v7905_v3  ;;  %v11579_v24 = vld [vmem:[#allocation40_spill] sm:$0xff] }
 0x311   :  { %2032 = vmatpush.msrb.mxu0 %v11554_v2  ;;  %2072 = vmatpush.msra.mxu2 %v7666_v31  ;;  %v7912_v2 = vld [vmem:[%s10525_s3 + $0x488] sm:$0xff] }
 0x312   :  { %1870 = vmatpush.msra.mxu1 %v7279_v15  ;;  %1910 = vmatpush.msrb.mxu3 %v11555_v6  ;;  %v7684_v15 = vld [vmem:[%s10525_s3 + $0x218] sm:$0xff]  ;;  %11580 = vst [vmem:[#allocation30_spill] sm:$0xff] %v7912_v2  ;;  %v7918_v6 = vld [vmem:[%s10525_s3 + $0x250] sm:$0xff] }
 0x313   :  { %2033 = vmatpush.msrb.mxu0 %v11556_v8  ;;  %2073 = vmatpush.msra.mxu2 %v7675_v50  ;;  %11581 = vst [vmem:[#allocation44_spill] sm:$0xff] %v7918_v6  ;;  %v7924_v8 = vld [vmem:[%s10525_s3 + $0x258] sm:$0xff] }
 0x314   :  { %1871 = vmatpush.msra.mxu1 %v7298_v12  ;;  %1911 = vmatpush.msrb.mxu3 %v11557_v16  ;;  %v7693_v12 = vld [vmem:[%s10525_s3 + $0x1e8] sm:$0xff]  ;;  %11582 = vst [vmem:[#allocation38_spill] sm:$0xff] %v7924_v8  ;;  %v7930_v16 = vld [vmem:[%s10525_s3 + $0x450] sm:$0xff] }
 0x315   :  { %2034 = vmatpush.msrb.mxu0 %v11558_v33  ;;  %2074 = vmatpush.msra.mxu2 %v7684_v15  ;;  %11583 = vst [vmem:[#allocation49_spill] sm:$0xff] %v7930_v16  ;;  %v7936_v33 = vld [vmem:[%s10525_s3 + $0x458] sm:$0xff] }
 0x316   :  { %1872 = vmatpush.msra.mxu1 %v7317_v32  ;;  %1912 = vmatpush.msrb.mxu3 %v11559_v53  ;;  %v7702_v32 = vld [vmem:[%s10525_s3 + $0x1b8] sm:$0xff]  ;;  %11584 = vst [vmem:[#allocation33_spill] sm:$0xff] %v7936_v33  ;;  %v7942_v53 = vld [vmem:[%s10525_s3 + $0x220] sm:$0xff] }
 0x317   :  { %2035 = vmatpush.msrb.mxu0 %v11560_v26  ;;  %2075 = vmatpush.msra.mxu2 %v7693_v12  ;;  %11585 = vst [vmem:[#allocation48_spill] sm:$0xff] %v7942_v53  ;;  %v7948_v26 = vld [vmem:[%s10525_s3 + $0x228] sm:$0xff] }
 0x318   :  { %1873 = vmatpush.msra.mxu1 %v7336_v45  ;;  %1913 = vmatpush.msrb.mxu3 %v11561_v41  ;;  %v7730_v45 = vld [vmem:[%s10525_s3 + $0x158] sm:$0xff]  ;;  %11586 = vst [vmem:[#allocation42_spill] sm:$0xff] %v7948_v26  ;;  %v7954_v41 = vld [vmem:[%s10525_s3 + $0x420] sm:$0xff] }
 0x319   :  { %2036 = vmatpush.msrb.mxu0 %v7348_v22  ;;  %2076 = vmatpush.msra.mxu2 %v7702_v32  ;;  %v7716_v22 = vld [vmem:[%s10525_s3 + $0x188] sm:$0xff]  ;;  %11587 = vst [vmem:[#allocation53_spill] sm:$0xff] %v7954_v41 }
 0x31a   :  { %1874 = vmatpush.msra.mxu1 %v11562_v11  ;;  %1914 = vmatpush.msrb.mxu3 %v7361_v34  ;;  %v7724_v34 = vld [vmem:[%s10525_s3 + $0x150] sm:$0xff]  ;;  %v7960_v11 = vld [vmem:[%s10525_s3 + $0x428] sm:$0xff] }
 0x31b   :  { %2037 = vmatpush.msrb.mxu0 %v7710_v36  ;;  %2077 = vmatpush.msra.mxu2 %v7716_v22  ;;  %11588 = vst [vmem:[#allocation39_spill] sm:$0xff] %v7960_v11 }
 0x31c   :  { %1875 = vmatpush.msra.mxu1 %v7369_v57  ;;  %1915 = vmatpush.msrb.mxu3 %v7375_v51  ;;  %v7738_v51 = vld [vmem:[%s10525_s3 + $0x120] sm:$0xff]  ;;  %v7744_v57 = vld [vmem:[%s10525_s3 + $0x128] sm:$0xff] }
 0x31d   :  { %2038 = vmatpush.msrb.mxu0 %v7724_v34  ;;  %2078 = vmatpush.msra.mxu2 %v7730_v45 }
 0x31e   :  { %1876 = vmatpush.msra.mxu1 %v11563_v27  ;;  %1916 = vmatpush.msrb.mxu3 %v11564_v19  ;;  %v7966_v27 = vld [vmem:[%s10525_s3 + $0x1f0] sm:$0xff]  ;;  %v7972_v19 = vld [vmem:[%s10525_s3 + $0x1f8] sm:$0xff] }
 0x31f   :  { %2039 = vmatpush.msrb.mxu0 %v7738_v51  ;;  %2079 = vmatpush.msra.mxu2 %v7744_v57  ;;  %11589 = vst [vmem:[#allocation50_spill] sm:$0xff] %v7966_v27 }
 0x320   :  { %1877 = vmatpush.msra.mxu1 %v11565_v13  ;;  %1917 = vmatpush.msrb.mxu3 %v11566_v4  ;;  %11590 = vst [vmem:[#allocation45_spill] sm:$0xff] %v7972_v19  ;;  %v7978_v13 = vld [vmem:[%s10525_s3 + $0x3f0] sm:$0xff]  ;;  %v7984_v4 = vld [vmem:[%s10525_s3 + $0x3f8] sm:$0xff] }
 0x321   :  { %1878 = vmatmul.f32.vlgmr.msra.gmra.mxu1 %v7614_v46  ;;  %1918 = vmatmul.f32.vlgmr.msrb.gmra.mxu3 %v7614_v46  ;;  %11591 = vst [vmem:[#allocation43_spill] sm:$0xff] %v7978_v13 }
 0x322   :  { %2040 = vmatpush.msrb.mxu0 %v7754_v21  ;;  %2080 = vmatpush.msra.mxu2 %v7760_v30  ;;  %11592 = vst [vmem:[#allocation54_spill] sm:$0xff] %v7984_v4 }
 0x323   :  { %2050 = vmatpush.msrb.mxu1 %v11567_v47  ;;  %2090 = vmatpush.msra.mxu3 %v7767_v40  ;;  %v7990_v47 = vld [vmem:[%s10525_s3 + $0x1c0] sm:$0xff] }
 0x324   :  { %2041 = vmatpush.msrb.mxu0 %v7773_v35  ;;  %2081 = vmatpush.msra.mxu2 %v7779_v52  ;;  %11593 = vst [vmem:[#allocation51_spill] sm:$0xff] %v7990_v47 }
 0x325   :  { %2051 = vmatpush.msrb.mxu1 %v11568_v18  ;;  %2091 = vmatpush.msra.mxu3 %v7786_v63  ;;  %v7996_v18 = vld [vmem:[%s10525_s3 + $0x1c8] sm:$0xff] }
 0x326   :  { %2042 = vmatpush.msrb.mxu0 %v7792_v25  ;;  %2082 = vmatpush.msra.mxu2 %v7798_v37  ;;  %11594 = vst [vmem:[#allocation60_spill] sm:$0xff] %v7996_v18 }
 0x327   :  { %2052 = vmatpush.msrb.mxu1 %v11569_v62  ;;  %2092 = vmatpush.msra.mxu3 %v7805_v9  ;;  %v8002_v62 = vld [vmem:[%s10525_s3 + $0x3c0] sm:$0xff] }
 0x328   :  { %2043 = vmatpush.msrb.mxu0 %v7811_v48  ;;  %2083 = vmatpush.msra.mxu2 %v7817_v17  ;;  %11595 = vst [vmem:[#allocation46_spill] sm:$0xff] %v8002_v62 }
 0x329   :  { %2053 = vmatpush.msrb.mxu1 %v11570_v1  ;;  %2093 = vmatpush.msra.mxu3 %v7824_v5  ;;  %v8008_v1 = vld [vmem:[%s10525_s3 + $0x3c8] sm:$0xff] }
 0x32a   :  { %2044 = vmatpush.msrb.mxu0 %v7830_v23  ;;  %2084 = vmatpush.msra.mxu2 %v7836_v49  ;;  %11596 = vst [vmem:[#allocation57_spill] sm:$0xff] %v8008_v1 }
 0x32b   :  { %2054 = vmatpush.msrb.mxu1 %v11571_v10  ;;  %2094 = vmatpush.msra.mxu3 %v7843_v61  ;;  %v8014_v10 = vld [vmem:[%s10525_s3 + $0x190] sm:$0xff] }
 0x32c   :  { %2045 = vmatpush.msrb.mxu0 %v7849_v56  ;;  %2085 = vmatpush.msra.mxu2 %v7855_v54  ;;  %11597 = vst [vmem:[#allocation55_spill] sm:$0xff] %v8014_v10 }
 0x32d   :  { %2055 = vmatpush.msrb.mxu1 %v11572_v55  ;;  %2095 = vmatpush.msra.mxu3 %v7874_v59  ;;  %v8020_v55 = vld [vmem:[%s10525_s3 + $0x198] sm:$0xff] }
 0x32e   :  { %2110 = vmatpush.msra.mxu0 %v7861_v7  ;;  %2150 = vmatpush.msrb.mxu2 %v7867_v58  ;;  %11598 = vst [vmem:[#allocation62_spill] sm:$0xff] %v8020_v55 }
 0x32f   :  { %2056 = vmatpush.msrb.mxu1 %v11575_v42  ;;  %2096 = vmatpush.msra.mxu3 %v7893_v44  ;;  %v8026_v42 = vld [vmem:[%s10525_s3 + $0x390] sm:$0xff] }
 0x330   :  { %2111 = vmatpush.msra.mxu0 %v7880_v43  ;;  %2151 = vmatpush.msrb.mxu2 %v7886_v20  ;;  %11599 = vst [vmem:[#allocation52_spill] sm:$0xff] %v8026_v42 }
 0x331   :  { %2057 = vmatpush.msrb.mxu1 %v11579_v24  ;;  %2097 = vmatpush.msra.mxu3 %v7912_v2  ;;  %v8032_v24 = vld [vmem:[%s10525_s3 + $0x398] sm:$0xff] }
 0x332   :  { %2112 = vmatpush.msra.mxu0 %v7899_v60  ;;  %2152 = vmatpush.msrb.mxu2 %v7905_v3  ;;  %11600 = vst [vmem:[#allocation61_spill] sm:$0xff] %v8032_v24  ;;  %v11660_v2 = vld [vmem:[#allocation139_spill] sm:$0xff] }
 0x333   :  { %2058 = vmatpush.msrb.mxu1 %v7930_v16  ;;  %2098 = vmatpush.msra.mxu3 %v7936_v33 }
 0x334   :  { %2113 = vmatpush.msra.mxu0 %v7918_v6  ;;  %2153 = vmatpush.msrb.mxu2 %v7924_v8  ;;  %v11659_v6 = vld [vmem:[#allocation18_spill] sm:$0xff] }
 0x335   :  { %2059 = vmatpush.msrb.mxu1 %v7954_v41  ;;  %2099 = vmatpush.msra.mxu3 %v7960_v11  ;;  %v11658_v11 = vld [vmem:[#allocation133_spill] sm:$0xff] }
 0x336   :  { %2114 = vmatpush.msra.mxu0 %v7942_v53  ;;  %2154 = vmatpush.msrb.mxu2 %v7948_v26 }
 0x337   :  { %2060 = vmatpush.msrb.mxu1 %v7978_v13  ;;  %2100 = vmatpush.msra.mxu3 %v7984_v4 }
 0x338   :  { %2115 = vmatpush.msra.mxu0 %v7966_v27  ;;  %2155 = vmatpush.msrb.mxu2 %v7972_v19  ;;  %v11657_v27 = vld [vmem:[#allocation13_spill] sm:$0xff] }
 0x339   :  { %2061 = vmatpush.msrb.mxu1 %v8002_v62  ;;  %2101 = vmatpush.msra.mxu3 %v8008_v1  ;;  %v11655_v1 = vld [vmem:[#allocation26_spill] sm:$0xff]  ;;  %v11656_v62 = vld [vmem:[#allocation132_spill] sm:$0xff] }
 0x33a   :  { %2116 = vmatpush.msra.mxu0 %v7990_v47  ;;  %2156 = vmatpush.msrb.mxu2 %v7996_v18  ;;  %v170_v18 = vadd.f32 %v11656_v62, %v11655_v1  ;;  %v296_v62 = vadd.f32 %v11660_v2, %v11659_v6  ;;  %v11663_v1 = vld [vmem:[#allocation134_spill] sm:$0xff] }
 0x33b   :  { %2062 = vmatpush.msrb.mxu1 %v8026_v42  ;;  %2102 = vmatpush.msra.mxu3 %v8032_v24  ;;  %v8050_v42 = vld [vmem:[%s10525_s3 + $0x360] sm:$0xff]  ;;  %v8056_v24 = vld [vmem:[%s10525_s3 + $0x368] sm:$0xff] }
 0x33c   :  { %2117 = vmatpush.msra.mxu0 %v8014_v10  ;;  %2157 = vmatpush.msrb.mxu2 %v8020_v55  ;;  %v8044_v55 = vld [vmem:[%s10525_s3 + $0x168] sm:$0xff]  ;;  %11603 = vst [vmem:[#allocation63_spill] sm:$0xff] %v8050_v42 }
 0x33d   :  { %11602 = vst [vmem:[#allocation56_spill] sm:$0xff] %v8044_v55  ;;  %2063 = vmatpush.msrb.mxu1 %v8050_v42  ;;  %2103 = vmatpush.msra.mxu3 %v8056_v24  ;;  %v8074_v42 = vld [vmem:[%s10525_s3 + $0x330] sm:$0xff] }
 0x33e   :  { %2118 = vmatpush.msra.mxu0 %v8038_v29  ;;  %2158 = vmatpush.msrb.mxu2 %v8044_v55  ;;  %11604 = vst [vmem:[#allocation59_spill] sm:$0xff] %v8056_v24  ;;  %v8062_v29 = vld [vmem:[%s10525_s3 + $0x130] sm:$0xff]  ;;  %v8068_v55 = vld [vmem:[%s10525_s3 + $0x138] sm:$0xff] }
 0x33f   :  { %11605 = vst [vmem:[#allocation66_spill] sm:$0xff] %v8062_v29  ;;  %2064 = vmatpush.msrb.mxu1 %v8074_v42  ;;  %v8080_v24 = vld [vmem:[%s10525_s3 + $0x338] sm:$0xff] }
 0x340   :  { %2119 = vmatpush.msra.mxu0 %v8062_v29  ;;  %11606 = vst [vmem:[#allocation69_spill] sm:$0xff] %v8068_v55  ;;  %2159 = vmatpush.msrb.mxu2 %v8068_v55  ;;  %v8086_v29 = vld [vmem:[%s10525_s3 + $0x100] sm:$0xff]  ;;  %v8092_v55 = vld [vmem:[%s10525_s3 + $0x108] sm:$0xff] }
 0x341   :  { %11607 = vst [vmem:[#allocation110_spill] sm:$0xff] %v8074_v42  ;;  %2104 = vmatpush.msra.mxu3 %v8080_v24  ;;  %v8098_v42 = vld [vmem:[%s10525_s3 + $0x300] sm:$0xff] }
 0x342   :  { %11608 = vst [vmem:[#allocation74_spill] sm:$0xff] %v8080_v24  ;;  %2120 = vmatpush.msra.mxu0 %v8086_v29  ;;  %2160 = vmatpush.msrb.mxu2 %v8092_v55  ;;  %v8104_v24 = vld [vmem:[%s10525_s3 + $0x308] sm:$0xff] }
 0x343   :  { %11609 = vst [vmem:[#allocation64_spill] sm:$0xff] %v8086_v29  ;;  %2065 = vmatpush.msrb.mxu1 %v8098_v42  ;;  %2105 = vmatpush.msra.mxu3 %v8104_v24  ;;  %v8110_v29 = vld [vmem:[%s10525_s3 + $0xd0] sm:$0xff] }
 0x344   :  { %11610 = vst [vmem:[#allocation78_spill] sm:$0xff] %v8092_v55  ;;  %2121 = vmatpush.msra.mxu0 %v8110_v29  ;;  %v8116_v55 = vld [vmem:[%s10525_s3 + $0x5e0] sm:$0xff] }
 0x345   :  { %11611 = vst [vmem:[#allocation67_spill] sm:$0xff] %v8098_v42  ;;  %2130 = vmatpush.msra.mxu1 %v8116_v55  ;;  %v8122_v42 = vld [vmem:[%s10525_s3 + $0xd8] sm:$0xff] }
 0x346   :  { %11612 = vst [vmem:[#allocation82_spill] sm:$0xff] %v8104_v24  ;;  %2161 = vmatpush.msrb.mxu2 %v8122_v42  ;;  %v8128_v24 = vld [vmem:[%s10525_s3 + $0x5e8] sm:$0xff] }
 0x347   :  { %11613 = vst [vmem:[#allocation70_spill] sm:$0xff] %v8110_v29  ;;  %2170 = vmatpush.msrb.mxu3 %v8128_v24  ;;  %v8134_v29 = vld [vmem:[%s10525_s3 + $0xa0] sm:$0xff] }
 0x348   :  { %11614 = vst [vmem:[#allocation86_spill] sm:$0xff] %v8116_v55  ;;  %2122 = vmatpush.msra.mxu0 %v8134_v29  ;;  %v8140_v55 = vld [vmem:[%s10525_s3 + $0x5b0] sm:$0xff] }
 0x349   :  { %11615 = vst [vmem:[#allocation72_spill] sm:$0xff] %v8122_v42  ;;  %2131 = vmatpush.msra.mxu1 %v8140_v55  ;;  %v8146_v42 = vld [vmem:[%s10525_s3 + $0xa8] sm:$0xff] }
 0x34a   :  { %11616 = vst [vmem:[#allocation92_spill] sm:$0xff] %v8128_v24  ;;  %2162 = vmatpush.msrb.mxu2 %v8146_v42  ;;  %v8152_v24 = vld [vmem:[%s10525_s3 + $0x5b8] sm:$0xff] }
 0x34b   :  { %11617 = vst [vmem:[#allocation76_spill] sm:$0xff] %v8134_v29  ;;  %2171 = vmatpush.msrb.mxu3 %v8152_v24  ;;  %v8158_v29 = vld [vmem:[%s10525_s3 + $0x70] sm:$0xff] }
 0x34c   :  { %11618 = vst [vmem:[#allocation96_spill] sm:$0xff] %v8140_v55  ;;  %2123 = vmatpush.msra.mxu0 %v8158_v29  ;;  %v8164_v55 = vld [vmem:[%s10525_s3 + $0x580] sm:$0xff] }
 0x34d   :  { %11619 = vst [vmem:[#allocation80_spill] sm:$0xff] %v8146_v42  ;;  %2132 = vmatpush.msra.mxu1 %v8164_v55  ;;  %v8170_v42 = vld [vmem:[%s10525_s3 + $0x78] sm:$0xff] }
 0x34e   :  { %11620 = vst [vmem:[#allocation100_spill] sm:$0xff] %v8152_v24  ;;  %2163 = vmatpush.msrb.mxu2 %v8170_v42  ;;  %v8176_v24 = vld [vmem:[%s10525_s3 + $0x588] sm:$0xff] }
 0x34f   :  { %11621 = vst [vmem:[#allocation84_spill] sm:$0xff] %v8158_v29  ;;  %2172 = vmatpush.msrb.mxu3 %v8176_v24  ;;  %v8182_v29 = vld [vmem:[%s10525_s3 + $0x40] sm:$0xff] }
 0x350   :  { %11622 = vst [vmem:[#allocation104_spill] sm:$0xff] %v8164_v55  ;;  %2124 = vmatpush.msra.mxu0 %v8182_v29  ;;  %v8188_v55 = vld [vmem:[%s10525_s3 + $0x550] sm:$0xff] }
 0x351   :  { %11623 = vst [vmem:[#allocation88_spill] sm:$0xff] %v8170_v42  ;;  %2133 = vmatpush.msra.mxu1 %v8188_v55  ;;  %v8194_v42 = vld [vmem:[%s10525_s3 + $0x48] sm:$0xff] }
 0x352   :  { %11624 = vst [vmem:[#allocation108_spill] sm:$0xff] %v8176_v24  ;;  %2164 = vmatpush.msrb.mxu2 %v8194_v42  ;;  %v8200_v24 = vld [vmem:[%s10525_s3 + $0x558] sm:$0xff] }
 0x353   :  { %11625 = vst [vmem:[#allocation90_spill] sm:$0xff] %v8182_v29  ;;  %2173 = vmatpush.msrb.mxu3 %v8200_v24  ;;  %v8206_v29 = vld [vmem:[%s10525_s3 + $0x10] sm:$0xff] }
 0x354   :  { %11626 = vst [vmem:[#allocation113_spill] sm:$0xff] %v8188_v55  ;;  %2125 = vmatpush.msra.mxu0 %v8206_v29  ;;  %v8212_v55 = vld [vmem:[%s10525_s3 + $0x520] sm:$0xff] }
 0x355   :  { %11627 = vst [vmem:[#allocation94_spill] sm:$0xff] %v8194_v42  ;;  %2134 = vmatpush.msra.mxu1 %v8212_v55  ;;  %v8218_v42 = vld [vmem:[%s10525_s3 + $0x18] sm:$0xff] }
 0x356   :  { %11628 = vst [vmem:[#allocation98_spill] sm:$0xff] %v8200_v24  ;;  %2165 = vmatpush.msrb.mxu2 %v8218_v42  ;;  %v8224_v24 = vld [vmem:[%s10525_s3 + $0x528] sm:$0xff] }
 0x357   :  { %11629 = vst [vmem:[#allocation120_spill] sm:$0xff] %v8206_v29  ;;  %2174 = vmatpush.msrb.mxu3 %v8224_v24  ;;  %v8230_v29 = vld [vmem:[%s10525_s3 + $0x4f0] sm:$0xff] }
 0x358   :  { %11630 = vst [vmem:[#allocation102_spill] sm:$0xff] %v8212_v55  ;;  %2135 = vmatpush.msra.mxu1 %v8230_v29  ;;  %v8236_v55 = vld [vmem:[%s10525_s3 + $0x4f8] sm:$0xff] }
 0x359   :  { %11631 = vst [vmem:[#allocation123_spill] sm:$0xff] %v8218_v42  ;;  %2175 = vmatpush.msrb.mxu3 %v8236_v55  ;;  %v8242_v42 = vld [vmem:[%s10525_s3 + $0x4c0] sm:$0xff] }
 0x35a   :  { %11632 = vst [vmem:[#allocation106_spill] sm:$0xff] %v8224_v24  ;;  %2136 = vmatpush.msra.mxu1 %v8242_v42  ;;  %v8248_v24 = vld [vmem:[%s10525_s3 + $0x4c8] sm:$0xff] }
 0x35b   :  { %11633 = vst [vmem:[#allocation111_spill] sm:$0xff] %v8230_v29  ;;  %2176 = vmatpush.msrb.mxu3 %v8248_v24  ;;  %v8254_v29 = vld [vmem:[%s10525_s3 + $0x490] sm:$0xff] }
 0x35c   :  { %11634 = vst [vmem:[#allocation75_spill] sm:$0xff] %v8236_v55  ;;  %2137 = vmatpush.msra.mxu1 %v8254_v29  ;;  %v8260_v55 = vld [vmem:[%s10525_s3 + $0x498] sm:$0xff] }
 0x35d   :  { %11635 = vst [vmem:[#allocation65_spill] sm:$0xff] %v8242_v42  ;;  %2177 = vmatpush.msrb.mxu3 %v8260_v55  ;;  %v8266_v42 = vld [vmem:[%s10525_s3 + $0x460] sm:$0xff] }
 0x35e   :  { %11636 = vst [vmem:[#allocation115_spill] sm:$0xff] %v8248_v24  ;;  %2138 = vmatpush.msra.mxu1 %v8266_v42  ;;  %v8272_v24 = vld [vmem:[%s10525_s3 + $0x468] sm:$0xff] }
 0x35f   :  { %11637 = vst [vmem:[#allocation79_spill] sm:$0xff] %v8254_v29  ;;  %2178 = vmatpush.msrb.mxu3 %v8272_v24  ;;  %v8278_v29 = vld [vmem:[%s10525_s3 + $0x430] sm:$0xff] }
 0x360   :  { %11638 = vst [vmem:[#allocation68_spill] sm:$0xff] %v8260_v55  ;;  %2139 = vmatpush.msra.mxu1 %v8278_v29  ;;  %v8284_v55 = vld [vmem:[%s10525_s3 + $0x438] sm:$0xff] }
 0x361   :  { %11639 = vst [vmem:[#allocation118_spill] sm:$0xff] %v8266_v42  ;;  %2179 = vmatpush.msrb.mxu3 %v8284_v55  ;;  %v8290_v42 = vld [vmem:[%s10525_s3 + $0x400] sm:$0xff] }
 0x362   :  { %11640 = vst [vmem:[#allocation83_spill] sm:$0xff] %v8272_v24  ;;  %2140 = vmatpush.msra.mxu1 %v8290_v42  ;;  %v8296_v24 = vld [vmem:[%s10525_s3 + $0x408] sm:$0xff] }
 0x363   :  { %11641 = vst [vmem:[#allocation71_spill] sm:$0xff] %v8278_v29  ;;  %2180 = vmatpush.msrb.mxu3 %v8296_v24  ;;  %v8302_v29 = vld [vmem:[%s10525_s3 + $0x3d0] sm:$0xff] }
 0x364   :  { %11642 = vst [vmem:[#allocation87_spill] sm:$0xff] %v8284_v55  ;;  %2141 = vmatpush.msra.mxu1 %v8302_v29  ;;  %v8308_v55 = vld [vmem:[%s10525_s3 + $0x3d8] sm:$0xff] }
 0x365   :  { %11643 = vst [vmem:[#allocation73_spill] sm:$0xff] %v8290_v42  ;;  %2181 = vmatpush.msrb.mxu3 %v8308_v55  ;;  %v8314_v42 = vld [vmem:[%s10525_s3 + $0x3a0] sm:$0xff] }
 0x366   :  { %11644 = vst [vmem:[#allocation93_spill] sm:$0xff] %v8296_v24  ;;  %2142 = vmatpush.msra.mxu1 %v8314_v42  ;;  %v8320_v24 = vld [vmem:[%s10525_s3 + $0x3a8] sm:$0xff] }
 0x367   :  { %11645 = vst [vmem:[#allocation77_spill] sm:$0xff] %v8302_v29  ;;  %2182 = vmatpush.msrb.mxu3 %v8320_v24  ;;  %v8326_v29 = vld [vmem:[%s10525_s3 + $0x370] sm:$0xff] }
 0x368   :  { %11646 = vst [vmem:[#allocation97_spill] sm:$0xff] %v8308_v55  ;;  %2143 = vmatpush.msra.mxu1 %v8326_v29  ;;  %v8332_v55 = vld [vmem:[%s10525_s3 + $0x378] sm:$0xff] }
 0x369   :  { %11647 = vst [vmem:[#allocation81_spill] sm:$0xff] %v8314_v42  ;;  %2183 = vmatpush.msrb.mxu3 %v8332_v55  ;;  %v8338_v42 = vld [vmem:[%s10525_s3 + $0x340] sm:$0xff] }
 0x36a   :  { %11648 = vst [vmem:[#allocation101_spill] sm:$0xff] %v8320_v24  ;;  %2144 = vmatpush.msra.mxu1 %v8338_v42  ;;  %v8344_v24 = vld [vmem:[%s10525_s3 + $0x348] sm:$0xff]  ;;  %v1739_v4 = vpop.f32.mrf.mxu2 }
 0x36b   :  { %11649 = vst [vmem:[#allocation85_spill] sm:$0xff] %v8326_v29  ;;  %2184 = vmatpush.msrb.mxu3 %v8344_v24  ;;  %v8350_v29 = vld [vmem:[%s10525_s3 + $0x310] sm:$0xff] }
 0x36c   :  { %11650 = vst [vmem:[#allocation105_spill] sm:$0xff] %v8332_v55  ;;  %2145 = vmatpush.msra.mxu1 %v8350_v29  ;;  %v8356_v55 = vld [vmem:[%s10525_s3 + $0x318] sm:$0xff] }
 0x36d   :  { %11651 = vst [vmem:[#allocation89_spill] sm:$0xff] %v8338_v42  ;;  %2185 = vmatpush.msrb.mxu3 %v8356_v55  ;;  %v1699_v42 = vpop.f32.mrf.mxu0 }
 0x36e   :  { %11652 = vst [vmem:[#allocation128_spill] sm:$0xff] %v8344_v24 }
 0x36f   :  { %11653 = vst [vmem:[#allocation129_spill] sm:$0xff] %v8350_v29  ;;  %v211_v29 = vadd.f32 %v11658_v11, %v11657_v27 }
 0x370   :  { %11654 = vst [vmem:[#allocation5_spill] sm:$0xff] %v8356_v55 }
 0x372   :  { %v1819_v55 = vpop.f32.mrf.mxu2 }
 0x37e   :  { %v1719_v10 = vpop.f32.mrf.mxu1 }
 0x37f   :  { %v1720_v24 = vadd.f32 %v1719_v10, %v1699_v42 }
 0x381   :  { %v1930_v47 = vadd.f32 %v1720_v24, %v170_v18 }
 0x383   :  { %v3471_v13 = vmul.f32 -1.442695, %v1930_v47 }
 0x384   :  { %v1759_v19 = vpop.f32.mrf.mxu3 }
 0x385   :  { %3559 = vpow2.f32 %v3471_v13  ;;  %v1760_v41 = vadd.f32 %v1759_v19, %v1739_v4 }
 0x387   :  { %v1950_v26 = vadd.f32 %v1760_v41, %v211_v29  ;;  %v1799_v29 = vpop.f32.mrf.mxu1 }
 0x389   :  { %v3472_v53 = vmul.f32 -1.442695, %v1950_v26  ;;  %v1779_v26 = vpop.f32.mrf.mxu0 }
 0x38b   :  { %v3560_v33 = vpop.eup %3559  ;;  %3561 = vpow2.f32 %v3472_v53 }
 0x38c   :  { %v1934_v16 = vadd.f32 1.0, %v3560_v33  ;;  %v1839_v8 = vpop.f32.mrf.mxu3  ;;  %v1800_v33 = vadd.f32 %v1799_v29, %v1779_v26 }
 0x38d   :  { %v1840_v10 = vadd.f32 %v1839_v8, %v1819_v55 }
 0x38e   :  { %3563 = vrcp.f32 %v1934_v16  ;;  %v1946_v53 = vand.u32 2147483648, %v1934_v16  ;;  %v1944_v27 = vand.u32 2147483647, %v1934_v16  ;;  %vm1940_vm1 = vweird.f32 %v1934_v16 }
 0x38f   :  { %v1978_v18 = vadd.f32 %v1840_v10, %v296_v62 }
 0x390   :  { %v1947_v10 = vor.u32 1.1754944e-38, %v1946_v53  ;;  %vm1945_vm3 = vcmp.eq.f32.partialorder %v1944_v27, 8.507059e+37 }
 0x391   :  { %v3562_v47 = vpop.eup %3561  ;;  %v3473_v42 = vmul.f32 -1.442695, %v1978_v18 }
 0x392   :  { %v1954_v24 = vadd.f32 1.0, %v3562_v47 }
 0x393   :  { %3565 = vpow2.f32 %v3473_v42  ;;  %v11661_v42 = vld [vmem:[#allocation19_spill] sm:$0xff] }
 0x394   :  { %v3564_v11 = vpop.eup %3563  ;;  %3567 = vrcp.f32 %v1954_v24  ;;  %v1970_v6 = vadd.f32 %v11661_v42, %v1800_v33  ;;  %v1964_v53 = vand.u32 2147483647, %v1954_v24  ;;  %vm1960_vm5 = vweird.f32 %v1954_v24 }
 0x395   :  { %v1936_v19 = vmul.f32 %v3564_v11, %v1934_v16  ;;  %vm1941_vm0 = vweird.f32 %v3564_v11  ;;  %v11665_v16 = vld [vmem:[#allocation15_spill] sm:$0xff] }
 0x396   :  { %vm1942_vm2 = vmor %vm1940_vm1, %vm1941_vm0  ;;  %vm1965_vm7 = vcmp.eq.f32.partialorder %v1964_v53, 8.507059e+37 }
 0x397   :  { %v1937_v41 = vsub.f32 1.0, %v1936_v19  ;;  %v11662_v19 = vld [vmem:[#allocation36_spill] sm:$0xff] }
 0x398   :  { %v252_v3 = vadd.f32 %v11663_v1, %v11662_v19 }
 0x399   :  { %v3566_v13 = vpop.eup %3565  ;;  %v1938_v4 = vmul.f32 %v3564_v11, %v1937_v41  ;;  %v1966_v41 = vand.u32 2147483648, %v1954_v24 }
 0x39a   :  { %v3568_v2 = vpop.eup %3567  ;;  %v1982_v8 = vadd.f32 1.0, %v3566_v13  ;;  %v1859_v13 = vpop.f32.mrf.mxu0 }
 0x39b   :  { %v1956_v55 = vmul.f32 %v3568_v2, %v1954_v24  ;;  %v1939_v62 = vadd.f32 %v3564_v11, %v1938_v4  ;;  %vm1961_vm4 = vweird.f32 %v3568_v2  ;;  %v11664_v4 = vld [vmem:[#allocation16_spill] sm:$0xff] }
 0x39c   :  { %3569 = vrcp.f32 %v1982_v8  ;;  %v337_v20 = vadd.f32 %v11665_v16, %v11664_v4  ;;  %vm1962_vm6 = vmor %vm1960_vm5, %vm1961_vm4  ;;  %v1994_v16 = vand.u32 2147483648, %v1982_v8  ;;  %v1992_v24 = vand.u32 2147483647, %v1982_v8 }
 0x39d   :  { %v1957_v18 = vsub.f32 1.0, %v1956_v55  ;;  %v1943_v47 = vsel %vm1942_vm2, %v3564_v11, %v1939_v62  ;;  %v1967_v62 = vor.u32 1.1754944e-38, %v1966_v41  ;;  %vm1988_vm9 = vweird.f32 %v1982_v8 }
 0x39e   :  { %v1948_v29 = vsel %vm1945_vm3, %v1947_v10, %v1943_v47  ;;  %v1879_v44 = vpop.f32.mrf.mxu1  ;;  %vm1993_vm11 = vcmp.eq.f32.partialorder %v1992_v24, 8.507059e+37  ;;  %v8437_v24 = vld [vmem:[%s10525_s3 + $0x238] sm:$0xff] }
 0x39f   :  { %v1958_v26 = vmul.f32 %v3568_v2, %v1957_v18  ;;  %v1971_v60 = vmul.f32 %v1970_v6, %v1948_v29  ;;  %v1880_v43 = vadd.f32 %v1879_v44, %v1859_v13  ;;  %v1899_v29 = vpop.f32.mrf.mxu2 }
 0x3a1   :  { %v1959_v55 = vadd.f32 %v3568_v2, %v1958_v26  ;;  %v1972_v27 = vadd.f32 %v1971_v60, %v252_v3  ;;  %v1998_v33 = vadd.f32 %v1880_v43, %v337_v20 }
 0x3a2   :  { %v3570_v11 = vpop.eup %3569 }
 0x3a3   :  { %v1963_v1 = vsel %vm1962_vm6, %v3568_v2, %v1959_v55  ;;  %3571 = vtanh.f32 %v1972_v27  ;;  %v1984_v10 = vmul.f32 %v3570_v11, %v1982_v8  ;;  %v3474_v18 = vmul.f32 -1.442695, %v1998_v33 }
 0x3a4   :  { %v1968_v6 = vsel %vm1965_vm7, %v1967_v62, %v1963_v1  ;;  %v1919_v47 = vpop.f32.mrf.mxu3  ;;  %vm1989_vm8 = vweird.f32 %v3570_v11  ;;  %v1995_v2 = vor.u32 1.1754944e-38, %v1994_v16  ;;  %v11666_v1 = vld [vmem:[#allocation34_spill] sm:$0xff] }
 0x3a5   :  { %v1985_v42 = vsub.f32 1.0, %v1984_v10  ;;  %3573 = vpow2.f32 %v3474_v18  ;;  %v1920_v4 = vadd.f32 %v1919_v47, %v1899_v29  ;;  %v1974_v60 = vsub.f32 1.0, %v1968_v6  ;;  %vm1990_vm10 = vmor %vm1988_vm9, %vm1989_vm8  ;;  %v8405_v18 = vld [vmem:[%s10525_s3 + $0x290] sm:$0xff]  ;;  %v8423_v29 = vld [vmem:[%s10525_s3 + $0x268] sm:$0xff] }
 0x3a6   :  { %v1976_v20 = vmul.f32 %v1968_v6, %v7573_v14  ;;  %v378_v10 = vadd.f32 %v11666_v1, %v6165_v38  ;;  %v8381_v14 = vld [vmem:[%s10525_s3 + $0x2f0] sm:$0xff]  ;;  %v8411_v6 = vld [vmem:[%s10525_s3 + $0x298] sm:$0xff]  ;;  %v8473_v1 = vld [vmem:[%s10525_s3 + $0x1a8] sm:$0xff] }
 0x3a7   :  { %v1986_v44 = vmul.f32 %v3570_v11, %v1985_v42  ;;  %v2018_v13 = vadd.f32 %v7578_v28, %v1920_v4  ;;  %v8387_v28 = vld [vmem:[%s10525_s3 + $0x2f8] sm:$0xff]  ;;  %v8393_v4 = vld [vmem:[%s10525_s3 + $0x2c0] sm:$0xff] }
 0x3a8   :  { %v8417_v42 = vld [vmem:[%s10525_s3 + $0x260] sm:$0xff] }
 0x3a9   :  { %v3572_v3 = vpop.eup %3571  ;;  %v1987_v26 = vadd.f32 %v3570_v11, %v1986_v44  ;;  %v8431_v44 = vld [vmem:[%s10525_s3 + $0x230] sm:$0xff] }
 0x3aa   :  { %v1975_v43 = vmul.f32 %v3572_v3, %v1974_v60 }
 0x3ab   :  { %v1991_v41 = vsel %vm1990_vm10, %v3570_v11, %v1987_v26  ;;  %v3574_v53 = vpop.eup %3573  ;;  %v8399_v11 = vld [vmem:[%s10525_s3 + $0x2c8] sm:$0xff]  ;;  %v8443_v26 = vld [vmem:[%s10525_s3 + $0x200] sm:$0xff] }
 0x3ac   :  { %v8372_v55 = vadd.f32 %v1976_v20, %v1975_v43  ;;  %v1996_v27 = vsel %vm1993_vm11, %v1995_v2, %v1991_v41  ;;  %v2002_v33 = vadd.f32 1.0, %v3574_v53  ;;  %v8449_v43 = vld [vmem:[%s10525_s3 + $0x208] sm:$0xff]  ;;  %v8455_v41 = vld [vmem:[%s10525_s3 + $0x1d0] sm:$0xff] }
 0x3ad   :  { %v2019_v62 = vmul.f32 %v2018_v13, %v1996_v27  ;;  %v8461_v13 = vld [vmem:[%s10525_s3 + $0x1d8] sm:$0xff] }
 0x3ae   :  { %2046 = vmatmul.f32.vlgmr.msrb.gmra.mxu0 %v8372_v55  ;;  %2086 = vmatmul.f32.vlgmr.msra.gmra.mxu2 %v8372_v55  ;;  %3575 = vrcp.f32 %v2002_v33  ;;  %v2014_v3 = vand.u32 2147483648, %v2002_v33  ;;  %v2012_v2 = vand.u32 2147483647, %v2002_v33  ;;  %vm2008_vm13 = vweird.f32 %v2002_v33 }
 0x3af   :  { %2190 = vmatpush.msrb.mxu0 %v8381_v14  ;;  %2230 = vmatpush.msra.mxu2 %v8387_v28  ;;  %v2020_v8 = vadd.f32 %v2019_v62, %v378_v10  ;;  %v8467_v62 = vld [vmem:[%s10525_s3 + $0x1a0] sm:$0xff] }
 0x3b0   :  { %v2015_v27 = vor.u32 1.1754944e-38, %v2014_v3  ;;  %vm2013_vm15 = vcmp.eq.f32.partialorder %v2012_v2, 8.507059e+37 }
 0x3b1   :  { %2191 = vmatpush.msrb.mxu0 %v8393_v4  ;;  %2231 = vmatpush.msra.mxu2 %v8399_v11  ;;  %3577 = vtanh.f32 %v2020_v8 }
 0x3b3   :  { %2192 = vmatpush.msrb.mxu0 %v8405_v18  ;;  %2232 = vmatpush.msra.mxu2 %v8411_v6 }
 0x3b4   :  { %v3576_v47 = vpop.eup %3575 }
 0x3b5   :  { %2193 = vmatpush.msrb.mxu0 %v8417_v42  ;;  %2233 = vmatpush.msra.mxu2 %v8423_v29  ;;  %v2004_v16 = vmul.f32 %v3576_v47, %v2002_v33  ;;  %vm2009_vm12 = vweird.f32 %v3576_v47  ;;  %v8479_v33 = vld [vmem:[%s10525_s3 + $0x170] sm:$0xff] }
 0x3b6   :  { %2126 = vmatmul.f32.vlgmr.msra.gmra.mxu0 %v8372_v55  ;;  %2166 = vmatmul.f32.vlgmr.msrb.gmra.mxu2 %v8372_v55  ;;  %vm2010_vm14 = vmor %vm2008_vm13, %vm2009_vm12 }
 0x3b7   :  { %2194 = vmatpush.msrb.mxu0 %v8431_v44  ;;  %2234 = vmatpush.msra.mxu2 %v8437_v24  ;;  %v2005_v60 = vsub.f32 1.0, %v2004_v16  ;;  %v8485_v16 = vld [vmem:[%s10525_s3 + $0x178] sm:$0xff]  ;;  %v3578_v3 = vpop.eup %3577 }
 0x3b9   :  { %2195 = vmatpush.msrb.mxu0 %v8443_v26  ;;  %2235 = vmatpush.msra.mxu2 %v8449_v43  ;;  %v2006_v20 = vmul.f32 %v3576_v47, %v2005_v60 }
 0x3bb   :  { %2196 = vmatpush.msrb.mxu0 %v8455_v41  ;;  %2236 = vmatpush.msra.mxu2 %v8461_v13  ;;  %v2007_v53 = vadd.f32 %v3576_v47, %v2006_v20  ;;  %v8497_v20 = vld [vmem:[%s10525_s3 + $0x148] sm:$0xff] }
 0x3bd   :  { %2197 = vmatpush.msrb.mxu0 %v8467_v62  ;;  %2237 = vmatpush.msra.mxu2 %v8473_v1  ;;  %v2011_v10 = vsel %vm2010_vm14, %v3576_v47, %v2007_v53  ;;  %v8491_v47 = vld [vmem:[%s10525_s3 + $0x140] sm:$0xff] }
 0x3be   :  { %v2016_v8 = vsel %vm2013_vm15, %v2015_v27, %v2011_v10  ;;  %11667 = vst [vmem:[#allocation130_spill] sm:$0xff] %v8491_v47  ;;  %v8504_v27 = vld [vmem:[%s10525_s3 + $0x110] sm:$0xff]  ;;  %v8510_v10 = vld [vmem:[%s10525_s3 + $0x118] sm:$0xff] }
 0x3bf   :  { %2198 = vmatpush.msrb.mxu0 %v8479_v33  ;;  %2238 = vmatpush.msra.mxu2 %v8485_v16  ;;  %v2022_v60 = vsub.f32 1.0, %v2016_v8  ;;  %v2024_v53 = vmul.f32 %v2016_v8, %v7614_v46  ;;  %v8518_v8 = vld [vmem:[%s10525_s3 + $0xe0] sm:$0xff]  ;;  %v8550_v46 = vld [vmem:[%s10525_s3 + $0xb8] sm:$0xff] }
 0x3c0   :  { %11671 = vst [vmem:[#allocation114_spill] sm:$0xff] %v8550_v46 }
 0x3c1   :  { %2199 = vmatpush.msrb.mxu0 %v8491_v47  ;;  %2239 = vmatpush.msra.mxu2 %v8497_v20  ;;  %v2023_v2 = vmul.f32 %v3578_v3, %v2022_v60  ;;  %v8524_v60 = vld [vmem:[%s10525_s3 + $0xe8] sm:$0xff]  ;;  %v8532_v3 = vld [vmem:[%s10525_s3 + $0x5f0] sm:$0xff] }
 0x3c2   :  { %11668 = vst [vmem:[#allocation14_spill] sm:$0xff] %v8532_v3 }
 0x3c3   :  { %2200 = vmatpush.msrb.mxu0 %v8504_v27  ;;  %2240 = vmatpush.msra.mxu2 %v8510_v10  ;;  %v8513_v47 = vadd.f32 %v2024_v53, %v2023_v2  ;;  %v8538_v2 = vld [vmem:[%s10525_s3 + $0x5f8] sm:$0xff]  ;;  %v8544_v53 = vld [vmem:[%s10525_s3 + $0xb0] sm:$0xff] }
 0x3c4   :  { %11669 = vst [vmem:[#allocation31_spill] sm:$0xff] %v8538_v2 }
 0x3c5   :  { %2201 = vmatpush.msrb.mxu0 %v8518_v8  ;;  %2241 = vmatpush.msra.mxu2 %v8524_v60  ;;  %11670 = vst [vmem:[#allocation91_spill] sm:$0xff] %v8544_v53 }
 0x3c6   :  { %2066 = vmatmul.f32.vlgmr.msrb.gmra.mxu1 %v8513_v47  ;;  %2106 = vmatmul.f32.vlgmr.msra.gmra.mxu3 %v8513_v47 }
 0x3c7   :  { %2210 = vmatpush.msrb.mxu1 %v8532_v3  ;;  %2250 = vmatpush.msra.mxu3 %v8538_v2  ;;  %v8556_v3 = vld [vmem:[%s10525_s3 + $0x5c0] sm:$0xff]  ;;  %v8562_v2 = vld [vmem:[%s10525_s3 + $0x5c8] sm:$0xff] }
 0x3c8   :  { %2202 = vmatpush.msrb.mxu0 %v8544_v53  ;;  %2242 = vmatpush.msra.mxu2 %v8550_v46  ;;  %11672 = vst [vmem:[#allocation95_spill] sm:$0xff] %v8556_v3  ;;  %v8568_v53 = vld [vmem:[%s10525_s3 + $0x80] sm:$0xff]  ;;  %v8574_v46 = vld [vmem:[%s10525_s3 + $0x88] sm:$0xff] }
 0x3c9   :  { %2211 = vmatpush.msrb.mxu1 %v8556_v3  ;;  %11673 = vst [vmem:[#allocation99_spill] sm:$0xff] %v8562_v2  ;;  %2251 = vmatpush.msra.mxu3 %v8562_v2  ;;  %v8580_v3 = vld [vmem:[%s10525_s3 + $0x590] sm:$0xff]  ;;  %v8586_v2 = vld [vmem:[%s10525_s3 + $0x598] sm:$0xff] }
 0x3ca   :  { %11674 = vst [vmem:[#allocation117_spill] sm:$0xff] %v8568_v53  ;;  %2203 = vmatpush.msrb.mxu0 %v8568_v53  ;;  %2243 = vmatpush.msra.mxu2 %v8574_v46  ;;  %v8592_v53 = vld [vmem:[%s10525_s3 + $0x50] sm:$0xff] }
 0x3cb   :  { %11675 = vst [vmem:[#allocation121_spill] sm:$0xff] %v8574_v46  ;;  %2212 = vmatpush.msrb.mxu1 %v8580_v3  ;;  %2252 = vmatpush.msra.mxu3 %v8586_v2  ;;  %v8598_v46 = vld [vmem:[%s10525_s3 + $0x58] sm:$0xff] }
 0x3cc   :  { %11676 = vst [vmem:[#allocation103_spill] sm:$0xff] %v8580_v3  ;;  %2204 = vmatpush.msrb.mxu0 %v8592_v53  ;;  %2244 = vmatpush.msra.mxu2 %v8598_v46  ;;  %v8604_v3 = vld [vmem:[%s10525_s3 + $0x560] sm:$0xff] }
 0x3cd   :  { %11677 = vst [vmem:[#allocation107_spill] sm:$0xff] %v8586_v2  ;;  %2213 = vmatpush.msrb.mxu1 %v8604_v3  ;;  %v8610_v2 = vld [vmem:[%s10525_s3 + $0x568] sm:$0xff] }
 0x3ce   :  { %11678 = vst [vmem:[#allocation126_spill] sm:$0xff] %v8592_v53  ;;  %2253 = vmatpush.msra.mxu3 %v8610_v2  ;;  %2146 = vmatmul.f32.vlgmr.msra.gmra.mxu1 %v8513_v47  ;;  %v8636_v53 = vld [vmem:[%s10525_s3 + $0x538] sm:$0xff] }
 0x3cf   :  { %11679 = vst [vmem:[#allocation112_spill] sm:$0xff] %v8598_v46  ;;  %2186 = vmatmul.f32.vlgmr.msrb.gmra.mxu3 %v8513_v47  ;;  %v8618_v46 = vld [vmem:[%s10525_s3 + $0x20] sm:$0xff] }
 0x3d0   :  { %11680 = vst [vmem:[#allocation116_spill] sm:$0xff] %v8604_v3  ;;  %2205 = vmatpush.msrb.mxu0 %v8618_v46  ;;  %v8624_v3 = vld [vmem:[%s10525_s3 + $0x530] sm:$0xff]  ;;  %2254 = vmatpush.msra.mxu3 %v8636_v53 }
 0x3d1   :  { %11681 = vst [vmem:[#allocation124_spill] sm:$0xff] %v8610_v2  ;;  %2214 = vmatpush.msrb.mxu1 %v8624_v3  ;;  %v8630_v2 = vld [vmem:[%s10525_s3 + $0x28] sm:$0xff]  ;;  %2206 = vmatmul.f32.vlgmr.msrb.gmra.mxu0 %v8372_v55 }
 0x3d2   :  { %11682 = vst [vmem:[#allocation119_spill] sm:$0xff] %v8624_v3  ;;  %2245 = vmatpush.msra.mxu2 %v8630_v2  ;;  %v8644_v3 = vld [vmem:[%s10525_s3 + $0x500] sm:$0xff] }
 0x3d3   :  { %11683 = vst [vmem:[#allocation125_spill] sm:$0xff] %v8630_v2  ;;  %2246 = vmatmul.f32.vlgmr.msra.gmra.mxu2 %v8372_v55  ;;  %2215 = vmatpush.msrb.mxu1 %v8644_v3  ;;  %v8650_v2 = vld [vmem:[%s10525_s3 + $0x508] sm:$0xff] }
 0x3d4   :  { %11684 = vst [vmem:[#allocation142_spill] sm:$0xff] %v8636_v53  ;;  %2255 = vmatpush.msra.mxu3 %v8650_v2  ;;  %v8656_v53 = vld [vmem:[%s10525_s3 + $0x2d0] sm:$0xff]  ;;  %2416 = vmatpush.msrb.mxu2 %v7648_v39  ;;  %v8682_v39 = vld [vmem:[%s10525_s3 + $0x4a0] sm:$0xff] }
 0x3d5   :  { %11685 = vst [vmem:[#allocation143_spill] sm:$0xff] %v8644_v3  ;;  %2376 = vmatpush.msra.mxu0 %v8656_v53  ;;  %v8663_v3 = vld [vmem:[%s10525_s3 + $0x4d0] sm:$0xff] }
 0x3d6   :  { %11686 = vst [vmem:[#allocation144_spill] sm:$0xff] %v8650_v2  ;;  %2216 = vmatpush.msrb.mxu1 %v8663_v3  ;;  %v8669_v2 = vld [vmem:[%s10525_s3 + $0x4d8] sm:$0xff]  ;;  %2417 = vmatpush.msrb.mxu2 %v7657_v0  ;;  %v8701_v0 = vld [vmem:[%s10525_s3 + $0x470] sm:$0xff] }
 0x3d7   :  { %11687 = vst [vmem:[#allocation145_spill] sm:$0xff] %v8656_v53  ;;  %2256 = vmatpush.msra.mxu3 %v8669_v2  ;;  %v8675_v53 = vld [vmem:[%s10525_s3 + $0x2a0] sm:$0xff] }
 0x3d8   :  { %11688 = vst [vmem:[#allocation146_spill] sm:$0xff] %v8669_v2  ;;  %2377 = vmatpush.msra.mxu0 %v8675_v53  ;;  %2217 = vmatpush.msrb.mxu1 %v8682_v39  ;;  %v8688_v2 = vld [vmem:[%s10525_s3 + $0x4a8] sm:$0xff] }
 0x3d9   :  { %11689 = vst [vmem:[#allocation147_spill] sm:$0xff] %v8675_v53  ;;  %2257 = vmatpush.msra.mxu3 %v8688_v2  ;;  %v8694_v53 = vld [vmem:[%s10525_s3 + $0x270] sm:$0xff]  ;;  %2418 = vmatpush.msrb.mxu2 %v7666_v31  ;;  %v8720_v31 = vld [vmem:[%s10525_s3 + $0x440] sm:$0xff] }
 0x3da   :  { %11690 = vst [vmem:[#allocation148_spill] sm:$0xff] %v8688_v2  ;;  %2378 = vmatpush.msra.mxu0 %v8694_v53  ;;  %2218 = vmatpush.msrb.mxu1 %v8701_v0  ;;  %v8707_v2 = vld [vmem:[%s10525_s3 + $0x478] sm:$0xff] }
 0x3db   :  { %11691 = vst [vmem:[#allocation149_spill] sm:$0xff] %v8694_v53  ;;  %2258 = vmatpush.msra.mxu3 %v8707_v2  ;;  %v8713_v53 = vld [vmem:[%s10525_s3 + $0x240] sm:$0xff]  ;;  %2419 = vmatpush.msrb.mxu2 %v7675_v50  ;;  %v8739_v50 = vld [vmem:[%s10525_s3 + $0x410] sm:$0xff] }
 0x3dc   :  { %11692 = vst [vmem:[#allocation150_spill] sm:$0xff] %v8707_v2  ;;  %2379 = vmatpush.msra.mxu0 %v8713_v53  ;;  %2219 = vmatpush.msrb.mxu1 %v8720_v31  ;;  %v8726_v2 = vld [vmem:[%s10525_s3 + $0x448] sm:$0xff] }
 0x3dd   :  { %11693 = vst [vmem:[#allocation151_spill] sm:$0xff] %v8713_v53  ;;  %2259 = vmatpush.msra.mxu3 %v8726_v2  ;;  %v8732_v53 = vld [vmem:[%s10525_s3 + $0x210] sm:$0xff]  ;;  %2420 = vmatpush.msrb.mxu2 %v7684_v15  ;;  %v8758_v15 = vld [vmem:[%s10525_s3 + $0x3e0] sm:$0xff] }
 0x3de   :  { %11694 = vst [vmem:[#allocation152_spill] sm:$0xff] %v8726_v2  ;;  %2380 = vmatpush.msra.mxu0 %v8732_v53  ;;  %2220 = vmatpush.msrb.mxu1 %v8739_v50  ;;  %v8745_v2 = vld [vmem:[%s10525_s3 + $0x418] sm:$0xff] }
 0x3df   :  { %11695 = vst [vmem:[#allocation153_spill] sm:$0xff] %v8732_v53  ;;  %2260 = vmatpush.msra.mxu3 %v8745_v2  ;;  %v8751_v53 = vld [vmem:[%s10525_s3 + $0x1e0] sm:$0xff]  ;;  %2421 = vmatpush.msrb.mxu2 %v7693_v12  ;;  %v8777_v12 = vld [vmem:[%s10525_s3 + $0x3b0] sm:$0xff] }
 0x3e0   :  { %11696 = vst [vmem:[#allocation154_spill] sm:$0xff] %v8745_v2  ;;  %2381 = vmatpush.msra.mxu0 %v8751_v53  ;;  %2221 = vmatpush.msrb.mxu1 %v8758_v15  ;;  %v8764_v2 = vld [vmem:[%s10525_s3 + $0x3e8] sm:$0xff] }
 0x3e1   :  { %11697 = vst [vmem:[#allocation155_spill] sm:$0xff] %v8751_v53  ;;  %2261 = vmatpush.msra.mxu3 %v8764_v2  ;;  %v8770_v53 = vld [vmem:[%s10525_s3 + $0x1b0] sm:$0xff]  ;;  %2422 = vmatpush.msrb.mxu2 %v7702_v32  ;;  %v8791_v32 = vld [vmem:[%s10525_s3 + $0x380] sm:$0xff] }
 0x3e2   :  { %11698 = vst [vmem:[#allocation156_spill] sm:$0xff] %v8764_v2  ;;  %2382 = vmatpush.msra.mxu0 %v8770_v53  ;;  %2222 = vmatpush.msrb.mxu1 %v8777_v12  ;;  %v8783_v2 = vld [vmem:[%s10525_s3 + $0x3b8] sm:$0xff] }
 0x3e3   :  { %11699 = vst [vmem:[#allocation157_spill] sm:$0xff] %v8777_v12  ;;  %2262 = vmatpush.msra.mxu3 %v8783_v2  ;;  %2423 = vmatpush.msrb.mxu2 %v7716_v22  ;;  %v8797_v12 = vld [vmem:[%s10525_s3 + $0x388] sm:$0xff]  ;;  %v8811_v22 = vld [vmem:[%s10525_s3 + $0x358] sm:$0xff] }
 0x3e4   :  { %2383 = vmatpush.msra.mxu0 %v7710_v36  ;;  %2223 = vmatpush.msrb.mxu1 %v8791_v32  ;;  %v8805_v36 = vld [vmem:[%s10525_s3 + $0x350] sm:$0xff]  ;;  %11700 = vst [vmem:[#allocation158_spill] sm:$0xff] %v8811_v22 }
 0x3e5   :  { %2263 = vmatpush.msra.mxu3 %v8797_v12  ;;  %2424 = vmatpush.msrb.mxu2 %v7730_v45  ;;  %v8825_v45 = vld [vmem:[%s10525_s3 + $0x328] sm:$0xff] }
 0x3e6   :  { %2384 = vmatpush.msra.mxu0 %v7724_v34  ;;  %2224 = vmatpush.msrb.mxu1 %v8805_v36  ;;  %v8819_v34 = vld [vmem:[%s10525_s3 + $0x320] sm:$0xff]  ;;  %11702 = vst [vmem:[#allocation160_spill] sm:$0xff] %v8825_v45 }
 0x3e7   :  { %2264 = vmatpush.msra.mxu3 %v8811_v22  ;;  %2425 = vmatpush.msrb.mxu2 %v7744_v57  ;;  %11701 = vst [vmem:[#allocation159_spill] sm:$0xff] %v8819_v34  ;;  %v8844_v57 = vld [vmem:[%s10525_s3 + $0x5a0] sm:$0xff] }
 0x3e8   :  { %2385 = vmatpush.msra.mxu0 %v7738_v51  ;;  %2225 = vmatpush.msrb.mxu1 %v8819_v34  ;;  %v8835_v51 = vld [vmem:[%s10525_s3 + $0x5d0] sm:$0xff]  ;;  %11704 = vst [vmem:[#allocation162_spill] sm:$0xff] %v8844_v57 }
 0x3e9   :  { %2265 = vmatpush.msra.mxu3 %v8825_v45  ;;  %2226 = vmatmul.f32.vlgmr.msrb.gmra.mxu1 %v8513_v47  ;;  %11703 = vst [vmem:[#allocation161_spill] sm:$0xff] %v8835_v51 }
 0x3ea   :  { %2266 = vmatmul.f32.vlgmr.msra.gmra.mxu3 %v8513_v47  ;;  %2386 = vmatpush.msra.mxu0 %v7754_v21  ;;  %v8853_v21 = vld [vmem:[%s10525_s3 + $0x570] sm:$0xff] }
 0x3eb   :  { %2426 = vmatpush.msrb.mxu2 %v7760_v30  ;;  %2396 = vmatpush.msra.mxu1 %v8835_v51  ;;  %11705 = vst [vmem:[#allocation163_spill] sm:$0xff] %v8853_v21  ;;  %v8862_v30 = vld [vmem:[%s10525_s3 + $0x540] sm:$0xff]  ;;  %v11796_v51 = vld [vmem:[#allocation135_spill] sm:$0xff] }
 0x3ec   :  { %2436 = vmatpush.msrb.mxu3 %v7767_v40  ;;  %2387 = vmatpush.msra.mxu0 %v7773_v35  ;;  %11706 = vst [vmem:[#allocation164_spill] sm:$0xff] %v8862_v30  ;;  %v8871_v40 = vld [vmem:[%s10525_s3 + $0x510] sm:$0xff]  ;;  %v8882_v35 = vld [vmem:[%s10525_s3 + $0x4e0] sm:$0xff] }
 0x3ed   :  { %2427 = vmatpush.msrb.mxu2 %v7779_v52  ;;  %2397 = vmatpush.msra.mxu1 %v8844_v57  ;;  %11707 = vst [vmem:[#allocation165_spill] sm:$0xff] %v8871_v40  ;;  %v11709_v52 = vld [vmem:[#allocation29_spill] sm:$0xff]  ;;  %v11795_v57 = vld [vmem:[#allocation18_spill] sm:$0xff] }
 0x3ee   :  { %2437 = vmatpush.msrb.mxu3 %v7786_v63  ;;  %2388 = vmatpush.msra.mxu0 %v7792_v25  ;;  %11708 = vst [vmem:[#allocation166_spill] sm:$0xff] %v8882_v35  ;;  %v11710_v63 = vld [vmem:[#allocation22_spill] sm:$0xff] }
 0x3ef   :  { %2428 = vmatpush.msrb.mxu2 %v7798_v37  ;;  %2398 = vmatpush.msra.mxu1 %v8853_v21  ;;  %v8891_v25 = vld [vmem:[%s10525_s3 + $0x4b0] sm:$0xff]  ;;  %v11712_v37 = vld [vmem:[#allocation41_spill] sm:$0xff] }
 0x3f0   :  { %2438 = vmatpush.msrb.mxu3 %v7805_v9  ;;  %2389 = vmatpush.msra.mxu0 %v7811_v48  ;;  %11711 = vst [vmem:[#allocation167_spill] sm:$0xff] %v8891_v25  ;;  %v11713_v9 = vld [vmem:[#allocation32_spill] sm:$0xff]  ;;  %v11714_v48 = vld [vmem:[#allocation47_spill] sm:$0xff] }
 0x3f1   :  { %2429 = vmatpush.msrb.mxu2 %v7817_v17  ;;  %2399 = vmatpush.msra.mxu1 %v8862_v30  ;;  %v8900_v17 = vld [vmem:[%s10525_s3 + $0x480] sm:$0xff] }
 0x3f2   :  { %2439 = vmatpush.msrb.mxu3 %v7824_v5  ;;  %2390 = vmatpush.msra.mxu0 %v7830_v23  ;;  %11715 = vst [vmem:[#allocation168_spill] sm:$0xff] %v8900_v17  ;;  %v11716_v5 = vld [vmem:[#allocation30_spill] sm:$0xff]  ;;  %v11717_v23 = vld [vmem:[#allocation44_spill] sm:$0xff] }
 0x3f3   :  { %2430 = vmatpush.msrb.mxu2 %v7836_v49  ;;  %2400 = vmatpush.msra.mxu1 %v8871_v40  ;;  %v11718_v49 = vld [vmem:[#allocation38_spill] sm:$0xff] }
 0x3f4   :  { %2440 = vmatpush.msrb.mxu3 %v7843_v61  ;;  %2391 = vmatpush.msra.mxu0 %v7849_v56  ;;  %v11719_v61 = vld [vmem:[#allocation49_spill] sm:$0xff] }
 0x3f5   :  { %2431 = vmatpush.msrb.mxu2 %v7855_v54  ;;  %2401 = vmatpush.msra.mxu1 %v8882_v35  ;;  %v11720_v56 = vld [vmem:[#allocation33_spill] sm:$0xff]  ;;  %v11721_v54 = vld [vmem:[#allocation48_spill] sm:$0xff] }
 0x3f6   :  { %2456 = vmatpush.msrb.mxu0 %v7861_v7  ;;  %2441 = vmatpush.msrb.mxu3 %v7874_v59  ;;  %v11722_v7 = vld [vmem:[#allocation42_spill] sm:$0xff]  ;;  %v11724_v59 = vld [vmem:[#allocation39_spill] sm:$0xff] }
 0x3f7   :  { %2496 = vmatpush.msra.mxu2 %v7867_v58  ;;  %2402 = vmatpush.msra.mxu1 %v8891_v25  ;;  %v11723_v58 = vld [vmem:[#allocation53_spill] sm:$0xff] }
 0x3f8   :  { %2457 = vmatpush.msrb.mxu0 %v11709_v52  ;;  %2442 = vmatpush.msrb.mxu3 %v11712_v37  ;;  %v11725_v52 = vld [vmem:[#allocation50_spill] sm:$0xff]  ;;  %v11727_v37 = vld [vmem:[#allocation43_spill] sm:$0xff]  ;;  %v11793_v25 = vld [vmem:[#allocation13_spill] sm:$0xff] }
 0x3f9   :  { %2497 = vmatpush.msra.mxu2 %v11710_v63  ;;  %2403 = vmatpush.msra.mxu1 %v8900_v17  ;;  %v11726_v63 = vld [vmem:[#allocation45_spill] sm:$0xff] }
 0x3fa   :  { %2458 = vmatpush.msrb.mxu0 %v11713_v9  ;;  %2443 = vmatpush.msrb.mxu3 %v11716_v5  ;;  %v11728_v9 = vld [vmem:[#allocation54_spill] sm:$0xff]  ;;  %v11730_v5 = vld [vmem:[#allocation60_spill] sm:$0xff] }
 0x3fb   :  { %2498 = vmatpush.msra.mxu2 %v11714_v48  ;;  %2404 = vmatpush.msra.mxu1 %v11719_v61  ;;  %v11729_v48 = vld [vmem:[#allocation51_spill] sm:$0xff] }
 0x3fc   :  { %2459 = vmatpush.msrb.mxu0 %v11717_v23  ;;  %2444 = vmatpush.msrb.mxu3 %v11720_v56  ;;  %v11731_v23 = vld [vmem:[#allocation46_spill] sm:$0xff]  ;;  %v11733_v61 = vld [vmem:[#allocation55_spill] sm:$0xff] }
 0x3fd   :  { %2499 = vmatpush.msra.mxu2 %v11718_v49  ;;  %2405 = vmatpush.msra.mxu1 %v11723_v58  ;;  %v11732_v49 = vld [vmem:[#allocation57_spill] sm:$0xff]  ;;  %v11734_v56 = vld [vmem:[#allocation62_spill] sm:$0xff] }
 0x3fe   :  { %2460 = vmatpush.msrb.mxu0 %v11721_v54  ;;  %2445 = vmatpush.msrb.mxu3 %v11724_v59  ;;  %v11735_v54 = vld [vmem:[#allocation52_spill] sm:$0xff]  ;;  %v11737_v58 = vld [vmem:[#allocation58_spill] sm:$0xff] }
 0x3ff   :  { %2500 = vmatpush.msra.mxu2 %v11722_v7  ;;  %2406 = vmatpush.msra.mxu1 %v11727_v37  ;;  %v11736_v7 = vld [vmem:[#allocation61_spill] sm:$0xff]  ;;  %v11738_v59 = vld [vmem:[#allocation56_spill] sm:$0xff]  ;;  %v11741_v37 = vld [vmem:[#allocation66_spill] sm:$0xff] }
 0x400   :  { %2461 = vmatpush.msrb.mxu0 %v11725_v52  ;;  %2446 = vmatpush.msrb.mxu3 %v11728_v9  ;;  %v11739_v52 = vld [vmem:[#allocation63_spill] sm:$0xff]  ;;  %v11742_v9 = vld [vmem:[#allocation69_spill] sm:$0xff] }
 0x401   :  { %2501 = vmatpush.msra.mxu2 %v11726_v63  ;;  %2407 = vmatpush.msra.mxu1 %v11731_v23  ;;  %v11740_v63 = vld [vmem:[#allocation59_spill] sm:$0xff]  ;;  %v11745_v23 = vld [vmem:[#allocation64_spill] sm:$0xff] }
 0x402   :  { %2462 = vmatpush.msrb.mxu0 %v11729_v48  ;;  %2447 = vmatpush.msrb.mxu3 %v11732_v49  ;;  %v11743_v48 = vld [vmem:[#allocation110_spill] sm:$0xff] }
 0x403   :  { %2502 = vmatpush.msra.mxu2 %v11730_v5  ;;  %2408 = vmatpush.msra.mxu1 %v11735_v54  ;;  %v11744_v5 = vld [vmem:[#allocation74_spill] sm:$0xff] }
 0x404   :  { %2463 = vmatpush.msrb.mxu0 %v11733_v61  ;;  %2448 = vmatpush.msrb.mxu3 %v11736_v7  ;;  %v11746_v49 = vld [vmem:[#allocation78_spill] sm:$0xff]  ;;  %v11747_v61 = vld [vmem:[#allocation67_spill] sm:$0xff] }
 0x405   :  { %2503 = vmatpush.msra.mxu2 %v11734_v56  ;;  %2409 = vmatpush.msra.mxu1 %v11739_v52  ;;  %v11748_v56 = vld [vmem:[#allocation82_spill] sm:$0xff]  ;;  %v11753_v52 = vld [vmem:[#allocation76_spill] sm:$0xff] }
 0x406   :  { %2464 = vmatpush.msrb.mxu0 %v11737_v58  ;;  %2449 = vmatpush.msrb.mxu3 %v11740_v63  ;;  %v11749_v54 = vld [vmem:[#allocation70_spill] sm:$0xff]  ;;  %v11751_v58 = vld [vmem:[#allocation72_spill] sm:$0xff] }
 0x407   :  { %2504 = vmatpush.msra.mxu2 %v11738_v59  ;;  %2410 = vmatpush.msra.mxu1 %v11743_v48  ;;  %v11750_v7 = vld [vmem:[#allocation86_spill] sm:$0xff]  ;;  %v11752_v59 = vld [vmem:[#allocation92_spill] sm:$0xff] }
 0x408   :  { %2465 = vmatpush.msrb.mxu0 %v11741_v37  ;;  %2450 = vmatpush.msrb.mxu3 %v11744_v5  ;;  %v11754_v63 = vld [vmem:[#allocation96_spill] sm:$0xff] }
 0x409   :  { %2505 = vmatpush.msra.mxu2 %v11742_v9  ;;  %2411 = vmatpush.msra.mxu1 %v11747_v61  ;;  %v11755_v37 = vld [vmem:[#allocation80_spill] sm:$0xff]  ;;  %v11761_v61 = vld [vmem:[#allocation90_spill] sm:$0xff] }
 0x40a   :  { %2466 = vmatpush.msrb.mxu0 %v11745_v23  ;;  %2451 = vmatpush.msrb.mxu3 %v11748_v56  ;;  %v11756_v9 = vld [vmem:[#allocation100_spill] sm:$0xff]  ;;  %v11762_v56 = vld [vmem:[#allocation113_spill] sm:$0xff] }
 0x40b   :  { %2506 = vmatpush.msra.mxu2 %v11746_v49  ;;  %2476 = vmatpush.msrb.mxu1 %v11750_v7  ;;  %v11757_v48 = vld [vmem:[#allocation84_spill] sm:$0xff]  ;;  %v11764_v7 = vld [vmem:[#allocation98_spill] sm:$0xff] }
 0x40c   :  { %2467 = vmatpush.msrb.mxu0 %v11749_v54  ;;  %2516 = vmatpush.msra.mxu3 %v11752_v59  ;;  %v11758_v5 = vld [vmem:[#allocation104_spill] sm:$0xff]  ;;  %v11763_v54 = vld [vmem:[#allocation94_spill] sm:$0xff] }
 0x40d   :  { %2507 = vmatpush.msra.mxu2 %v11751_v58  ;;  %2477 = vmatpush.msrb.mxu1 %v11754_v63  ;;  %v11759_v23 = vld [vmem:[#allocation88_spill] sm:$0xff]  ;;  %v11766_v59 = vld [vmem:[#allocation102_spill] sm:$0xff] }
 0x40e   :  { %2468 = vmatpush.msrb.mxu0 %v11753_v52  ;;  %2517 = vmatpush.msra.mxu3 %v11756_v9  ;;  %v11760_v49 = vld [vmem:[#allocation108_spill] sm:$0xff]  ;;  %v11767_v52 = vld [vmem:[#allocation123_spill] sm:$0xff]  ;;  %v11768_v63 = vld [vmem:[#allocation106_spill] sm:$0xff] }
 0x40f   :  { %2508 = vmatpush.msra.mxu2 %v11755_v37  ;;  %2478 = vmatpush.msrb.mxu1 %v11758_v5  ;;  %v11765_v58 = vld [vmem:[#allocation120_spill] sm:$0xff]  ;;  %v11769_v37 = vld [vmem:[#allocation111_spill] sm:$0xff] }
 0x410   :  { %2469 = vmatpush.msrb.mxu0 %v11757_v48  ;;  %2518 = vmatpush.msra.mxu3 %v11760_v49  ;;  %v11770_v9 = vld [vmem:[#allocation75_spill] sm:$0xff]  ;;  %v11771_v48 = vld [vmem:[#allocation65_spill] sm:$0xff]  ;;  %v11774_v49 = vld [vmem:[#allocation68_spill] sm:$0xff] }
 0x411   :  { %2509 = vmatpush.msra.mxu2 %v11759_v23  ;;  %2479 = vmatpush.msrb.mxu1 %v11762_v56  ;;  %v11772_v5 = vld [vmem:[#allocation115_spill] sm:$0xff] }
 0x412   :  { %2470 = vmatpush.msrb.mxu0 %v11761_v61  ;;  %2519 = vmatpush.msra.mxu3 %v11764_v7  ;;  %v11773_v23 = vld [vmem:[#allocation79_spill] sm:$0xff]  ;;  %v11775_v61 = vld [vmem:[#allocation118_spill] sm:$0xff] }
 0x413   :  { %2510 = vmatpush.msra.mxu2 %v11763_v54  ;;  %2480 = vmatpush.msrb.mxu1 %v11766_v59  ;;  %v11776_v56 = vld [vmem:[#allocation83_spill] sm:$0xff]  ;;  %v11780_v59 = vld [vmem:[#allocation93_spill] sm:$0xff] }
 0x414   :  { %2471 = vmatpush.msrb.mxu0 %v11765_v58  ;;  %2520 = vmatpush.msra.mxu3 %v11768_v63  ;;  %v11777_v54 = vld [vmem:[#allocation71_spill] sm:$0xff]  ;;  %v11779_v58 = vld [vmem:[#allocation73_spill] sm:$0xff] }
 0x415   :  { %2511 = vmatpush.msra.mxu2 %v11767_v52  ;;  %2481 = vmatpush.msrb.mxu1 %v11769_v37  ;;  %v11778_v7 = vld [vmem:[#allocation87_spill] sm:$0xff]  ;;  %v11781_v52 = vld [vmem:[#allocation77_spill] sm:$0xff] }
 0x416   :  { %2521 = vmatpush.msra.mxu3 %v11770_v9  ;;  %v11782_v63 = vld [vmem:[#allocation97_spill] sm:$0xff] }
 0x417   :  { %2482 = vmatpush.msrb.mxu1 %v11771_v48  ;;  %v11783_v37 = vld [vmem:[#allocation81_spill] sm:$0xff] }
 0x418   :  { %2522 = vmatpush.msra.mxu3 %v11772_v5  ;;  %v11784_v9 = vld [vmem:[#allocation101_spill] sm:$0xff] }
 0x419   :  { %2483 = vmatpush.msrb.mxu1 %v11773_v23  ;;  %v11785_v48 = vld [vmem:[#allocation85_spill] sm:$0xff] }
 0x41a   :  { %2523 = vmatpush.msra.mxu3 %v11774_v49  ;;  %v11786_v5 = vld [vmem:[#allocation105_spill] sm:$0xff]  ;;  %v11788_v49 = vld [vmem:[#allocation128_spill] sm:$0xff] }
 0x41b   :  { %2484 = vmatpush.msrb.mxu1 %v11775_v61  ;;  %v11787_v23 = vld [vmem:[#allocation89_spill] sm:$0xff] }
 0x41c   :  { %2524 = vmatpush.msra.mxu3 %v11776_v56  ;;  %v11789_v61 = vld [vmem:[#allocation129_spill] sm:$0xff] }
 0x41d   :  { %2485 = vmatpush.msrb.mxu1 %v11777_v54  ;;  %v11790_v56 = vld [vmem:[#allocation5_spill] sm:$0xff] }
 0x41e   :  { %2525 = vmatpush.msra.mxu3 %v11778_v7 }
 0x41f   :  { %2486 = vmatpush.msrb.mxu1 %v11779_v58  ;;  %v11791_v58 = vld [vmem:[#allocation26_spill] sm:$0xff] }
 0x420   :  { %2526 = vmatpush.msra.mxu3 %v11780_v59  ;;  %v11792_v59 = vld [vmem:[#allocation136_spill] sm:$0xff] }
 0x421   :  { %2487 = vmatpush.msrb.mxu1 %v11781_v52  ;;  %v173_v52 = vadd.f32 %v11792_v59, %v11791_v58  ;;  %v293_v59 = vadd.f32 %v11796_v51, %v11795_v57 }
 0x422   :  { %2527 = vmatpush.msra.mxu3 %v11782_v63 }
 0x423   :  { %2488 = vmatpush.msrb.mxu1 %v11783_v37 }
 0x424   :  { %2528 = vmatpush.msra.mxu3 %v11784_v9 }
 0x425   :  { %2489 = vmatpush.msrb.mxu1 %v11785_v48 }
 0x426   :  { %2529 = vmatpush.msra.mxu3 %v11786_v5  ;;  %v11794_v5 = vld [vmem:[#allocation137_spill] sm:$0xff] }
 0x427   :  { %2490 = vmatpush.msrb.mxu1 %v11787_v23  ;;  %v214_v35 = vadd.f32 %v11794_v5, %v11793_v25 }
 0x428   :  { %2530 = vmatpush.msra.mxu3 %v11788_v49 }
 0x429   :  { %2491 = vmatpush.msrb.mxu1 %v11789_v61 }
 0x42a   :  { %2531 = vmatpush.msra.mxu3 %v11790_v56 }
 0x42b   :  { %v2047_v54 = vpop.f32.mrf.mxu0 }
 0x431   :  { %v2087_v9 = vpop.f32.mrf.mxu2 }
 0x439   :  { %v2167_v56 = vpop.f32.mrf.mxu2 }
 0x443   :  { %v2067_v7 = vpop.f32.mrf.mxu1 }
 0x444   :  { %v2068_v63 = vadd.f32 %v2067_v7, %v2047_v54 }
 0x446   :  { %v2276_v37 = vadd.f32 %v2068_v63, %v173_v52 }
 0x448   :  { %v3476_v17 = vmul.f32 -1.442695, %v2276_v37 }
 0x449   :  { %v2107_v48 = vpop.f32.mrf.mxu3 }
 0x44a   :  { %3579 = vpow2.f32 %v3476_v17  ;;  %v2108_v23 = vadd.f32 %v2107_v48, %v2087_v9  ;;  %v2127_v9 = vpop.f32.mrf.mxu0 }
 0x44c   :  { %v2296_v49 = vadd.f32 %v2108_v23, %v214_v35  ;;  %v2147_v35 = vpop.f32.mrf.mxu1 }
 0x44e   :  { %v3477_v40 = vmul.f32 -1.442695, %v2296_v49  ;;  %v2148_v49 = vadd.f32 %v2147_v35, %v2127_v9  ;;  %v11798_v35 = vld [vmem:[#allocation138_spill] sm:$0xff] }
 0x44f   :  { %v255_v9 = vadd.f32 %v11798_v35, %v11662_v19 }
 0x450   :  { %v3580_v61 = vpop.eup %3579  ;;  %3581 = vpow2.f32 %v3477_v40 }
 0x451   :  { %v2280_v30 = vadd.f32 1.0, %v3580_v61 }
 0x452   :  { %v2187_v21 = vpop.f32.mrf.mxu3 }
 0x453   :  { %v2188_v54 = vadd.f32 %v2187_v21, %v2167_v56  ;;  %3583 = vrcp.f32 %v2280_v30  ;;  %v2292_v40 = vand.u32 2147483648, %v2280_v30  ;;  %v2290_v25 = vand.u32 2147483647, %v2280_v30 }
 0x454   :  { %vm2286_vm1 = vweird.f32 %v2280_v30 }
 0x455   :  { %v2324_v7 = vadd.f32 %v2188_v54, %v293_v59  ;;  %v2293_v54 = vor.u32 1.1754944e-38, %v2292_v40  ;;  %vm2291_vm3 = vcmp.eq.f32.partialorder %v2290_v25, 8.507059e+37  ;;  %v2207_v40 = vpop.f32.mrf.mxu0 }
 0x456   :  { %v3582_v52 = vpop.eup %3581  ;;  %v2247_v19 = vpop.f32.mrf.mxu2 }
 0x457   :  { %v3478_v63 = vmul.f32 -1.442695, %v2324_v7  ;;  %v2300_v37 = vadd.f32 1.0, %v3582_v52 }
 0x459   :  { %3585 = vpow2.f32 %v3478_v63  ;;  %v3584_v5 = vpop.eup %3583  ;;  %v8987_v63 = vld [vmem:[%s10527_s5] ss:$0 sm:$0xff]  ;;  %vm2306_vm5 = vweird.f32 %v2300_v37 }
 0x45a   :  { %3587 = vrcp.f32 %v2300_v37  ;;  %v2282_v17 = vmul.f32 %v3584_v5, %v2280_v30  ;;  %vm2287_vm0 = vweird.f32 %v3584_v5  ;;  %11797 = vst [vmem:[#allocation169_spill] sm:$0xff] %v8987_v63  ;;  %v2312_v30 = vand.u32 2147483648, %v2300_v37 }
 0x45b   :  { %vm2288_vm2 = vmor %vm2286_vm1, %vm2287_vm0 }
 0x45c   :  { %v2283_v48 = vsub.f32 1.0, %v2282_v17  ;;  %v2316_v17 = vadd.f32 %v8987_v63, %v2148_v49  ;;  %v2313_v63 = vor.u32 1.1754944e-38, %v2312_v30 }
 0x45e   :  { %v2284_v61 = vmul.f32 %v3584_v5, %v2283_v48 }
 0x45f   :  { %v3586_v23 = vpop.eup %3585 }
 0x460   :  { %v3588_v51 = vpop.eup %3587  ;;  %v2328_v21 = vadd.f32 1.0, %v3586_v23  ;;  %v2285_v59 = vadd.f32 %v3584_v5, %v2284_v61 }
 0x461   :  { %v2302_v56 = vmul.f32 %v3588_v51, %v2300_v37  ;;  %vm2307_vm4 = vweird.f32 %v3588_v51 }
 0x462   :  { %3589 = vrcp.f32 %v2328_v21  ;;  %v2289_v52 = vsel %vm2288_vm2, %v3584_v5, %v2285_v59  ;;  %v11800_v5 = vld [vmem:[#allocation12_spill] sm:$0xff]  ;;  %v2310_v59 = vand.u32 2147483647, %v2300_v37  ;;  %vm2308_vm6 = vmor %vm2306_vm5, %vm2307_vm4  ;;  %v2338_v37 = vand.u32 2147483647, %v2328_v21 }
 0x463   :  { %v2303_v7 = vsub.f32 1.0, %v2302_v56  ;;  %v2294_v48 = vsel %vm2291_vm3, %v2293_v54, %v2289_v52  ;;  %v11799_v56 = vld [vmem:[#allocation16_spill] sm:$0xff]  ;;  %vm2334_vm9 = vweird.f32 %v2328_v21 }
 0x464   :  { %v2317_v61 = vmul.f32 %v2316_v17, %v2294_v48  ;;  %v334_v25 = vadd.f32 %v11800_v5, %v11799_v56  ;;  %vm2311_vm7 = vcmp.eq.f32.partialorder %v2310_v59, 8.507059e+37  ;;  %v2340_v5 = vand.u32 2147483648, %v2328_v21 }
 0x465   :  { %v2304_v23 = vmul.f32 %v3588_v51, %v2303_v7  ;;  %vm2339_vm11 = vcmp.eq.f32.partialorder %v2338_v37, 8.507059e+37  ;;  %v11818_v37 = vld [vmem:[#allocation125_spill] sm:$0xff] }
 0x466   :  { %v2227_v57 = vpop.f32.mrf.mxu1  ;;  %v2318_v34 = vadd.f32 %v2317_v61, %v255_v9 }
 0x467   :  { %v2228_v58 = vadd.f32 %v2227_v57, %v2207_v40  ;;  %v2305_v45 = vadd.f32 %v3588_v51, %v2304_v23 }
 0x468   :  { %v3590_v22 = vpop.eup %3589  ;;  %3591 = vtanh.f32 %v2318_v34 }
 0x469   :  { %v2344_v49 = vadd.f32 %v2228_v58, %v334_v25  ;;  %v2309_v35 = vsel %vm2308_vm6, %v3588_v51, %v2305_v45  ;;  %v2330_v54 = vmul.f32 %v3590_v22, %v2328_v21  ;;  %vm2335_vm8 = vweird.f32 %v3590_v22 }
 0x46a   :  { %v2314_v52 = vsel %vm2311_vm7, %v2313_v63, %v2309_v35  ;;  %vm2336_vm10 = vmor %vm2334_vm9, %vm2335_vm8  ;;  %v2341_v45 = vor.u32 1.1754944e-38, %v2340_v5  ;;  %v8998_v63 = vld [vmem:[%s10527_s5 + $0x1] ss:$0 sm:$0xff] }
 0x46b   :  { %v3479_v7 = vmul.f32 -1.442695, %v2344_v49  ;;  %v2331_v48 = vsub.f32 1.0, %v2330_v54  ;;  %v2320_v9 = vsub.f32 1.0, %v2314_v52  ;;  %v2322_v34 = vmul.f32 %v2314_v52, %v8372_v55  ;;  %v11801_v49 = vld [vmem:[#allocation28_spill] sm:$0xff]  ;;  %v11813_v52 = vld [vmem:[#allocation126_spill] sm:$0xff] }
 0x46c   :  { %v375_v35 = vadd.f32 %v11801_v49, %v6165_v38  ;;  %v11816_v5 = vld [vmem:[#allocation124_spill] sm:$0xff]  ;;  %v11830_v49 = vld [vmem:[#allocation153_spill] sm:$0xff] }
 0x46d   :  { %v2267_v17 = vpop.f32.mrf.mxu3  ;;  %3593 = vpow2.f32 %v3479_v7  ;;  %v2332_v57 = vmul.f32 %v3590_v22, %v2331_v48  ;;  %v11812_v7 = vld [vmem:[#allocation107_spill] sm:$0xff]  ;;  %v11815_v48 = vld [vmem:[#allocation116_spill] sm:$0xff] }
 0x46e   :  { %v2268_v56 = vadd.f32 %v2267_v17, %v2247_v19  ;;  %v3592_v23 = vpop.eup %3591  ;;  %v11814_v17 = vld [vmem:[#allocation112_spill] sm:$0xff] }
 0x46f   :  { %v2333_v61 = vadd.f32 %v3590_v22, %v2332_v57  ;;  %v2321_v58 = vmul.f32 %v3592_v23, %v2320_v9  ;;  %v11817_v57 = vld [vmem:[#allocation119_spill] sm:$0xff]  ;;  %v11819_v9 = vld [vmem:[#allocation142_spill] sm:$0xff] }
 0x470   :  { %v2364_v19 = vadd.f32 %v8998_v63, %v2268_v56  ;;  %v11820_v23 = vld [vmem:[#allocation143_spill] sm:$0xff] }
 0x471   :  { %v2337_v51 = vsel %vm2336_vm10, %v3590_v22, %v2333_v61  ;;  %v9001_v40 = vadd.f32 %v2322_v34, %v2321_v58  ;;  %v11821_v61 = vld [vmem:[#allocation144_spill] sm:$0xff]  ;;  %v11822_v58 = vld [vmem:[#allocation145_spill] sm:$0xff]  ;;  %v11823_v34 = vld [vmem:[#allocation146_spill] sm:$0xff] }
 0x472   :  { %v2342_v25 = vsel %vm2339_vm11, %v2341_v45, %v2337_v51  ;;  %v11824_v45 = vld [vmem:[#allocation147_spill] sm:$0xff]  ;;  %v9085_v51 = vld [vmem:[%s10525_s3 + $0x2a8] sm:$0xff] }
 0x473   :  { %v3594_v30 = vpop.eup %3593  ;;  %v2365_v21 = vmul.f32 %v2364_v19, %v2342_v25  ;;  %v3433_v22 = vadd.f32 %v9001_v40, %v8513_v47  ;;  %2392 = vmatmul.f32.vlgmr.msra.gmra.mxu0 %v9001_v40  ;;  %2432 = vmatmul.f32.vlgmr.msrb.gmra.mxu2 %v9001_v40  ;;  %v11825_v19 = vld [vmem:[#allocation148_spill] sm:$0xff]  ;;  %v11827_v25 = vld [vmem:[#allocation150_spill] sm:$0xff] }
 0x474   :  { %v2348_v59 = vadd.f32 1.0, %v3594_v30  ;;  %2536 = vmatpush.msra.mxu0 %v8381_v14  ;;  %2576 = vmatpush.msrb.mxu2 %v8387_v28  ;;  %v11826_v30 = vld [vmem:[#allocation149_spill] sm:$0xff] }
 0x475   :  { %3441 = vst [vmem:[%s10529_s6 + $0x20] sm:$0xff] %v3433_v22  ;;  %v2366_v56 = vadd.f32 %v2365_v21, %v375_v35  ;;  %v11829_v21 = vld [vmem:[#allocation152_spill] sm:$0xff]  ;;  %v11831_v35 = vld [vmem:[#allocation154_spill] sm:$0xff]  ;;  %v11832_v22 = vld [vmem:[#allocation155_spill] sm:$0xff] }
 0x476   :  { %3595 = vrcp.f32 %v2348_v59  ;;  %2537 = vmatpush.msra.mxu0 %v8393_v4  ;;  %2577 = vmatpush.msrb.mxu2 %v8399_v11  ;;  %v2360_v4 = vand.u32 2147483648, %v2348_v59  ;;  %vm2354_vm13 = vweird.f32 %v2348_v59 }
 0x477   :  { %3597 = vtanh.f32 %v2366_v56  ;;  %v11833_v56 = vld [vmem:[#allocation156_spill] sm:$0xff] }
 0x478   :  { %2538 = vmatpush.msra.mxu0 %v8405_v18  ;;  %2578 = vmatpush.msrb.mxu2 %v8411_v6  ;;  %v2358_v18 = vand.u32 2147483647, %v2348_v59 }
 0x47a   :  { %2539 = vmatpush.msra.mxu0 %v8417_v42  ;;  %2579 = vmatpush.msrb.mxu2 %v8423_v29  ;;  %v2361_v42 = vor.u32 1.1754944e-38, %v2360_v4  ;;  %vm2359_vm15 = vcmp.eq.f32.partialorder %v2358_v18, 8.507059e+37  ;;  %v11836_v4 = vld [vmem:[#allocation159_spill] sm:$0xff] }
 0x47b   :  { %2472 = vmatmul.f32.vlgmr.msrb.gmra.mxu0 %v9001_v40  ;;  %2512 = vmatmul.f32.vlgmr.msra.gmra.mxu2 %v9001_v40  ;;  %v9188_v18 = vld [vmem:[%s10525_s3 + $0xf8] sm:$0xff] }
 0x47c   :  { %v3596_v54 = vpop.eup %3595  ;;  %2540 = vmatpush.msra.mxu0 %v8431_v44  ;;  %2580 = vmatpush.msrb.mxu2 %v8437_v24 }
 0x47d   :  { %v2350_v14 = vmul.f32 %v3596_v54, %v2348_v59  ;;  %vm2355_vm12 = vweird.f32 %v3596_v54  ;;  %v11828_v59 = vld [vmem:[#allocation151_spill] sm:$0xff] }
 0x47e   :  { %2541 = vmatpush.msra.mxu0 %v8443_v26  ;;  %2581 = vmatpush.msrb.mxu2 %v8449_v43  ;;  %vm2356_vm14 = vmor %vm2354_vm13, %vm2355_vm12  ;;  %v3598_v26 = vpop.eup %3597  ;;  %v11802_v43 = vld [vmem:[#allocation130_spill] sm:$0xff] }
 0x47f   :  { %v2351_v28 = vsub.f32 1.0, %v2350_v14  ;;  %v9138_v14 = vld [vmem:[%s10525_s3 + $0x180] sm:$0xff] }
 0x480   :  { %2542 = vmatpush.msra.mxu0 %v8455_v41  ;;  %2582 = vmatpush.msrb.mxu2 %v8461_v13 }
 0x481   :  { %v2352_v11 = vmul.f32 %v3596_v54, %v2351_v28  ;;  %v11835_v28 = vld [vmem:[#allocation158_spill] sm:$0xff] }
 0x482   :  { %2543 = vmatpush.msra.mxu0 %v8467_v62  ;;  %2583 = vmatpush.msrb.mxu2 %v8473_v1 }
 0x483   :  { %v2353_v6 = vadd.f32 %v3596_v54, %v2352_v11  ;;  %v11837_v11 = vld [vmem:[#allocation160_spill] sm:$0xff] }
 0x484   :  { %2544 = vmatpush.msra.mxu0 %v8479_v33  ;;  %2584 = vmatpush.msrb.mxu2 %v8485_v16  ;;  %v11803_v33 = vld [vmem:[#allocation14_spill] sm:$0xff]  ;;  %v11804_v16 = vld [vmem:[#allocation31_spill] sm:$0xff] }
 0x485   :  { %v2357_v29 = vsel %vm2356_vm14, %v3596_v54, %v2353_v6  ;;  %v11834_v54 = vld [vmem:[#allocation157_spill] sm:$0xff] }
 0x486   :  { %v2362_v44 = vsel %vm2359_vm15, %v2361_v42, %v2357_v29  ;;  %2545 = vmatpush.msra.mxu0 %v11802_v43  ;;  %2585 = vmatpush.msrb.mxu2 %v8497_v20  ;;  %v11806_v20 = vld [vmem:[#allocation114_spill] sm:$0xff]  ;;  %v11838_v6 = vld [vmem:[#allocation161_spill] sm:$0xff]  ;;  %v9195_v42 = vld [vmem:[%s10525_s3 + $0x5d8] sm:$0xff] }
 0x487   :  { %v2368_v24 = vsub.f32 1.0, %v2362_v44  ;;  %v2370_v13 = vmul.f32 %v2362_v44, %v8513_v47  ;;  %v11805_v47 = vld [vmem:[#allocation91_spill] sm:$0xff]  ;;  %v9201_v29 = vld [vmem:[%s10525_s3 + $0xc0] sm:$0xff]  ;;  %v9207_v44 = vld [vmem:[%s10525_s3 + $0xc8] sm:$0xff] }
 0x488   :  { %2546 = vmatpush.msra.mxu0 %v8504_v27  ;;  %2586 = vmatpush.msrb.mxu2 %v8510_v10  ;;  %v11807_v27 = vld [vmem:[#allocation95_spill] sm:$0xff]  ;;  %v9220_v43 = vld [vmem:[%s10525_s3 + $0x90] sm:$0xff] }
 0x489   :  { %v2369_v41 = vmul.f32 %v3598_v26, %v2368_v24  ;;  %v11808_v10 = vld [vmem:[#allocation99_spill] sm:$0xff]  ;;  %v11839_v24 = vld [vmem:[#allocation162_spill] sm:$0xff]  ;;  %v9214_v26 = vld [vmem:[%s10525_s3 + $0x5a8] sm:$0xff] }
 0x48a   :  { %2547 = vmatpush.msra.mxu0 %v8518_v8  ;;  %2587 = vmatpush.msrb.mxu2 %v8524_v60  ;;  %v11810_v8 = vld [vmem:[#allocation121_spill] sm:$0xff]  ;;  %v11811_v60 = vld [vmem:[#allocation103_spill] sm:$0xff] }
 0x48b   :  { %v9037_v62 = vadd.f32 %v2370_v13, %v2369_v41  ;;  %v9226_v41 = vld [vmem:[%s10525_s3 + $0x98] sm:$0xff] }
 0x48c   :  { %2548 = vmatpush.msra.mxu0 %v11805_v47  ;;  %2588 = vmatpush.msrb.mxu2 %v11806_v20  ;;  %v11840_v13 = vld [vmem:[#allocation163_spill] sm:$0xff]  ;;  %v11841_v47 = vld [vmem:[#allocation164_spill] sm:$0xff]  ;;  %v9252_v20 = vld [vmem:[%s10525_s3 + $0x548] sm:$0xff] }
 0x48d   :  { %v3432_v1 = vadd.f32 %v9037_v62, %v8372_v55  ;;  %2412 = vmatmul.f32.vlgmr.msra.gmra.mxu1 %v9037_v62  ;;  %2452 = vmatmul.f32.vlgmr.msrb.gmra.mxu3 %v9037_v62  ;;  %v11809_v55 = vld [vmem:[#allocation117_spill] sm:$0xff] }
 0x48e   :  { %2556 = vmatpush.msra.mxu1 %v11803_v33  ;;  %2596 = vmatpush.msrb.mxu3 %v11804_v16  ;;  %v9239_v33 = vld [vmem:[%s10525_s3 + $0x60] sm:$0xff]  ;;  %v9245_v16 = vld [vmem:[%s10525_s3 + $0x68] sm:$0xff] }
 0x48f   :  { %3440 = vst [vmem:[%s10529_s6 + $0x18] sm:$0xff] %v3432_v1  ;;  %2549 = vmatpush.msra.mxu0 %v11809_v55  ;;  %2589 = vmatpush.msrb.mxu2 %v11810_v8  ;;  %v9233_v1 = vld [vmem:[%s10525_s3 + $0x578] sm:$0xff]  ;;  %v11842_v55 = vld [vmem:[#allocation165_spill] sm:$0xff] }
 0x490   :  { %2557 = vmatpush.msra.mxu1 %v11807_v27  ;;  %2597 = vmatpush.msrb.mxu3 %v11808_v10  ;;  %v9258_v27 = vld [vmem:[%s10525_s3 + $0x30] sm:$0xff]  ;;  %v9264_v10 = vld [vmem:[%s10525_s3 + $0x38] sm:$0xff] }
 0x491   :  { %2550 = vmatpush.msra.mxu0 %v11813_v52  ;;  %2590 = vmatpush.msrb.mxu2 %v11814_v17  ;;  %v9271_v8 = vld [vmem:[%s10525_s3 + $0x518] sm:$0xff]  ;;  %v9289_v52 = vld [vmem:[%s10525_s3 + $0x2e0] sm:$0xff]  ;;  %v9295_v17 = vld [vmem:[%s10525_s3 + $0x2e8] sm:$0xff] }
 0x492   :  { %2558 = vmatpush.msra.mxu1 %v11811_v60  ;;  %2598 = vmatpush.msrb.mxu3 %v11812_v7  ;;  %v9277_v60 = vld [vmem:[%s10525_s3] sm:$0xff]  ;;  %v9283_v7 = vld [vmem:[%s10525_s3 + $0x8] sm:$0xff] }
 0x493   :  { %2551 = vmatpush.msra.mxu0 %v8618_v46  ;;  %2591 = vmatpush.msrb.mxu2 %v11818_v37  ;;  %v9076_v46 = vld [vmem:[%s10525_s3 + $0x2d8] sm:$0xff] }
 0x494   :  { %2559 = vmatpush.msra.mxu1 %v11815_v48  ;;  %2599 = vmatpush.msrb.mxu3 %v11816_v5  ;;  %v11843_v48 = vld [vmem:[#allocation166_spill] sm:$0xff]  ;;  %v9302_v5 = vld [vmem:[%s10525_s3 + $0x4e8] sm:$0xff]  ;;  %v9314_v37 = vld [vmem:[%s10525_s3 + $0x2b8] sm:$0xff] }
 0x495   :  { %2492 = vmatmul.f32.vlgmr.msrb.gmra.mxu1 %v9037_v62  ;;  %2532 = vmatmul.f32.vlgmr.msra.gmra.mxu3 %v9037_v62  ;;  %11845 = vst [vmem:[#allocation40_spill] sm:$0xff] %v9314_v37 }
 0x496   :  { %2560 = vmatpush.msra.mxu1 %v11817_v57  ;;  %2600 = vmatpush.msrb.mxu3 %v11819_v9  ;;  %v9308_v57 = vld [vmem:[%s10525_s3 + $0x2b0] sm:$0xff]  ;;  %v11846_v9 = vld [vmem:[#allocation167_spill] sm:$0xff] }
 0x497   :  { %2552 = vmatmul.f32.vlgmr.msra.gmra.mxu0 %v9001_v40  ;;  %2592 = vmatmul.f32.vlgmr.msrb.gmra.mxu2 %v9001_v40  ;;  %11844 = vst [vmem:[#allocation21_spill] sm:$0xff] %v9308_v57 }
 0x498   :  { %2561 = vmatpush.msra.mxu1 %v11820_v23  ;;  %2601 = vmatpush.msrb.mxu3 %v11821_v61  ;;  %v9321_v23 = vld [vmem:[%s10525_s3 + $0x4b8] sm:$0xff]  ;;  %v9327_v61 = vld [vmem:[%s10525_s3 + $0x280] sm:$0xff] }
 0x499   :  { %2722 = vmatpush.msrb.mxu0 %v11822_v58  ;;  %2762 = vmatpush.msra.mxu2 %v9076_v46  ;;  %11847 = vst [vmem:[#allocation132_spill] sm:$0xff] %v9321_v23  ;;  %v9333_v58 = vld [vmem:[%s10525_s3 + $0x288] sm:$0xff] }
 0x49a   :  { %2562 = vmatpush.msra.mxu1 %v8663_v3  ;;  %2602 = vmatpush.msrb.mxu3 %v11823_v34  ;;  %v9094_v3 = vld [vmem:[%s10525_s3 + $0x278] sm:$0xff]  ;;  %11848 = vst [vmem:[#allocation133_spill] sm:$0xff] %v9327_v61  ;;  %v11850_v34 = vld [vmem:[#allocation168_spill] sm:$0xff] }
 0x49b   :  { %2723 = vmatpush.msrb.mxu0 %v11824_v45  ;;  %2763 = vmatpush.msra.mxu2 %v9085_v51  ;;  %11849 = vst [vmem:[#allocation139_spill] sm:$0xff] %v9333_v58  ;;  %v9340_v45 = vld [vmem:[%s10525_s3 + $0x488] sm:$0xff] }
 0x49c   :  { %2563 = vmatpush.msra.mxu1 %v8682_v39  ;;  %2603 = vmatpush.msrb.mxu3 %v11825_v19  ;;  %v9103_v39 = vld [vmem:[%s10525_s3 + $0x248] sm:$0xff]  ;;  %11851 = vst [vmem:[#allocation19_spill] sm:$0xff] %v9340_v45  ;;  %v9346_v19 = vld [vmem:[%s10525_s3 + $0x250] sm:$0xff] }
 0x49d   :  { %2724 = vmatpush.msrb.mxu0 %v11826_v30  ;;  %2764 = vmatpush.msra.mxu2 %v9094_v3  ;;  %11852 = vst [vmem:[#allocation134_spill] sm:$0xff] %v9346_v19  ;;  %v9352_v30 = vld [vmem:[%s10525_s3 + $0x258] sm:$0xff] }
 0x49e   :  { %2564 = vmatpush.msra.mxu1 %v8701_v0  ;;  %2604 = vmatpush.msrb.mxu3 %v11827_v25  ;;  %v9112_v0 = vld [vmem:[%s10525_s3 + $0x218] sm:$0xff]  ;;  %11853 = vst [vmem:[#allocation15_spill] sm:$0xff] %v9352_v30  ;;  %v9358_v25 = vld [vmem:[%s10525_s3 + $0x450] sm:$0xff] }
 0x49f   :  { %2725 = vmatpush.msrb.mxu0 %v11828_v59  ;;  %2765 = vmatpush.msra.mxu2 %v9103_v39  ;;  %11854 = vst [vmem:[#allocation34_spill] sm:$0xff] %v9358_v25  ;;  %v9364_v59 = vld [vmem:[%s10525_s3 + $0x458] sm:$0xff] }
 0x4a0   :  { %2565 = vmatpush.msra.mxu1 %v8720_v31  ;;  %2605 = vmatpush.msrb.mxu3 %v11829_v21  ;;  %v9121_v31 = vld [vmem:[%s10525_s3 + $0x1e8] sm:$0xff]  ;;  %11855 = vst [vmem:[#allocation29_spill] sm:$0xff] %v9364_v59  ;;  %v9370_v21 = vld [vmem:[%s10525_s3 + $0x220] sm:$0xff] }
 0x4a1   :  { %2726 = vmatpush.msrb.mxu0 %v11830_v49  ;;  %2766 = vmatpush.msra.mxu2 %v9112_v0  ;;  %11856 = vst [vmem:[#allocation22_spill] sm:$0xff] %v9370_v21  ;;  %v9376_v49 = vld [vmem:[%s10525_s3 + $0x228] sm:$0xff] }
 0x4a2   :  { %2566 = vmatpush.msra.mxu1 %v8739_v50  ;;  %2606 = vmatpush.msrb.mxu3 %v11831_v35  ;;  %v9130_v50 = vld [vmem:[%s10525_s3 + $0x1b8] sm:$0xff]  ;;  %11857 = vst [vmem:[#allocation41_spill] sm:$0xff] %v9376_v49  ;;  %v9382_v35 = vld [vmem:[%s10525_s3 + $0x420] sm:$0xff] }
 0x4a3   :  { %2727 = vmatpush.msrb.mxu0 %v11832_v22  ;;  %2767 = vmatpush.msra.mxu2 %v9121_v31  ;;  %11858 = vst [vmem:[#allocation32_spill] sm:$0xff] %v9382_v35  ;;  %v9388_v22 = vld [vmem:[%s10525_s3 + $0x428] sm:$0xff] }
 0x4a4   :  { %2567 = vmatpush.msra.mxu1 %v8758_v15  ;;  %2607 = vmatpush.msrb.mxu3 %v11833_v56  ;;  %v9158_v15 = vld [vmem:[%s10525_s3 + $0x158] sm:$0xff]  ;;  %11859 = vst [vmem:[#allocation47_spill] sm:$0xff] %v9388_v22  ;;  %v9394_v56 = vld [vmem:[%s10525_s3 + $0x1f0] sm:$0xff] }
 0x4a5   :  { %2728 = vmatpush.msrb.mxu0 %v8770_v53  ;;  %2768 = vmatpush.msra.mxu2 %v9130_v50  ;;  %v9144_v53 = vld [vmem:[%s10525_s3 + $0x188] sm:$0xff]  ;;  %11860 = vst [vmem:[#allocation30_spill] sm:$0xff] %v9394_v56 }
 0x4a6   :  { %2568 = vmatpush.msra.mxu1 %v11834_v54  ;;  %2608 = vmatpush.msrb.mxu3 %v8783_v2  ;;  %v9152_v2 = vld [vmem:[%s10525_s3 + $0x150] sm:$0xff]  ;;  %v9400_v54 = vld [vmem:[%s10525_s3 + $0x1f8] sm:$0xff] }
 0x4a7   :  { %2729 = vmatpush.msrb.mxu0 %v9138_v14  ;;  %2769 = vmatpush.msra.mxu2 %v9144_v53  ;;  %11861 = vst [vmem:[#allocation44_spill] sm:$0xff] %v9400_v54 }
 0x4a8   :  { %2569 = vmatpush.msra.mxu1 %v8791_v32  ;;  %2609 = vmatpush.msrb.mxu3 %v8797_v12  ;;  %v9166_v12 = vld [vmem:[%s10525_s3 + $0x120] sm:$0xff]  ;;  %v9172_v32 = vld [vmem:[%s10525_s3 + $0x128] sm:$0xff] }
 0x4a9   :  { %2730 = vmatpush.msrb.mxu0 %v9152_v2  ;;  %2770 = vmatpush.msra.mxu2 %v9158_v15 }
 0x4aa   :  { %2570 = vmatpush.msra.mxu1 %v8805_v36  ;;  %2610 = vmatpush.msrb.mxu3 %v11835_v28  ;;  %v9182_v36 = vld [vmem:[%s10525_s3 + $0xf0] sm:$0xff] }
 0x4ab   :  { %2731 = vmatpush.msrb.mxu0 %v9166_v12  ;;  %2771 = vmatpush.msra.mxu2 %v9172_v32  ;;  %v9406_v28 = vld [vmem:[%s10525_s3 + $0x3f0] sm:$0xff] }
 0x4ac   :  { %2571 = vmatpush.msra.mxu1 %v11836_v4  ;;  %2611 = vmatpush.msrb.mxu3 %v11837_v11  ;;  %11862 = vst [vmem:[#allocation38_spill] sm:$0xff] %v9406_v28  ;;  %v9412_v4 = vld [vmem:[%s10525_s3 + $0x3f8] sm:$0xff]  ;;  %v9418_v11 = vld [vmem:[%s10525_s3 + $0x1c0] sm:$0xff] }
 0x4ad   :  { %2572 = vmatmul.f32.vlgmr.msra.gmra.mxu1 %v9037_v62  ;;  %2612 = vmatmul.f32.vlgmr.msrb.gmra.mxu3 %v9037_v62  ;;  %11863 = vst [vmem:[#allocation49_spill] sm:$0xff] %v9412_v4 }
 0x4ae   :  { %2732 = vmatpush.msrb.mxu0 %v9182_v36  ;;  %2772 = vmatpush.msra.mxu2 %v9188_v18  ;;  %11864 = vst [vmem:[#allocation33_spill] sm:$0xff] %v9418_v11 }
 0x4af   :  { %2742 = vmatpush.msrb.mxu1 %v11838_v6  ;;  %2782 = vmatpush.msra.mxu3 %v9195_v42  ;;  %v9424_v6 = vld [vmem:[%s10525_s3 + $0x1c8] sm:$0xff] }
 0x4b0   :  { %2733 = vmatpush.msrb.mxu0 %v9201_v29  ;;  %2773 = vmatpush.msra.mxu2 %v9207_v44  ;;  %11865 = vst [vmem:[#allocation48_spill] sm:$0xff] %v9424_v6 }
 0x4b1   :  { %2743 = vmatpush.msrb.mxu1 %v11839_v24  ;;  %2783 = vmatpush.msra.mxu3 %v9214_v26  ;;  %v9430_v24 = vld [vmem:[%s10525_s3 + $0x3c0] sm:$0xff] }
 0x4b2   :  { %2734 = vmatpush.msrb.mxu0 %v9220_v43  ;;  %2774 = vmatpush.msra.mxu2 %v9226_v41  ;;  %11866 = vst [vmem:[#allocation42_spill] sm:$0xff] %v9430_v24 }
 0x4b3   :  { %2744 = vmatpush.msrb.mxu1 %v11840_v13  ;;  %2784 = vmatpush.msra.mxu3 %v9233_v1  ;;  %v9436_v13 = vld [vmem:[%s10525_s3 + $0x3c8] sm:$0xff] }
 0x4b4   :  { %2735 = vmatpush.msrb.mxu0 %v9239_v33  ;;  %2775 = vmatpush.msra.mxu2 %v9245_v16  ;;  %11867 = vst [vmem:[#allocation53_spill] sm:$0xff] %v9436_v13 }
 0x4b5   :  { %2745 = vmatpush.msrb.mxu1 %v11841_v47  ;;  %2785 = vmatpush.msra.mxu3 %v9252_v20  ;;  %v9442_v47 = vld [vmem:[%s10525_s3 + $0x190] sm:$0xff] }
 0x4b6   :  { %2736 = vmatpush.msrb.mxu0 %v9258_v27  ;;  %2776 = vmatpush.msra.mxu2 %v9264_v10  ;;  %11868 = vst [vmem:[#allocation39_spill] sm:$0xff] %v9442_v47 }
 0x4b7   :  { %2746 = vmatpush.msrb.mxu1 %v11842_v55  ;;  %2786 = vmatpush.msra.mxu3 %v9271_v8  ;;  %v9448_v55 = vld [vmem:[%s10525_s3 + $0x198] sm:$0xff] }
 0x4b8   :  { %2737 = vmatpush.msrb.mxu0 %v9277_v60  ;;  %2777 = vmatpush.msra.mxu2 %v9283_v7  ;;  %11869 = vst [vmem:[#allocation50_spill] sm:$0xff] %v9448_v55 }
 0x4b9   :  { %2747 = vmatpush.msrb.mxu1 %v11843_v48  ;;  %2787 = vmatpush.msra.mxu3 %v9302_v5  ;;  %v9454_v48 = vld [vmem:[%s10525_s3 + $0x390] sm:$0xff] }
 0x4ba   :  { %2802 = vmatpush.msra.mxu0 %v9289_v52  ;;  %2842 = vmatpush.msrb.mxu2 %v9295_v17  ;;  %11870 = vst [vmem:[#allocation45_spill] sm:$0xff] %v9454_v48 }
 0x4bb   :  { %2748 = vmatpush.msrb.mxu1 %v11846_v9  ;;  %2788 = vmatpush.msra.mxu3 %v9321_v23  ;;  %v9460_v9 = vld [vmem:[%s10525_s3 + $0x398] sm:$0xff] }
 0x4bc   :  { %2803 = vmatpush.msra.mxu0 %v9308_v57  ;;  %2843 = vmatpush.msrb.mxu2 %v9314_v37  ;;  %11871 = vst [vmem:[#allocation43_spill] sm:$0xff] %v9460_v9 }
 0x4bd   :  { %2749 = vmatpush.msrb.mxu1 %v11850_v34  ;;  %2789 = vmatpush.msra.mxu3 %v9340_v45  ;;  %v9466_v34 = vld [vmem:[%s10525_s3 + $0x160] sm:$0xff]  ;;  %v11931_v45 = vld [vmem:[#allocation131_spill] sm:$0xff] }
 0x4be   :  { %2804 = vmatpush.msra.mxu0 %v9327_v61  ;;  %2844 = vmatpush.msrb.mxu2 %v9333_v58  ;;  %11872 = vst [vmem:[#allocation54_spill] sm:$0xff] %v9466_v34 }
 0x4bf   :  { %2750 = vmatpush.msrb.mxu1 %v9358_v25  ;;  %2790 = vmatpush.msra.mxu3 %v9364_v59 }
 0x4c0   :  { %2805 = vmatpush.msra.mxu0 %v9346_v19  ;;  %2845 = vmatpush.msrb.mxu2 %v9352_v30  ;;  %v11930_v19 = vld [vmem:[#allocation18_spill] sm:$0xff] }
 0x4c1   :  { %2751 = vmatpush.msrb.mxu1 %v9382_v35  ;;  %2791 = vmatpush.msra.mxu3 %v9388_v22  ;;  %v11929_v22 = vld [vmem:[#allocation141_spill] sm:$0xff] }
 0x4c2   :  { %2806 = vmatpush.msra.mxu0 %v9370_v21  ;;  %2846 = vmatpush.msrb.mxu2 %v9376_v49 }
 0x4c3   :  { %2752 = vmatpush.msrb.mxu1 %v9406_v28  ;;  %2792 = vmatpush.msra.mxu3 %v9412_v4 }
 0x4c4   :  { %2807 = vmatpush.msra.mxu0 %v9394_v56  ;;  %2847 = vmatpush.msrb.mxu2 %v9400_v54  ;;  %v11928_v56 = vld [vmem:[#allocation13_spill] sm:$0xff] }
 0x4c5   :  { %2753 = vmatpush.msrb.mxu1 %v9430_v24  ;;  %2793 = vmatpush.msra.mxu3 %v9436_v13  ;;  %v11926_v13 = vld [vmem:[#allocation26_spill] sm:$0xff]  ;;  %v11927_v24 = vld [vmem:[#allocation140_spill] sm:$0xff] }
 0x4c6   :  { %2808 = vmatpush.msra.mxu0 %v9418_v11  ;;  %2848 = vmatpush.msrb.mxu2 %v9424_v6  ;;  %v176_v6 = vadd.f32 %v11927_v24, %v11926_v13  ;;  %v290_v24 = vadd.f32 %v11931_v45, %v11930_v19  ;;  %v11934_v13 = vld [vmem:[#allocation4_spill] sm:$0xff] }
 0x4c7   :  { %2754 = vmatpush.msrb.mxu1 %v9454_v48  ;;  %2794 = vmatpush.msra.mxu3 %v9460_v9  ;;  %v9478_v48 = vld [vmem:[%s10525_s3 + $0x360] sm:$0xff]  ;;  %v9484_v9 = vld [vmem:[%s10525_s3 + $0x368] sm:$0xff] }
 0x4c8   :  { %2809 = vmatpush.msra.mxu0 %v9442_v47  ;;  %2849 = vmatpush.msrb.mxu2 %v9448_v55  ;;  %v9472_v55 = vld [vmem:[%s10525_s3 + $0x168] sm:$0xff]  ;;  %11874 = vst [vmem:[#allocation60_spill] sm:$0xff] %v9478_v48 }
 0x4c9   :  { %11873 = vst [vmem:[#allocation51_spill] sm:$0xff] %v9472_v55  ;;  %2755 = vmatpush.msrb.mxu1 %v9478_v48  ;;  %2795 = vmatpush.msra.mxu3 %v9484_v9  ;;  %v9502_v48 = vld [vmem:[%s10525_s3 + $0x330] sm:$0xff] }
 0x4ca   :  { %2810 = vmatpush.msra.mxu0 %v9466_v34  ;;  %2850 = vmatpush.msrb.mxu2 %v9472_v55  ;;  %11875 = vst [vmem:[#allocation46_spill] sm:$0xff] %v9484_v9  ;;  %v9490_v34 = vld [vmem:[%s10525_s3 + $0x130] sm:$0xff]  ;;  %v9496_v55 = vld [vmem:[%s10525_s3 + $0x138] sm:$0xff] }
 0x4cb   :  { %11876 = vst [vmem:[#allocation57_spill] sm:$0xff] %v9490_v34  ;;  %2756 = vmatpush.msrb.mxu1 %v9502_v48  ;;  %v9508_v9 = vld [vmem:[%s10525_s3 + $0x338] sm:$0xff] }
 0x4cc   :  { %2811 = vmatpush.msra.mxu0 %v9490_v34  ;;  %11877 = vst [vmem:[#allocation55_spill] sm:$0xff] %v9496_v55  ;;  %2851 = vmatpush.msrb.mxu2 %v9496_v55  ;;  %v9514_v34 = vld [vmem:[%s10525_s3 + $0x100] sm:$0xff]  ;;  %v9520_v55 = vld [vmem:[%s10525_s3 + $0x108] sm:$0xff] }
 0x4cd   :  { %11878 = vst [vmem:[#allocation62_spill] sm:$0xff] %v9502_v48  ;;  %2796 = vmatpush.msra.mxu3 %v9508_v9  ;;  %v9526_v48 = vld [vmem:[%s10525_s3 + $0x300] sm:$0xff] }
 0x4ce   :  { %11879 = vst [vmem:[#allocation52_spill] sm:$0xff] %v9508_v9  ;;  %2812 = vmatpush.msra.mxu0 %v9514_v34  ;;  %2852 = vmatpush.msrb.mxu2 %v9520_v55  ;;  %v9532_v9 = vld [vmem:[%s10525_s3 + $0x308] sm:$0xff] }
 0x4cf   :  { %11880 = vst [vmem:[#allocation61_spill] sm:$0xff] %v9514_v34  ;;  %2757 = vmatpush.msrb.mxu1 %v9526_v48  ;;  %2797 = vmatpush.msra.mxu3 %v9532_v9  ;;  %v9538_v34 = vld [vmem:[%s10525_s3 + $0xd0] sm:$0xff] }
 0x4d0   :  { %11881 = vst [vmem:[#allocation58_spill] sm:$0xff] %v9520_v55  ;;  %2813 = vmatpush.msra.mxu0 %v9538_v34  ;;  %v9544_v55 = vld [vmem:[%s10525_s3 + $0x5e0] sm:$0xff] }
 0x4d1   :  { %11882 = vst [vmem:[#allocation56_spill] sm:$0xff] %v9526_v48  ;;  %2822 = vmatpush.msra.mxu1 %v9544_v55  ;;  %v9550_v48 = vld [vmem:[%s10525_s3 + $0xd8] sm:$0xff] }
 0x4d2   :  { %11883 = vst [vmem:[#allocation63_spill] sm:$0xff] %v9532_v9  ;;  %2853 = vmatpush.msrb.mxu2 %v9550_v48  ;;  %v9556_v9 = vld [vmem:[%s10525_s3 + $0x5e8] sm:$0xff] }
 0x4d3   :  { %11884 = vst [vmem:[#allocation59_spill] sm:$0xff] %v9538_v34  ;;  %2862 = vmatpush.msrb.mxu3 %v9556_v9  ;;  %v9562_v34 = vld [vmem:[%s10525_s3 + $0xa0] sm:$0xff] }
 0x4d4   :  { %11885 = vst [vmem:[#allocation66_spill] sm:$0xff] %v9544_v55  ;;  %2814 = vmatpush.msra.mxu0 %v9562_v34  ;;  %v9568_v55 = vld [vmem:[%s10525_s3 + $0x5b0] sm:$0xff] }
 0x4d5   :  { %11886 = vst [vmem:[#allocation69_spill] sm:$0xff] %v9550_v48  ;;  %2823 = vmatpush.msra.mxu1 %v9568_v55  ;;  %v9574_v48 = vld [vmem:[%s10525_s3 + $0xa8] sm:$0xff] }
 0x4d6   :  { %11887 = vst [vmem:[#allocation110_spill] sm:$0xff] %v9556_v9  ;;  %2854 = vmatpush.msrb.mxu2 %v9574_v48  ;;  %v9580_v9 = vld [vmem:[%s10525_s3 + $0x5b8] sm:$0xff] }
 0x4d7   :  { %11888 = vst [vmem:[#allocation74_spill] sm:$0xff] %v9562_v34  ;;  %2863 = vmatpush.msrb.mxu3 %v9580_v9  ;;  %v9586_v34 = vld [vmem:[%s10525_s3 + $0x70] sm:$0xff] }
 0x4d8   :  { %11889 = vst [vmem:[#allocation64_spill] sm:$0xff] %v9568_v55  ;;  %2815 = vmatpush.msra.mxu0 %v9586_v34  ;;  %v9592_v55 = vld [vmem:[%s10525_s3 + $0x580] sm:$0xff] }
 0x4d9   :  { %11890 = vst [vmem:[#allocation78_spill] sm:$0xff] %v9574_v48  ;;  %2824 = vmatpush.msra.mxu1 %v9592_v55  ;;  %v9598_v48 = vld [vmem:[%s10525_s3 + $0x78] sm:$0xff] }
 0x4da   :  { %11891 = vst [vmem:[#allocation67_spill] sm:$0xff] %v9580_v9  ;;  %2855 = vmatpush.msrb.mxu2 %v9598_v48  ;;  %v9604_v9 = vld [vmem:[%s10525_s3 + $0x588] sm:$0xff] }
 0x4db   :  { %11892 = vst [vmem:[#allocation82_spill] sm:$0xff] %v9586_v34  ;;  %2864 = vmatpush.msrb.mxu3 %v9604_v9  ;;  %v9610_v34 = vld [vmem:[%s10525_s3 + $0x40] sm:$0xff] }
 0x4dc   :  { %11893 = vst [vmem:[#allocation70_spill] sm:$0xff] %v9592_v55  ;;  %2816 = vmatpush.msra.mxu0 %v9610_v34  ;;  %v9616_v55 = vld [vmem:[%s10525_s3 + $0x550] sm:$0xff] }
 0x4dd   :  { %11894 = vst [vmem:[#allocation86_spill] sm:$0xff] %v9598_v48  ;;  %2825 = vmatpush.msra.mxu1 %v9616_v55  ;;  %v9622_v48 = vld [vmem:[%s10525_s3 + $0x48] sm:$0xff] }
 0x4de   :  { %11895 = vst [vmem:[#allocation72_spill] sm:$0xff] %v9604_v9  ;;  %2856 = vmatpush.msrb.mxu2 %v9622_v48  ;;  %v9628_v9 = vld [vmem:[%s10525_s3 + $0x558] sm:$0xff] }
 0x4df   :  { %11896 = vst [vmem:[#allocation92_spill] sm:$0xff] %v9610_v34  ;;  %2865 = vmatpush.msrb.mxu3 %v9628_v9  ;;  %v9634_v34 = vld [vmem:[%s10525_s3 + $0x10] sm:$0xff] }
 0x4e0   :  { %11897 = vst [vmem:[#allocation76_spill] sm:$0xff] %v9616_v55  ;;  %2817 = vmatpush.msra.mxu0 %v9634_v34  ;;  %v9640_v55 = vld [vmem:[%s10525_s3 + $0x520] sm:$0xff] }
 0x4e1   :  { %11898 = vst [vmem:[#allocation96_spill] sm:$0xff] %v9622_v48  ;;  %2826 = vmatpush.msra.mxu1 %v9640_v55  ;;  %v9646_v48 = vld [vmem:[%s10525_s3 + $0x18] sm:$0xff] }
 0x4e2   :  { %11899 = vst [vmem:[#allocation80_spill] sm:$0xff] %v9628_v9  ;;  %2857 = vmatpush.msrb.mxu2 %v9646_v48  ;;  %v9652_v9 = vld [vmem:[%s10525_s3 + $0x528] sm:$0xff] }
 0x4e3   :  { %11900 = vst [vmem:[#allocation100_spill] sm:$0xff] %v9634_v34  ;;  %2866 = vmatpush.msrb.mxu3 %v9652_v9  ;;  %v9658_v34 = vld [vmem:[%s10525_s3 + $0x4f0] sm:$0xff] }
 0x4e4   :  { %11901 = vst [vmem:[#allocation84_spill] sm:$0xff] %v9640_v55  ;;  %2827 = vmatpush.msra.mxu1 %v9658_v34  ;;  %v9664_v55 = vld [vmem:[%s10525_s3 + $0x4f8] sm:$0xff] }
 0x4e5   :  { %11902 = vst [vmem:[#allocation104_spill] sm:$0xff] %v9646_v48  ;;  %2867 = vmatpush.msrb.mxu3 %v9664_v55  ;;  %v9670_v48 = vld [vmem:[%s10525_s3 + $0x4c0] sm:$0xff] }
 0x4e6   :  { %11903 = vst [vmem:[#allocation88_spill] sm:$0xff] %v9652_v9  ;;  %2828 = vmatpush.msra.mxu1 %v9670_v48  ;;  %v9676_v9 = vld [vmem:[%s10525_s3 + $0x4c8] sm:$0xff] }
 0x4e7   :  { %11904 = vst [vmem:[#allocation108_spill] sm:$0xff] %v9658_v34  ;;  %2868 = vmatpush.msrb.mxu3 %v9676_v9  ;;  %v9682_v34 = vld [vmem:[%s10525_s3 + $0x490] sm:$0xff] }
 0x4e8   :  { %11905 = vst [vmem:[#allocation90_spill] sm:$0xff] %v9664_v55  ;;  %2829 = vmatpush.msra.mxu1 %v9682_v34  ;;  %v9688_v55 = vld [vmem:[%s10525_s3 + $0x498] sm:$0xff] }
 0x4e9   :  { %11906 = vst [vmem:[#allocation113_spill] sm:$0xff] %v9670_v48  ;;  %2869 = vmatpush.msrb.mxu3 %v9688_v55  ;;  %v9694_v48 = vld [vmem:[%s10525_s3 + $0x460] sm:$0xff] }
 0x4ea   :  { %11907 = vst [vmem:[#allocation94_spill] sm:$0xff] %v9676_v9  ;;  %2830 = vmatpush.msra.mxu1 %v9694_v48  ;;  %v9700_v9 = vld [vmem:[%s10525_s3 + $0x468] sm:$0xff] }
 0x4eb   :  { %11908 = vst [vmem:[#allocation98_spill] sm:$0xff] %v9682_v34  ;;  %2870 = vmatpush.msrb.mxu3 %v9700_v9  ;;  %v9706_v34 = vld [vmem:[%s10525_s3 + $0x430] sm:$0xff] }
 0x4ec   :  { %11909 = vst [vmem:[#allocation120_spill] sm:$0xff] %v9688_v55  ;;  %2831 = vmatpush.msra.mxu1 %v9706_v34  ;;  %v9712_v55 = vld [vmem:[%s10525_s3 + $0x438] sm:$0xff] }
 0x4ed   :  { %11910 = vst [vmem:[#allocation102_spill] sm:$0xff] %v9694_v48  ;;  %2871 = vmatpush.msrb.mxu3 %v9712_v55  ;;  %v9718_v48 = vld [vmem:[%s10525_s3 + $0x400] sm:$0xff] }
 0x4ee   :  { %11911 = vst [vmem:[#allocation123_spill] sm:$0xff] %v9700_v9  ;;  %2832 = vmatpush.msra.mxu1 %v9718_v48  ;;  %v9724_v9 = vld [vmem:[%s10525_s3 + $0x408] sm:$0xff] }
 0x4ef   :  { %11912 = vst [vmem:[#allocation106_spill] sm:$0xff] %v9706_v34  ;;  %2872 = vmatpush.msrb.mxu3 %v9724_v9  ;;  %v9730_v34 = vld [vmem:[%s10525_s3 + $0x3d0] sm:$0xff] }
 0x4f0   :  { %11913 = vst [vmem:[#allocation111_spill] sm:$0xff] %v9712_v55  ;;  %2833 = vmatpush.msra.mxu1 %v9730_v34  ;;  %v9736_v55 = vld [vmem:[%s10525_s3 + $0x3d8] sm:$0xff] }
 0x4f1   :  { %11914 = vst [vmem:[#allocation75_spill] sm:$0xff] %v9718_v48  ;;  %2873 = vmatpush.msrb.mxu3 %v9736_v55  ;;  %v9742_v48 = vld [vmem:[%s10525_s3 + $0x3a0] sm:$0xff] }
 0x4f2   :  { %11915 = vst [vmem:[#allocation65_spill] sm:$0xff] %v9724_v9  ;;  %2834 = vmatpush.msra.mxu1 %v9742_v48  ;;  %v9748_v9 = vld [vmem:[%s10525_s3 + $0x3a8] sm:$0xff] }
 0x4f3   :  { %11916 = vst [vmem:[#allocation115_spill] sm:$0xff] %v9730_v34  ;;  %2874 = vmatpush.msrb.mxu3 %v9748_v9  ;;  %v9754_v34 = vld [vmem:[%s10525_s3 + $0x370] sm:$0xff] }
 0x4f4   :  { %11917 = vst [vmem:[#allocation79_spill] sm:$0xff] %v9736_v55  ;;  %2835 = vmatpush.msra.mxu1 %v9754_v34  ;;  %v9760_v55 = vld [vmem:[%s10525_s3 + $0x378] sm:$0xff] }
 0x4f5   :  { %11918 = vst [vmem:[#allocation68_spill] sm:$0xff] %v9742_v48  ;;  %2875 = vmatpush.msrb.mxu3 %v9760_v55  ;;  %v9766_v48 = vld [vmem:[%s10525_s3 + $0x340] sm:$0xff] }
 0x4f6   :  { %11919 = vst [vmem:[#allocation118_spill] sm:$0xff] %v9748_v9  ;;  %2836 = vmatpush.msra.mxu1 %v9766_v48  ;;  %v9772_v9 = vld [vmem:[%s10525_s3 + $0x348] sm:$0xff]  ;;  %v2433_v4 = vpop.f32.mrf.mxu2 }
 0x4f7   :  { %11920 = vst [vmem:[#allocation83_spill] sm:$0xff] %v9754_v34  ;;  %2876 = vmatpush.msrb.mxu3 %v9772_v9  ;;  %v9778_v34 = vld [vmem:[%s10525_s3 + $0x310] sm:$0xff] }
 0x4f8   :  { %11921 = vst [vmem:[#allocation71_spill] sm:$0xff] %v9760_v55  ;;  %2837 = vmatpush.msra.mxu1 %v9778_v34  ;;  %v9784_v55 = vld [vmem:[%s10525_s3 + $0x318] sm:$0xff] }
 0x4f9   :  { %11922 = vst [vmem:[#allocation87_spill] sm:$0xff] %v9766_v48  ;;  %2877 = vmatpush.msrb.mxu3 %v9784_v55  ;;  %v2393_v48 = vpop.f32.mrf.mxu0 }
 0x4fa   :  { %11923 = vst [vmem:[#allocation73_spill] sm:$0xff] %v9772_v9 }
 0x4fb   :  { %11924 = vst [vmem:[#allocation93_spill] sm:$0xff] %v9778_v34  ;;  %v217_v34 = vadd.f32 %v11929_v22, %v11928_v56 }
 0x4fc   :  { %11925 = vst [vmem:[#allocation77_spill] sm:$0xff] %v9784_v55 }
 0x4fe   :  { %v2513_v55 = vpop.f32.mrf.mxu2 }
 0x50a   :  { %v2413_v47 = vpop.f32.mrf.mxu1 }
 0x50b   :  { %v2414_v9 = vadd.f32 %v2413_v47, %v2393_v48 }
 0x50d   :  { %v2622_v11 = vadd.f32 %v2414_v9, %v176_v6 }
 0x50f   :  { %v3481_v28 = vmul.f32 -1.442695, %v2622_v11 }
 0x510   :  { %v2453_v54 = vpop.f32.mrf.mxu3 }
 0x511   :  { %3599 = vpow2.f32 %v3481_v28  ;;  %v2454_v35 = vadd.f32 %v2453_v54, %v2433_v4 }
 0x513   :  { %v2642_v49 = vadd.f32 %v2454_v35, %v217_v34  ;;  %v2493_v35 = vpop.f32.mrf.mxu1 }
 0x515   :  { %v3482_v21 = vmul.f32 -1.442695, %v2642_v49  ;;  %v2473_v49 = vpop.f32.mrf.mxu0 }
 0x517   :  { %v3600_v59 = vpop.eup %3599  ;;  %3601 = vpow2.f32 %v3482_v21 }
 0x518   :  { %v2626_v25 = vadd.f32 1.0, %v3600_v59  ;;  %v2533_v30 = vpop.f32.mrf.mxu3  ;;  %v2494_v59 = vadd.f32 %v2493_v35, %v2473_v49 }
 0x519   :  { %v2534_v47 = vadd.f32 %v2533_v30, %v2513_v55 }
 0x51a   :  { %3603 = vrcp.f32 %v2626_v25  ;;  %v2638_v21 = vand.u32 2147483648, %v2626_v25  ;;  %v2636_v56 = vand.u32 2147483647, %v2626_v25  ;;  %vm2632_vm1 = vweird.f32 %v2626_v25 }
 0x51b   :  { %v2670_v6 = vadd.f32 %v2534_v47, %v290_v24 }
 0x51c   :  { %v2639_v47 = vor.u32 1.1754944e-38, %v2638_v21  ;;  %vm2637_vm3 = vcmp.eq.f32.partialorder %v2636_v56, 8.507059e+37 }
 0x51d   :  { %v3602_v11 = vpop.eup %3601  ;;  %v3483_v48 = vmul.f32 -1.442695, %v2670_v6 }
 0x51e   :  { %v2646_v9 = vadd.f32 1.0, %v3602_v11 }
 0x51f   :  { %3605 = vpow2.f32 %v3483_v48  ;;  %v11932_v48 = vld [vmem:[#allocation169_spill] sm:$0xff] }
 0x520   :  { %v3604_v22 = vpop.eup %3603  ;;  %3607 = vrcp.f32 %v2646_v9  ;;  %v2662_v19 = vadd.f32 %v11932_v48, %v2494_v59  ;;  %v2656_v21 = vand.u32 2147483647, %v2646_v9  ;;  %vm2652_vm5 = vweird.f32 %v2646_v9 }
 0x521   :  { %v2628_v54 = vmul.f32 %v3604_v22, %v2626_v25  ;;  %vm2633_vm0 = vweird.f32 %v3604_v22  ;;  %v11936_v25 = vld [vmem:[#allocation27_spill] sm:$0xff] }
 0x522   :  { %vm2634_vm2 = vmor %vm2632_vm1, %vm2633_vm0  ;;  %vm2657_vm7 = vcmp.eq.f32.partialorder %v2656_v21, 8.507059e+37 }
 0x523   :  { %v2629_v28 = vsub.f32 1.0, %v2628_v54  ;;  %v11933_v54 = vld [vmem:[#allocation36_spill] sm:$0xff] }
 0x524   :  { %v258_v58 = vadd.f32 %v11934_v13, %v11933_v54 }
 0x525   :  { %v3606_v4 = vpop.eup %3605  ;;  %v2630_v34 = vmul.f32 %v3604_v22, %v2629_v28  ;;  %v2658_v28 = vand.u32 2147483648, %v2646_v9 }
 0x526   :  { %v3608_v45 = vpop.eup %3607  ;;  %v2674_v30 = vadd.f32 1.0, %v3606_v4  ;;  %v2553_v4 = vpop.f32.mrf.mxu0 }
 0x527   :  { %v2648_v55 = vmul.f32 %v3608_v45, %v2646_v9  ;;  %v2631_v24 = vadd.f32 %v3604_v22, %v2630_v34  ;;  %vm2653_vm4 = vweird.f32 %v3608_v45  ;;  %v11935_v34 = vld [vmem:[#allocation16_spill] sm:$0xff] }
 0x528   :  { %3609 = vrcp.f32 %v2674_v30  ;;  %v331_v37 = vadd.f32 %v11936_v25, %v11935_v34  ;;  %vm2654_vm6 = vmor %vm2652_vm5, %vm2653_vm4  ;;  %v2686_v25 = vand.u32 2147483648, %v2674_v30  ;;  %v2684_v9 = vand.u32 2147483647, %v2674_v30 }
 0x529   :  { %v2649_v6 = vsub.f32 1.0, %v2648_v55  ;;  %v2635_v11 = vsel %vm2634_vm2, %v3604_v22, %v2631_v24  ;;  %v2659_v24 = vor.u32 1.1754944e-38, %v2658_v28  ;;  %vm2680_vm9 = vweird.f32 %v2674_v30 }
 0x52a   :  { %v2640_v35 = vsel %vm2637_vm3, %v2639_v47, %v2635_v11  ;;  %v2573_v23 = vpop.f32.mrf.mxu1  ;;  %vm2685_vm11 = vcmp.eq.f32.partialorder %v2684_v9, 8.507059e+37 }
 0x52b   :  { %v2650_v49 = vmul.f32 %v3608_v45, %v2649_v6  ;;  %v2663_v61 = vmul.f32 %v2662_v19, %v2640_v35  ;;  %v2574_v57 = vadd.f32 %v2573_v23, %v2553_v4  ;;  %v2593_v35 = vpop.f32.mrf.mxu2 }
 0x52d   :  { %v2651_v55 = vadd.f32 %v3608_v45, %v2650_v49  ;;  %v2664_v56 = vadd.f32 %v2663_v61, %v258_v58  ;;  %v2690_v59 = vadd.f32 %v2574_v57, %v331_v37 }
 0x52e   :  { %v3610_v22 = vpop.eup %3609 }
 0x52f   :  { %v2655_v13 = vsel %vm2654_vm6, %v3608_v45, %v2651_v55  ;;  %3611 = vtanh.f32 %v2664_v56  ;;  %v2676_v47 = vmul.f32 %v3610_v22, %v2674_v30  ;;  %v3484_v6 = vmul.f32 -1.442695, %v2690_v59 }
 0x530   :  { %v2660_v19 = vsel %vm2657_vm7, %v2659_v24, %v2655_v13  ;;  %v2613_v11 = vpop.f32.mrf.mxu3  ;;  %vm2681_vm8 = vweird.f32 %v3610_v22  ;;  %v2687_v45 = vor.u32 1.1754944e-38, %v2686_v25  ;;  %v11937_v13 = vld [vmem:[#allocation10_spill] sm:$0xff]  ;;  %v9850_v25 = vld [vmem:[%s10525_s3 + $0x260] sm:$0xff] }
 0x531   :  { %v2677_v48 = vsub.f32 1.0, %v2676_v47  ;;  %3613 = vpow2.f32 %v3484_v6  ;;  %v2614_v34 = vadd.f32 %v2613_v11, %v2593_v35  ;;  %v2666_v61 = vsub.f32 1.0, %v2660_v19  ;;  %vm2682_vm10 = vmor %vm2680_vm9, %vm2681_vm8  ;;  %v11938_v6 = vld [vmem:[#allocation37_spill] sm:$0xff]  ;;  %v9838_v11 = vld [vmem:[%s10525_s3 + $0x290] sm:$0xff] }
 0x532   :  { %v2668_v37 = vmul.f32 %v2660_v19, %v9001_v40  ;;  %v372_v47 = vadd.f32 %v11937_v13, %v6165_v38  ;;  %v9817_v40 = vld [vmem:[%s10525_s3 + $0x2f8] sm:$0xff]  ;;  %v9832_v19 = vld [vmem:[%s10525_s3 + $0x2c8] sm:$0xff] }
 0x533   :  { %v2678_v23 = vmul.f32 %v3610_v22, %v2677_v48  ;;  %v2710_v4 = vadd.f32 %v8998_v63, %v2614_v34  ;;  %v9811_v63 = vld [vmem:[%s10525_s3 + $0x2f0] sm:$0xff]  ;;  %v9844_v48 = vld [vmem:[%s10525_s3 + $0x298] sm:$0xff] }
 0x535   :  { %v3612_v58 = vpop.eup %3611  ;;  %v2679_v49 = vadd.f32 %v3610_v22, %v2678_v23  ;;  %v9856_v23 = vld [vmem:[%s10525_s3 + $0x268] sm:$0xff] }
 0x536   :  { %v2667_v57 = vmul.f32 %v3612_v58, %v2666_v61  ;;  %v9864_v61 = vld [vmem:[%s10525_s3 + $0x230] sm:$0xff]  ;;  %v9870_v58 = vld [vmem:[%s10525_s3 + $0x238] sm:$0xff] }
 0x537   :  { %v2683_v28 = vsel %vm2682_vm10, %v3610_v22, %v2679_v49  ;;  %v3614_v21 = vpop.eup %3613  ;;  %v9826_v22 = vld [vmem:[%s10525_s3 + $0x2c0] sm:$0xff] }
 0x538   :  { %v9800_v55 = vadd.f32 %v2668_v37, %v2667_v57  ;;  %v2688_v56 = vsel %vm2685_vm11, %v2687_v45, %v2683_v28  ;;  %v2694_v59 = vadd.f32 1.0, %v3614_v21  ;;  %v9876_v37 = vld [vmem:[%s10525_s3 + $0x200] sm:$0xff]  ;;  %v9882_v45 = vld [vmem:[%s10525_s3 + $0x208] sm:$0xff]  ;;  %v9888_v21 = vld [vmem:[%s10525_s3 + $0x1d0] sm:$0xff] }
 0x539   :  { %v2711_v24 = vmul.f32 %v2710_v4, %v2688_v56  ;;  %v9894_v56 = vld [vmem:[%s10525_s3 + $0x1d8] sm:$0xff] }
 0x53a   :  { %v3434_v30 = vadd.f32 %v9800_v55, %v11938_v6  ;;  %2738 = vmatmul.f32.vlgmr.msrb.gmra.mxu0 %v9800_v55  ;;  %2778 = vmatmul.f32.vlgmr.msra.gmra.mxu2 %v9800_v55  ;;  %3615 = vrcp.f32 %v2694_v59  ;;  %v2706_v57 = vand.u32 2147483648, %v2694_v59  ;;  %v2704_v4 = vand.u32 2147483647, %v2694_v59  ;;  %v9906_v6 = vld [vmem:[%s10525_s3 + $0x1a8] sm:$0xff] }
 0x53b   :  { %2882 = vmatpush.msrb.mxu0 %v9811_v63  ;;  %2922 = vmatpush.msra.mxu2 %v9817_v40  ;;  %v2712_v34 = vadd.f32 %v2711_v24, %v372_v47  ;;  %vm2700_vm13 = vweird.f32 %v2694_v59  ;;  %v9900_v47 = vld [vmem:[%s10525_s3 + $0x1a0] sm:$0xff] }
 0x53c   :  { %3442 = vst [vmem:[%s10529_s6 + $0x28] sm:$0xff] %v3434_v30  ;;  %v2707_v13 = vor.u32 1.1754944e-38, %v2706_v57  ;;  %vm2705_vm15 = vcmp.eq.f32.partialorder %v2704_v4, 8.507059e+37 }
 0x53d   :  { %2883 = vmatpush.msrb.mxu0 %v9826_v22  ;;  %2923 = vmatpush.msra.mxu2 %v9832_v19  ;;  %3617 = vtanh.f32 %v2712_v34 }
 0x53f   :  { %2884 = vmatpush.msrb.mxu0 %v9838_v11  ;;  %2924 = vmatpush.msra.mxu2 %v9844_v48 }
 0x540   :  { %v3616_v35 = vpop.eup %3615 }
 0x541   :  { %2885 = vmatpush.msrb.mxu0 %v9850_v25  ;;  %2925 = vmatpush.msra.mxu2 %v9856_v23  ;;  %v2696_v9 = vmul.f32 %v3616_v35, %v2694_v59  ;;  %vm2701_vm12 = vweird.f32 %v3616_v35  ;;  %v9912_v59 = vld [vmem:[%s10525_s3 + $0x170] sm:$0xff] }
 0x542   :  { %2818 = vmatmul.f32.vlgmr.msra.gmra.mxu0 %v9800_v55  ;;  %2858 = vmatmul.f32.vlgmr.msrb.gmra.mxu2 %v9800_v55  ;;  %vm2702_vm14 = vmor %vm2700_vm13, %vm2701_vm12 }
 0x543   :  { %2886 = vmatpush.msrb.mxu0 %v9864_v61  ;;  %2926 = vmatpush.msra.mxu2 %v9870_v58  ;;  %v2697_v49 = vsub.f32 1.0, %v2696_v9  ;;  %v9918_v9 = vld [vmem:[%s10525_s3 + $0x178] sm:$0xff]  ;;  %v3618_v57 = vpop.eup %3617 }
 0x545   :  { %2887 = vmatpush.msrb.mxu0 %v9876_v37  ;;  %2927 = vmatpush.msra.mxu2 %v9882_v45  ;;  %v2698_v28 = vmul.f32 %v3616_v35, %v2697_v49 }
 0x547   :  { %2888 = vmatpush.msrb.mxu0 %v9888_v21  ;;  %2928 = vmatpush.msra.mxu2 %v9894_v56  ;;  %v2699_v24 = vadd.f32 %v3616_v35, %v2698_v28  ;;  %v9930_v28 = vld [vmem:[%s10525_s3 + $0x148] sm:$0xff] }
 0x549   :  { %2889 = vmatpush.msrb.mxu0 %v9900_v47  ;;  %2929 = vmatpush.msra.mxu2 %v9906_v6  ;;  %v2703_v30 = vsel %vm2702_vm14, %v3616_v35, %v2699_v24  ;;  %v9924_v35 = vld [vmem:[%s10525_s3 + $0x140] sm:$0xff] }
 0x54a   :  { %v2708_v34 = vsel %vm2705_vm15, %v2707_v13, %v2703_v30  ;;  %11939 = vst [vmem:[#allocation97_spill] sm:$0xff] %v9924_v35  ;;  %v9937_v13 = vld [vmem:[%s10525_s3 + $0x110] sm:$0xff]  ;;  %v9943_v30 = vld [vmem:[%s10525_s3 + $0x118] sm:$0xff] }
 0x54b   :  { %2890 = vmatpush.msrb.mxu0 %v9912_v59  ;;  %2930 = vmatpush.msra.mxu2 %v9918_v9  ;;  %v2714_v49 = vsub.f32 1.0, %v2708_v34  ;;  %v2716_v24 = vmul.f32 %v2708_v34, %v9037_v62  ;;  %v3415_v62 = vld [vmem:[%s10529_s6 + $0x10] sm:$0xff]  ;;  %v9954_v34 = vld [vmem:[%s10525_s3 + $0xe0] sm:$0xff] }
 0x54d   :  { %2891 = vmatpush.msrb.mxu0 %v9924_v35  ;;  %2931 = vmatpush.msra.mxu2 %v9930_v28  ;;  %v2715_v4 = vmul.f32 %v3618_v57, %v2714_v49  ;;  %v9960_v49 = vld [vmem:[%s10525_s3 + $0xe8] sm:$0xff] }
 0x54f   :  { %2892 = vmatpush.msrb.mxu0 %v9937_v13  ;;  %2932 = vmatpush.msra.mxu2 %v9943_v30  ;;  %v9946_v35 = vadd.f32 %v2716_v24, %v2715_v4  ;;  %v9969_v4 = vld [vmem:[%s10525_s3 + $0x5f0] sm:$0xff]  ;;  %v9975_v24 = vld [vmem:[%s10525_s3 + $0x5f8] sm:$0xff] }
 0x550   :  { %11940 = vst [vmem:[#allocation81_spill] sm:$0xff] %v9969_v4 }
 0x551   :  { %2893 = vmatpush.msrb.mxu0 %v9954_v34  ;;  %2933 = vmatpush.msra.mxu2 %v9960_v49  ;;  %v3431_v57 = vadd.f32 %v3415_v62, %v9946_v35  ;;  %11941 = vst [vmem:[#allocation101_spill] sm:$0xff] %v9975_v24  ;;  %v9984_v62 = vld [vmem:[%s10525_s3 + $0xb0] sm:$0xff] }
 0x552   :  { %2758 = vmatmul.f32.vlgmr.msrb.gmra.mxu1 %v9946_v35  ;;  %2798 = vmatmul.f32.vlgmr.msra.gmra.mxu3 %v9946_v35  ;;  %11942 = vst [vmem:[#allocation85_spill] sm:$0xff] %v9984_v62 }
 0x553   :  { %2902 = vmatpush.msrb.mxu1 %v9969_v4  ;;  %2942 = vmatpush.msra.mxu3 %v9975_v24  ;;  %3439 = vst [vmem:[%s10529_s6 + $0x10] sm:$0xff] %v3431_v57  ;;  %v9990_v4 = vld [vmem:[%s10525_s3 + $0xb8] sm:$0xff]  ;;  %v9996_v24 = vld [vmem:[%s10525_s3 + $0x5c0] sm:$0xff]  ;;  %v10002_v57 = vld [vmem:[%s10525_s3 + $0x5c8] sm:$0xff] }
 0x554   :  { %2894 = vmatpush.msrb.mxu0 %v9984_v62  ;;  %11943 = vst [vmem:[#allocation105_spill] sm:$0xff] %v9990_v4  ;;  %2934 = vmatpush.msra.mxu2 %v9990_v4  ;;  %v10008_v62 = vld [vmem:[%s10525_s3 + $0x80] sm:$0xff]  ;;  %v10014_v4 = vld [vmem:[%s10525_s3 + $0x88] sm:$0xff] }
 0x555   :  { %11944 = vst [vmem:[#allocation89_spill] sm:$0xff] %v9996_v24  ;;  %2903 = vmatpush.msrb.mxu1 %v9996_v24  ;;  %2943 = vmatpush.msra.mxu3 %v10002_v57  ;;  %v10020_v24 = vld [vmem:[%s10525_s3 + $0x590] sm:$0xff] }
 0x556   :  { %11945 = vst [vmem:[#allocation128_spill] sm:$0xff] %v10002_v57  ;;  %2895 = vmatpush.msrb.mxu0 %v10008_v62  ;;  %2935 = vmatpush.msra.mxu2 %v10014_v4  ;;  %v10026_v57 = vld [vmem:[%s10525_s3 + $0x598] sm:$0xff] }
 0x557   :  { %11946 = vst [vmem:[#allocation129_spill] sm:$0xff] %v10008_v62  ;;  %2904 = vmatpush.msrb.mxu1 %v10020_v24  ;;  %2944 = vmatpush.msra.mxu3 %v10026_v57  ;;  %v10032_v62 = vld [vmem:[%s10525_s3 + $0x50] sm:$0xff] }
 0x558   :  { %11947 = vst [vmem:[#allocation5_spill] sm:$0xff] %v10014_v4  ;;  %2896 = vmatpush.msrb.mxu0 %v10032_v62  ;;  %v10038_v4 = vld [vmem:[%s10525_s3 + $0x58] sm:$0xff] }
 0x559   :  { %11948 = vst [vmem:[#allocation136_spill] sm:$0xff] %v10020_v24  ;;  %2936 = vmatpush.msra.mxu2 %v10038_v4  ;;  %v10044_v24 = vld [vmem:[%s10525_s3 + $0x560] sm:$0xff] }
 0x55a   :  { %11949 = vst [vmem:[#allocation137_spill] sm:$0xff] %v10026_v57  ;;  %2905 = vmatpush.msrb.mxu1 %v10044_v24  ;;  %v10050_v57 = vld [vmem:[%s10525_s3 + $0x568] sm:$0xff]  ;;  %2878 = vmatmul.f32.vlgmr.msrb.gmra.mxu3 %v9946_v35 }
 0x55b   :  { %11950 = vst [vmem:[#allocation135_spill] sm:$0xff] %v10032_v62  ;;  %2945 = vmatpush.msra.mxu3 %v10050_v57  ;;  %2838 = vmatmul.f32.vlgmr.msra.gmra.mxu1 %v9946_v35  ;;  %v10076_v62 = vld [vmem:[%s10525_s3 + $0x538] sm:$0xff] }
 0x55c   :  { %11951 = vst [vmem:[#allocation138_spill] sm:$0xff] %v10038_v4  ;;  %v10058_v4 = vld [vmem:[%s10525_s3 + $0x20] sm:$0xff] }
 0x55d   :  { %11952 = vst [vmem:[#allocation12_spill] sm:$0xff] %v10044_v24  ;;  %2897 = vmatpush.msrb.mxu0 %v10058_v4  ;;  %v10064_v24 = vld [vmem:[%s10525_s3 + $0x530] sm:$0xff]  ;;  %2946 = vmatpush.msra.mxu3 %v10076_v62 }
 0x55e   :  { %11953 = vst [vmem:[#allocation28_spill] sm:$0xff] %v10050_v57  ;;  %2906 = vmatpush.msrb.mxu1 %v10064_v24  ;;  %v10070_v57 = vld [vmem:[%s10525_s3 + $0x28] sm:$0xff]  ;;  %2898 = vmatmul.f32.vlgmr.msrb.gmra.mxu0 %v9800_v55 }
 0x55f   :  { %11954 = vst [vmem:[#allocation130_spill] sm:$0xff] %v10058_v4  ;;  %2937 = vmatpush.msra.mxu2 %v10070_v57  ;;  %v10100_v4 = vld [vmem:[%s10525_s3 + $0x4d0] sm:$0xff] }
 0x560   :  { %11955 = vst [vmem:[#allocation14_spill] sm:$0xff] %v10064_v24  ;;  %2938 = vmatmul.f32.vlgmr.msra.gmra.mxu2 %v9800_v55  ;;  %v10084_v24 = vld [vmem:[%s10525_s3 + $0x500] sm:$0xff] }
 0x561   :  { %11956 = vst [vmem:[#allocation31_spill] sm:$0xff] %v10070_v57  ;;  %2907 = vmatpush.msrb.mxu1 %v10084_v24  ;;  %v10090_v57 = vld [vmem:[%s10525_s3 + $0x508] sm:$0xff]  ;;  %3108 = vmatpush.msrb.mxu2 %v9076_v46  ;;  %v10116_v46 = vld [vmem:[%s10525_s3 + $0x4a0] sm:$0xff] }
 0x562   :  { %11957 = vst [vmem:[#allocation91_spill] sm:$0xff] %v10076_v62  ;;  %2947 = vmatpush.msra.mxu3 %v10090_v57  ;;  %v4221_v62 = vld [vmem:[%s10525_s3 + $0x2d0] sm:$0xff] }
 0x563   :  { %11958 = vst [vmem:[#allocation114_spill] sm:$0xff] %v10084_v24  ;;  %3068 = vmatpush.msra.mxu0 %v4221_v62  ;;  %2908 = vmatpush.msrb.mxu1 %v10100_v4  ;;  %v10106_v24 = vld [vmem:[%s10525_s3 + $0x4d8] sm:$0xff]  ;;  %v4224_v62 = vld [vmem:[%s10525_s3 + $0x2a0] sm:$0xff] }
 0x564   :  { %11959 = vst [vmem:[#allocation95_spill] sm:$0xff] %v10100_v4  ;;  %2948 = vmatpush.msra.mxu3 %v10106_v24  ;;  %3109 = vmatpush.msrb.mxu2 %v9085_v51  ;;  %v10122_v4 = vld [vmem:[%s10525_s3 + $0x4a8] sm:$0xff]  ;;  %v10132_v51 = vld [vmem:[%s10525_s3 + $0x470] sm:$0xff] }
 0x565   :  { %3069 = vmatpush.msra.mxu0 %v4224_v62  ;;  %11960 = vst [vmem:[#allocation99_spill] sm:$0xff] %v10116_v46  ;;  %2909 = vmatpush.msrb.mxu1 %v10116_v46  ;;  %v4227_v62 = vld [vmem:[%s10525_s3 + $0x270] sm:$0xff]  ;;  %v10138_v46 = vld [vmem:[%s10525_s3 + $0x478] sm:$0xff] }
 0x566   :  { %2949 = vmatpush.msra.mxu3 %v10122_v4  ;;  %3110 = vmatpush.msrb.mxu2 %v9094_v3  ;;  %11961 = vst [vmem:[#allocation117_spill] sm:$0xff] %v10132_v51  ;;  %v10148_v3 = vld [vmem:[%s10525_s3 + $0x440] sm:$0xff] }
 0x567   :  { %3070 = vmatpush.msra.mxu0 %v4227_v62  ;;  %2910 = vmatpush.msrb.mxu1 %v10132_v51  ;;  %v4230_v62 = vld [vmem:[%s10525_s3 + $0x240] sm:$0xff]  ;;  %11962 = vst [vmem:[#allocation121_spill] sm:$0xff] %v10148_v3  ;;  %v10154_v51 = vld [vmem:[%s10525_s3 + $0x448] sm:$0xff] }
 0x568   :  { %2950 = vmatpush.msra.mxu3 %v10138_v46  ;;  %3111 = vmatpush.msrb.mxu2 %v9103_v39  ;;  %v10164_v39 = vld [vmem:[%s10525_s3 + $0x410] sm:$0xff] }
 0x569   :  { %3071 = vmatpush.msra.mxu0 %v4230_v62  ;;  %2911 = vmatpush.msrb.mxu1 %v10148_v3  ;;  %v4233_v62 = vld [vmem:[%s10525_s3 + $0x210] sm:$0xff]  ;;  %11963 = vst [vmem:[#allocation103_spill] sm:$0xff] %v10164_v39  ;;  %v10170_v3 = vld [vmem:[%s10525_s3 + $0x418] sm:$0xff] }
 0x56a   :  { %2951 = vmatpush.msra.mxu3 %v10154_v51  ;;  %3112 = vmatpush.msrb.mxu2 %v9112_v0  ;;  %v10180_v0 = vld [vmem:[%s10525_s3 + $0x3e0] sm:$0xff] }
 0x56b   :  { %3072 = vmatpush.msra.mxu0 %v4233_v62  ;;  %2912 = vmatpush.msrb.mxu1 %v10164_v39  ;;  %v4236_v62 = vld [vmem:[%s10525_s3 + $0x1e0] sm:$0xff]  ;;  %11964 = vst [vmem:[#allocation107_spill] sm:$0xff] %v10180_v0  ;;  %v10186_v39 = vld [vmem:[%s10525_s3 + $0x3e8] sm:$0xff] }
 0x56c   :  { %2952 = vmatpush.msra.mxu3 %v10170_v3  ;;  %3113 = vmatpush.msrb.mxu2 %v9121_v31  ;;  %v10196_v31 = vld [vmem:[%s10525_s3 + $0x3b0] sm:$0xff] }
 0x56d   :  { %3073 = vmatpush.msra.mxu0 %v4236_v62  ;;  %2913 = vmatpush.msrb.mxu1 %v10180_v0  ;;  %v4239_v62 = vld [vmem:[%s10525_s3 + $0x1b0] sm:$0xff]  ;;  %v10202_v0 = vld [vmem:[%s10525_s3 + $0x3b8] sm:$0xff] }
 0x56e   :  { %2953 = vmatpush.msra.mxu3 %v10186_v39  ;;  %3114 = vmatpush.msrb.mxu2 %v9130_v50  ;;  %v10210_v50 = vld [vmem:[%s10525_s3 + $0x380] sm:$0xff] }
 0x56f   :  { %3074 = vmatpush.msra.mxu0 %v4239_v62  ;;  %2914 = vmatpush.msrb.mxu1 %v10196_v31  ;;  %v10216_v62 = vld [vmem:[%s10525_s3 + $0x388] sm:$0xff] }
 0x570   :  { %2954 = vmatpush.msra.mxu3 %v10202_v0  ;;  %3115 = vmatpush.msrb.mxu2 %v9144_v53  ;;  %v10230_v53 = vld [vmem:[%s10525_s3 + $0x358] sm:$0xff] }
 0x571   :  { %3075 = vmatpush.msra.mxu0 %v9138_v14  ;;  %2915 = vmatpush.msrb.mxu1 %v10210_v50  ;;  %v10224_v14 = vld [vmem:[%s10525_s3 + $0x350] sm:$0xff]  ;;  %11965 = vst [vmem:[#allocation126_spill] sm:$0xff] %v10230_v53 }
 0x572   :  { %2955 = vmatpush.msra.mxu3 %v10216_v62  ;;  %3116 = vmatpush.msrb.mxu2 %v9158_v15  ;;  %v10244_v15 = vld [vmem:[%s10525_s3 + $0x328] sm:$0xff] }
 0x573   :  { %3076 = vmatpush.msra.mxu0 %v9152_v2  ;;  %2916 = vmatpush.msrb.mxu1 %v10224_v14  ;;  %v10238_v2 = vld [vmem:[%s10525_s3 + $0x320] sm:$0xff]  ;;  %11967 = vst [vmem:[#allocation116_spill] sm:$0xff] %v10244_v15 }
 0x574   :  { %2956 = vmatpush.msra.mxu3 %v10230_v53  ;;  %3117 = vmatpush.msrb.mxu2 %v9172_v32  ;;  %11966 = vst [vmem:[#allocation112_spill] sm:$0xff] %v10238_v2  ;;  %v4249_v32 = vld [vmem:[%s10525_s3 + $0x5a0] sm:$0xff] }
 0x575   :  { %3077 = vmatpush.msra.mxu0 %v9166_v12  ;;  %2917 = vmatpush.msrb.mxu1 %v10238_v2  ;;  %v4248_v12 = vld [vmem:[%s10525_s3 + $0x5d0] sm:$0xff] }
 0x576   :  { %2957 = vmatpush.msra.mxu3 %v10244_v15  ;;  %2918 = vmatmul.f32.vlgmr.msrb.gmra.mxu1 %v9946_v35 }
 0x577   :  { %2958 = vmatmul.f32.vlgmr.msra.gmra.mxu3 %v9946_v35  ;;  %3078 = vmatpush.msra.mxu0 %v9182_v36  ;;  %v4250_v36 = vld [vmem:[%s10525_s3 + $0x570] sm:$0xff] }
 0x578   :  { %3118 = vmatpush.msrb.mxu2 %v9188_v18  ;;  %3088 = vmatpush.msra.mxu1 %v4248_v12  ;;  %v4251_v18 = vld [vmem:[%s10525_s3 + $0x540] sm:$0xff]  ;;  %v11982_v12 = vld [vmem:[#allocation30_spill] sm:$0xff] }
 0x579   :  { %3128 = vmatpush.msrb.mxu3 %v9195_v42  ;;  %3079 = vmatpush.msra.mxu0 %v9201_v29  ;;  %v4252_v42 = vld [vmem:[%s10525_s3 + $0x510] sm:$0xff]  ;;  %v4253_v29 = vld [vmem:[%s10525_s3 + $0x4e0] sm:$0xff] }
 0x57a   :  { %3119 = vmatpush.msrb.mxu2 %v9207_v44  ;;  %3089 = vmatpush.msra.mxu1 %v4249_v32  ;;  %v11968_v44 = vld [vmem:[#allocation21_spill] sm:$0xff]  ;;  %v11983_v32 = vld [vmem:[#allocation44_spill] sm:$0xff] }
 0x57b   :  { %3129 = vmatpush.msrb.mxu3 %v9214_v26  ;;  %3080 = vmatpush.msra.mxu0 %v9220_v43  ;;  %v11969_v26 = vld [vmem:[#allocation40_spill] sm:$0xff]  ;;  %v4254_v43 = vld [vmem:[%s10525_s3 + $0x4b0] sm:$0xff] }
 0x57c   :  { %3120 = vmatpush.msrb.mxu2 %v9226_v41  ;;  %3090 = vmatpush.msra.mxu1 %v4250_v36  ;;  %v11970_v41 = vld [vmem:[#allocation132_spill] sm:$0xff]  ;;  %v11984_v36 = vld [vmem:[#allocation38_spill] sm:$0xff] }
 0x57d   :  { %3130 = vmatpush.msrb.mxu3 %v9233_v1  ;;  %3081 = vmatpush.msra.mxu0 %v9239_v33  ;;  %v11971_v1 = vld [vmem:[#allocation133_spill] sm:$0xff]  ;;  %v11972_v33 = vld [vmem:[#allocation139_spill] sm:$0xff] }
 0x57e   :  { %3121 = vmatpush.msrb.mxu2 %v9245_v16  ;;  %3091 = vmatpush.msra.mxu1 %v4251_v18  ;;  %v4255_v16 = vld [vmem:[%s10525_s3 + $0x480] sm:$0xff]  ;;  %v11985_v18 = vld [vmem:[#allocation49_spill] sm:$0xff] }
 0x57f   :  { %3131 = vmatpush.msrb.mxu3 %v9252_v20  ;;  %3082 = vmatpush.msra.mxu0 %v9258_v27  ;;  %v11973_v20 = vld [vmem:[#allocation19_spill] sm:$0xff]  ;;  %v11974_v27 = vld [vmem:[#allocation134_spill] sm:$0xff] }
 0x580   :  { %3122 = vmatpush.msrb.mxu2 %v9264_v10  ;;  %3092 = vmatpush.msra.mxu1 %v4252_v42  ;;  %v11975_v10 = vld [vmem:[#allocation15_spill] sm:$0xff]  ;;  %v11986_v42 = vld [vmem:[#allocation33_spill] sm:$0xff] }
 0x581   :  { %3132 = vmatpush.msrb.mxu3 %v9271_v8  ;;  %3083 = vmatpush.msra.mxu0 %v9277_v60  ;;  %v11976_v8 = vld [vmem:[#allocation34_spill] sm:$0xff]  ;;  %v11977_v60 = vld [vmem:[#allocation29_spill] sm:$0xff] }
 0x582   :  { %3123 = vmatpush.msrb.mxu2 %v9283_v7  ;;  %3093 = vmatpush.msra.mxu1 %v4253_v29  ;;  %v11978_v7 = vld [vmem:[#allocation22_spill] sm:$0xff]  ;;  %v11987_v29 = vld [vmem:[#allocation48_spill] sm:$0xff] }
 0x583   :  { %3148 = vmatpush.msrb.mxu0 %v9289_v52  ;;  %3133 = vmatpush.msrb.mxu3 %v9302_v5  ;;  %v11979_v52 = vld [vmem:[#allocation41_spill] sm:$0xff]  ;;  %v11981_v5 = vld [vmem:[#allocation47_spill] sm:$0xff] }
 0x584   :  { %3188 = vmatpush.msra.mxu2 %v9295_v17  ;;  %3094 = vmatpush.msra.mxu1 %v4254_v43  ;;  %v11980_v17 = vld [vmem:[#allocation32_spill] sm:$0xff]  ;;  %v11990_v43 = vld [vmem:[#allocation39_spill] sm:$0xff] }
 0x585   :  { %3149 = vmatpush.msrb.mxu0 %v11968_v44  ;;  %3134 = vmatpush.msrb.mxu3 %v11970_v41  ;;  %v11988_v44 = vld [vmem:[#allocation42_spill] sm:$0xff] }
 0x586   :  { %3189 = vmatpush.msra.mxu2 %v11969_v26  ;;  %3095 = vmatpush.msra.mxu1 %v4255_v16  ;;  %v11989_v26 = vld [vmem:[#allocation53_spill] sm:$0xff]  ;;  %v11991_v41 = vld [vmem:[#allocation50_spill] sm:$0xff] }
 0x587   :  { %3150 = vmatpush.msrb.mxu0 %v11971_v1  ;;  %3135 = vmatpush.msrb.mxu3 %v11973_v20  ;;  %v11992_v1 = vld [vmem:[#allocation45_spill] sm:$0xff]  ;;  %v11994_v16 = vld [vmem:[#allocation54_spill] sm:$0xff]  ;;  %v11995_v20 = vld [vmem:[#allocation51_spill] sm:$0xff] }
 0x588   :  { %3190 = vmatpush.msra.mxu2 %v11972_v33  ;;  %3096 = vmatpush.msra.mxu1 %v11976_v8  ;;  %v11993_v33 = vld [vmem:[#allocation43_spill] sm:$0xff]  ;;  %v11998_v8 = vld [vmem:[#allocation57_spill] sm:$0xff] }
 0x589   :  { %3151 = vmatpush.msrb.mxu0 %v11974_v27  ;;  %3136 = vmatpush.msrb.mxu3 %v11977_v60  ;;  %v11996_v27 = vld [vmem:[#allocation60_spill] sm:$0xff]  ;;  %v11999_v60 = vld [vmem:[#allocation55_spill] sm:$0xff] }
 0x58a   :  { %3191 = vmatpush.msra.mxu2 %v11975_v10  ;;  %3097 = vmatpush.msra.mxu1 %v11980_v17  ;;  %v11997_v10 = vld [vmem:[#allocation46_spill] sm:$0xff]  ;;  %v12002_v17 = vld [vmem:[#allocation61_spill] sm:$0xff] }
 0x58b   :  { %3152 = vmatpush.msrb.mxu0 %v11978_v7  ;;  %3137 = vmatpush.msrb.mxu3 %v11981_v5  ;;  %v12000_v7 = vld [vmem:[#allocation62_spill] sm:$0xff] }
 0x58c   :  { %3192 = vmatpush.msra.mxu2 %v11979_v52  ;;  %3098 = vmatpush.msra.mxu1 %v11984_v36  ;;  %v12001_v52 = vld [vmem:[#allocation52_spill] sm:$0xff]  ;;  %v12003_v5 = vld [vmem:[#allocation58_spill] sm:$0xff]  ;;  %v12006_v36 = vld [vmem:[#allocation59_spill] sm:$0xff] }
 0x58d   :  { %3153 = vmatpush.msrb.mxu0 %v11982_v12  ;;  %3138 = vmatpush.msrb.mxu3 %v11985_v18  ;;  %v12004_v12 = vld [vmem:[#allocation56_spill] sm:$0xff]  ;;  %v12007_v18 = vld [vmem:[#allocation66_spill] sm:$0xff] }
 0x58e   :  { %3193 = vmatpush.msra.mxu2 %v11983_v32  ;;  %3099 = vmatpush.msra.mxu1 %v11988_v44  ;;  %v12005_v32 = vld [vmem:[#allocation63_spill] sm:$0xff]  ;;  %v12010_v44 = vld [vmem:[#allocation74_spill] sm:$0xff] }
 0x58f   :  { %3154 = vmatpush.msrb.mxu0 %v11986_v42  ;;  %3139 = vmatpush.msrb.mxu3 %v11989_v26  ;;  %v12008_v42 = vld [vmem:[#allocation69_spill] sm:$0xff]  ;;  %v12011_v26 = vld [vmem:[#allocation64_spill] sm:$0xff] }
 0x590   :  { %3194 = vmatpush.msra.mxu2 %v11987_v29  ;;  %3100 = vmatpush.msra.mxu1 %v11992_v1  ;;  %v12009_v29 = vld [vmem:[#allocation110_spill] sm:$0xff] }
 0x591   :  { %3155 = vmatpush.msrb.mxu0 %v11990_v43  ;;  %3140 = vmatpush.msrb.mxu3 %v11993_v33  ;;  %v12012_v43 = vld [vmem:[#allocation78_spill] sm:$0xff] }
 0x592   :  { %3195 = vmatpush.msra.mxu2 %v11991_v41  ;;  %3101 = vmatpush.msra.mxu1 %v11996_v27  ;;  %v12013_v41 = vld [vmem:[#allocation67_spill] sm:$0xff]  ;;  %v12014_v1 = vld [vmem:[#allocation82_spill] sm:$0xff]  ;;  %v12018_v27 = vld [vmem:[#allocation92_spill] sm:$0xff] }
 0x593   :  { %3156 = vmatpush.msrb.mxu0 %v11994_v16  ;;  %3141 = vmatpush.msrb.mxu3 %v11997_v10  ;;  %v12015_v33 = vld [vmem:[#allocation70_spill] sm:$0xff]  ;;  %v12019_v10 = vld [vmem:[#allocation76_spill] sm:$0xff] }
 0x594   :  { %3196 = vmatpush.msra.mxu2 %v11995_v20  ;;  %3102 = vmatpush.msra.mxu1 %v12000_v7  ;;  %v12016_v16 = vld [vmem:[#allocation86_spill] sm:$0xff]  ;;  %v12017_v20 = vld [vmem:[#allocation72_spill] sm:$0xff] }
 0x595   :  { %3157 = vmatpush.msrb.mxu0 %v11998_v8  ;;  %3142 = vmatpush.msrb.mxu3 %v12001_v52  ;;  %v12020_v8 = vld [vmem:[#allocation96_spill] sm:$0xff] }
 0x596   :  { %3197 = vmatpush.msra.mxu2 %v11999_v60  ;;  %3103 = vmatpush.msra.mxu1 %v12004_v12  ;;  %v12021_v60 = vld [vmem:[#allocation80_spill] sm:$0xff] }
 0x597   :  { %3158 = vmatpush.msrb.mxu0 %v12002_v17  ;;  %3143 = vmatpush.msrb.mxu3 %v12005_v32  ;;  %v12022_v7 = vld [vmem:[#allocation100_spill] sm:$0xff]  ;;  %v12027_v32 = vld [vmem:[#allocation90_spill] sm:$0xff] }
 0x598   :  { %3198 = vmatpush.msra.mxu2 %v12003_v5  ;;  %3168 = vmatpush.msrb.mxu1 %v12007_v18  ;;  %v12023_v52 = vld [vmem:[#allocation84_spill] sm:$0xff]  ;;  %v12029_v18 = vld [vmem:[#allocation94_spill] sm:$0xff] }
 0x599   :  { %3159 = vmatpush.msrb.mxu0 %v12006_v36  ;;  %3208 = vmatpush.msra.mxu3 %v12009_v29  ;;  %v12024_v17 = vld [vmem:[#allocation104_spill] sm:$0xff]  ;;  %v12028_v36 = vld [vmem:[#allocation113_spill] sm:$0xff] }
 0x59a   :  { %3199 = vmatpush.msra.mxu2 %v12008_v42  ;;  %3169 = vmatpush.msrb.mxu1 %v12011_v26  ;;  %v12025_v5 = vld [vmem:[#allocation88_spill] sm:$0xff]  ;;  %v12030_v42 = vld [vmem:[#allocation98_spill] sm:$0xff]  ;;  %v12033_v26 = vld [vmem:[#allocation123_spill] sm:$0xff] }
 0x59b   :  { %3160 = vmatpush.msrb.mxu0 %v12010_v44  ;;  %3209 = vmatpush.msra.mxu3 %v12013_v41  ;;  %v12026_v12 = vld [vmem:[#allocation108_spill] sm:$0xff]  ;;  %v12032_v44 = vld [vmem:[#allocation102_spill] sm:$0xff]  ;;  %v12035_v41 = vld [vmem:[#allocation111_spill] sm:$0xff] }
 0x59c   :  { %3200 = vmatpush.msra.mxu2 %v12012_v43  ;;  %3170 = vmatpush.msrb.mxu1 %v12015_v33  ;;  %v12031_v29 = vld [vmem:[#allocation120_spill] sm:$0xff]  ;;  %v12034_v43 = vld [vmem:[#allocation106_spill] sm:$0xff]  ;;  %v12037_v33 = vld [vmem:[#allocation65_spill] sm:$0xff] }
 0x59d   :  { %3161 = vmatpush.msrb.mxu0 %v12014_v1  ;;  %3210 = vmatpush.msra.mxu3 %v12017_v20  ;;  %v12036_v1 = vld [vmem:[#allocation75_spill] sm:$0xff] }
 0x59e   :  { %3201 = vmatpush.msra.mxu2 %v12016_v16  ;;  %3171 = vmatpush.msrb.mxu1 %v12019_v10  ;;  %v12038_v16 = vld [vmem:[#allocation115_spill] sm:$0xff]  ;;  %v12041_v10 = vld [vmem:[#allocation118_spill] sm:$0xff] }
 0x59f   :  { %3162 = vmatpush.msrb.mxu0 %v12018_v27  ;;  %3211 = vmatpush.msra.mxu3 %v12021_v60  ;;  %v12039_v20 = vld [vmem:[#allocation79_spill] sm:$0xff]  ;;  %v12040_v27 = vld [vmem:[#allocation68_spill] sm:$0xff] }
 0x5a0   :  { %3202 = vmatpush.msra.mxu2 %v12020_v8  ;;  %3172 = vmatpush.msrb.mxu1 %v12023_v52  ;;  %v12042_v8 = vld [vmem:[#allocation83_spill] sm:$0xff]  ;;  %v12045_v52 = vld [vmem:[#allocation73_spill] sm:$0xff] }
 0x5a1   :  { %3163 = vmatpush.msrb.mxu0 %v12022_v7  ;;  %3212 = vmatpush.msra.mxu3 %v12025_v5  ;;  %v12043_v60 = vld [vmem:[#allocation71_spill] sm:$0xff]  ;;  %v12047_v5 = vld [vmem:[#allocation77_spill] sm:$0xff] }
 0x5a2   :  { %3203 = vmatpush.msra.mxu2 %v12024_v17  ;;  %3173 = vmatpush.msrb.mxu1 %v12026_v12  ;;  %v12044_v7 = vld [vmem:[#allocation87_spill] sm:$0xff]  ;;  %v12046_v17 = vld [vmem:[#allocation93_spill] sm:$0xff] }
 0x5a3   :  { %3213 = vmatpush.msra.mxu3 %v12027_v32 }
 0x5a4   :  { %3174 = vmatpush.msrb.mxu1 %v12028_v36  ;;  %v12048_v36 = vld [vmem:[#allocation26_spill] sm:$0xff] }
 0x5a5   :  { %3214 = vmatpush.msra.mxu3 %v12029_v18  ;;  %v12049_v18 = vld [vmem:[#allocation17_spill] sm:$0xff] }
 0x5a6   :  { %3175 = vmatpush.msrb.mxu1 %v12030_v42  ;;  %v179_v42 = vadd.f32 %v12049_v18, %v12048_v36 }
 0x5a7   :  { %3215 = vmatpush.msra.mxu3 %v12031_v29 }
 0x5a8   :  { %3176 = vmatpush.msrb.mxu1 %v12032_v44 }
 0x5a9   :  { %3216 = vmatpush.msra.mxu3 %v12033_v26 }
 0x5aa   :  { %3177 = vmatpush.msrb.mxu1 %v12034_v43 }
 0x5ab   :  { %3217 = vmatpush.msra.mxu3 %v12035_v41 }
 0x5ac   :  { %3178 = vmatpush.msrb.mxu1 %v12036_v1  ;;  %v12050_v1 = vld [vmem:[#allocation13_spill] sm:$0xff] }
 0x5ad   :  { %3218 = vmatpush.msra.mxu3 %v12037_v33  ;;  %v12051_v33 = vld [vmem:[#allocation23_spill] sm:$0xff] }
 0x5ae   :  { %3179 = vmatpush.msrb.mxu1 %v12038_v16  ;;  %v220_v16 = vadd.f32 %v12051_v33, %v12050_v1 }
 0x5af   :  { %3219 = vmatpush.msra.mxu3 %v12039_v20 }
 0x5b0   :  { %3180 = vmatpush.msrb.mxu1 %v12040_v27 }
 0x5b1   :  { %3220 = vmatpush.msra.mxu3 %v12041_v10 }
 0x5b2   :  { %3181 = vmatpush.msrb.mxu1 %v12042_v8 }
 0x5b3   :  { %3221 = vmatpush.msra.mxu3 %v12043_v60 }
 0x5b4   :  { %3182 = vmatpush.msrb.mxu1 %v12044_v7 }
 0x5b5   :  { %3222 = vmatpush.msra.mxu3 %v12045_v52 }
 0x5b6   :  { %3183 = vmatpush.msrb.mxu1 %v12046_v17  ;;  %v12052_v17 = vld [vmem:[#allocation18_spill] sm:$0xff] }
 0x5b7   :  { %3223 = vmatpush.msra.mxu3 %v12047_v5  ;;  %v2739_v12 = vpop.f32.mrf.mxu0  ;;  %v12053_v5 = vld [vmem:[#allocation127_spill] sm:$0xff] }
 0x5b8   :  { %v287_v18 = vadd.f32 %v12053_v5, %v12052_v17 }
 0x5bd   :  { %v2779_v26 = vpop.f32.mrf.mxu2 }
 0x5c5   :  { %v2859_v60 = vpop.f32.mrf.mxu2 }
 0x5cf   :  { %v2759_v32 = vpop.f32.mrf.mxu1 }
 0x5d0   :  { %v2760_v29 = vadd.f32 %v2759_v32, %v2739_v12 }
 0x5d2   :  { %v2968_v44 = vadd.f32 %v2760_v29, %v179_v42 }
 0x5d4   :  { %v3486_v43 = vmul.f32 -1.442695, %v2968_v44 }
 0x5d5   :  { %v2799_v41 = vpop.f32.mrf.mxu3 }
 0x5d6   :  { %3619 = vpow2.f32 %v3486_v43  ;;  %v2800_v20 = vadd.f32 %v2799_v41, %v2779_v26  ;;  %v2819_v41 = vpop.f32.mrf.mxu0 }
 0x5d8   :  { %v2988_v27 = vadd.f32 %v2800_v20, %v220_v16  ;;  %v2839_v43 = vpop.f32.mrf.mxu1 }
 0x5da   :  { %v3487_v10 = vmul.f32 -1.442695, %v2988_v27 }
 0x5dc   :  { %v3620_v8 = vpop.eup %3619  ;;  %3621 = vpow2.f32 %v3487_v10  ;;  %v2840_v10 = vadd.f32 %v2839_v43, %v2819_v41  ;;  %v12055_v43 = vld [vmem:[#allocation20_spill] sm:$0xff] }
 0x5dd   :  { %v2972_v7 = vadd.f32 1.0, %v3620_v8  ;;  %v2879_v52 = vpop.f32.mrf.mxu3  ;;  %v261_v41 = vadd.f32 %v12055_v43, %v11933_v54 }
 0x5de   :  { %v2880_v12 = vadd.f32 %v2879_v52, %v2859_v60 }
 0x5df   :  { %3623 = vrcp.f32 %v2972_v7  ;;  %v2984_v20 = vand.u32 2147483648, %v2972_v7  ;;  %v2982_v1 = vand.u32 2147483647, %v2972_v7  ;;  %vm2978_vm1 = vweird.f32 %v2972_v7 }
 0x5e0   :  { %v3016_v32 = vadd.f32 %v2880_v12, %v287_v18 }
 0x5e1   :  { %v2985_v12 = vor.u32 1.1754944e-38, %v2984_v20  ;;  %vm2983_vm3 = vcmp.eq.f32.partialorder %v2982_v1, 8.507059e+37  ;;  %v2899_v20 = vpop.f32.mrf.mxu0 }
 0x5e2   :  { %v3622_v42 = vpop.eup %3621  ;;  %v3488_v29 = vmul.f32 -1.442695, %v3016_v32 }
 0x5e3   :  { %v2992_v44 = vadd.f32 1.0, %v3622_v42  ;;  %v2939_v54 = vpop.f32.mrf.mxu2 }
 0x5e4   :  { %3625 = vpow2.f32 %v3488_v29  ;;  %v10382_v29 = vld [vmem:[%s10527_s5] ss:$0 sm:$0xff] }
 0x5e5   :  { %v3624_v33 = vpop.eup %3623  ;;  %3627 = vrcp.f32 %v2992_v44  ;;  %12054 = vst [vmem:[#allocation124_spill] sm:$0xff] %v10382_v29  ;;  %vm2998_vm5 = vweird.f32 %v2992_v44 }
 0x5e6   :  { %v2974_v26 = vmul.f32 %v3624_v33, %v2972_v7  ;;  %vm2979_vm0 = vweird.f32 %v3624_v33  ;;  %v3004_v7 = vand.u32 2147483648, %v2992_v44 }
 0x5e7   :  { %vm2980_vm2 = vmor %vm2978_vm1, %vm2979_vm0 }
 0x5e8   :  { %v2975_v16 = vsub.f32 1.0, %v2974_v26  ;;  %v3008_v26 = vadd.f32 %v10382_v29, %v2840_v10  ;;  %v3005_v29 = vor.u32 1.1754944e-38, %v3004_v7 }
 0x5ea   :  { %v3626_v27 = vpop.eup %3625  ;;  %v2976_v8 = vmul.f32 %v3624_v33, %v2975_v16 }
 0x5eb   :  { %v3628_v5 = vpop.eup %3627  ;;  %v3020_v60 = vadd.f32 1.0, %v3626_v27 }
 0x5ec   :  { %v2994_v52 = vmul.f32 %v3628_v5, %v2992_v44  ;;  %v2977_v18 = vadd.f32 %v3624_v33, %v2976_v8  ;;  %vm2999_vm4 = vweird.f32 %v3628_v5 }
 0x5ed   :  { %3629 = vrcp.f32 %v3020_v60  ;;  %vm3000_vm6 = vmor %vm2998_vm5, %vm2999_vm4  ;;  %vm3026_vm9 = vweird.f32 %v3020_v60 }
 0x5ee   :  { %v2995_v32 = vsub.f32 1.0, %v2994_v52  ;;  %v2981_v42 = vsel %vm2980_vm2, %v3624_v33, %v2977_v18  ;;  %v12056_v52 = vld [vmem:[#allocation16_spill] sm:$0xff]  ;;  %v3002_v18 = vand.u32 2147483647, %v2992_v44  ;;  %v3030_v44 = vand.u32 2147483647, %v3020_v60 }
 0x5ef   :  { %v2986_v16 = vsel %vm2983_vm3, %v2985_v12, %v2981_v42  ;;  %v12057_v33 = vld [vmem:[#allocation24_spill] sm:$0xff] }
 0x5f0   :  { %v2996_v27 = vmul.f32 %v3628_v5, %v2995_v32  ;;  %v3009_v8 = vmul.f32 %v3008_v26, %v2986_v16  ;;  %v328_v1 = vadd.f32 %v12057_v33, %v12056_v52  ;;  %vm3003_vm7 = vcmp.eq.f32.partialorder %v3002_v18, 8.507059e+37 }
 0x5f1   :  { %v3032_v33 = vand.u32 2147483648, %v3020_v60  ;;  %vm3031_vm11 = vcmp.eq.f32.partialorder %v3030_v44, 8.507059e+37  ;;  %v12074_v44 = vld [vmem:[#allocation28_spill] sm:$0xff] }
 0x5f2   :  { %v2997_v15 = vadd.f32 %v3628_v5, %v2996_v27  ;;  %v3010_v2 = vadd.f32 %v3009_v8, %v261_v41 }
 0x5f3   :  { %v2919_v17 = vpop.f32.mrf.mxu1  ;;  %v3630_v53 = vpop.eup %3629 }
 0x5f4   :  { %v2920_v36 = vadd.f32 %v2919_v17, %v2899_v20  ;;  %v3001_v43 = vsel %vm3000_vm6, %v3628_v5, %v2997_v15  ;;  %3631 = vtanh.f32 %v3010_v2  ;;  %v3022_v12 = vmul.f32 %v3630_v53, %v3020_v60 }
 0x5f5   :  { %v3006_v42 = vsel %vm3003_vm7, %v3005_v29, %v3001_v43  ;;  %vm3027_vm8 = vweird.f32 %v3630_v53  ;;  %v3033_v15 = vor.u32 1.1754944e-38, %v3032_v33  ;;  %v10393_v29 = vld [vmem:[%s10527_s5 + $0x1] ss:$0 sm:$0xff]  ;;  %v12059_v43 = vld [vmem:[#allocation109_spill] sm:$0xff]  ;;  %v12072_v33 = vld [vmem:[#allocation138_spill] sm:$0xff] }
 0x5f6   :  { %v3036_v10 = vadd.f32 %v2920_v36, %v328_v1  ;;  %v3023_v16 = vsub.f32 1.0, %v3022_v12  ;;  %v3012_v41 = vsub.f32 1.0, %v3006_v42  ;;  %v3014_v2 = vmul.f32 %v3006_v42, %v9800_v55  ;;  %vm3028_vm10 = vmor %vm3026_vm9, %vm3027_vm8  ;;  %v12069_v42 = vld [vmem:[#allocation136_spill] sm:$0xff] }
 0x5f8   :  { %v3489_v32 = vmul.f32 -1.442695, %v3036_v10  ;;  %v3024_v17 = vmul.f32 %v3630_v53, %v3023_v16  ;;  %v12058_v10 = vld [vmem:[#allocation11_spill] sm:$0xff] }
 0x5f9   :  { %v369_v55 = vadd.f32 %v12058_v10, %v6165_v38  ;;  %v12071_v16 = vld [vmem:[#allocation135_spill] sm:$0xff]  ;;  %v12091_v10 = vld [vmem:[#allocation13_spill] sm:$0xff] }
 0x5fa   :  { %v2959_v26 = vpop.f32.mrf.mxu3  ;;  %3633 = vpow2.f32 %v3489_v32  ;;  %v3632_v27 = vpop.eup %3631  ;;  %v3025_v8 = vadd.f32 %v3630_v53, %v3024_v17  ;;  %v12068_v32 = vld [vmem:[#allocation5_spill] sm:$0xff]  ;;  %v12073_v17 = vld [vmem:[#allocation12_spill] sm:$0xff] }
 0x5fb   :  { %v2960_v52 = vadd.f32 %v2959_v26, %v2939_v54  ;;  %v3013_v36 = vmul.f32 %v3632_v27, %v3012_v41  ;;  %v12070_v26 = vld [vmem:[#allocation137_spill] sm:$0xff]  ;;  %v12075_v41 = vld [vmem:[#allocation130_spill] sm:$0xff] }
 0x5fc   :  { %v3029_v5 = vsel %vm3028_vm10, %v3630_v53, %v3025_v8  ;;  %v12076_v27 = vld [vmem:[#allocation14_spill] sm:$0xff]  ;;  %v12077_v8 = vld [vmem:[#allocation31_spill] sm:$0xff] }
 0x5fd   :  { %v3056_v54 = vadd.f32 %v10393_v29, %v2960_v52  ;;  %v10396_v20 = vadd.f32 %v3014_v2, %v3013_v36  ;;  %v3034_v1 = vsel %vm3031_vm11, %v3033_v15, %v3029_v5  ;;  %v12078_v36 = vld [vmem:[#allocation91_spill] sm:$0xff]  ;;  %v12079_v2 = vld [vmem:[#allocation114_spill] sm:$0xff] }
 0x5fe   :  { %v12080_v15 = vld [vmem:[#allocation95_spill] sm:$0xff] }
 0x5ff   :  { %v3057_v60 = vmul.f32 %v3056_v54, %v3034_v1  ;;  %v3435_v53 = vadd.f32 %v10396_v20, %v12059_v43  ;;  %3084 = vmatmul.f32.vlgmr.msra.gmra.mxu0 %v10396_v20  ;;  %3124 = vmatmul.f32.vlgmr.msrb.gmra.mxu2 %v10396_v20  ;;  %v12081_v5 = vld [vmem:[#allocation99_spill] sm:$0xff]  ;;  %v12082_v54 = vld [vmem:[#allocation117_spill] sm:$0xff] }
 0x600   :  { %v3634_v7 = vpop.eup %3633  ;;  %3228 = vmatpush.msra.mxu0 %v9811_v63  ;;  %3268 = vmatpush.msrb.mxu2 %v9817_v40  ;;  %v12084_v1 = vld [vmem:[#allocation103_spill] sm:$0xff] }
 0x601   :  { %v3040_v18 = vadd.f32 1.0, %v3634_v7  ;;  %3443 = vst [vmem:[%s10529_s6 + $0x30] sm:$0xff] %v3435_v53  ;;  %v3058_v52 = vadd.f32 %v3057_v60, %v369_v55  ;;  %v12083_v7 = vld [vmem:[#allocation121_spill] sm:$0xff]  ;;  %v12092_v55 = vld [vmem:[#allocation7_spill] sm:$0xff] }
 0x602   :  { %3229 = vmatpush.msra.mxu0 %v9826_v22  ;;  %3269 = vmatpush.msrb.mxu2 %v9832_v19  ;;  %v223_v43 = vadd.f32 %v12092_v55, %v12091_v10 }
 0x603   :  { %3635 = vrcp.f32 %v3040_v18  ;;  %v3052_v22 = vand.u32 2147483648, %v3040_v18  ;;  %vm3046_vm13 = vweird.f32 %v3040_v18 }
 0x604   :  { %3230 = vmatpush.msra.mxu0 %v9838_v11  ;;  %3270 = vmatpush.msrb.mxu2 %v9844_v48  ;;  %v3050_v11 = vand.u32 2147483647, %v3040_v18  ;;  %3637 = vtanh.f32 %v3058_v52 }
 0x606   :  { %3231 = vmatpush.msra.mxu0 %v9850_v25  ;;  %3271 = vmatpush.msrb.mxu2 %v9856_v23  ;;  %v3053_v25 = vor.u32 1.1754944e-38, %v3052_v22  ;;  %vm3051_vm15 = vcmp.eq.f32.partialorder %v3050_v11, 8.507059e+37  ;;  %v12093_v11 = vld [vmem:[#allocation18_spill] sm:$0xff] }
 0x607   :  { %3164 = vmatmul.f32.vlgmr.msrb.gmra.mxu0 %v10396_v20  ;;  %3204 = vmatmul.f32.vlgmr.msra.gmra.mxu2 %v10396_v20 }
 0x608   :  { %3232 = vmatpush.msra.mxu0 %v9864_v61  ;;  %3272 = vmatpush.msrb.mxu2 %v9870_v58 }
 0x609   :  { %v3636_v12 = vpop.eup %3635 }
 0x60a   :  { %v3042_v63 = vmul.f32 %v3636_v12, %v3040_v18  ;;  %3233 = vmatpush.msra.mxu0 %v9876_v37  ;;  %3273 = vmatpush.msrb.mxu2 %v9882_v45  ;;  %vm3047_vm12 = vweird.f32 %v3636_v12  ;;  %v3638_v37 = vpop.eup %3637  ;;  %v12060_v45 = vld [vmem:[#allocation97_spill] sm:$0xff] }
 0x60b   :  { %vm3048_vm14 = vmor %vm3046_vm13, %vm3047_vm12 }
 0x60c   :  { %v3043_v40 = vsub.f32 1.0, %v3042_v63  ;;  %3234 = vmatpush.msra.mxu0 %v9888_v21  ;;  %3274 = vmatpush.msrb.mxu2 %v9894_v56 }
 0x60e   :  { %v3044_v19 = vmul.f32 %v3636_v12, %v3043_v40  ;;  %3235 = vmatpush.msra.mxu0 %v9900_v47  ;;  %3275 = vmatpush.msrb.mxu2 %v9906_v6  ;;  %v3414_v6 = vld [vmem:[%s10529_s6 + $0x8] sm:$0xff] }
 0x610   :  { %v3045_v48 = vadd.f32 %v3636_v12, %v3044_v19  ;;  %3236 = vmatpush.msra.mxu0 %v9912_v59  ;;  %3276 = vmatpush.msrb.mxu2 %v9918_v9  ;;  %v12061_v9 = vld [vmem:[#allocation81_spill] sm:$0xff] }
 0x612   :  { %v3049_v23 = vsel %vm3048_vm14, %v3636_v12, %v3045_v48  ;;  %3237 = vmatpush.msra.mxu0 %v12060_v45  ;;  %3277 = vmatpush.msrb.mxu2 %v9930_v28  ;;  %v12063_v28 = vld [vmem:[#allocation85_spill] sm:$0xff]  ;;  %v12094_v48 = vld [vmem:[#allocation122_spill] sm:$0xff] }
 0x613   :  { %v3054_v61 = vsel %vm3051_vm15, %v3053_v25, %v3049_v23  ;;  %v284_v25 = vadd.f32 %v12094_v48, %v12093_v11 }
 0x614   :  { %v3060_v58 = vsub.f32 1.0, %v3054_v61  ;;  %v3062_v56 = vmul.f32 %v3054_v61, %v9946_v35  ;;  %3238 = vmatpush.msra.mxu0 %v9937_v13  ;;  %3278 = vmatpush.msrb.mxu2 %v9943_v30  ;;  %v12062_v35 = vld [vmem:[#allocation101_spill] sm:$0xff] }
 0x615   :  { %v12064_v13 = vld [vmem:[#allocation105_spill] sm:$0xff] }
 0x616   :  { %v3061_v21 = vmul.f32 %v3638_v37, %v3060_v58  ;;  %3239 = vmatpush.msra.mxu0 %v9954_v34  ;;  %3279 = vmatpush.msrb.mxu2 %v9960_v49  ;;  %v12065_v30 = vld [vmem:[#allocation89_spill] sm:$0xff]  ;;  %v12066_v34 = vld [vmem:[#allocation128_spill] sm:$0xff] }
 0x617   :  { %v12067_v49 = vld [vmem:[#allocation129_spill] sm:$0xff] }
 0x618   :  { %v10432_v47 = vadd.f32 %v3062_v56, %v3061_v21  ;;  %3240 = vmatpush.msra.mxu0 %v12063_v28  ;;  %3280 = vmatpush.msrb.mxu2 %v12064_v13 }
 0x61a   :  { %v3430_v59 = vadd.f32 %v3414_v6, %v10432_v47  ;;  %3104 = vmatmul.f32.vlgmr.msra.gmra.mxu1 %v10432_v47  ;;  %3144 = vmatmul.f32.vlgmr.msrb.gmra.mxu3 %v10432_v47 }
 0x61b   :  { %3248 = vmatpush.msra.mxu1 %v12061_v9  ;;  %3288 = vmatpush.msrb.mxu3 %v12062_v35 }
 0x61c   :  { %3438 = vst [vmem:[%s10529_s6 + $0x8] sm:$0xff] %v3430_v59  ;;  %3241 = vmatpush.msra.mxu0 %v12067_v49  ;;  %3281 = vmatpush.msrb.mxu2 %v12068_v32 }
 0x61d   :  { %3249 = vmatpush.msra.mxu1 %v12065_v30  ;;  %3289 = vmatpush.msrb.mxu3 %v12066_v34 }
 0x61e   :  { %3242 = vmatpush.msra.mxu0 %v12071_v16  ;;  %3282 = vmatpush.msrb.mxu2 %v12072_v33 }
 0x61f   :  { %3250 = vmatpush.msra.mxu1 %v12069_v42  ;;  %3290 = vmatpush.msrb.mxu3 %v12070_v26 }
 0x620   :  { %3243 = vmatpush.msra.mxu0 %v12075_v41  ;;  %3283 = vmatpush.msrb.mxu2 %v12077_v8  ;;  %v12097_v8 = vld [vmem:[#allocation8_spill] sm:$0xff] }
 0x621   :  { %3251 = vmatpush.msra.mxu1 %v12073_v17  ;;  %3291 = vmatpush.msrb.mxu3 %v12074_v44  ;;  %v12095_v44 = vld [vmem:[#allocation124_spill] sm:$0xff] }
 0x622   :  { %3184 = vmatmul.f32.vlgmr.msrb.gmra.mxu1 %v10432_v47  ;;  %3224 = vmatmul.f32.vlgmr.msra.gmra.mxu3 %v10432_v47 }
 0x623   :  { %3252 = vmatpush.msra.mxu1 %v12076_v27  ;;  %3292 = vmatpush.msrb.mxu3 %v12078_v36  ;;  %v12096_v27 = vld [vmem:[#allocation36_spill] sm:$0xff] }
 0x624   :  { %3244 = vmatmul.f32.vlgmr.msra.gmra.mxu0 %v10396_v20  ;;  %3284 = vmatmul.f32.vlgmr.msrb.gmra.mxu2 %v10396_v20  ;;  %v264_v36 = vadd.f32 %v12097_v8, %v12096_v27  ;;  %v3413_v27 = vld [vmem:[%s10529_s6] sm:$0xff] }
 0x625   :  { %3253 = vmatpush.msra.mxu1 %v12079_v2  ;;  %3293 = vmatpush.msrb.mxu3 %v10090_v57  ;;  %v12085_v57 = vld [vmem:[#allocation107_spill] sm:$0xff] }
 0x627   :  { %3254 = vmatpush.msra.mxu1 %v12080_v15  ;;  %3294 = vmatpush.msrb.mxu3 %v10106_v24  ;;  %v12087_v24 = vld [vmem:[#allocation112_spill] sm:$0xff] }
 0x629   :  { %3255 = vmatpush.msra.mxu1 %v12081_v5  ;;  %3295 = vmatpush.msrb.mxu3 %v10122_v4  ;;  %v12086_v4 = vld [vmem:[#allocation126_spill] sm:$0xff] }
 0x62b   :  { %3256 = vmatpush.msra.mxu1 %v12082_v54  ;;  %3296 = vmatpush.msrb.mxu3 %v10138_v46  ;;  %v12088_v46 = vld [vmem:[#allocation116_spill] sm:$0xff] }
 0x62d   :  { %3257 = vmatpush.msra.mxu1 %v12083_v7  ;;  %3297 = vmatpush.msrb.mxu3 %v10154_v51 }
 0x62f   :  { %3258 = vmatpush.msra.mxu1 %v12084_v1  ;;  %3298 = vmatpush.msrb.mxu3 %v10170_v3 }
 0x631   :  { %3259 = vmatpush.msra.mxu1 %v12085_v57  ;;  %3299 = vmatpush.msrb.mxu3 %v10186_v39  ;;  %v12089_v39 = vld [vmem:[#allocation26_spill] sm:$0xff]  ;;  %v12098_v57 = vld [vmem:[#allocation16_spill] sm:$0xff] }
 0x633   :  { %3260 = vmatpush.msra.mxu1 %v10196_v31  ;;  %3300 = vmatpush.msrb.mxu3 %v10202_v0  ;;  %v12090_v0 = vld [vmem:[#allocation6_spill] sm:$0xff] }
 0x634   :  { %v182_v31 = vadd.f32 %v12090_v0, %v12089_v39 }
 0x635   :  { %3261 = vmatpush.msra.mxu1 %v10210_v50  ;;  %3301 = vmatpush.msrb.mxu3 %v10216_v62 }
 0x637   :  { %3262 = vmatpush.msra.mxu1 %v10224_v14  ;;  %3302 = vmatpush.msrb.mxu3 %v12086_v4  ;;  %v12099_v4 = vld [vmem:[#allocation9_spill] sm:$0xff] }
 0x639   :  { %3263 = vmatpush.msra.mxu1 %v12087_v24  ;;  %3303 = vmatpush.msrb.mxu3 %v12088_v46  ;;  %v325_v24 = vadd.f32 %v12099_v4, %v12098_v57 }
 0x63a   :  { %3264 = vmatmul.f32.vlgmr.msra.gmra.mxu1 %v10432_v47  ;;  %3304 = vmatmul.f32.vlgmr.msrb.gmra.mxu3 %v10432_v47 }
 0x67c   :  { %v3085_v51 = vpop.f32.mrf.mxu0 }
 0x682   :  { %v3125_v62 = vpop.f32.mrf.mxu2 }
 0x684   :  { %v3165_v59 = vpop.f32.mrf.mxu0 }
 0x68a   :  { %v3205_v40 = vpop.f32.mrf.mxu2 }
 0x697   :  { %v3105_v3 = vpop.f32.mrf.mxu1 }
 0x698   :  { %v3106_v50 = vadd.f32 %v3105_v3, %v3085_v51 }
 0x69a   :  { %v3314_v18 = vadd.f32 %v3106_v50, %v182_v31 }
 0x69c   :  { %v3491_v60 = vmul.f32 -1.442695, %v3314_v18 }
 0x69d   :  { %v3145_v14 = vpop.f32.mrf.mxu3 }
 0x69e   :  { %3639 = vpow2.f32 %v3491_v60  ;;  %v3146_v53 = vadd.f32 %v3145_v14, %v3125_v62 }
 0x69f   :  { %v3185_v6 = vpop.f32.mrf.mxu1 }
 0x6a0   :  { %v3334_v52 = vadd.f32 %v3146_v53, %v223_v43  ;;  %v3186_v13 = vadd.f32 %v3185_v6, %v3165_v59  ;;  %v12100_v6 = vld [vmem:[#allocation25_spill] sm:$0xff] }
 0x6a1   :  { %v3245_v7 = vpop.f32.mrf.mxu0  ;;  %v366_v59 = vadd.f32 %v12100_v6, %v6165_v38 }
 0x6a2   :  { %v3492_v12 = vmul.f32 -1.442695, %v3334_v52  ;;  %v3354_v41 = vadd.f32 %v12095_v44, %v3186_v13 }
 0x6a4   :  { %v3640_v63 = vpop.eup %3639  ;;  %3641 = vpow2.f32 %v3492_v12 }
 0x6a5   :  { %v3318_v22 = vadd.f32 1.0, %v3640_v63  ;;  %v3225_v19 = vpop.f32.mrf.mxu3 }
 0x6a6   :  { %v3226_v23 = vadd.f32 %v3225_v19, %v3205_v40 }
 0x6a7   :  { %3643 = vrcp.f32 %v3318_v22  ;;  %v3330_v35 = vand.u32 2147483648, %v3318_v22  ;;  %v3328_v34 = vand.u32 2147483647, %v3318_v22  ;;  %vm3324_vm1 = vweird.f32 %v3318_v22  ;;  %v3285_v43 = vpop.f32.mrf.mxu2 }
 0x6a8   :  { %v3362_v61 = vadd.f32 %v3226_v23, %v284_v25 }
 0x6a9   :  { %v3331_v16 = vor.u32 1.1754944e-38, %v3330_v35  ;;  %vm3329_vm3 = vcmp.eq.f32.partialorder %v3328_v34, 8.507059e+37 }
 0x6aa   :  { %v3642_v58 = vpop.eup %3641  ;;  %v3493_v37 = vmul.f32 -1.442695, %v3362_v61 }
 0x6ab   :  { %v3338_v45 = vadd.f32 1.0, %v3642_v58 }
 0x6ac   :  { %3645 = vpow2.f32 %v3493_v37 }
 0x6ad   :  { %v3644_v21 = vpop.eup %3643  ;;  %3647 = vrcp.f32 %v3338_v45  ;;  %v3350_v5 = vand.u32 2147483648, %v3338_v45  ;;  %v3348_v46 = vand.u32 2147483647, %v3338_v45  ;;  %vm3344_vm5 = vweird.f32 %v3338_v45 }
 0x6ae   :  { %v3320_v56 = vmul.f32 %v3644_v21, %v3318_v22  ;;  %vm3325_vm0 = vweird.f32 %v3644_v21 }
 0x6af   :  { %vm3326_vm2 = vmor %vm3324_vm1, %vm3325_vm0  ;;  %v3351_v50 = vor.u32 1.1754944e-38, %v3350_v5  ;;  %vm3349_vm7 = vcmp.eq.f32.partialorder %v3348_v46, 8.507059e+37 }
 0x6b0   :  { %v3321_v9 = vsub.f32 1.0, %v3320_v56 }
 0x6b2   :  { %v3646_v28 = vpop.eup %3645  ;;  %v3322_v30 = vmul.f32 %v3644_v21, %v3321_v9  ;;  %v12101_v9 = vld [vmem:[#allocation35_spill] sm:$0xff] }
 0x6b3   :  { %v3648_v49 = vpop.eup %3647  ;;  %v3366_v32 = vadd.f32 1.0, %v3646_v28 }
 0x6b4   :  { %v3340_v42 = vmul.f32 %v3648_v49, %v3338_v45  ;;  %v3323_v26 = vadd.f32 %v3644_v21, %v3322_v30  ;;  %vm3345_vm4 = vweird.f32 %v3648_v49 }
 0x6b5   :  { %3649 = vrcp.f32 %v3366_v32  ;;  %vm3346_vm6 = vmor %vm3344_vm5, %vm3345_vm4  ;;  %v3378_v53 = vand.u32 2147483648, %v3366_v32  ;;  %v3376_v63 = vand.u32 2147483647, %v3366_v32  ;;  %vm3372_vm9 = vweird.f32 %v3366_v32 }
 0x6b6   :  { %v3341_v33 = vsub.f32 1.0, %v3340_v42  ;;  %v3327_v17 = vsel %vm3326_vm2, %v3644_v21, %v3323_v26 }
 0x6b7   :  { %v3332_v2 = vsel %vm3329_vm3, %v3331_v16, %v3327_v17  ;;  %v3265_v1 = vpop.f32.mrf.mxu1  ;;  %v3379_v25 = vor.u32 1.1754944e-38, %v3378_v53  ;;  %vm3377_vm11 = vcmp.eq.f32.partialorder %v3376_v63, 8.507059e+37 }
 0x6b8   :  { %v3342_v15 = vmul.f32 %v3648_v49, %v3341_v33  ;;  %v3355_v54 = vmul.f32 %v3354_v41, %v3332_v2  ;;  %v3266_v51 = vadd.f32 %v3265_v1, %v3245_v7 }
 0x6ba   :  { %v3343_v3 = vadd.f32 %v3648_v49, %v3342_v15  ;;  %v3356_v39 = vadd.f32 %v3355_v54, %v264_v36  ;;  %v3382_v31 = vadd.f32 %v3266_v51, %v325_v24 }
 0x6bb   :  { %v3650_v0 = vpop.eup %3649 }
 0x6bc   :  { %v3347_v18 = vsel %vm3346_vm6, %v3648_v49, %v3343_v3  ;;  %3651 = vtanh.f32 %v3356_v39  ;;  %v3368_v62 = vmul.f32 %v3650_v0, %v3366_v32  ;;  %v3494_v60 = vmul.f32 -1.442695, %v3382_v31 }
 0x6bd   :  { %v3352_v14 = vsel %vm3349_vm7, %v3351_v50, %v3347_v18  ;;  %v3305_v10 = vpop.f32.mrf.mxu3  ;;  %vm3373_vm8 = vweird.f32 %v3650_v0 }
 0x6be   :  { %v3369_v55 = vsub.f32 1.0, %v3368_v62  ;;  %3653 = vpow2.f32 %v3494_v60  ;;  %v3306_v52 = vadd.f32 %v3305_v10, %v3285_v43  ;;  %v3358_v40 = vsub.f32 1.0, %v3352_v14  ;;  %vm3374_vm10 = vmor %vm3372_vm9, %vm3373_vm8 }
 0x6bf   :  { %v3360_v48 = vmul.f32 %v3352_v14, %v10396_v20 }
 0x6c0   :  { %v3370_v12 = vmul.f32 %v3650_v0, %v3369_v55  ;;  %v3402_v61 = vadd.f32 %v10393_v29, %v3306_v52 }
 0x6c2   :  { %v3652_v22 = vpop.eup %3651  ;;  %v3371_v19 = vadd.f32 %v3650_v0, %v3370_v12 }
 0x6c3   :  { %v3359_v11 = vmul.f32 %v3652_v22, %v3358_v40 }
 0x6c4   :  { %v3375_v23 = vsel %vm3374_vm10, %v3650_v0, %v3371_v19  ;;  %v3654_v58 = vpop.eup %3653 }
 0x6c5   :  { %v3361_v37 = vadd.f32 %v3360_v48, %v3359_v11  ;;  %v3380_v45 = vsel %vm3377_vm11, %v3379_v25, %v3375_v23  ;;  %v3386_v21 = vadd.f32 1.0, %v3654_v58 }
 0x6c6   :  { %v3403_v56 = vmul.f32 %v3402_v61, %v3380_v45 }
 0x6c7   :  { %v3436_v35 = vadd.f32 %v3361_v37, %v12101_v9  ;;  %3445 = vst [vmem:[%s10530_s7] sm:$0xff] %v3361_v37  ;;  %3655 = vrcp.f32 %v3386_v21  ;;  %v3398_v30 = vand.u32 2147483648, %v3386_v21  ;;  %v3396_v49 = vand.u32 2147483647, %v3386_v21 }
 0x6c8   :  { %v3404_v29 = vadd.f32 %v3403_v56, %v366_v59  ;;  %vm3392_vm13 = vweird.f32 %v3386_v21 }
 0x6c9   :  { %3444 = vst [vmem:[%s10529_s6 + $0x38] sm:$0xff] %v3436_v35  ;;  %v3399_v32 = vor.u32 1.1754944e-38, %v3398_v30  ;;  %vm3397_vm15 = vcmp.eq.f32.partialorder %v3396_v49, 8.507059e+37 }
 0x6ca   :  { %3657 = vtanh.f32 %v3404_v29 }
 0x6cd   :  { %v3656_v20 = vpop.eup %3655 }
 0x6ce   :  { %v3388_v28 = vmul.f32 %v3656_v20, %v3386_v21  ;;  %vm3393_vm12 = vweird.f32 %v3656_v20 }
 0x6cf   :  { %vm3394_vm14 = vmor %vm3392_vm13, %vm3393_vm12 }
 0x6d0   :  { %v3389_v13 = vsub.f32 1.0, %v3388_v28  ;;  %v3658_v33 = vpop.eup %3657 }
 0x6d2   :  { %v3390_v34 = vmul.f32 %v3656_v20, %v3389_v13 }
 0x6d4   :  { %v3391_v38 = vadd.f32 %v3656_v20, %v3390_v34 }
 0x6d6   :  { %v3395_v42 = vsel %vm3394_vm14, %v3656_v20, %v3391_v38 }
 0x6d7   :  { %v3400_v26 = vsel %vm3397_vm15, %v3399_v32, %v3395_v42 }
 0x6d8   :  { %v3406_v16 = vsub.f32 1.0, %v3400_v26  ;;  %v3408_v44 = vmul.f32 %v3400_v26, %v10432_v47 }
 0x6da   :  { %v3407_v17 = vmul.f32 %v3658_v33, %v3406_v16 }
 0x6dc   :  { %v3409_v41 = vadd.f32 %v3408_v44, %v3407_v17 }
 0x6de   :  { %v3429_v8 = vadd.f32 %v3413_v27, %v3409_v41  ;;  %3496 = vst [vmem:[%s10530_s7 + $0x8] sm:$0xff] %v3409_v41 }
 0x6e0   :  { %3437 = vst [vmem:[%s10529_s6] sm:$0xff] %v3429_v8 }

</bundles_post_ra>
